<compile_context>
chip_gen: v7x
topology: tpu7x:2x2x1
jax: 0.10.0
libtpu: 0.0.40
codegen_flags: <defaults>
</compile_context>

<pallas_src>
import functools

import jax
import jax.numpy as jnp
from jax.experimental import pallas as pl
from jax.experimental.pallas import tpu as pltpu


LANE = 128        # TPU lane width; conv matmul outputs are padded to this
TN_FC = 512       # fc1 output tile width -> 2 grid steps over the 1024 dim
NEG_SLOPE = 0.1   # nn.LeakyReLU(0.1) in the torch module


# ----------------------------------------------------------------------------
# Kernel 1: conv-as-matmul   out = leaky_relu(x @ w + b)
# Single full-block grid step (conv operands at B=2 are < ~1 MiB); N is
# pre-padded to 128 so the output store is lane-dense.
# ----------------------------------------------------------------------------
def _matmul_bias_leaky_kernel(x_ref, w_ref, b_ref, o_ref, *, negative_slope):
    acc = jnp.dot(x_ref[...], w_ref[...], preferred_element_type=jnp.float32)
    acc = acc + b_ref[...]                       # (1, N) broadcasts over (M, N)
    o_ref[...] = jnp.where(acc > 0, acc, negative_slope * acc)


def matmul_bias_leaky(x, w, b, negative_slope):
    """x: (M, K) f32, w: (K, N) f32, b: (1, N) f32 -> (M, N) f32.  N % 128 == 0."""
    M, K = x.shape
    _, N = w.shape
    kernel = functools.partial(_matmul_bias_leaky_kernel,
                               negative_slope=negative_slope)
    return pl.pallas_call(
        kernel,
        out_shape=jax.ShapeDtypeStruct((M, N), jnp.float32),
        grid_spec=pltpu.PrefetchScalarGridSpec(
            num_scalar_prefetch=0,
            grid=(1,),
            in_specs=[
                pl.BlockSpec((M, K), lambda i: (0, 0)),
                pl.BlockSpec((K, N), lambda i: (0, 0)),
                pl.BlockSpec((1, N), lambda i: (0, 0)),
            ],
            out_specs=pl.BlockSpec((M, N), lambda i: (0, 0)),
        ),
        compiler_params=pltpu.CompilerParams(
            dimension_semantics=("arbitrary",),
            vmem_limit_bytes=16 * 1024 * 1024,
        ),
    )(x, w, b)


# ----------------------------------------------------------------------------
# Conv2d (valid padding, stride s) = im2col glue + Pallas matmul kernel.
# Weights come in pre-flattened and lane-padded: (k*k*Cin, 128), (1, 128).
# ----------------------------------------------------------------------------
def conv2d_leaky(x, w_padded, b_padded, cout, k, stride, negative_slope):
    B, H, W, C = x.shape
    OH = (H - k) // stride + 1
    OW = (W - k) // stride + 1
    cols = []
    for i in range(k):
        for j in range(k):
            cols.append(x[:, i:i + stride * OH:stride, j:j + stride * OW:stride, :])
    cols = jnp.stack(cols, axis=3)                       # (B, OH, OW, k*k, C)
    cols = cols.reshape(B * OH * OW, k * k * C)
    out = matmul_bias_leaky(cols, w_padded, b_padded, negative_slope)  # (M, 128)
    return out[:, :cout].reshape(B, OH, OW, cout)        # slice real channels back


# ----------------------------------------------------------------------------
# Kernel 2: fused FC stack   out = relu(relu(x @ W1 + b1) @ W2 + b2)
# Grid over fc1's 1024-wide N in TN_FC-wide tiles; fc2 accumulates directly
# into the grid-resident f32 output so the (B, 1024) intermediate never leaves
# VMEM.  fc1w is a pre-tiled contiguous (n_tiles, K1, TN_FC) bf16 slab.
# ----------------------------------------------------------------------------
def _fc_fused_kernel(x_ref, w1_ref, b1_ref, w2_ref, b2_ref, o_ref):
    j = pl.program_id(0)

    @pl.when(j == 0)
    def _():
        o_ref[...] = jnp.zeros_like(o_ref)

    # fc1 tile: (B, TN_FC).  K1 is not split, so per-tile ReLU is exact.
    h = jnp.dot(x_ref[...], w1_ref[...], preferred_element_type=jnp.float32)
    h = jnp.maximum(h + b1_ref[...], 0.0)

    # fc2 partial product over this slice of its contraction dim, accumulated
    # directly into the resident output block (f32).
    o_ref[...] += jnp.dot(h.astype(jnp.bfloat16), w2_ref[...],
                          preferred_element_type=jnp.float32)

    @pl.when(j == pl.num_programs(0) - 1)
    def _():
        o_ref[...] = jnp.maximum(o_ref[...] + b2_ref[...], 0.0)


def fc_stack(x, w1_tiled, b1, w2, b2):
    """x: (B, K1) f32; w1_tiled: (n_tiles, K1, TN_FC) bf16; w2: (N1, N2) bf16;
    b1: (1, N1) f32; b2: (1, N2) f32."""
    B, K1 = x.shape
    n_tiles, K1_, tn = w1_tiled.shape
    N2 = w2.shape[1]
    assert K1_ == K1 and tn == TN_FC and w2.shape[0] == n_tiles * TN_FC

    x_bf16 = x.astype(jnp.bfloat16)   # halves the (tiny) activation DMA too

    return pl.pallas_call(
        _fc_fused_kernel,
        out_shape=jax.ShapeDtypeStruct((B, N2), jnp.float32),
        grid_spec=pltpu.PrefetchScalarGridSpec(
            num_scalar_prefetch=0,
            grid=(n_tiles,),
            in_specs=[
                pl.BlockSpec((B, K1), lambda j: (0, 0)),              # x (resident)
                pl.BlockSpec((None, K1, TN_FC), lambda j: (j, 0, 0)),  # fc1w slab j
                pl.BlockSpec((1, TN_FC), lambda j: (0, j)),            # fc1b tile
                pl.BlockSpec((TN_FC, N2), lambda j: (j, 0)),           # fc2w rows (contiguous)
                pl.BlockSpec((1, N2), lambda j: (0, 0)),               # fc2b
            ],
            out_specs=pl.BlockSpec((B, N2), lambda j: (0, 0)),         # resident accumulator
        ),
        compiler_params=pltpu.CompilerParams(
            # reduction axis (fc2 accumulates across fc1 tiles) -> arbitrary
            dimension_semantics=("arbitrary",),
            vmem_limit_bytes=32 * 1024 * 1024,
        ),
    )(x_bf16, w1_tiled, b1, w2, b2)


# ----------------------------------------------------------------------------
# Full forward pass.
# ----------------------------------------------------------------------------
def feature_extractor_forward(params, image, stats):
    x = image.astype(jnp.float32)   # NHWC; PyTorch's permute-to-NCHW is folded away

    x = conv2d_leaky(x, params["c1w"], params["c1b"], cout=16, k=5, stride=2,
                     negative_slope=NEG_SLOPE)
    x = conv2d_leaky(x, params["c2w"], params["c2b"], cout=32, k=3, stride=2,
                     negative_slope=NEG_SLOPE)
    x = conv2d_leaky(x, params["c3w"], params["c3b"], cout=64, k=3, stride=1,
                     negative_slope=NEG_SLOPE)

    # MaxPool2d(kernel=2, stride=2) + adaptive pools + C-major flatten — tiny
    # (<100 KiB) reductions kept as JAX glue inside the jit.
    # TODO(synk): fold this glue into the FC kernel's first grid step / one
    #             small Pallas kernel to cut the remaining small-op dispatch.
    B, H, W, C = x.shape
    x = jnp.max(x.reshape(B, H // 2, 2, W // 2, 2, C), axis=(2, 4))      # (B, 6, 6, 64)

    # The adaptive-pool shortcuts below are only exact for a 6x6 feature map.
    assert x.shape[1:3] == (6, 6), "adaptive-pool shortcuts require a 6x6 CNN map"

    # AdaptiveAvgPool2d(2) on 6x6 == mean over 3x3 blocks.
    g = jnp.mean(x.reshape(B, 2, 3, 2, 3, C), axis=(2, 4))               # (B, 2, 2, 64)
    # AdaptiveAvgPool2d(6) on 6x6 == identity.
    l = x                                                                 # (B, 6, 6, 64)

    # Flatten in C-major order to match PyTorch flatten of NCHW tensors.
    global_features = jnp.transpose(g, (0, 3, 1, 2)).reshape(B, -1)      # (B, 256)
    local_features = jnp.transpose(l, (0, 3, 1, 2)).reshape(B, -1)       # (B, 2304)
    img = jnp.concatenate([global_features, local_features], axis=-1)    # (B, 2560)

    # image_fc: Linear(2560,1024)+ReLU, Linear(1024,512)+ReLU — one fused kernel.
    img = fc_stack(img, params["fc1w"], params["fc1b"], params["fc2w"], params["fc2b"])

    stats = stats.reshape(stats.shape[0], -1).astype(jnp.float32)
    return jnp.concatenate([img, stats], axis=-1)


# ----------------------------------------------------------------------------
# Deterministic synthetic parameter init + one-time packing (what you would do
# once when loading a torch checkpoint): lane-pad conv weights to 128 output
# columns, pre-tile fc1w into a contiguous (n_tiles, K1, TN_FC) bf16 slab.
# ----------------------------------------------------------------------------
def init_params(key, in_channels, cnn_output_size):
    ks = jax.random.split(key, 10)
    s = 0.05

    def w(k, shape):
        return jax.random.normal(k, shape, dtype=jnp.float32) * s

    return {
        "c1w": w(ks[0], (5, 5, in_channels, 16)), "c1b": w(ks[1], (1, 16)),
        "c2w": w(ks[2], (3, 3, 16, 32)),          "c2b": w(ks[3], (1, 32)),
        "c3w": w(ks[4], (3, 3, 32, 64)),          "c3b": w(ks[5], (1, 64)),
        "fc1w": w(ks[6], (cnn_output_size, 1024)), "fc1b": w(ks[7], (1, 1024)),
        "fc2w": w(ks[8], (1024, 512)),             "fc2b": w(ks[9], (1, 512)),
    }


def pack_params(raw):
    def pack_conv(w4, b2):
        kh, kw, cin, cout = w4.shape
        w2 = w4.reshape(kh * kw * cin, cout)
        w2 = jnp.pad(w2, ((0, 0), (0, LANE - cout)))   # zero cols -> lane-dense stores
        b2 = jnp.pad(b2, ((0, 0), (0, LANE - cout)))
        return w2, b2

    c1w, c1b = pack_conv(raw["c1w"], raw["c1b"])
    c2w, c2b = pack_conv(raw["c2w"], raw["c2b"])
    c3w, c3b = pack_conv(raw["c3w"], raw["c3b"])

    K1, N1 = raw["fc1w"].shape
    assert N1 % TN_FC == 0
    n_tiles = N1 // TN_FC
    fc1w = (raw["fc1w"].astype(jnp.bfloat16)
            .reshape(K1, n_tiles, TN_FC)
            .transpose(1, 0, 2))                        # contiguous slab per FC tile
    fc2w = raw["fc2w"].astype(jnp.bfloat16)

    return {
        "c1w": c1w, "c1b": c1b,
        "c2w": c2w, "c2b": c2b,
        "c3w": c3w, "c3b": c3b,
        "fc1w": fc1w, "fc1b": raw["fc1b"],
        "fc2w": fc2w, "fc2b": raw["fc2b"],
    }


if __name__ == "__main__":
    image_shape = (64, 64, 3)   # (H, W, C) -> 6x6x64 CNN feature map
    stats_dim = 8
    B = 2

    cnn_output_size = 64 * 2 * 2 + 64 * 6 * 6   # 2560, matches the torch dummy probe
    assert cnn_output_size == 2560

    key = jax.random.PRNGKey(0)
    k_params, k_img, k_stats = jax.random.split(key, 3)
    params = pack_params(init_params(k_params, image_shape[2], cnn_output_size))

    image = jax.random.uniform(
        k_img, (B, image_shape[0], image_shape[1], image_shape[2]), dtype=jnp.float32)
    stats = jax.random.normal(k_stats, (B, stats_dim), dtype=jnp.float32)

    fwd = jax.jit(feature_extractor_forward)
    out = fwd(params, image, stats)
    out = jax.block_until_ready(out)

    assert out.shape == (B, 512 + stats_dim), out.shape
    assert out.dtype == jnp.float32
    print("KERNEL_OK")
</pallas_src>

<mosaic_0001>
module attributes {stable_mosaic.version = 11 : i64} {
  func.func @_matmul_bias_leaky_kernel(%arg0: i32, %arg1: memref<1800x75xf32, #tpu.memory_space<vmem>>, %arg2: memref<75x128xf32, #tpu.memory_space<vmem>>, %arg3: memref<1x128xf32, #tpu.memory_space<vmem>>, %arg4: memref<1800x128xf32, #tpu.memory_space<vmem>>) attributes {dimension_semantics = [#tpu.dimension_semantics<arbitrary>], iteration_bounds = array<i64: 1>, scalar_prefetch = 0 : i64, scratch_operands = 0 : i64, tpu.core_type = #tpu.core_type<tc>, window_params = [{pipeline_mode = #tpu.pipeline_mode<synchronous>, transform_indices = @transform_0, window_bounds = array<i64: 1800, 75>}, {pipeline_mode = #tpu.pipeline_mode<synchronous>, transform_indices = @transform_1, window_bounds = array<i64: 75, 128>}, {pipeline_mode = #tpu.pipeline_mode<synchronous>, transform_indices = @transform_2, window_bounds = array<i64: 1, 128>}, {pipeline_mode = #tpu.pipeline_mode<synchronous>, transform_indices = @transform_3, window_bounds = array<i64: 1800, 128>}]} {
    %c0 = arith.constant 0 : index
    %c0_0 = arith.constant 0 : index
    %0 = vector.load %arg1[%c0, %c0_0] : memref<1800x75xf32, #tpu.memory_space<vmem>>, vector<1800x75xf32>
    %c0_1 = arith.constant 0 : index
    %c0_2 = arith.constant 0 : index
    %1 = vector.load %arg2[%c0_1, %c0_2] : memref<75x128xf32, #tpu.memory_space<vmem>>, vector<75x128xf32>
    %cst = arith.constant dense<0.000000e+00> : vector<1800x128xf32>
    %2 = tpu.matmul %0, %1, %cst {dimension_numbers = #tpu.dot_dimension_numbers<[1], [0], [0], [1], [0, 0, 1, 1], [], []>} : vector<1800x75xf32>, vector<75x128xf32>, vector<1800x128xf32> -> vector<1800x128xf32>
    %c0_3 = arith.constant 0 : index
    %c0_4 = arith.constant 0 : index
    %3 = vector.load %arg3[%c0_3, %c0_4] : memref<1x128xf32, #tpu.memory_space<vmem>>, vector<1x128xf32>
    %4 = vector.broadcast %3 : vector<1x128xf32> to vector<1800x128xf32>
    %5 = arith.addf %2, %4 : vector<1800x128xf32>
    %cst_5 = arith.constant 0.000000e+00 : f32
    %6 = vector.broadcast %cst_5 : f32 to vector<1800x128xf32>
    %7 = arith.cmpf ogt, %5, %6 : vector<1800x128xf32>
    %cst_6 = arith.constant 1.000000e-01 : f32
    %8 = vector.broadcast %cst_6 : f32 to vector<1800x128xf32>
    %9 = arith.mulf %8, %5 : vector<1800x128xf32>
    %10 = arith.select %7, %5, %9 : vector<1800x128xi1>, vector<1800x128xf32>
    %c0_7 = arith.constant 0 : index
    %c0_8 = arith.constant 0 : index
    %11 = vector.load %arg4[%c0_7, %c0_8] : memref<1800x128xf32, #tpu.memory_space<vmem>>, vector<1800x128xf32>
    tpu.vector_store %arg4[%c0_7, %c0_8], %10 {strides = array<i32>} : memref<1800x128xf32, #tpu.memory_space<vmem>>, vector<1800x128xf32>,
    return
  }
  func.func @transform_0(%arg0: i32) -> (i32, i32) {
    %c0_i32 = arith.constant 0 : i32
    %c0_i32_0 = arith.constant 0 : i32
    %c0_i32_1 = arith.constant 0 : i32
    return %c0_i32, %c0_i32_0 : i32, i32
  }
  func.func @transform_1(%arg0: i32) -> (i32, i32) {
    %c0_i32 = arith.constant 0 : i32
    %c0_i32_0 = arith.constant 0 : i32
    %c0_i32_1 = arith.constant 0 : i32
    return %c0_i32, %c0_i32_0 : i32, i32
  }
  func.func @transform_2(%arg0: i32) -> (i32, i32) {
    %c0_i32 = arith.constant 0 : i32
    %c0_i32_0 = arith.constant 0 : i32
    %c0_i32_1 = arith.constant 0 : i32
    return %c0_i32, %c0_i32_0 : i32, i32
  }
  func.func @transform_3(%arg0: i32) -> (i32, i32) {
    %c0_i32 = arith.constant 0 : i32
    %c0_i32_0 = arith.constant 0 : i32
    %c0_i32_1 = arith.constant 0 : i32
    return %c0_i32, %c0_i32_0 : i32, i32
  }
}

module attributes {stable_mosaic.version = 11 : i64} {
  func.func @_matmul_bias_leaky_kernel(%arg0: i32, %arg1: memref<392x144xf32, #tpu.memory_space<vmem>>, %arg2: memref<144x128xf32, #tpu.memory_space<vmem>>, %arg3: memref<1x128xf32, #tpu.memory_space<vmem>>, %arg4: memref<392x128xf32, #tpu.memory_space<vmem>>) attributes {dimension_semantics = [#tpu.dimension_semantics<arbitrary>], iteration_bounds = array<i64: 1>, scalar_prefetch = 0 : i64, scratch_operands = 0 : i64, tpu.core_type = #tpu.core_type<tc>, window_params = [{pipeline_mode = #tpu.pipeline_mode<synchronous>, transform_indices = @transform_0, window_bounds = array<i64: 392, 144>}, {pipeline_mode = #tpu.pipeline_mode<synchronous>, transform_indices = @transform_1, window_bounds = array<i64: 144, 128>}, {pipeline_mode = #tpu.pipeline_mode<synchronous>, transform_indices = @transform_2, window_bounds = array<i64: 1, 128>}, {pipeline_mode = #tpu.pipeline_mode<synchronous>, transform_indices = @transform_3, window_bounds = array<i64: 392, 128>}]} {
    %c0 = arith.constant 0 : index
    %c0_0 = arith.constant 0 : index
    %0 = vector.load %arg1[%c0, %c0_0] : memref<392x144xf32, #tpu.memory_space<vmem>>, vector<392x144xf32>
    %c0_1 = arith.constant 0 : index
    %c0_2 = arith.constant 0 : index
    %1 = vector.load %arg2[%c0_1, %c0_2] : memref<144x128xf32, #tpu.memory_space<vmem>>, vector<144x128xf32>
    %cst = arith.constant dense<0.000000e+00> : vector<392x128xf32>
    %2 = tpu.matmul %0, %1, %cst {dimension_numbers = #tpu.dot_dimension_numbers<[1], [0], [0], [1], [0, 0, 1, 1], [], []>} : vector<392x144xf32>, vector<144x128xf32>, vector<392x128xf32> -> vector<392x128xf32>
    %c0_3 = arith.constant 0 : index
    %c0_4 = arith.constant 0 : index
    %3 = vector.load %arg3[%c0_3, %c0_4] : memref<1x128xf32, #tpu.memory_space<vmem>>, vector<1x128xf32>
    %4 = vector.broadcast %3 : vector<1x128xf32> to vector<392x128xf32>
    %5 = arith.addf %2, %4 : vector<392x128xf32>
    %cst_5 = arith.constant 0.000000e+00 : f32
    %6 = vector.broadcast %cst_5 : f32 to vector<392x128xf32>
    %7 = arith.cmpf ogt, %5, %6 : vector<392x128xf32>
    %cst_6 = arith.constant 1.000000e-01 : f32
    %8 = vector.broadcast %cst_6 : f32 to vector<392x128xf32>
    %9 = arith.mulf %8, %5 : vector<392x128xf32>
    %10 = arith.select %7, %5, %9 : vector<392x128xi1>, vector<392x128xf32>
    %c0_7 = arith.constant 0 : index
    %c0_8 = arith.constant 0 : index
    %11 = vector.load %arg4[%c0_7, %c0_8] : memref<392x128xf32, #tpu.memory_space<vmem>>, vector<392x128xf32>
    tpu.vector_store %arg4[%c0_7, %c0_8], %10 {strides = array<i32>} : memref<392x128xf32, #tpu.memory_space<vmem>>, vector<392x128xf32>,
    return
  }
  func.func @transform_0(%arg0: i32) -> (i32, i32) {
    %c0_i32 = arith.constant 0 : i32
    %c0_i32_0 = arith.constant 0 : i32
    %c0_i32_1 = arith.constant 0 : i32
    return %c0_i32, %c0_i32_0 : i32, i32
  }
  func.func @transform_1(%arg0: i32) -> (i32, i32) {
    %c0_i32 = arith.constant 0 : i32
    %c0_i32_0 = arith.constant 0 : i32
    %c0_i32_1 = arith.constant 0 : i32
    return %c0_i32, %c0_i32_0 : i32, i32
  }
  func.func @transform_2(%arg0: i32) -> (i32, i32) {
    %c0_i32 = arith.constant 0 : i32
    %c0_i32_0 = arith.constant 0 : i32
    %c0_i32_1 = arith.constant 0 : i32
    return %c0_i32, %c0_i32_0 : i32, i32
  }
  func.func @transform_3(%arg0: i32) -> (i32, i32) {
    %c0_i32 = arith.constant 0 : i32
    %c0_i32_0 = arith.constant 0 : i32
    %c0_i32_1 = arith.constant 0 : i32
    return %c0_i32, %c0_i32_0 : i32, i32
  }
}

module attributes {stable_mosaic.version = 11 : i64} {
  func.func @_matmul_bias_leaky_kernel(%arg0: i32, %arg1: memref<288x288xf32, #tpu.memory_space<vmem>>, %arg2: memref<288x128xf32, #tpu.memory_space<vmem>>, %arg3: memref<1x128xf32, #tpu.memory_space<vmem>>, %arg4: memref<288x128xf32, #tpu.memory_space<vmem>>) attributes {dimension_semantics = [#tpu.dimension_semantics<arbitrary>], iteration_bounds = array<i64: 1>, scalar_prefetch = 0 : i64, scratch_operands = 0 : i64, tpu.core_type = #tpu.core_type<tc>, window_params = [{pipeline_mode = #tpu.pipeline_mode<synchronous>, transform_indices = @transform_0, window_bounds = array<i64: 288, 288>}, {pipeline_mode = #tpu.pipeline_mode<synchronous>, transform_indices = @transform_1, window_bounds = array<i64: 288, 128>}, {pipeline_mode = #tpu.pipeline_mode<synchronous>, transform_indices = @transform_2, window_bounds = array<i64: 1, 128>}, {pipeline_mode = #tpu.pipeline_mode<synchronous>, transform_indices = @transform_3, window_bounds = array<i64: 288, 128>}]} {
    %c0 = arith.constant 0 : index
    %c0_0 = arith.constant 0 : index
    %0 = vector.load %arg1[%c0, %c0_0] : memref<288x288xf32, #tpu.memory_space<vmem>>, vector<288x288xf32>
    %c0_1 = arith.constant 0 : index
    %c0_2 = arith.constant 0 : index
    %1 = vector.load %arg2[%c0_1, %c0_2] : memref<288x128xf32, #tpu.memory_space<vmem>>, vector<288x128xf32>
    %cst = arith.constant dense<0.000000e+00> : vector<288x128xf32>
    %2 = tpu.matmul %0, %1, %cst {dimension_numbers = #tpu.dot_dimension_numbers<[1], [0], [0], [1], [0, 0, 1, 1], [], []>} : vector<288x288xf32>, vector<288x128xf32>, vector<288x128xf32> -> vector<288x128xf32>
    %c0_3 = arith.constant 0 : index
    %c0_4 = arith.constant 0 : index
    %3 = vector.load %arg3[%c0_3, %c0_4] : memref<1x128xf32, #tpu.memory_space<vmem>>, vector<1x128xf32>
    %4 = vector.broadcast %3 : vector<1x128xf32> to vector<288x128xf32>
    %5 = arith.addf %2, %4 : vector<288x128xf32>
    %cst_5 = arith.constant 0.000000e+00 : f32
    %6 = vector.broadcast %cst_5 : f32 to vector<288x128xf32>
    %7 = arith.cmpf ogt, %5, %6 : vector<288x128xf32>
    %cst_6 = arith.constant 1.000000e-01 : f32
    %8 = vector.broadcast %cst_6 : f32 to vector<288x128xf32>
    %9 = arith.mulf %8, %5 : vector<288x128xf32>
    %10 = arith.select %7, %5, %9 : vector<288x128xi1>, vector<288x128xf32>
    %c0_7 = arith.constant 0 : index
    %c0_8 = arith.constant 0 : index
    %11 = vector.load %arg4[%c0_7, %c0_8] : memref<288x128xf32, #tpu.memory_space<vmem>>, vector<288x128xf32>
    tpu.vector_store %arg4[%c0_7, %c0_8], %10 {strides = array<i32>} : memref<288x128xf32, #tpu.memory_space<vmem>>, vector<288x128xf32>,
    return
  }
  func.func @transform_0(%arg0: i32) -> (i32, i32) {
    %c0_i32 = arith.constant 0 : i32
    %c0_i32_0 = arith.constant 0 : i32
    %c0_i32_1 = arith.constant 0 : i32
    return %c0_i32, %c0_i32_0 : i32, i32
  }
  func.func @transform_1(%arg0: i32) -> (i32, i32) {
    %c0_i32 = arith.constant 0 : i32
    %c0_i32_0 = arith.constant 0 : i32
    %c0_i32_1 = arith.constant 0 : i32
    return %c0_i32, %c0_i32_0 : i32, i32
  }
  func.func @transform_2(%arg0: i32) -> (i32, i32) {
    %c0_i32 = arith.constant 0 : i32
    %c0_i32_0 = arith.constant 0 : i32
    %c0_i32_1 = arith.constant 0 : i32
    return %c0_i32, %c0_i32_0 : i32, i32
  }
  func.func @transform_3(%arg0: i32) -> (i32, i32) {
    %c0_i32 = arith.constant 0 : i32
    %c0_i32_0 = arith.constant 0 : i32
    %c0_i32_1 = arith.constant 0 : i32
    return %c0_i32, %c0_i32_0 : i32, i32
  }
}

module attributes {stable_mosaic.version = 11 : i64} {
  func.func @_fc_fused_kernel(%arg0: i32, %arg1: memref<2x2560xbf16, #tpu.memory_space<vmem>>, %arg2: memref<1x2560x512xbf16, #tpu.memory_space<vmem>>, %arg3: memref<1x512xf32, #tpu.memory_space<vmem>>, %arg4: memref<512x512xbf16, #tpu.memory_space<vmem>>, %arg5: memref<1x512xf32, #tpu.memory_space<vmem>>, %arg6: memref<2x512xf32, #tpu.memory_space<vmem>>) attributes {dimension_semantics = [#tpu.dimension_semantics<arbitrary>], iteration_bounds = array<i64: 2>, scalar_prefetch = 0 : i64, scratch_operands = 0 : i64, tpu.core_type = #tpu.core_type<tc>, window_params = [{pipeline_mode = #tpu.pipeline_mode<synchronous>, transform_indices = @transform_0, window_bounds = array<i64: 2, 2560>}, {transform_indices = @transform_1, window_bounds = array<i64: 1, 2560, 512>}, {transform_indices = @transform_2, window_bounds = array<i64: 1, 512>}, {transform_indices = @transform_3, window_bounds = array<i64: 512, 512>}, {pipeline_mode = #tpu.pipeline_mode<synchronous>, transform_indices = @transform_4, window_bounds = array<i64: 1, 512>}, {pipeline_mode = #tpu.pipeline_mode<synchronous>, transform_indices = @transform_5, window_bounds = array<i64: 2, 512>}]} {
    %c0_i32 = arith.constant 0 : i32
    %0 = arith.cmpi eq, %arg0, %c0_i32 : i32
    %1 = arith.extui %0 : i1 to i32
    %c0_i32_0 = arith.constant 0 : i32
    %2 = arith.cmpi ne, %1, %c0_i32_0 : i32
    scf.if %2 {
      %cst_16 = arith.constant 0.000000e+00 : f32
      %21 = vector.broadcast %cst_16 : f32 to vector<2x512xf32>
      %c0_17 = arith.constant 0 : index
      %c0_18 = arith.constant 0 : index
      %22 = vector.load %arg6[%c0_17, %c0_18] : memref<2x512xf32, #tpu.memory_space<vmem>>, vector<2x512xf32>
      tpu.vector_store %arg6[%c0_17, %c0_18], %21 {strides = array<i32>} : memref<2x512xf32, #tpu.memory_space<vmem>>, vector<2x512xf32>,
    } else {
    }
    %c0 = arith.constant 0 : index
    %c0_1 = arith.constant 0 : index
    %3 = vector.load %arg1[%c0, %c0_1] : memref<2x2560xbf16, #tpu.memory_space<vmem>>, vector<2x2560xbf16>
    %c0_2 = arith.constant 0 : index
    %c0_3 = arith.constant 0 : index
    %c0_4 = arith.constant 0 : index
    %4 = vector.load %arg2[%c0_2, %c0_3, %c0_4] : memref<1x2560x512xbf16, #tpu.memory_space<vmem>>, vector<1x2560x512xbf16>
    %5 = vector.shape_cast %4 : vector<1x2560x512xbf16> to vector<2560x512xbf16>
    %cst = arith.constant dense<0.000000e+00> : vector<2x512xf32>
    %6 = tpu.matmul %3, %5, %cst {dimension_numbers = #tpu.dot_dimension_numbers<[1], [0], [0], [1], [0, 0, 1, 1], [], []>} : vector<2x2560xbf16>, vector<2560x512xbf16>, vector<2x512xf32> -> vector<2x512xf32>
    %c0_5 = arith.constant 0 : index
    %c0_6 = arith.constant 0 : index
    %7 = vector.load %arg3[%c0_5, %c0_6] : memref<1x512xf32, #tpu.memory_space<vmem>>, vector<1x512xf32>
    %8 = vector.broadcast %7 : vector<1x512xf32> to vector<2x512xf32>
    %9 = arith.addf %6, %8 : vector<2x512xf32>
    %cst_7 = arith.constant 0.000000e+00 : f32
    %10 = vector.broadcast %cst_7 : f32 to vector<2x512xf32>
    %11 = arith.maximumf %9, %10 : vector<2x512xf32>
    %c0_8 = arith.constant 0 : index
    %c0_9 = arith.constant 0 : index
    %12 = vector.load %arg6[%c0_8, %c0_9] : memref<2x512xf32, #tpu.memory_space<vmem>>, vector<2x512xf32>
    %13 = arith.truncf %11 : vector<2x512xf32> to vector<2x512xbf16>
    %c0_10 = arith.constant 0 : index
    %c0_11 = arith.constant 0 : index
    %14 = vector.load %arg4[%c0_10, %c0_11] : memref<512x512xbf16, #tpu.memory_space<vmem>>, vector<512x512xbf16>
    %cst_12 = arith.constant dense<0.000000e+00> : vector<2x512xf32>
    %15 = tpu.matmul %13, %14, %cst_12 {dimension_numbers = #tpu.dot_dimension_numbers<[1], [0], [0], [1], [0, 0, 1, 1], [], []>} : vector<2x512xbf16>, vector<512x512xbf16>, vector<2x512xf32> -> vector<2x512xf32>
    %16 = arith.addf %12, %15 : vector<2x512xf32>
    %c0_13 = arith.constant 0 : index
    %c0_14 = arith.constant 0 : index
    %17 = vector.load %arg6[%c0_13, %c0_14] : memref<2x512xf32, #tpu.memory_space<vmem>>, vector<2x512xf32>
    tpu.vector_store %arg6[%c0_13, %c0_14], %16 {strides = array<i32>} : memref<2x512xf32, #tpu.memory_space<vmem>>, vector<2x512xf32>,
    %c1_i32 = arith.constant 1 : i32
    %18 = arith.cmpi eq, %arg0, %c1_i32 : i32
    %19 = arith.extui %18 : i1 to i32
    %c0_i32_15 = arith.constant 0 : i32
    %20 = arith.cmpi ne, %19, %c0_i32_15 : i32
    scf.if %20 {
      %c0_16 = arith.constant 0 : index
      %c0_17 = arith.constant 0 : index
      %21 = vector.load %arg6[%c0_16, %c0_17] : memref<2x512xf32, #tpu.memory_space<vmem>>, vector<2x512xf32>
      %c0_18 = arith.constant 0 : index
      %c0_19 = arith.constant 0 : index
      %22 = vector.load %arg5[%c0_18, %c0_19] : memref<1x512xf32, #tpu.memory_space<vmem>>, vector<1x512xf32>
      %23 = vector.broadcast %22 : vector<1x512xf32> to vector<2x512xf32>
      %24 = arith.addf %21, %23 : vector<2x512xf32>
      %cst_20 = arith.constant 0.000000e+00 : f32
      %25 = vector.broadcast %cst_20 : f32 to vector<2x512xf32>
      %26 = arith.maximumf %24, %25 : vector<2x512xf32>
      %c0_21 = arith.constant 0 : index
      %c0_22 = arith.constant 0 : index
      %27 = vector.load %arg6[%c0_21, %c0_22] : memref<2x512xf32, #tpu.memory_space<vmem>>, vector<2x512xf32>
      tpu.vector_store %arg6[%c0_21, %c0_22], %26 {strides = array<i32>} : memref<2x512xf32, #tpu.memory_space<vmem>>, vector<2x512xf32>,
    } else {
    }
    return
  }
  func.func @transform_0(%arg0: i32) -> (i32, i32) {
    %c0_i32 = arith.constant 0 : i32
    %c0_i32_0 = arith.constant 0 : i32
    %c0_i32_1 = arith.constant 0 : i32
    return %c0_i32, %c0_i32_0 : i32, i32
  }
  func.func @transform_1(%arg0: i32) -> (i32, i32, i32) {
    %c0_i32 = arith.constant 0 : i32
    %c0_i32_0 = arith.constant 0 : i32
    %c0_i32_1 = arith.constant 0 : i32
    return %arg0, %c0_i32, %c0_i32_0 : i32, i32, i32
  }
  func.func @transform_2(%arg0: i32) -> (i32, i32) {
    %c0_i32 = arith.constant 0 : i32
    %c0_i32_0 = arith.constant 0 : i32
    return %c0_i32, %arg0 : i32, i32
  }
  func.func @transform_3(%arg0: i32) -> (i32, i32) {
    %c0_i32 = arith.constant 0 : i32
    %c0_i32_0 = arith.constant 0 : i32
    return %arg0, %c0_i32 : i32, i32
  }
  func.func @transform_4(%arg0: i32) -> (i32, i32) {
    %c0_i32 = arith.constant 0 : i32
    %c0_i32_0 = arith.constant 0 : i32
    %c0_i32_1 = arith.constant 0 : i32
    return %c0_i32, %c0_i32_0 : i32, i32
  }
  func.func @transform_5(%arg0: i32) -> (i32, i32) {
    %c0_i32 = arith.constant 0 : i32
    %c0_i32_0 = arith.constant 0 : i32
    %c0_i32_1 = arith.constant 0 : i32
    return %c0_i32, %c0_i32_0 : i32, i32
  }
}

</mosaic_0001>

<bundles_post_ra>
// kernel: feature_extractor_forward.4
= control target key start
LH: loop header
LB: loop body
LE: loop exit
PB: predicated region body
PF: predicated region fallthrough
CT: control target
= control target key end

     0   :  { %v4220_v0 = vmov 0.0|0.0   ;;  %vm4221_vm0 = vmmov 0   ;;  %v4222_v6 = vmov 0.0   ;;  %vm932_vm1 = vcmask 1042432   ;;  %s6544_s1 = inlined_call_operand.vmem [shape: f32[75,128], index: 1, kind: input, shape index: {}]   ;;  %s6545_s0 = inlined_call_operand.vmem [shape: f32[1800,75], index: 0, kind: input, shape index: {}]   ;;  %s6546_s2 = inlined_call_operand.vmem [shape: f32[1,128], index: 2, kind: input, shape index: {}]   ;;  %s6547_s3 = inlined_call_operand.vmem [shape: f32[1800,128], index: 3, kind: output, shape index: {}]  }
   0x1   :  { %4187 = vmatprep.subr.bf16.mxu0 %v4220_v0  ;;  %v239_v1 = vld [vmem:[%s6544_s1] sm:$0xff]  ;;  %v240_v2 = vld [vmem:[%s6544_s1 + $0x8] sm:$0xff]  ;;  %4203 = vmatprep.subr.bf16.mxu1 %v4220_v0  ;;  %v241_v3 = vld [vmem:[%s6544_s1 + $0x10] sm:$0xff]  ;;  %vm4223_vm2 = vmmov 1   ;;  %vm256_vm4 = vcmask 613376  }
   0x2   :  { %v4188_v4 = vpack.c.bf16 %v240_v2, %v239_v1  ;;  %v242_v5 = vld [vmem:[%s6544_s1 + $0x18] sm:$0xff]  ;;  %3512 = vmatprep.mubr.msk.f32.mxu0 %vm4221_vm0, %v4222_v6  ;;  %3851 = vmatprep.mubr.msk.f32.mxu1 %vm4221_vm0, %v4222_v6  ;;  %v243_v8 = vld [vmem:[%s6544_s1 + $0x20] sm:$0xff]  ;;  %v244_v9 = vld [vmem:[%s6544_s1 + $0x28] sm:$0xff] }
   0x3   :  { %v4191_v7 = vpack.c.bf16 %v242_v5, %v241_v3  ;;  %v4194_v10 = vpack.c.bf16 %v244_v9, %v243_v8  ;;  %v245_v11 = vld [vmem:[%s6544_s1 + $0x30] sm:$0xff]  ;;  %v246_v12 = vld [vmem:[%s6544_s1 + $0x38] sm:$0xff]  ;;  %v247_v14 = vld [vmem:[%s6544_s1 + $0x40] sm:$0xff] }
   0x4   :  { %4189 = vmatpush3.bf16.msra.mxu0 %v4188_v4  ;;  %4208 = vmatpush3.bf16.msra.mxu1 %v4188_v4  ;;  %v4197_v13 = vpack.c.bf16 %v246_v12, %v245_v11  ;;  %v248_v15 = vld [vmem:[%s6544_s1 + $0x48] sm:$0x7]  ;;  %vm4201_vm3 = vmpackc.low %vm932_vm1, %vm4223_vm2  ;;  %v14_v17 = vld [vmem:[%s6545_s0] sm:$0xff] }
   0x5   :  { %4190 = vmatprep.subr.bf16.mxu0 %v4220_v0  ;;  %4204 = vmatprep.subr.bf16.mxu1 %v4220_v0  ;;  %v4200_v16 = vpack.c.bf16 %v248_v15, %v247_v14  ;;  %v127_v18 = vld [vmem:[%s6545_s0 + $0x388] sm:$0xff]  ;;  %v128_v20 = vld [vmem:[%s6545_s0 + $0x390] sm:$0xff]  ;;  %v129_v22 = vld [vmem:[%s6545_s0 + $0x398] sm:$0xff] }
   0x6   :  { %v15_v19 = vld [vmem:[%s6545_s0 + $0x8] sm:$0xff]  ;;  %v16_v21 = vld [vmem:[%s6545_s0 + $0x10] sm:$0xff]  ;;  %v17_v23 = vld [vmem:[%s6545_s0 + $0x18] sm:$0xff] }
   0x7   :  { %v130_v24 = vld [vmem:[%s6545_s0 + $0x3a0] sm:$0xff]  ;;  %v131_v26 = vld [vmem:[%s6545_s0 + $0x3a8] sm:$0xff]  ;;  %v132_v28 = vld [vmem:[%s6545_s0 + $0x3b0] sm:$0xff] }
   0x8   :  { %4192 = vmatpush3.bf16.msra.mxu0 %v4191_v7  ;;  %4209 = vmatpush3.bf16.msra.mxu1 %v4191_v7  ;;  %v18_v25 = vld [vmem:[%s6545_s0 + $0x20] sm:$0xff]  ;;  %v19_v27 = vld [vmem:[%s6545_s0 + $0x28] sm:$0xff]  ;;  %v20_v29 = vld [vmem:[%s6545_s0 + $0x30] sm:$0xff] }
   0x9   :  { %4193 = vmatprep.subr.bf16.mxu0 %v4220_v0  ;;  %4205 = vmatprep.subr.bf16.mxu1 %v4220_v0  ;;  %v133_v30 = vld [vmem:[%s6545_s0 + $0x3b8] sm:$0xff]  ;;  %v134_v32 = vld [vmem:[%s6545_s0 + $0x3c0] sm:$0xff]  ;;  %v135_v34 = vld [vmem:[%s6545_s0 + $0x3c8] sm:$0xff] }
   0xa   :  { %v21_v31 = vld [vmem:[%s6545_s0 + $0x38] sm:$0xff]  ;;  %v22_v33 = vld [vmem:[%s6545_s0 + $0x40] sm:$0xff]  ;;  %v23_v35 = vld [vmem:[%s6545_s0 + $0x48] sm:$0xff] }
   0xb   :  { %v136_v36 = vld [vmem:[%s6545_s0 + $0x3d0] sm:$0xff]  ;;  %v137_v38 = vld [vmem:[%s6545_s0 + $0x3d8] sm:$0xff]  ;;  %v138_v40 = vld [vmem:[%s6545_s0 + $0x3e0] sm:$0xff] }
   0xc   :  { %4195 = vmatpush3.bf16.msra.mxu0 %v4194_v10  ;;  %4210 = vmatpush3.bf16.msra.mxu1 %v4194_v10  ;;  %v24_v37 = vld [vmem:[%s6545_s0 + $0x50] sm:$0xff]  ;;  %v25_v39 = vld [vmem:[%s6545_s0 + $0x58] sm:$0xff]  ;;  %v26_v41 = vld [vmem:[%s6545_s0 + $0x60] sm:$0xff] }
   0xd   :  { %4196 = vmatprep.subr.bf16.mxu0 %v4220_v0  ;;  %4206 = vmatprep.subr.bf16.mxu1 %v4220_v0  ;;  %v139_v42 = vld [vmem:[%s6545_s0 + $0x3e8] sm:$0xff]  ;;  %v140_v44 = vld [vmem:[%s6545_s0 + $0x3f0] sm:$0xff]  ;;  %v141_v46 = vld [vmem:[%s6545_s0 + $0x3f8] sm:$0xff] }
   0xe   :  { %v27_v43 = vld [vmem:[%s6545_s0 + $0x68] sm:$0xff]  ;;  %v28_v45 = vld [vmem:[%s6545_s0 + $0x70] sm:$0xff]  ;;  %v29_v47 = vld [vmem:[%s6545_s0 + $0x78] sm:$0xff] }
   0xf   :  { %v142_v48 = vld [vmem:[%s6545_s0 + $0x400] sm:$0xff]  ;;  %v143_v50 = vld [vmem:[%s6545_s0 + $0x408] sm:$0xff]  ;;  %v144_v52 = vld [vmem:[%s6545_s0 + $0x410] sm:$0xff] }
  0x10   :  { %4198 = vmatpush3.bf16.msra.mxu0 %v4197_v13  ;;  %4211 = vmatpush3.bf16.msra.mxu1 %v4197_v13  ;;  %v30_v49 = vld [vmem:[%s6545_s0 + $0x80] sm:$0xff]  ;;  %v31_v51 = vld [vmem:[%s6545_s0 + $0x88] sm:$0xff]  ;;  %v32_v53 = vld [vmem:[%s6545_s0 + $0x90] sm:$0xff] }
  0x11   :  { %4199 = vmatprep.subr.bf16.mxu0 %v4220_v0  ;;  %4207 = vmatprep.subr.bf16.mxu1 %v4220_v0  ;;  %v145_v54 = vld [vmem:[%s6545_s0 + $0x418] sm:$0xff]  ;;  %v146_v56 = vld [vmem:[%s6545_s0 + $0x420] sm:$0xff]  ;;  %v147_v58 = vld [vmem:[%s6545_s0 + $0x428] sm:$0xff] }
  0x12   :  { %v33_v55 = vld [vmem:[%s6545_s0 + $0x98] sm:$0xff]  ;;  %v34_v57 = vld [vmem:[%s6545_s0 + $0xa0] sm:$0xff]  ;;  %v35_v59 = vld [vmem:[%s6545_s0 + $0xa8] sm:$0xff] }
  0x13   :  { %v148_v60 = vld [vmem:[%s6545_s0 + $0x430] sm:$0xff]  ;;  %v149_v62 = vld [vmem:[%s6545_s0 + $0x438] sm:$0xff]  ;;  %v150_v0 = vld [vmem:[%s6545_s0 + $0x440] sm:$0xff] }
  0x14   :  { %4202 = vmatpush3.bf16.msk.msra.mxu0 %vm4201_vm3, %v4200_v16  ;;  %4212 = vmatpush3.bf16.msk.msra.mxu1 %vm4201_vm3, %v4200_v16  ;;  %v36_v61 = vld [vmem:[%s6545_s0 + $0xb0] sm:$0xff]  ;;  %v37_v63 = vld [vmem:[%s6545_s0 + $0xb8] sm:$0xff]  ;;  %v38_v1 = vld [vmem:[%s6545_s0 + $0xc0] sm:$0xff] }
  0x15   :  { %v151_v2 = vld [vmem:[%s6545_s0 + $0x448] sm:$0xff]  ;;  %v152_v4 = vld [vmem:[%s6545_s0 + $0x450] sm:$0xff]  ;;  %v153_v7 = vld [vmem:[%s6545_s0 + $0x458] sm:$0xff] }
  0x16   :  { %v39_v3 = vld [vmem:[%s6545_s0 + $0xc8] sm:$0xff]  ;;  %v40_v5 = vld [vmem:[%s6545_s0 + $0xd0] sm:$0xff]  ;;  %v41_v8 = vld [vmem:[%s6545_s0 + $0xd8] sm:$0xff] }
  0x17   :  { %3513 = vmatmul.mubr.msk.f32.vlgmr.msra.gmra.mrb[0].mxu0 %vm256_vm4, %v14_v17  ;;  %3852 = vmatmul.mubr.msk.f32.vlgmr.msra.gmra.mrb[0].mxu1 %vm256_vm4, %v127_v18  ;;  %v154_v9 = vld [vmem:[%s6545_s0 + $0x460] sm:$0xff]  ;;  %v155_v11 = vld [vmem:[%s6545_s0 + $0x468] sm:$0xff]  ;;  %v156_v13 = vld [vmem:[%s6545_s0 + $0x470] sm:$0xff] }
  0x18   :  { %3515 = vmatprep.mubr.msk.f32.mxu0 %vm4221_vm0, %v4222_v6  ;;  %3854 = vmatprep.mubr.msk.f32.mxu1 %vm4221_vm0, %v4222_v6  ;;  %v42_v10 = vld [vmem:[%s6545_s0 + $0xe0] sm:$0xff]  ;;  %v43_v12 = vld [vmem:[%s6545_s0 + $0xe8] sm:$0xff]  ;;  %v44_v14 = vld [vmem:[%s6545_s0 + $0xf0] sm:$0xff] }
  0x19   :  { %v157_v15 = vld [vmem:[%s6545_s0 + $0x478] sm:$0xff]  ;;  %v158_v17 = vld [vmem:[%s6545_s0 + $0x480] sm:$0xff] }
  0x1a   :  { %v45_v16 = vld [vmem:[%s6545_s0 + $0xf8] sm:$0xff]  ;;  %v46_v18 = vld [vmem:[%s6545_s0 + $0x100] sm:$0xff] }
  0x1b   :  { %3516 = vmatmul.mubr.msk.f32.gmra.mrb[2].mxu0 %vm256_vm4, %v15_v19  ;;  %3855 = vmatmul.mubr.msk.f32.gmra.mrb[2].mxu1 %vm256_vm4, %v128_v20  ;;  %v159_v19 = vld [vmem:[%s6545_s0 + $0x488] sm:$0xff] }
  0x1c   :  { %3518 = vmatprep.mubr.msk.f32.mxu0 %vm4221_vm0, %v4222_v6  ;;  %3857 = vmatprep.mubr.msk.f32.mxu1 %vm4221_vm0, %v4222_v6  ;;  %v47_v20 = vld [vmem:[%s6545_s0 + $0x108] sm:$0xff] }
  0x1f   :  { %3519 = vmatmul.mubr.msk.f32.gmra.mrb[4].mxu0 %vm256_vm4, %v16_v21  ;;  %3858 = vmatmul.mubr.msk.f32.gmra.mrb[4].mxu1 %vm256_vm4, %v129_v22  ;;  %v160_v21 = vld [vmem:[%s6545_s0 + $0x490] sm:$0xff] }
  0x20   :  { %3521 = vmatprep.mubr.msk.f32.mxu0 %vm4221_vm0, %v4222_v6  ;;  %3860 = vmatprep.mubr.msk.f32.mxu1 %vm4221_vm0, %v4222_v6  ;;  %v48_v22 = vld [vmem:[%s6545_s0 + $0x110] sm:$0xff] }
  0x23   :  { %3522 = vmatmul.mubr.msk.f32.gmra.mrb[6].mxu0 %vm256_vm4, %v17_v23  ;;  %3861 = vmatmul.mubr.msk.f32.gmra.mrb[6].mxu1 %vm256_vm4, %v130_v24  ;;  %v161_v23 = vld [vmem:[%s6545_s0 + $0x498] sm:$0xff] }
  0x24   :  { %3524 = vmatprep.mubr.msk.f32.mxu0 %vm4221_vm0, %v4222_v6  ;;  %3863 = vmatprep.mubr.msk.f32.mxu1 %vm4221_vm0, %v4222_v6  ;;  %v49_v24 = vld [vmem:[%s6545_s0 + $0x118] sm:$0xff] }
  0x27   :  { %3525 = vmatmul.mubr.msk.f32.gmra.mrb[8].mxu0 %vm256_vm4, %v18_v25  ;;  %3864 = vmatmul.mubr.msk.f32.gmra.mrb[8].mxu1 %vm256_vm4, %v131_v26  ;;  %v162_v25 = vld [vmem:[%s6545_s0 + $0x4a0] sm:$0xff] }
  0x28   :  { %3527 = vmatprep.mubr.msk.f32.mxu0 %vm4221_vm0, %v4222_v6  ;;  %3866 = vmatprep.mubr.msk.f32.mxu1 %vm4221_vm0, %v4222_v6  ;;  %v50_v26 = vld [vmem:[%s6545_s0 + $0x120] sm:$0xff] }
  0x2b   :  { %3528 = vmatmul.mubr.msk.f32.gmra.mrb[10].mxu0 %vm256_vm4, %v19_v27  ;;  %3867 = vmatmul.mubr.msk.f32.gmra.mrb[10].mxu1 %vm256_vm4, %v132_v28  ;;  %v163_v27 = vld [vmem:[%s6545_s0 + $0x4a8] sm:$0xff] }
  0x2c   :  { %3530 = vmatprep.mubr.msk.f32.mxu0 %vm4221_vm0, %v4222_v6  ;;  %3869 = vmatprep.mubr.msk.f32.mxu1 %vm4221_vm0, %v4222_v6  ;;  %v51_v28 = vld [vmem:[%s6545_s0 + $0x128] sm:$0xff] }
  0x2f   :  { %3531 = vmatmul.mubr.msk.f32.gmra.mrb[12].mxu0 %vm256_vm4, %v20_v29  ;;  %3870 = vmatmul.mubr.msk.f32.gmra.mrb[12].mxu1 %vm256_vm4, %v133_v30  ;;  %v164_v29 = vld [vmem:[%s6545_s0 + $0x4b0] sm:$0xff] }
  0x30   :  { %3533 = vmatprep.mubr.msk.f32.mxu0 %vm4221_vm0, %v4222_v6  ;;  %3872 = vmatprep.mubr.msk.f32.mxu1 %vm4221_vm0, %v4222_v6  ;;  %v52_v30 = vld [vmem:[%s6545_s0 + $0x130] sm:$0xff] }
  0x33   :  { %3534 = vmatmul.mubr.msk.f32.gmra.mrb[14].mxu0 %vm256_vm4, %v21_v31  ;;  %3873 = vmatmul.mubr.msk.f32.gmra.mrb[14].mxu1 %vm256_vm4, %v134_v32  ;;  %v165_v31 = vld [vmem:[%s6545_s0 + $0x4b8] sm:$0xff] }
  0x34   :  { %3536 = vmatprep.mubr.msk.f32.mxu0 %vm4221_vm0, %v4222_v6  ;;  %3875 = vmatprep.mubr.msk.f32.mxu1 %vm4221_vm0, %v4222_v6  ;;  %v53_v32 = vld [vmem:[%s6545_s0 + $0x138] sm:$0xff] }
  0x37   :  { %3537 = vmatmul.mubr.msk.f32.gmra.mrb[16].mxu0 %vm256_vm4, %v22_v33  ;;  %3876 = vmatmul.mubr.msk.f32.gmra.mrb[16].mxu1 %vm256_vm4, %v135_v34  ;;  %v166_v33 = vld [vmem:[%s6545_s0 + $0x4c0] sm:$0xff] }
  0x38   :  { %3539 = vmatprep.mubr.msk.f32.mxu0 %vm4221_vm0, %v4222_v6  ;;  %3878 = vmatprep.mubr.msk.f32.mxu1 %vm4221_vm0, %v4222_v6  ;;  %v54_v34 = vld [vmem:[%s6545_s0 + $0x140] sm:$0xff] }
  0x3b   :  { %3540 = vmatmul.mubr.msk.f32.gmra.mrb[18].mxu0 %vm256_vm4, %v23_v35  ;;  %3879 = vmatmul.mubr.msk.f32.gmra.mrb[18].mxu1 %vm256_vm4, %v136_v36  ;;  %v167_v35 = vld [vmem:[%s6545_s0 + $0x4c8] sm:$0xff] }
  0x3c   :  { %3542 = vmatprep.mubr.msk.f32.mxu0 %vm4221_vm0, %v4222_v6  ;;  %3881 = vmatprep.mubr.msk.f32.mxu1 %vm4221_vm0, %v4222_v6  ;;  %v55_v36 = vld [vmem:[%s6545_s0 + $0x148] sm:$0xff] }
  0x3f   :  { %3543 = vmatmul.mubr.msk.f32.gmra.mrb[20].mxu0 %vm256_vm4, %v24_v37  ;;  %3882 = vmatmul.mubr.msk.f32.gmra.mrb[20].mxu1 %vm256_vm4, %v137_v38  ;;  %v168_v37 = vld [vmem:[%s6545_s0 + $0x4d0] sm:$0xff] }
  0x40   :  { %3545 = vmatprep.mubr.msk.f32.mxu0 %vm4221_vm0, %v4222_v6  ;;  %3884 = vmatprep.mubr.msk.f32.mxu1 %vm4221_vm0, %v4222_v6  ;;  %v56_v38 = vld [vmem:[%s6545_s0 + $0x150] sm:$0xff] }
  0x43   :  { %3546 = vmatmul.mubr.msk.f32.gmra.mrb[22].mxu0 %vm256_vm4, %v25_v39  ;;  %3885 = vmatmul.mubr.msk.f32.gmra.mrb[22].mxu1 %vm256_vm4, %v138_v40  ;;  %v169_v39 = vld [vmem:[%s6545_s0 + $0x4d8] sm:$0xff] }
  0x44   :  { %3548 = vmatprep.mubr.msk.f32.mxu0 %vm4221_vm0, %v4222_v6  ;;  %3887 = vmatprep.mubr.msk.f32.mxu1 %vm4221_vm0, %v4222_v6  ;;  %v57_v40 = vld [vmem:[%s6545_s0 + $0x158] sm:$0xff] }
  0x47   :  { %3549 = vmatmul.mubr.msk.f32.gmra.mrb[24].mxu0 %vm256_vm4, %v26_v41  ;;  %3888 = vmatmul.mubr.msk.f32.gmra.mrb[24].mxu1 %vm256_vm4, %v139_v42  ;;  %v170_v41 = vld [vmem:[%s6545_s0 + $0x4e0] sm:$0xff] }
  0x48   :  { %3551 = vmatprep.mubr.msk.f32.mxu0 %vm4221_vm0, %v4222_v6  ;;  %3890 = vmatprep.mubr.msk.f32.mxu1 %vm4221_vm0, %v4222_v6  ;;  %v58_v42 = vld [vmem:[%s6545_s0 + $0x160] sm:$0xff] }
  0x4b   :  { %3552 = vmatmul.mubr.msk.f32.gmra.mrb[26].mxu0 %vm256_vm4, %v27_v43  ;;  %3891 = vmatmul.mubr.msk.f32.gmra.mrb[26].mxu1 %vm256_vm4, %v140_v44  ;;  %v171_v43 = vld [vmem:[%s6545_s0 + $0x4e8] sm:$0xff] }
  0x4c   :  { %3554 = vmatprep.mubr.msk.f32.mxu0 %vm4221_vm0, %v4222_v6  ;;  %3893 = vmatprep.mubr.msk.f32.mxu1 %vm4221_vm0, %v4222_v6  ;;  %v59_v44 = vld [vmem:[%s6545_s0 + $0x168] sm:$0xff] }
  0x4f   :  { %3555 = vmatmul.mubr.msk.f32.gmra.mrb[28].mxu0 %vm256_vm4, %v28_v45  ;;  %3894 = vmatmul.mubr.msk.f32.gmra.mrb[28].mxu1 %vm256_vm4, %v141_v46  ;;  %v172_v45 = vld [vmem:[%s6545_s0 + $0x4f0] sm:$0xff] }
  0x50   :  { %3557 = vmatprep.mubr.msk.f32.mxu0 %vm4221_vm0, %v4222_v6  ;;  %3896 = vmatprep.mubr.msk.f32.mxu1 %vm4221_vm0, %v4222_v6  ;;  %v60_v46 = vld [vmem:[%s6545_s0 + $0x170] sm:$0xff] }
  0x53   :  { %3558 = vmatmul.mubr.msk.f32.gmra.mrb[30].mxu0 %vm256_vm4, %v29_v47  ;;  %3897 = vmatmul.mubr.msk.f32.gmra.mrb[30].mxu1 %vm256_vm4, %v142_v48  ;;  %v173_v47 = vld [vmem:[%s6545_s0 + $0x4f8] sm:$0xff] }
  0x54   :  { %3560 = vmatprep.mubr.msk.f32.mxu0 %vm4221_vm0, %v4222_v6  ;;  %3899 = vmatprep.mubr.msk.f32.mxu1 %vm4221_vm0, %v4222_v6  ;;  %v61_v48 = vld [vmem:[%s6545_s0 + $0x178] sm:$0xff] }
  0x57   :  { %3561 = vmatmul.mubr.msk.f32.gmra.mrb[32].mxu0 %vm256_vm4, %v30_v49  ;;  %3900 = vmatmul.mubr.msk.f32.gmra.mrb[32].mxu1 %vm256_vm4, %v143_v50  ;;  %v174_v49 = vld [vmem:[%s6545_s0 + $0x500] sm:$0xff] }
  0x58   :  { %3563 = vmatprep.mubr.msk.f32.mxu0 %vm4221_vm0, %v4222_v6  ;;  %3902 = vmatprep.mubr.msk.f32.mxu1 %vm4221_vm0, %v4222_v6  ;;  %v62_v50 = vld [vmem:[%s6545_s0 + $0x180] sm:$0xff] }
  0x5b   :  { %3564 = vmatmul.mubr.msk.f32.gmra.mrb[34].mxu0 %vm256_vm4, %v31_v51  ;;  %3903 = vmatmul.mubr.msk.f32.gmra.mrb[34].mxu1 %vm256_vm4, %v144_v52  ;;  %v175_v51 = vld [vmem:[%s6545_s0 + $0x508] sm:$0xff] }
  0x5c   :  { %3566 = vmatprep.mubr.msk.f32.mxu0 %vm4221_vm0, %v4222_v6  ;;  %3905 = vmatprep.mubr.msk.f32.mxu1 %vm4221_vm0, %v4222_v6  ;;  %v63_v52 = vld [vmem:[%s6545_s0 + $0x188] sm:$0xff] }
  0x5f   :  { %3567 = vmatmul.mubr.msk.f32.gmra.mrb[36].mxu0 %vm256_vm4, %v32_v53  ;;  %3906 = vmatmul.mubr.msk.f32.gmra.mrb[36].mxu1 %vm256_vm4, %v145_v54  ;;  %v176_v53 = vld [vmem:[%s6545_s0 + $0x510] sm:$0xff] }
  0x60   :  { %3569 = vmatprep.mubr.msk.f32.mxu0 %vm4221_vm0, %v4222_v6  ;;  %3908 = vmatprep.mubr.msk.f32.mxu1 %vm4221_vm0, %v4222_v6  ;;  %v64_v54 = vld [vmem:[%s6545_s0 + $0x190] sm:$0xff] }
  0x63   :  { %3570 = vmatmul.mubr.msk.f32.gmra.mrb[38].mxu0 %vm256_vm4, %v33_v55  ;;  %3909 = vmatmul.mubr.msk.f32.gmra.mrb[38].mxu1 %vm256_vm4, %v146_v56  ;;  %v177_v55 = vld [vmem:[%s6545_s0 + $0x518] sm:$0xff] }
  0x64   :  { %3572 = vmatprep.mubr.msk.f32.mxu0 %vm4221_vm0, %v4222_v6  ;;  %3911 = vmatprep.mubr.msk.f32.mxu1 %vm4221_vm0, %v4222_v6  ;;  %v65_v56 = vld [vmem:[%s6545_s0 + $0x198] sm:$0xff] }
  0x67   :  { %3573 = vmatmul.mubr.msk.f32.gmra.mrb[40].mxu0 %vm256_vm4, %v34_v57  ;;  %3912 = vmatmul.mubr.msk.f32.gmra.mrb[40].mxu1 %vm256_vm4, %v147_v58  ;;  %v178_v57 = vld [vmem:[%s6545_s0 + $0x520] sm:$0xff] }
  0x68   :  { %3575 = vmatprep.mubr.msk.f32.mxu0 %vm4221_vm0, %v4222_v6  ;;  %3914 = vmatprep.mubr.msk.f32.mxu1 %vm4221_vm0, %v4222_v6  ;;  %v66_v58 = vld [vmem:[%s6545_s0 + $0x1a0] sm:$0xff] }
  0x6b   :  { %3576 = vmatmul.mubr.msk.f32.gmra.mrb[42].mxu0 %vm256_vm4, %v35_v59  ;;  %3915 = vmatmul.mubr.msk.f32.gmra.mrb[42].mxu1 %vm256_vm4, %v148_v60  ;;  %v179_v59 = vld [vmem:[%s6545_s0 + $0x528] sm:$0xff]  ;;  %v4913_v60 = vld [vmem:[%s6546_s2] ss:$0 sm:$0xff] }
  0x6c   :  { %3578 = vmatprep.mubr.msk.f32.mxu0 %vm4221_vm0, %v4222_v6  ;;  %3917 = vmatprep.mubr.msk.f32.mxu1 %vm4221_vm0, %v4222_v6 }
  0x6f   :  { %3579 = vmatmul.mubr.msk.f32.gmra.mrb[44].mxu0 %vm256_vm4, %v36_v61  ;;  %3918 = vmatmul.mubr.msk.f32.gmra.mrb[44].mxu1 %vm256_vm4, %v149_v62  ;;  %v67_v61 = vld [vmem:[%s6545_s0 + $0x1a8] sm:$0xff]  ;;  %v180_v62 = vld [vmem:[%s6545_s0 + $0x530] sm:$0xff] }
  0x70   :  { %3581 = vmatprep.mubr.msk.f32.mxu0 %vm4221_vm0, %v4222_v6  ;;  %3920 = vmatprep.mubr.msk.f32.mxu1 %vm4221_vm0, %v4222_v6 }
  0x73   :  { %3582 = vmatmul.mubr.msk.f32.gmra.mrb[46].mxu0 %vm256_vm4, %v37_v63  ;;  %3921 = vmatmul.mubr.msk.f32.gmra.mrb[46].mxu1 %vm256_vm4, %v150_v0 }
  0x74   :  { %3584 = vmatprep.mubr.msk.f32.mxu0 %vm4221_vm0, %v4222_v6  ;;  %3923 = vmatprep.mubr.msk.f32.mxu1 %vm4221_vm0, %v4222_v6 }
  0x77   :  { %3585 = vmatmul.mubr.msk.f32.gmra.mrb[48].mxu0 %vm256_vm4, %v38_v1  ;;  %3924 = vmatmul.mubr.msk.f32.gmra.mrb[48].mxu1 %vm256_vm4, %v151_v2 }
  0x78   :  { %3587 = vmatprep.mubr.msk.f32.mxu0 %vm4221_vm0, %v4222_v6  ;;  %3926 = vmatprep.mubr.msk.f32.mxu1 %vm4221_vm0, %v4222_v6 }
  0x7b   :  { %3588 = vmatmul.mubr.msk.f32.gmra.mrb[50].mxu0 %vm256_vm4, %v39_v3  ;;  %3927 = vmatmul.mubr.msk.f32.gmra.mrb[50].mxu1 %vm256_vm4, %v152_v4 }
  0x7c   :  { %3590 = vmatprep.mubr.msk.f32.mxu0 %vm4221_vm0, %v4222_v6  ;;  %3929 = vmatprep.mubr.msk.f32.mxu1 %vm4221_vm0, %v4222_v6 }
  0x7f   :  { %3591 = vmatmul.mubr.msk.f32.gmra.mrb[52].mxu0 %vm256_vm4, %v40_v5  ;;  %3930 = vmatmul.mubr.msk.f32.gmra.mrb[52].mxu1 %vm256_vm4, %v153_v7  ;;  %v68_v5 = vld [vmem:[%s6545_s0 + $0x1b0] sm:$0xff]  ;;  %v181_v7 = vld [vmem:[%s6545_s0 + $0x538] sm:$0xff] }
  0x80   :  { %3593 = vmatprep.mubr.msk.f32.mxu0 %vm4221_vm0, %v4222_v6  ;;  %3932 = vmatprep.mubr.msk.f32.mxu1 %vm4221_vm0, %v4222_v6 }
  0x83   :  { %3594 = vmatmul.mubr.msk.f32.gmra.mrb[54].mxu0 %vm256_vm4, %v41_v8  ;;  %3933 = vmatmul.mubr.msk.f32.gmra.mrb[54].mxu1 %vm256_vm4, %v154_v9 }
  0x84   :  { %3596 = vmatprep.mubr.msk.f32.mxu0 %vm4221_vm0, %v4222_v6  ;;  %3935 = vmatprep.mubr.msk.f32.mxu1 %vm4221_vm0, %v4222_v6 }
  0x87   :  { %3597 = vmatmul.mubr.msk.f32.gmra.mrb[56].mxu0 %vm256_vm4, %v42_v10  ;;  %3936 = vmatmul.mubr.msk.f32.gmra.mrb[56].mxu1 %vm256_vm4, %v155_v11 }
  0x88   :  { %3599 = vmatprep.mubr.msk.f32.mxu0 %vm4221_vm0, %v4222_v6  ;;  %3938 = vmatprep.mubr.msk.f32.mxu1 %vm4221_vm0, %v4222_v6 }
  0x8b   :  { %3600 = vmatmul.mubr.msk.f32.gmra.mrb[58].mxu0 %vm256_vm4, %v43_v12  ;;  %3939 = vmatmul.mubr.msk.f32.gmra.mrb[58].mxu1 %vm256_vm4, %v156_v13 }
  0x8c   :  { %3602 = vmatprep.mubr.msk.f32.mxu0 %vm4221_vm0, %v4222_v6  ;;  %3941 = vmatprep.mubr.msk.f32.mxu1 %vm4221_vm0, %v4222_v6 }
  0x8f   :  { %3603 = vmatmul.mubr.msk.f32.gmra.mrb[60].mxu0 %vm256_vm4, %v44_v14  ;;  %3942 = vmatmul.mubr.msk.f32.gmra.mrb[60].mxu1 %vm256_vm4, %v157_v15 }
  0x90   :  { %3605 = vmatprep.mubr.msk.f32.mxu0 %vm4221_vm0, %v4222_v6  ;;  %3944 = vmatprep.mubr.msk.f32.mxu1 %vm4221_vm0, %v4222_v6 }
  0x93   :  { %3606 = vmatmul.mubr.msk.f32.gmra.mrb[62].mxu0 %vm256_vm4, %v45_v16  ;;  %3945 = vmatmul.mubr.msk.f32.gmra.mrb[62].mxu1 %vm256_vm4, %v158_v17 }
  0x94   :  { %3608 = vmatprep.mubr.msk.f32.mxu0 %vm4221_vm0, %v4222_v6  ;;  %3947 = vmatprep.mubr.msk.f32.mxu1 %vm4221_vm0, %v4222_v6 }
  0x97   :  { %3609 = vmatmul.mubr.msk.f32.gmra.mrb[64].mxu0 %vm256_vm4, %v46_v18  ;;  %3948 = vmatmul.mubr.msk.f32.gmra.mrb[64].mxu1 %vm256_vm4, %v159_v19  ;;  %v69_v18 = vld [vmem:[%s6545_s0 + $0x1b8] sm:$0xff]  ;;  %v182_v19 = vld [vmem:[%s6545_s0 + $0x540] sm:$0xff] }
  0x98   :  { %3611 = vmatprep.mubr.msk.f32.mxu0 %vm4221_vm0, %v4222_v6  ;;  %3950 = vmatprep.mubr.msk.f32.mxu1 %vm4221_vm0, %v4222_v6 }
  0x9b   :  { %3612 = vmatmul.mubr.msk.f32.gmra.mrb[66].mxu0 %vm256_vm4, %v47_v20  ;;  %3951 = vmatmul.mubr.msk.f32.gmra.mrb[66].mxu1 %vm256_vm4, %v160_v21 }
  0x9c   :  { %3614 = vmatprep.mubr.msk.f32.mxu0 %vm4221_vm0, %v4222_v6  ;;  %3953 = vmatprep.mubr.msk.f32.mxu1 %vm4221_vm0, %v4222_v6 }
  0x9f   :  { %3615 = vmatmul.mubr.msk.f32.gmra.mrb[68].mxu0 %vm256_vm4, %v48_v22  ;;  %3954 = vmatmul.mubr.msk.f32.gmra.mrb[68].mxu1 %vm256_vm4, %v161_v23 }
  0xa0   :  { %3617 = vmatprep.mubr.msk.f32.mxu0 %vm4221_vm0, %v4222_v6  ;;  %3956 = vmatprep.mubr.msk.f32.mxu1 %vm4221_vm0, %v4222_v6 }
  0xa3   :  { %3618 = vmatmul.mubr.msk.f32.gmra.mrb[70].mxu0 %vm256_vm4, %v49_v24  ;;  %3957 = vmatmul.mubr.msk.f32.gmra.mrb[70].mxu1 %vm256_vm4, %v162_v25 }
  0xa4   :  { %3620 = vmatprep.mubr.msk.f32.mxu0 %vm4221_vm0, %v4222_v6  ;;  %3959 = vmatprep.mubr.msk.f32.mxu1 %vm4221_vm0, %v4222_v6 }
  0xa7   :  { %3621 = vmatmul.mubr.msk.f32.gmra.mrb[72].mxu0 %vm256_vm4, %v50_v26  ;;  %3960 = vmatmul.mubr.msk.f32.gmra.mrb[72].mxu1 %vm256_vm4, %v163_v27 }
  0xa8   :  { %3623 = vmatprep.mubr.msk.f32.mxu0 %vm4221_vm0, %v4222_v6  ;;  %3962 = vmatprep.mubr.msk.f32.mxu1 %vm4221_vm0, %v4222_v6 }
  0xab   :  { %3624 = vmatmul.mubr.msk.f32.gmra.mrb[74].mxu0 %vm256_vm4, %v51_v28  ;;  %3963 = vmatmul.mubr.msk.f32.gmra.mrb[74].mxu1 %vm256_vm4, %v164_v29 }
  0xac   :  { %3626 = vmatprep.mubr.msk.f32.mxu0 %vm4221_vm0, %v4222_v6  ;;  %3965 = vmatprep.mubr.msk.f32.mxu1 %vm4221_vm0, %v4222_v6 }
  0xaf   :  { %3627 = vmatmul.mubr.msk.f32.gmra.mrb[76].mxu0 %vm256_vm4, %v52_v30  ;;  %3966 = vmatmul.mubr.msk.f32.gmra.mrb[76].mxu1 %vm256_vm4, %v165_v31  ;;  %v70_v30 = vld [vmem:[%s6545_s0 + $0x1c0] sm:$0xff]  ;;  %v183_v31 = vld [vmem:[%s6545_s0 + $0x548] sm:$0xff] }
  0xb0   :  { %3629 = vmatprep.mubr.msk.f32.mxu0 %vm4221_vm0, %v4222_v6  ;;  %3968 = vmatprep.mubr.msk.f32.mxu1 %vm4221_vm0, %v4222_v6 }
  0xb3   :  { %3630 = vmatmul.mubr.msk.f32.gmra.mrb[78].mxu0 %vm256_vm4, %v53_v32  ;;  %3969 = vmatmul.mubr.msk.f32.gmra.mrb[78].mxu1 %vm256_vm4, %v166_v33 }
  0xb4   :  { %3632 = vmatprep.mubr.msk.f32.mxu0 %vm4221_vm0, %v4222_v6  ;;  %3971 = vmatprep.mubr.msk.f32.mxu1 %vm4221_vm0, %v4222_v6 }
  0xb7   :  { %3633 = vmatmul.mubr.msk.f32.gmra.mrb[80].mxu0 %vm256_vm4, %v54_v34  ;;  %3972 = vmatmul.mubr.msk.f32.gmra.mrb[80].mxu1 %vm256_vm4, %v167_v35 }
  0xb8   :  { %3635 = vmatprep.mubr.msk.f32.mxu0 %vm4221_vm0, %v4222_v6  ;;  %3974 = vmatprep.mubr.msk.f32.mxu1 %vm4221_vm0, %v4222_v6 }
  0xbb   :  { %3636 = vmatmul.mubr.msk.f32.gmra.mrb[82].mxu0 %vm256_vm4, %v55_v36  ;;  %3975 = vmatmul.mubr.msk.f32.gmra.mrb[82].mxu1 %vm256_vm4, %v168_v37 }
  0xbc   :  { %3638 = vmatprep.mubr.msk.f32.mxu0 %vm4221_vm0, %v4222_v6  ;;  %3977 = vmatprep.mubr.msk.f32.mxu1 %vm4221_vm0, %v4222_v6 }
  0xbf   :  { %3639 = vmatmul.mubr.msk.f32.gmra.mrb[84].mxu0 %vm256_vm4, %v56_v38  ;;  %3978 = vmatmul.mubr.msk.f32.gmra.mrb[84].mxu1 %vm256_vm4, %v169_v39 }
  0xc0   :  { %3641 = vmatprep.mubr.msk.f32.mxu0 %vm4221_vm0, %v4222_v6  ;;  %3980 = vmatprep.mubr.msk.f32.mxu1 %vm4221_vm0, %v4222_v6 }
  0xc3   :  { %3642 = vmatmul.mubr.msk.f32.gmra.mrb[86].mxu0 %vm256_vm4, %v57_v40  ;;  %3981 = vmatmul.mubr.msk.f32.gmra.mrb[86].mxu1 %vm256_vm4, %v170_v41 }
  0xc4   :  { %3644 = vmatprep.mubr.msk.f32.mxu0 %vm4221_vm0, %v4222_v6  ;;  %3983 = vmatprep.mubr.msk.f32.mxu1 %vm4221_vm0, %v4222_v6 }
  0xc7   :  { %3645 = vmatmul.mubr.msk.f32.gmra.mrb[88].mxu0 %vm256_vm4, %v58_v42  ;;  %3984 = vmatmul.mubr.msk.f32.gmra.mrb[88].mxu1 %vm256_vm4, %v171_v43  ;;  %v71_v42 = vld [vmem:[%s6545_s0 + $0x1c8] sm:$0xff]  ;;  %v184_v43 = vld [vmem:[%s6545_s0 + $0x550] sm:$0xff] }
  0xc8   :  { %3647 = vmatprep.mubr.msk.f32.mxu0 %vm4221_vm0, %v4222_v6  ;;  %3986 = vmatprep.mubr.msk.f32.mxu1 %vm4221_vm0, %v4222_v6 }
  0xcb   :  { %3648 = vmatmul.mubr.msk.f32.gmra.mrb[90].mxu0 %vm256_vm4, %v59_v44  ;;  %3987 = vmatmul.mubr.msk.f32.gmra.mrb[90].mxu1 %vm256_vm4, %v172_v45 }
  0xcc   :  { %3650 = vmatprep.mubr.msk.f32.mxu0 %vm4221_vm0, %v4222_v6  ;;  %3989 = vmatprep.mubr.msk.f32.mxu1 %vm4221_vm0, %v4222_v6 }
  0xcf   :  { %3651 = vmatmul.mubr.msk.f32.gmra.mrb[92].mxu0 %vm256_vm4, %v60_v46  ;;  %3990 = vmatmul.mubr.msk.f32.gmra.mrb[92].mxu1 %vm256_vm4, %v173_v47 }
  0xd0   :  { %3653 = vmatprep.mubr.msk.f32.mxu0 %vm4221_vm0, %v4222_v6  ;;  %3992 = vmatprep.mubr.msk.f32.mxu1 %vm4221_vm0, %v4222_v6 }
  0xd3   :  { %3654 = vmatmul.mubr.msk.f32.gmra.mrb[94].mxu0 %vm256_vm4, %v61_v48  ;;  %3993 = vmatmul.mubr.msk.f32.gmra.mrb[94].mxu1 %vm256_vm4, %v174_v49 }
  0xd4   :  { %3656 = vmatprep.mubr.msk.f32.mxu0 %vm4221_vm0, %v4222_v6  ;;  %3995 = vmatprep.mubr.msk.f32.mxu1 %vm4221_vm0, %v4222_v6 }
  0xd7   :  { %3657 = vmatmul.mubr.msk.f32.gmra.mrb[96].mxu0 %vm256_vm4, %v62_v50  ;;  %3996 = vmatmul.mubr.msk.f32.gmra.mrb[96].mxu1 %vm256_vm4, %v175_v51 }
  0xd8   :  { %3659 = vmatprep.mubr.msk.f32.mxu0 %vm4221_vm0, %v4222_v6  ;;  %3998 = vmatprep.mubr.msk.f32.mxu1 %vm4221_vm0, %v4222_v6 }
  0xdb   :  { %3660 = vmatmul.mubr.msk.f32.gmra.mrb[98].mxu0 %vm256_vm4, %v63_v52  ;;  %3999 = vmatmul.mubr.msk.f32.gmra.mrb[98].mxu1 %vm256_vm4, %v176_v53 }
  0xdc   :  { %3662 = vmatprep.mubr.msk.f32.mxu0 %vm4221_vm0, %v4222_v6  ;;  %4001 = vmatprep.mubr.msk.f32.mxu1 %vm4221_vm0, %v4222_v6 }
  0xdf   :  { %3663 = vmatmul.mubr.msk.f32.gmra.mrb[100].mxu0 %vm256_vm4, %v64_v54  ;;  %4002 = vmatmul.mubr.msk.f32.gmra.mrb[100].mxu1 %vm256_vm4, %v177_v55  ;;  %v72_v54 = vld [vmem:[%s6545_s0 + $0x1d0] sm:$0xff]  ;;  %v185_v55 = vld [vmem:[%s6545_s0 + $0x558] sm:$0xff] }
  0xe0   :  { %3665 = vmatprep.mubr.msk.f32.mxu0 %vm4221_vm0, %v4222_v6  ;;  %4004 = vmatprep.mubr.msk.f32.mxu1 %vm4221_vm0, %v4222_v6 }
  0xe3   :  { %3666 = vmatmul.mubr.msk.f32.gmra.mrb[102].mxu0 %vm256_vm4, %v65_v56  ;;  %4005 = vmatmul.mubr.msk.f32.gmra.mrb[102].mxu1 %vm256_vm4, %v178_v57 }
  0xe4   :  { %3668 = vmatprep.mubr.msk.f32.mxu0 %vm4221_vm0, %v4222_v6  ;;  %4007 = vmatprep.mubr.msk.f32.mxu1 %vm4221_vm0, %v4222_v6 }
  0xe7   :  { %3669 = vmatmul.mubr.msk.f32.gmra.mrb[104].mxu0 %vm256_vm4, %v66_v58  ;;  %4008 = vmatmul.mubr.msk.f32.gmra.mrb[104].mxu1 %vm256_vm4, %v179_v59 }
  0xe8   :  { %3671 = vmatprep.mubr.msk.f32.mxu0 %vm4221_vm0, %v4222_v6  ;;  %4010 = vmatprep.mubr.msk.f32.mxu1 %vm4221_vm0, %v4222_v6 }
  0xea   :  { %v1002_v63 = vpop.f32.mrb[0].mxu0  ;;  %v1567_v0 = vpop.f32.mrb[0].mxu1 }
  0xeb   :  { %v1003_v1 = vadd.f32 %v4913_v60, %v1002_v63  ;;  %v3514_v2 = vpop.f32.mrb[1].mxu0  ;;  %3672 = vmatmul.mubr.msk.f32.gmra.mrb[106].mxu0 %vm256_vm4, %v67_v61  ;;  %v1568_v3 = vadd.f32 %v4913_v60, %v1567_v0  ;;  %4011 = vmatmul.mubr.msk.f32.gmra.mrb[106].mxu1 %vm256_vm4, %v180_v62  ;;  %v3853_v4 = vpop.f32.mrb[1].mxu1 }
  0xec   :  { %3674 = vmatprep.mubr.msk.f32.mxu0 %vm4221_vm0, %v4222_v6  ;;  %4013 = vmatprep.mubr.msk.f32.mxu1 %vm4221_vm0, %v4222_v6  ;;  %v186_v4 = vld [vmem:[%s6545_s0 + $0x560] sm:$0xff] }
  0xed   :  { %vm2126_vm5 = vcmp.gt.f32.partialorder %v1003_v1, 0.0  ;;  %v2351_v8 = vmul.f32 0.1, %v1003_v1  ;;  %vm2239_vm6 = vcmp.gt.f32.partialorder %v1568_v3, 0.0  ;;  %v2464_v9 = vmul.f32 0.1, %v1568_v3 }
  0xee   :  { %v1007_v10 = vpop.f32.mrb[2].mxu0  ;;  %v1572_v11 = vpop.f32.mrb[2].mxu1 }
  0xef   :  { %v2576_v12 = vsel %vm2126_vm5, %v1003_v1, %v2351_v8  ;;  %v2689_v13 = vsel %vm2239_vm6, %v1568_v3, %v2464_v9  ;;  %v1008_v14 = vadd.f32 %v4913_v60, %v1007_v10  ;;  %v3517_v15 = vpop.f32.mrb[3].mxu0  ;;  %3675 = vmatmul.mubr.msk.f32.gmra.mrb[108].mxu0 %vm256_vm4, %v68_v5  ;;  %v1573_v16 = vadd.f32 %v4913_v60, %v1572_v11  ;;  %v3856_v17 = vpop.f32.mrb[3].mxu1  ;;  %v73_v3 = vld [vmem:[%s6545_s0 + $0x1d8] sm:$0xff] }
  0xf0   :  { %2801 = vst [vmem:[%s6547_s3] sm:$0xff] %v2576_v12  ;;  %2914 = vst [vmem:[%s6547_s3 + $0x388] sm:$0xff] %v2689_v13  ;;  %4014 = vmatmul.mubr.msk.f32.gmra.mrb[108].mxu1 %vm256_vm4, %v181_v7  ;;  %3677 = vmatprep.mubr.msk.f32.mxu0 %vm4221_vm0, %v4222_v6  ;;  %v187_v17 = vld [vmem:[%s6545_s0 + $0x568] sm:$0xff] }
  0xf1   :  { %vm2127_vm7 = vcmp.gt.f32.partialorder %v1008_v14, 0.0  ;;  %v2352_v20 = vmul.f32 0.1, %v1008_v14  ;;  %vm2240_vm8 = vcmp.gt.f32.partialorder %v1573_v16, 0.0  ;;  %v2465_v21 = vmul.f32 0.1, %v1573_v16  ;;  %4016 = vmatprep.mubr.msk.f32.mxu1 %vm4221_vm0, %v4222_v6 }
  0xf2   :  { %v1012_v22 = vpop.f32.mrb[4].mxu0  ;;  %v1577_v23 = vpop.f32.mrb[4].mxu1 }
  0xf3   :  { %v2577_v24 = vsel %vm2127_vm7, %v1008_v14, %v2352_v20  ;;  %v2690_v25 = vsel %vm2240_vm8, %v1573_v16, %v2465_v21  ;;  %v1013_v26 = vadd.f32 %v4913_v60, %v1012_v22  ;;  %v3520_v27 = vpop.f32.mrb[5].mxu0  ;;  %3678 = vmatmul.mubr.msk.f32.gmra.mrb[110].mxu0 %vm256_vm4, %v69_v18  ;;  %v1578_v28 = vadd.f32 %v4913_v60, %v1577_v23  ;;  %v3859_v29 = vpop.f32.mrb[5].mxu1  ;;  %v74_v16 = vld [vmem:[%s6545_s0 + $0x1e0] sm:$0xff] }
  0xf4   :  { %2802 = vst [vmem:[%s6547_s3 + $0x8] sm:$0xff] %v2577_v24  ;;  %2915 = vst [vmem:[%s6547_s3 + $0x390] sm:$0xff] %v2690_v25  ;;  %4017 = vmatmul.mubr.msk.f32.gmra.mrb[110].mxu1 %vm256_vm4, %v182_v19  ;;  %3680 = vmatprep.mubr.msk.f32.mxu0 %vm4221_vm0, %v4222_v6  ;;  %v188_v29 = vld [vmem:[%s6545_s0 + $0x570] sm:$0xff] }
  0xf5   :  { %vm2128_vm9 = vcmp.gt.f32.partialorder %v1013_v26, 0.0  ;;  %v2353_v32 = vmul.f32 0.1, %v1013_v26  ;;  %vm2241_vm10 = vcmp.gt.f32.partialorder %v1578_v28, 0.0  ;;  %v2466_v33 = vmul.f32 0.1, %v1578_v28  ;;  %4019 = vmatprep.mubr.msk.f32.mxu1 %vm4221_vm0, %v4222_v6 }
  0xf6   :  { %v1017_v34 = vpop.f32.mrb[6].mxu0  ;;  %v1582_v35 = vpop.f32.mrb[6].mxu1 }
  0xf7   :  { %v2578_v36 = vsel %vm2128_vm9, %v1013_v26, %v2353_v32  ;;  %v2691_v37 = vsel %vm2241_vm10, %v1578_v28, %v2466_v33  ;;  %v1018_v38 = vadd.f32 %v4913_v60, %v1017_v34  ;;  %v3523_v39 = vpop.f32.mrb[7].mxu0  ;;  %3681 = vmatmul.mubr.msk.f32.gmra.mrb[112].mxu0 %vm256_vm4, %v70_v30  ;;  %v1583_v40 = vadd.f32 %v4913_v60, %v1582_v35  ;;  %v3862_v41 = vpop.f32.mrb[7].mxu1  ;;  %v75_v28 = vld [vmem:[%s6545_s0 + $0x1e8] sm:$0xff] }
  0xf8   :  { %2803 = vst [vmem:[%s6547_s3 + $0x10] sm:$0xff] %v2578_v36  ;;  %2916 = vst [vmem:[%s6547_s3 + $0x398] sm:$0xff] %v2691_v37  ;;  %4020 = vmatmul.mubr.msk.f32.gmra.mrb[112].mxu1 %vm256_vm4, %v183_v31  ;;  %3683 = vmatprep.mubr.msk.f32.mxu0 %vm4221_vm0, %v4222_v6  ;;  %v189_v41 = vld [vmem:[%s6545_s0 + $0x578] sm:$0xff] }
  0xf9   :  { %vm2129_vm11 = vcmp.gt.f32.partialorder %v1018_v38, 0.0  ;;  %v2354_v44 = vmul.f32 0.1, %v1018_v38  ;;  %vm2242_vm12 = vcmp.gt.f32.partialorder %v1583_v40, 0.0  ;;  %v2467_v45 = vmul.f32 0.1, %v1583_v40  ;;  %4022 = vmatprep.mubr.msk.f32.mxu1 %vm4221_vm0, %v4222_v6 }
  0xfa   :  { %v1022_v46 = vpop.f32.mrb[8].mxu0  ;;  %v1587_v47 = vpop.f32.mrb[8].mxu1 }
  0xfb   :  { %v2579_v48 = vsel %vm2129_vm11, %v1018_v38, %v2354_v44  ;;  %v2692_v49 = vsel %vm2242_vm12, %v1583_v40, %v2467_v45  ;;  %v1023_v50 = vadd.f32 %v4913_v60, %v1022_v46  ;;  %v3526_v51 = vpop.f32.mrb[9].mxu0  ;;  %3684 = vmatmul.mubr.msk.f32.gmra.mrb[114].mxu0 %vm256_vm4, %v71_v42  ;;  %v1588_v52 = vadd.f32 %v4913_v60, %v1587_v47  ;;  %v3865_v53 = vpop.f32.mrb[9].mxu1  ;;  %v76_v40 = vld [vmem:[%s6545_s0 + $0x1f0] sm:$0xff] }
  0xfc   :  { %2804 = vst [vmem:[%s6547_s3 + $0x18] sm:$0xff] %v2579_v48  ;;  %2917 = vst [vmem:[%s6547_s3 + $0x3a0] sm:$0xff] %v2692_v49  ;;  %4023 = vmatmul.mubr.msk.f32.gmra.mrb[114].mxu1 %vm256_vm4, %v184_v43  ;;  %3686 = vmatprep.mubr.msk.f32.mxu0 %vm4221_vm0, %v4222_v6  ;;  %v190_v53 = vld [vmem:[%s6545_s0 + $0x580] sm:$0xff] }
  0xfd   :  { %vm2130_vm13 = vcmp.gt.f32.partialorder %v1023_v50, 0.0  ;;  %v2355_v56 = vmul.f32 0.1, %v1023_v50  ;;  %vm2243_vm14 = vcmp.gt.f32.partialorder %v1588_v52, 0.0  ;;  %v2468_v57 = vmul.f32 0.1, %v1588_v52  ;;  %4025 = vmatprep.mubr.msk.f32.mxu1 %vm4221_vm0, %v4222_v6 }
  0xfe   :  { %v1027_v58 = vpop.f32.mrb[10].mxu0  ;;  %v1592_v59 = vpop.f32.mrb[10].mxu1 }
  0xff   :  { %v2580_v61 = vsel %vm2130_vm13, %v1023_v50, %v2355_v56  ;;  %v2693_v62 = vsel %vm2243_vm14, %v1588_v52, %v2468_v57  ;;  %v1028_v63 = vadd.f32 %v4913_v60, %v1027_v58  ;;  %v3529_v0 = vpop.f32.mrb[11].mxu0  ;;  %3687 = vmatmul.mubr.msk.f32.gmra.mrb[116].mxu0 %vm256_vm4, %v72_v54  ;;  %v1593_v1 = vadd.f32 %v4913_v60, %v1592_v59  ;;  %v3868_v2 = vpop.f32.mrb[11].mxu1  ;;  %v77_v52 = vld [vmem:[%s6545_s0 + $0x1f8] sm:$0xff] }
 0x100   :  { %2805 = vst [vmem:[%s6547_s3 + $0x20] sm:$0xff] %v2580_v61  ;;  %2918 = vst [vmem:[%s6547_s3 + $0x3a8] sm:$0xff] %v2693_v62  ;;  %4026 = vmatmul.mubr.msk.f32.gmra.mrb[116].mxu1 %vm256_vm4, %v185_v55  ;;  %3689 = vmatprep.mubr.msk.f32.mxu0 %vm4221_vm0, %v4222_v6  ;;  %v191_v2 = vld [vmem:[%s6545_s0 + $0x588] sm:$0xff] }
 0x101   :  { %vm2131_vm15 = vcmp.gt.f32.partialorder %v1028_v63, 0.0  ;;  %v2356_v5 = vmul.f32 0.1, %v1028_v63  ;;  %vm2244_vm1 = vcmp.gt.f32.partialorder %v1593_v1, 0.0  ;;  %v2469_v7 = vmul.f32 0.1, %v1593_v1  ;;  %4028 = vmatprep.mubr.msk.f32.mxu1 %vm4221_vm0, %v4222_v6 }
 0x102   :  { %v1032_v8 = vpop.f32.mrb[12].mxu0  ;;  %v1597_v9 = vpop.f32.mrb[12].mxu1 }
 0x103   :  { %v2581_v10 = vsel %vm2131_vm15, %v1028_v63, %v2356_v5  ;;  %v2694_v11 = vsel %vm2244_vm1, %v1593_v1, %v2469_v7  ;;  %v1033_v12 = vadd.f32 %v4913_v60, %v1032_v8  ;;  %v3532_v13 = vpop.f32.mrb[13].mxu0  ;;  %3690 = vmatmul.mubr.msk.f32.gmra.mrb[118].mxu0 %vm256_vm4, %v73_v3  ;;  %v1598_v14 = vadd.f32 %v4913_v60, %v1597_v9  ;;  %v3871_v15 = vpop.f32.mrb[13].mxu1  ;;  %v78_v1 = vld [vmem:[%s6545_s0 + $0x200] sm:$0xff] }
 0x104   :  { %2806 = vst [vmem:[%s6547_s3 + $0x28] sm:$0xff] %v2581_v10  ;;  %2919 = vst [vmem:[%s6547_s3 + $0x3b0] sm:$0xff] %v2694_v11  ;;  %4029 = vmatmul.mubr.msk.f32.gmra.mrb[118].mxu1 %vm256_vm4, %v186_v4  ;;  %3692 = vmatprep.mubr.msk.f32.mxu0 %vm4221_vm0, %v4222_v6  ;;  %v192_v15 = vld [vmem:[%s6545_s0 + $0x590] sm:$0xff] }
 0x105   :  { %vm2132_vm2 = vcmp.gt.f32.partialorder %v1033_v12, 0.0  ;;  %v2357_v18 = vmul.f32 0.1, %v1033_v12  ;;  %vm2245_vm3 = vcmp.gt.f32.partialorder %v1598_v14, 0.0  ;;  %v2470_v19 = vmul.f32 0.1, %v1598_v14  ;;  %4031 = vmatprep.mubr.msk.f32.mxu1 %vm4221_vm0, %v4222_v6 }
 0x106   :  { %v1037_v20 = vpop.f32.mrb[14].mxu0  ;;  %v1602_v21 = vpop.f32.mrb[14].mxu1 }
 0x107   :  { %v2582_v22 = vsel %vm2132_vm2, %v1033_v12, %v2357_v18  ;;  %v2695_v23 = vsel %vm2245_vm3, %v1598_v14, %v2470_v19  ;;  %v1038_v24 = vadd.f32 %v4913_v60, %v1037_v20  ;;  %v3535_v25 = vpop.f32.mrb[15].mxu0  ;;  %3693 = vmatmul.mubr.msk.f32.gmra.mrb[120].mxu0 %vm256_vm4, %v74_v16  ;;  %v1603_v26 = vadd.f32 %v4913_v60, %v1602_v21  ;;  %v3874_v27 = vpop.f32.mrb[15].mxu1  ;;  %v79_v14 = vld [vmem:[%s6545_s0 + $0x208] sm:$0xff] }
 0x108   :  { %2807 = vst [vmem:[%s6547_s3 + $0x30] sm:$0xff] %v2582_v22  ;;  %2920 = vst [vmem:[%s6547_s3 + $0x3b8] sm:$0xff] %v2695_v23  ;;  %4032 = vmatmul.mubr.msk.f32.gmra.mrb[120].mxu1 %vm256_vm4, %v187_v17  ;;  %3695 = vmatprep.mubr.msk.f32.mxu0 %vm4221_vm0, %v4222_v6  ;;  %v193_v27 = vld [vmem:[%s6545_s0 + $0x598] sm:$0xff] }
 0x109   :  { %vm2133_vm5 = vcmp.gt.f32.partialorder %v1038_v24, 0.0  ;;  %v2358_v30 = vmul.f32 0.1, %v1038_v24  ;;  %vm2246_vm6 = vcmp.gt.f32.partialorder %v1603_v26, 0.0  ;;  %v2471_v31 = vmul.f32 0.1, %v1603_v26  ;;  %4034 = vmatprep.mubr.msk.f32.mxu1 %vm4221_vm0, %v4222_v6 }
 0x10a   :  { %v1042_v32 = vpop.f32.mrb[16].mxu0  ;;  %v1607_v33 = vpop.f32.mrb[16].mxu1 }
 0x10b   :  { %v2583_v34 = vsel %vm2133_vm5, %v1038_v24, %v2358_v30  ;;  %v2696_v35 = vsel %vm2246_vm6, %v1603_v26, %v2471_v31  ;;  %v1043_v36 = vadd.f32 %v4913_v60, %v1042_v32  ;;  %v3538_v37 = vpop.f32.mrb[17].mxu0  ;;  %3696 = vmatmul.mubr.msk.f32.gmra.mrb[122].mxu0 %vm256_vm4, %v75_v28  ;;  %v1608_v38 = vadd.f32 %v4913_v60, %v1607_v33  ;;  %v3877_v39 = vpop.f32.mrb[17].mxu1  ;;  %v80_v26 = vld [vmem:[%s6545_s0 + $0x210] sm:$0xff] }
 0x10c   :  { %2808 = vst [vmem:[%s6547_s3 + $0x38] sm:$0xff] %v2583_v34  ;;  %2921 = vst [vmem:[%s6547_s3 + $0x3c0] sm:$0xff] %v2696_v35  ;;  %4035 = vmatmul.mubr.msk.f32.gmra.mrb[122].mxu1 %vm256_vm4, %v188_v29  ;;  %3698 = vmatprep.mubr.msk.f32.mxu0 %vm4221_vm0, %v4222_v6  ;;  %v194_v39 = vld [vmem:[%s6545_s0 + $0x5a0] sm:$0xff] }
 0x10d   :  { %vm2134_vm7 = vcmp.gt.f32.partialorder %v1043_v36, 0.0  ;;  %v2359_v42 = vmul.f32 0.1, %v1043_v36  ;;  %vm2247_vm8 = vcmp.gt.f32.partialorder %v1608_v38, 0.0  ;;  %v2472_v43 = vmul.f32 0.1, %v1608_v38  ;;  %4037 = vmatprep.mubr.msk.f32.mxu1 %vm4221_vm0, %v4222_v6 }
 0x10e   :  { %v1047_v44 = vpop.f32.mrb[18].mxu0  ;;  %v1612_v45 = vpop.f32.mrb[18].mxu1 }
 0x10f   :  { %v2584_v46 = vsel %vm2134_vm7, %v1043_v36, %v2359_v42  ;;  %v2697_v47 = vsel %vm2247_vm8, %v1608_v38, %v2472_v43  ;;  %v1048_v48 = vadd.f32 %v4913_v60, %v1047_v44  ;;  %v3541_v49 = vpop.f32.mrb[19].mxu0  ;;  %3699 = vmatmul.mubr.msk.f32.gmra.mrb[124].mxu0 %vm256_vm4, %v76_v40  ;;  %v1613_v50 = vadd.f32 %v4913_v60, %v1612_v45  ;;  %v3880_v51 = vpop.f32.mrb[19].mxu1  ;;  %v81_v38 = vld [vmem:[%s6545_s0 + $0x218] sm:$0xff] }
 0x110   :  { %2809 = vst [vmem:[%s6547_s3 + $0x40] sm:$0xff] %v2584_v46  ;;  %2922 = vst [vmem:[%s6547_s3 + $0x3c8] sm:$0xff] %v2697_v47  ;;  %4038 = vmatmul.mubr.msk.f32.gmra.mrb[124].mxu1 %vm256_vm4, %v189_v41  ;;  %3701 = vmatprep.mubr.msk.f32.mxu0 %vm4221_vm0, %v4222_v6  ;;  %v195_v51 = vld [vmem:[%s6545_s0 + $0x5a8] sm:$0xff] }
 0x111   :  { %vm2135_vm9 = vcmp.gt.f32.partialorder %v1048_v48, 0.0  ;;  %v2360_v54 = vmul.f32 0.1, %v1048_v48  ;;  %vm2248_vm10 = vcmp.gt.f32.partialorder %v1613_v50, 0.0  ;;  %v2473_v55 = vmul.f32 0.1, %v1613_v50  ;;  %4040 = vmatprep.mubr.msk.f32.mxu1 %vm4221_vm0, %v4222_v6 }
 0x112   :  { %v1052_v56 = vpop.f32.mrb[20].mxu0  ;;  %v1617_v57 = vpop.f32.mrb[20].mxu1 }
 0x113   :  { %v2585_v58 = vsel %vm2135_vm9, %v1048_v48, %v2360_v54  ;;  %v2698_v59 = vsel %vm2248_vm10, %v1613_v50, %v2473_v55  ;;  %v1053_v61 = vadd.f32 %v4913_v60, %v1052_v56  ;;  %v3544_v62 = vpop.f32.mrb[21].mxu0  ;;  %3702 = vmatmul.mubr.msk.f32.gmra.mrb[126].mxu0 %vm256_vm4, %v77_v52  ;;  %v1618_v63 = vadd.f32 %v4913_v60, %v1617_v57  ;;  %v3883_v0 = vpop.f32.mrb[21].mxu1  ;;  %v82_v50 = vld [vmem:[%s6545_s0 + $0x220] sm:$0xff] }
 0x114   :  { %2810 = vst [vmem:[%s6547_s3 + $0x48] sm:$0xff] %v2585_v58  ;;  %2923 = vst [vmem:[%s6547_s3 + $0x3d0] sm:$0xff] %v2698_v59  ;;  %4041 = vmatmul.mubr.msk.f32.gmra.mrb[126].mxu1 %vm256_vm4, %v190_v53  ;;  %3704 = vmatprep.mubr.msk.f32.mxu0 %vm4221_vm0, %v4222_v6  ;;  %v196_v0 = vld [vmem:[%s6545_s0 + $0x5b0] sm:$0xff] }
 0x115   :  { %vm2136_vm11 = vcmp.gt.f32.partialorder %v1053_v61, 0.0  ;;  %v2361_v3 = vmul.f32 0.1, %v1053_v61  ;;  %vm2249_vm12 = vcmp.gt.f32.partialorder %v1618_v63, 0.0  ;;  %v2474_v4 = vmul.f32 0.1, %v1618_v63  ;;  %4043 = vmatprep.mubr.msk.f32.mxu1 %vm4221_vm0, %v4222_v6 }
 0x116   :  { %v1057_v5 = vpop.f32.mrb[22].mxu0  ;;  %v1622_v7 = vpop.f32.mrb[22].mxu1 }
 0x117   :  { %v2586_v8 = vsel %vm2136_vm11, %v1053_v61, %v2361_v3  ;;  %v2699_v9 = vsel %vm2249_vm12, %v1618_v63, %v2474_v4  ;;  %v1058_v10 = vadd.f32 %v4913_v60, %v1057_v5  ;;  %v3547_v11 = vpop.f32.mrb[23].mxu0  ;;  %3705 = vmatmul.mubr.msk.f32.gmra.mrb[128].mxu0 %vm256_vm4, %v78_v1  ;;  %v1623_v12 = vadd.f32 %v4913_v60, %v1622_v7  ;;  %v3886_v13 = vpop.f32.mrb[23].mxu1  ;;  %v83_v63 = vld [vmem:[%s6545_s0 + $0x228] sm:$0xff] }
 0x118   :  { %2811 = vst [vmem:[%s6547_s3 + $0x50] sm:$0xff] %v2586_v8  ;;  %2924 = vst [vmem:[%s6547_s3 + $0x3d8] sm:$0xff] %v2699_v9  ;;  %4044 = vmatmul.mubr.msk.f32.gmra.mrb[128].mxu1 %vm256_vm4, %v191_v2  ;;  %3707 = vmatprep.mubr.msk.f32.mxu0 %vm4221_vm0, %v4222_v6  ;;  %v197_v13 = vld [vmem:[%s6545_s0 + $0x5b8] sm:$0xff] }
 0x119   :  { %vm2137_vm13 = vcmp.gt.f32.partialorder %v1058_v10, 0.0  ;;  %v2362_v16 = vmul.f32 0.1, %v1058_v10  ;;  %vm2250_vm14 = vcmp.gt.f32.partialorder %v1623_v12, 0.0  ;;  %v2475_v17 = vmul.f32 0.1, %v1623_v12  ;;  %4046 = vmatprep.mubr.msk.f32.mxu1 %vm4221_vm0, %v4222_v6 }
 0x11a   :  { %v1062_v18 = vpop.f32.mrb[24].mxu0  ;;  %v1627_v19 = vpop.f32.mrb[24].mxu1 }
 0x11b   :  { %v2587_v20 = vsel %vm2137_vm13, %v1058_v10, %v2362_v16  ;;  %v2700_v21 = vsel %vm2250_vm14, %v1623_v12, %v2475_v17  ;;  %v1063_v22 = vadd.f32 %v4913_v60, %v1062_v18  ;;  %v3550_v23 = vpop.f32.mrb[25].mxu0  ;;  %3708 = vmatmul.mubr.msk.f32.gmra.mrb[130].mxu0 %vm256_vm4, %v79_v14  ;;  %v1628_v24 = vadd.f32 %v4913_v60, %v1627_v19  ;;  %v3889_v25 = vpop.f32.mrb[25].mxu1  ;;  %v84_v12 = vld [vmem:[%s6545_s0 + $0x230] sm:$0xff] }
 0x11c   :  { %2812 = vst [vmem:[%s6547_s3 + $0x58] sm:$0xff] %v2587_v20  ;;  %2925 = vst [vmem:[%s6547_s3 + $0x3e0] sm:$0xff] %v2700_v21  ;;  %4047 = vmatmul.mubr.msk.f32.gmra.mrb[130].mxu1 %vm256_vm4, %v192_v15  ;;  %3710 = vmatprep.mubr.msk.f32.mxu0 %vm4221_vm0, %v4222_v6  ;;  %v198_v25 = vld [vmem:[%s6545_s0 + $0x5c0] sm:$0xff] }
 0x11d   :  { %vm2138_vm15 = vcmp.gt.f32.partialorder %v1063_v22, 0.0  ;;  %v2363_v28 = vmul.f32 0.1, %v1063_v22  ;;  %vm2251_vm1 = vcmp.gt.f32.partialorder %v1628_v24, 0.0  ;;  %v2476_v29 = vmul.f32 0.1, %v1628_v24  ;;  %4049 = vmatprep.mubr.msk.f32.mxu1 %vm4221_vm0, %v4222_v6 }
 0x11e   :  { %v1067_v30 = vpop.f32.mrb[26].mxu0  ;;  %v1632_v31 = vpop.f32.mrb[26].mxu1 }
 0x11f   :  { %v2588_v32 = vsel %vm2138_vm15, %v1063_v22, %v2363_v28  ;;  %v2701_v33 = vsel %vm2251_vm1, %v1628_v24, %v2476_v29  ;;  %v1068_v34 = vadd.f32 %v4913_v60, %v1067_v30  ;;  %v3553_v35 = vpop.f32.mrb[27].mxu0  ;;  %3711 = vmatmul.mubr.msk.f32.gmra.mrb[132].mxu0 %vm256_vm4, %v80_v26  ;;  %v1633_v36 = vadd.f32 %v4913_v60, %v1632_v31  ;;  %v3892_v37 = vpop.f32.mrb[27].mxu1  ;;  %v85_v24 = vld [vmem:[%s6545_s0 + $0x238] sm:$0xff] }
 0x120   :  { %2813 = vst [vmem:[%s6547_s3 + $0x60] sm:$0xff] %v2588_v32  ;;  %2926 = vst [vmem:[%s6547_s3 + $0x3e8] sm:$0xff] %v2701_v33  ;;  %4050 = vmatmul.mubr.msk.f32.gmra.mrb[132].mxu1 %vm256_vm4, %v193_v27  ;;  %3713 = vmatprep.mubr.msk.f32.mxu0 %vm4221_vm0, %v4222_v6  ;;  %v199_v37 = vld [vmem:[%s6545_s0 + $0x5c8] sm:$0xff] }
 0x121   :  { %vm2139_vm2 = vcmp.gt.f32.partialorder %v1068_v34, 0.0  ;;  %v2364_v40 = vmul.f32 0.1, %v1068_v34  ;;  %vm2252_vm3 = vcmp.gt.f32.partialorder %v1633_v36, 0.0  ;;  %v2477_v41 = vmul.f32 0.1, %v1633_v36  ;;  %4052 = vmatprep.mubr.msk.f32.mxu1 %vm4221_vm0, %v4222_v6 }
 0x122   :  { %v1072_v42 = vpop.f32.mrb[28].mxu0  ;;  %v1637_v43 = vpop.f32.mrb[28].mxu1 }
 0x123   :  { %v2589_v44 = vsel %vm2139_vm2, %v1068_v34, %v2364_v40  ;;  %v2702_v45 = vsel %vm2252_vm3, %v1633_v36, %v2477_v41  ;;  %v1073_v46 = vadd.f32 %v4913_v60, %v1072_v42  ;;  %v3556_v47 = vpop.f32.mrb[29].mxu0  ;;  %3714 = vmatmul.mubr.msk.f32.gmra.mrb[134].mxu0 %vm256_vm4, %v81_v38  ;;  %v1638_v48 = vadd.f32 %v4913_v60, %v1637_v43  ;;  %v3895_v49 = vpop.f32.mrb[29].mxu1  ;;  %v86_v36 = vld [vmem:[%s6545_s0 + $0x240] sm:$0xff] }
 0x124   :  { %2814 = vst [vmem:[%s6547_s3 + $0x68] sm:$0xff] %v2589_v44  ;;  %2927 = vst [vmem:[%s6547_s3 + $0x3f0] sm:$0xff] %v2702_v45  ;;  %4053 = vmatmul.mubr.msk.f32.gmra.mrb[134].mxu1 %vm256_vm4, %v194_v39  ;;  %3716 = vmatprep.mubr.msk.f32.mxu0 %vm4221_vm0, %v4222_v6  ;;  %v200_v49 = vld [vmem:[%s6545_s0 + $0x5d0] sm:$0xff] }
 0x125   :  { %vm2140_vm5 = vcmp.gt.f32.partialorder %v1073_v46, 0.0  ;;  %v2365_v52 = vmul.f32 0.1, %v1073_v46  ;;  %vm2253_vm6 = vcmp.gt.f32.partialorder %v1638_v48, 0.0  ;;  %v2478_v53 = vmul.f32 0.1, %v1638_v48  ;;  %4055 = vmatprep.mubr.msk.f32.mxu1 %vm4221_vm0, %v4222_v6 }
 0x126   :  { %v1077_v54 = vpop.f32.mrb[30].mxu0  ;;  %v1642_v55 = vpop.f32.mrb[30].mxu1 }
 0x127   :  { %v2590_v56 = vsel %vm2140_vm5, %v1073_v46, %v2365_v52  ;;  %v2703_v57 = vsel %vm2253_vm6, %v1638_v48, %v2478_v53  ;;  %v1078_v58 = vadd.f32 %v4913_v60, %v1077_v54  ;;  %v3559_v59 = vpop.f32.mrb[31].mxu0  ;;  %3717 = vmatmul.mubr.msk.f32.gmra.mrb[136].mxu0 %vm256_vm4, %v82_v50  ;;  %v1643_v61 = vadd.f32 %v4913_v60, %v1642_v55  ;;  %v3898_v62 = vpop.f32.mrb[31].mxu1  ;;  %v87_v48 = vld [vmem:[%s6545_s0 + $0x248] sm:$0xff] }
 0x128   :  { %2815 = vst [vmem:[%s6547_s3 + $0x70] sm:$0xff] %v2590_v56  ;;  %2928 = vst [vmem:[%s6547_s3 + $0x3f8] sm:$0xff] %v2703_v57  ;;  %4056 = vmatmul.mubr.msk.f32.gmra.mrb[136].mxu1 %vm256_vm4, %v195_v51  ;;  %3719 = vmatprep.mubr.msk.f32.mxu0 %vm4221_vm0, %v4222_v6  ;;  %v201_v62 = vld [vmem:[%s6545_s0 + $0x5d8] sm:$0xff] }
 0x129   :  { %vm2141_vm7 = vcmp.gt.f32.partialorder %v1078_v58, 0.0  ;;  %v2366_v1 = vmul.f32 0.1, %v1078_v58  ;;  %vm2254_vm8 = vcmp.gt.f32.partialorder %v1643_v61, 0.0  ;;  %v2479_v2 = vmul.f32 0.1, %v1643_v61  ;;  %4058 = vmatprep.mubr.msk.f32.mxu1 %vm4221_vm0, %v4222_v6 }
 0x12a   :  { %v1082_v3 = vpop.f32.mrb[32].mxu0  ;;  %v1647_v4 = vpop.f32.mrb[32].mxu1 }
 0x12b   :  { %v2591_v5 = vsel %vm2141_vm7, %v1078_v58, %v2366_v1  ;;  %v2704_v7 = vsel %vm2254_vm8, %v1643_v61, %v2479_v2  ;;  %v1083_v8 = vadd.f32 %v4913_v60, %v1082_v3  ;;  %v3562_v9 = vpop.f32.mrb[33].mxu0  ;;  %3720 = vmatmul.mubr.msk.f32.gmra.mrb[138].mxu0 %vm256_vm4, %v83_v63  ;;  %v1648_v10 = vadd.f32 %v4913_v60, %v1647_v4  ;;  %v3901_v11 = vpop.f32.mrb[33].mxu1  ;;  %v88_v61 = vld [vmem:[%s6545_s0 + $0x250] sm:$0xff] }
 0x12c   :  { %2816 = vst [vmem:[%s6547_s3 + $0x78] sm:$0xff] %v2591_v5  ;;  %2929 = vst [vmem:[%s6547_s3 + $0x400] sm:$0xff] %v2704_v7  ;;  %4059 = vmatmul.mubr.msk.f32.gmra.mrb[138].mxu1 %vm256_vm4, %v196_v0  ;;  %3722 = vmatprep.mubr.msk.f32.mxu0 %vm4221_vm0, %v4222_v6  ;;  %v202_v11 = vld [vmem:[%s6545_s0 + $0x5e0] sm:$0xff] }
 0x12d   :  { %vm2142_vm9 = vcmp.gt.f32.partialorder %v1083_v8, 0.0  ;;  %v2367_v14 = vmul.f32 0.1, %v1083_v8  ;;  %vm2255_vm10 = vcmp.gt.f32.partialorder %v1648_v10, 0.0  ;;  %v2480_v15 = vmul.f32 0.1, %v1648_v10  ;;  %4061 = vmatprep.mubr.msk.f32.mxu1 %vm4221_vm0, %v4222_v6 }
 0x12e   :  { %v1087_v16 = vpop.f32.mrb[34].mxu0  ;;  %v1652_v17 = vpop.f32.mrb[34].mxu1 }
 0x12f   :  { %v2592_v18 = vsel %vm2142_vm9, %v1083_v8, %v2367_v14  ;;  %v2705_v19 = vsel %vm2255_vm10, %v1648_v10, %v2480_v15  ;;  %v1088_v20 = vadd.f32 %v4913_v60, %v1087_v16  ;;  %v3565_v21 = vpop.f32.mrb[35].mxu0  ;;  %3723 = vmatmul.mubr.msk.f32.gmra.mrb[140].mxu0 %vm256_vm4, %v84_v12  ;;  %v1653_v22 = vadd.f32 %v4913_v60, %v1652_v17  ;;  %v3904_v23 = vpop.f32.mrb[35].mxu1  ;;  %v89_v10 = vld [vmem:[%s6545_s0 + $0x258] sm:$0xff] }
 0x130   :  { %2817 = vst [vmem:[%s6547_s3 + $0x80] sm:$0xff] %v2592_v18  ;;  %2930 = vst [vmem:[%s6547_s3 + $0x408] sm:$0xff] %v2705_v19  ;;  %4062 = vmatmul.mubr.msk.f32.gmra.mrb[140].mxu1 %vm256_vm4, %v197_v13  ;;  %3725 = vmatprep.mubr.msk.f32.mxu0 %vm4221_vm0, %v4222_v6  ;;  %v203_v23 = vld [vmem:[%s6545_s0 + $0x5e8] sm:$0xff] }
 0x131   :  { %vm2143_vm11 = vcmp.gt.f32.partialorder %v1088_v20, 0.0  ;;  %v2368_v26 = vmul.f32 0.1, %v1088_v20  ;;  %vm2256_vm12 = vcmp.gt.f32.partialorder %v1653_v22, 0.0  ;;  %v2481_v27 = vmul.f32 0.1, %v1653_v22  ;;  %4064 = vmatprep.mubr.msk.f32.mxu1 %vm4221_vm0, %v4222_v6 }
 0x132   :  { %v1092_v28 = vpop.f32.mrb[36].mxu0  ;;  %v1657_v29 = vpop.f32.mrb[36].mxu1 }
 0x133   :  { %v2593_v30 = vsel %vm2143_vm11, %v1088_v20, %v2368_v26  ;;  %v2706_v31 = vsel %vm2256_vm12, %v1653_v22, %v2481_v27  ;;  %v1093_v32 = vadd.f32 %v4913_v60, %v1092_v28  ;;  %v3568_v33 = vpop.f32.mrb[37].mxu0  ;;  %3726 = vmatmul.mubr.msk.f32.gmra.mrb[142].mxu0 %vm256_vm4, %v85_v24  ;;  %v1658_v34 = vadd.f32 %v4913_v60, %v1657_v29  ;;  %v3907_v35 = vpop.f32.mrb[37].mxu1  ;;  %v90_v22 = vld [vmem:[%s6545_s0 + $0x260] sm:$0xff] }
 0x134   :  { %2818 = vst [vmem:[%s6547_s3 + $0x88] sm:$0xff] %v2593_v30  ;;  %2931 = vst [vmem:[%s6547_s3 + $0x410] sm:$0xff] %v2706_v31  ;;  %4065 = vmatmul.mubr.msk.f32.gmra.mrb[142].mxu1 %vm256_vm4, %v198_v25  ;;  %3728 = vmatprep.mubr.msk.f32.mxu0 %vm4221_vm0, %v4222_v6  ;;  %v204_v35 = vld [vmem:[%s6545_s0 + $0x5f0] sm:$0xff] }
 0x135   :  { %vm2144_vm13 = vcmp.gt.f32.partialorder %v1093_v32, 0.0  ;;  %v2369_v38 = vmul.f32 0.1, %v1093_v32  ;;  %vm2257_vm14 = vcmp.gt.f32.partialorder %v1658_v34, 0.0  ;;  %v2482_v39 = vmul.f32 0.1, %v1658_v34  ;;  %4067 = vmatprep.mubr.msk.f32.mxu1 %vm4221_vm0, %v4222_v6 }
 0x136   :  { %v1097_v40 = vpop.f32.mrb[38].mxu0  ;;  %v1662_v41 = vpop.f32.mrb[38].mxu1 }
 0x137   :  { %v2594_v42 = vsel %vm2144_vm13, %v1093_v32, %v2369_v38  ;;  %v2707_v43 = vsel %vm2257_vm14, %v1658_v34, %v2482_v39  ;;  %v1098_v44 = vadd.f32 %v4913_v60, %v1097_v40  ;;  %v3571_v45 = vpop.f32.mrb[39].mxu0  ;;  %3729 = vmatmul.mubr.msk.f32.gmra.mrb[144].mxu0 %vm256_vm4, %v86_v36  ;;  %v1663_v46 = vadd.f32 %v4913_v60, %v1662_v41  ;;  %v3910_v47 = vpop.f32.mrb[39].mxu1  ;;  %v91_v34 = vld [vmem:[%s6545_s0 + $0x268] sm:$0xff] }
 0x138   :  { %2819 = vst [vmem:[%s6547_s3 + $0x90] sm:$0xff] %v2594_v42  ;;  %2932 = vst [vmem:[%s6547_s3 + $0x418] sm:$0xff] %v2707_v43  ;;  %4068 = vmatmul.mubr.msk.f32.gmra.mrb[144].mxu1 %vm256_vm4, %v199_v37  ;;  %3731 = vmatprep.mubr.msk.f32.mxu0 %vm4221_vm0, %v4222_v6  ;;  %v205_v47 = vld [vmem:[%s6545_s0 + $0x5f8] sm:$0xff] }
 0x139   :  { %vm2145_vm15 = vcmp.gt.f32.partialorder %v1098_v44, 0.0  ;;  %v2370_v50 = vmul.f32 0.1, %v1098_v44  ;;  %vm2258_vm1 = vcmp.gt.f32.partialorder %v1663_v46, 0.0  ;;  %v2483_v51 = vmul.f32 0.1, %v1663_v46  ;;  %4070 = vmatprep.mubr.msk.f32.mxu1 %vm4221_vm0, %v4222_v6 }
 0x13a   :  { %v1102_v52 = vpop.f32.mrb[40].mxu0  ;;  %v1667_v53 = vpop.f32.mrb[40].mxu1 }
 0x13b   :  { %v2595_v54 = vsel %vm2145_vm15, %v1098_v44, %v2370_v50  ;;  %v2708_v55 = vsel %vm2258_vm1, %v1663_v46, %v2483_v51  ;;  %v1103_v56 = vadd.f32 %v4913_v60, %v1102_v52  ;;  %v3574_v57 = vpop.f32.mrb[41].mxu0  ;;  %3732 = vmatmul.mubr.msk.f32.gmra.mrb[146].mxu0 %vm256_vm4, %v87_v48  ;;  %v1668_v58 = vadd.f32 %v4913_v60, %v1667_v53  ;;  %v3913_v59 = vpop.f32.mrb[41].mxu1  ;;  %v92_v46 = vld [vmem:[%s6545_s0 + $0x270] sm:$0xff] }
 0x13c   :  { %2820 = vst [vmem:[%s6547_s3 + $0x98] sm:$0xff] %v2595_v54  ;;  %2933 = vst [vmem:[%s6547_s3 + $0x420] sm:$0xff] %v2708_v55  ;;  %4071 = vmatmul.mubr.msk.f32.gmra.mrb[146].mxu1 %vm256_vm4, %v200_v49  ;;  %3734 = vmatprep.mubr.msk.f32.mxu0 %vm4221_vm0, %v4222_v6 }
 0x13d   :  { %vm2146_vm2 = vcmp.gt.f32.partialorder %v1103_v56, 0.0  ;;  %v2371_v63 = vmul.f32 0.1, %v1103_v56  ;;  %vm2259_vm3 = vcmp.gt.f32.partialorder %v1668_v58, 0.0  ;;  %v2484_v0 = vmul.f32 0.1, %v1668_v58  ;;  %4073 = vmatprep.mubr.msk.f32.mxu1 %vm4221_vm0, %v4222_v6 }
 0x13e   :  { %v1107_v1 = vpop.f32.mrb[42].mxu0  ;;  %v1672_v2 = vpop.f32.mrb[42].mxu1 }
 0x13f   :  { %v2596_v3 = vsel %vm2146_vm2, %v1103_v56, %v2371_v63  ;;  %v2709_v4 = vsel %vm2259_vm3, %v1668_v58, %v2484_v0  ;;  %v1108_v5 = vadd.f32 %v4913_v60, %v1107_v1  ;;  %v3577_v7 = vpop.f32.mrb[43].mxu0  ;;  %3735 = vmatmul.mubr.msk.f32.gmra.mrb[148].mxu0 %vm256_vm4, %v88_v61  ;;  %v1673_v8 = vadd.f32 %v4913_v60, %v1672_v2  ;;  %v3916_v9 = vpop.f32.mrb[43].mxu1  ;;  %v93_v58 = vld [vmem:[%s6545_s0 + $0x278] sm:$0xff]  ;;  %v5442_v2 = vld [vmem:[%s6546_s2] ss:$0 sm:$0xff] }
 0x140   :  { %2821 = vst [vmem:[%s6547_s3 + $0xa0] sm:$0xff] %v2596_v3  ;;  %2934 = vst [vmem:[%s6547_s3 + $0x428] sm:$0xff] %v2709_v4  ;;  %4074 = vmatmul.mubr.msk.f32.gmra.mrb[148].mxu1 %vm256_vm4, %v201_v62  ;;  %3737 = vmatprep.mubr.msk.f32.mxu0 %vm4221_vm0, %v4222_v6  ;;  %v207_v9 = vld [vmem:[%s6545_s0 + $0x608] sm:$0xff] }
 0x141   :  { %vm2147_vm5 = vcmp.gt.f32.partialorder %v1108_v5, 0.0  ;;  %v2372_v12 = vmul.f32 0.1, %v1108_v5  ;;  %vm2260_vm6 = vcmp.gt.f32.partialorder %v1673_v8, 0.0  ;;  %v2485_v13 = vmul.f32 0.1, %v1673_v8  ;;  %4076 = vmatprep.mubr.msk.f32.mxu1 %vm4221_vm0, %v4222_v6 }
 0x142   :  { %v1112_v14 = vpop.f32.mrb[44].mxu0  ;;  %v1677_v15 = vpop.f32.mrb[44].mxu1 }
 0x143   :  { %v2597_v16 = vsel %vm2147_vm5, %v1108_v5, %v2372_v12  ;;  %v2710_v17 = vsel %vm2260_vm6, %v1673_v8, %v2485_v13  ;;  %v1113_v18 = vadd.f32 %v4913_v60, %v1112_v14  ;;  %v3580_v19 = vpop.f32.mrb[45].mxu0  ;;  %3738 = vmatmul.mubr.msk.f32.gmra.mrb[150].mxu0 %vm256_vm4, %v89_v10  ;;  %v1678_v20 = vadd.f32 %v4913_v60, %v1677_v15  ;;  %v3919_v21 = vpop.f32.mrb[45].mxu1  ;;  %v94_v8 = vld [vmem:[%s6545_s0 + $0x280] sm:$0xff] }
 0x144   :  { %2822 = vst [vmem:[%s6547_s3 + $0xa8] sm:$0xff] %v2597_v16  ;;  %2935 = vst [vmem:[%s6547_s3 + $0x430] sm:$0xff] %v2710_v17  ;;  %4077 = vmatmul.mubr.msk.f32.gmra.mrb[150].mxu1 %vm256_vm4, %v202_v11  ;;  %3740 = vmatprep.mubr.msk.f32.mxu0 %vm4221_vm0, %v4222_v6  ;;  %v208_v21 = vld [vmem:[%s6545_s0 + $0x610] sm:$0xff] }
 0x145   :  { %vm2148_vm7 = vcmp.gt.f32.partialorder %v1113_v18, 0.0  ;;  %v2373_v24 = vmul.f32 0.1, %v1113_v18  ;;  %vm2261_vm8 = vcmp.gt.f32.partialorder %v1678_v20, 0.0  ;;  %v2486_v25 = vmul.f32 0.1, %v1678_v20  ;;  %4079 = vmatprep.mubr.msk.f32.mxu1 %vm4221_vm0, %v4222_v6 }
 0x146   :  { %v1117_v26 = vpop.f32.mrb[46].mxu0  ;;  %v1682_v27 = vpop.f32.mrb[46].mxu1 }
 0x147   :  { %v2598_v28 = vsel %vm2148_vm7, %v1113_v18, %v2373_v24  ;;  %v2711_v29 = vsel %vm2261_vm8, %v1678_v20, %v2486_v25  ;;  %v1118_v30 = vadd.f32 %v4913_v60, %v1117_v26  ;;  %v3583_v31 = vpop.f32.mrb[47].mxu0  ;;  %3741 = vmatmul.mubr.msk.f32.gmra.mrb[152].mxu0 %vm256_vm4, %v90_v22  ;;  %v1683_v32 = vadd.f32 %v4913_v60, %v1682_v27  ;;  %v3922_v33 = vpop.f32.mrb[47].mxu1  ;;  %v95_v20 = vld [vmem:[%s6545_s0 + $0x288] sm:$0xff] }
 0x148   :  { %2823 = vst [vmem:[%s6547_s3 + $0xb0] sm:$0xff] %v2598_v28  ;;  %2936 = vst [vmem:[%s6547_s3 + $0x438] sm:$0xff] %v2711_v29  ;;  %4080 = vmatmul.mubr.msk.f32.gmra.mrb[152].mxu1 %vm256_vm4, %v203_v23  ;;  %3743 = vmatprep.mubr.msk.f32.mxu0 %vm4221_vm0, %v4222_v6  ;;  %v209_v33 = vld [vmem:[%s6545_s0 + $0x618] sm:$0xff] }
 0x149   :  { %vm2149_vm9 = vcmp.gt.f32.partialorder %v1118_v30, 0.0  ;;  %v2374_v36 = vmul.f32 0.1, %v1118_v30  ;;  %vm2262_vm10 = vcmp.gt.f32.partialorder %v1683_v32, 0.0  ;;  %v2487_v37 = vmul.f32 0.1, %v1683_v32  ;;  %4082 = vmatprep.mubr.msk.f32.mxu1 %vm4221_vm0, %v4222_v6 }
 0x14a   :  { %v1122_v38 = vpop.f32.mrb[48].mxu0  ;;  %v1687_v39 = vpop.f32.mrb[48].mxu1 }
 0x14b   :  { %v2599_v40 = vsel %vm2149_vm9, %v1118_v30, %v2374_v36  ;;  %v2712_v41 = vsel %vm2262_vm10, %v1683_v32, %v2487_v37  ;;  %v1123_v42 = vadd.f32 %v4913_v60, %v1122_v38  ;;  %v3586_v43 = vpop.f32.mrb[49].mxu0  ;;  %3744 = vmatmul.mubr.msk.f32.gmra.mrb[154].mxu0 %vm256_vm4, %v91_v34  ;;  %v1688_v44 = vadd.f32 %v4913_v60, %v1687_v39  ;;  %v3925_v45 = vpop.f32.mrb[49].mxu1  ;;  %v96_v32 = vld [vmem:[%s6545_s0 + $0x290] sm:$0xff] }
 0x14c   :  { %2824 = vst [vmem:[%s6547_s3 + $0xb8] sm:$0xff] %v2599_v40  ;;  %2937 = vst [vmem:[%s6547_s3 + $0x440] sm:$0xff] %v2712_v41  ;;  %4083 = vmatmul.mubr.msk.f32.gmra.mrb[154].mxu1 %vm256_vm4, %v204_v35  ;;  %3746 = vmatprep.mubr.msk.f32.mxu0 %vm4221_vm0, %v4222_v6  ;;  %v210_v45 = vld [vmem:[%s6545_s0 + $0x620] sm:$0xff] }
 0x14d   :  { %vm2150_vm11 = vcmp.gt.f32.partialorder %v1123_v42, 0.0  ;;  %v2375_v48 = vmul.f32 0.1, %v1123_v42  ;;  %vm2263_vm12 = vcmp.gt.f32.partialorder %v1688_v44, 0.0  ;;  %v2488_v49 = vmul.f32 0.1, %v1688_v44  ;;  %4085 = vmatprep.mubr.msk.f32.mxu1 %vm4221_vm0, %v4222_v6 }
 0x14e   :  { %v1127_v50 = vpop.f32.mrb[50].mxu0  ;;  %v1692_v51 = vpop.f32.mrb[50].mxu1 }
 0x14f   :  { %v2600_v52 = vsel %vm2150_vm11, %v1123_v42, %v2375_v48  ;;  %v2713_v53 = vsel %vm2263_vm12, %v1688_v44, %v2488_v49  ;;  %v1128_v54 = vadd.f32 %v4913_v60, %v1127_v50  ;;  %v3589_v55 = vpop.f32.mrb[51].mxu0  ;;  %3747 = vmatmul.mubr.msk.f32.gmra.mrb[156].mxu0 %vm256_vm4, %v92_v46  ;;  %v1693_v56 = vadd.f32 %v4913_v60, %v1692_v51  ;;  %v3928_v57 = vpop.f32.mrb[51].mxu1  ;;  %v206_v60 = vld [vmem:[%s6545_s0 + $0x600] sm:$0xff]  ;;  %v97_v44 = vld [vmem:[%s6545_s0 + $0x298] sm:$0xff] }
 0x150   :  { %2825 = vst [vmem:[%s6547_s3 + $0xc0] sm:$0xff] %v2600_v52  ;;  %2938 = vst [vmem:[%s6547_s3 + $0x448] sm:$0xff] %v2713_v53  ;;  %4086 = vmatmul.mubr.msk.f32.gmra.mrb[156].mxu1 %vm256_vm4, %v205_v47  ;;  %3749 = vmatprep.mubr.msk.f32.mxu0 %vm4221_vm0, %v4222_v6  ;;  %v211_v57 = vld [vmem:[%s6545_s0 + $0x628] sm:$0xff] }
 0x151   :  { %vm2151_vm13 = vcmp.gt.f32.partialorder %v1128_v54, 0.0  ;;  %v2376_v59 = vmul.f32 0.1, %v1128_v54  ;;  %vm2264_vm14 = vcmp.gt.f32.partialorder %v1693_v56, 0.0  ;;  %v2489_v61 = vmul.f32 0.1, %v1693_v56  ;;  %4088 = vmatprep.mubr.msk.f32.mxu1 %vm4221_vm0, %v4222_v6 }
 0x152   :  { %v1132_v62 = vpop.f32.mrb[52].mxu0  ;;  %v1697_v63 = vpop.f32.mrb[52].mxu1 }
 0x153   :  { %v2601_v0 = vsel %vm2151_vm13, %v1128_v54, %v2376_v59  ;;  %v2714_v1 = vsel %vm2264_vm14, %v1693_v56, %v2489_v61  ;;  %v1133_v3 = vadd.f32 %v5442_v2, %v1132_v62  ;;  %v3592_v4 = vpop.f32.mrb[53].mxu0  ;;  %3750 = vmatmul.mubr.msk.f32.gmra.mrb[158].mxu0 %vm256_vm4, %v93_v58  ;;  %v1698_v5 = vadd.f32 %v5442_v2, %v1697_v63  ;;  %v3931_v7 = vpop.f32.mrb[53].mxu1  ;;  %v98_v56 = vld [vmem:[%s6545_s0 + $0x2a0] sm:$0xff] }
 0x154   :  { %2826 = vst [vmem:[%s6547_s3 + $0xc8] sm:$0xff] %v2601_v0  ;;  %2939 = vst [vmem:[%s6547_s3 + $0x450] sm:$0xff] %v2714_v1  ;;  %4089 = vmatmul.mubr.msk.f32.gmra.mrb[158].mxu1 %vm256_vm4, %v206_v60  ;;  %3752 = vmatprep.mubr.msk.f32.mxu0 %vm4221_vm0, %v4222_v6  ;;  %v212_v7 = vld [vmem:[%s6545_s0 + $0x630] sm:$0xff] }
 0x155   :  { %vm2152_vm15 = vcmp.gt.f32.partialorder %v1133_v3, 0.0  ;;  %v2377_v10 = vmul.f32 0.1, %v1133_v3  ;;  %vm2265_vm1 = vcmp.gt.f32.partialorder %v1698_v5, 0.0  ;;  %v2490_v11 = vmul.f32 0.1, %v1698_v5  ;;  %4091 = vmatprep.mubr.msk.f32.mxu1 %vm4221_vm0, %v4222_v6 }
 0x156   :  { %v1137_v12 = vpop.f32.mrb[54].mxu0  ;;  %v1702_v13 = vpop.f32.mrb[54].mxu1 }
 0x157   :  { %v2602_v14 = vsel %vm2152_vm15, %v1133_v3, %v2377_v10  ;;  %v2715_v15 = vsel %vm2265_vm1, %v1698_v5, %v2490_v11  ;;  %v1138_v16 = vadd.f32 %v5442_v2, %v1137_v12  ;;  %v3595_v17 = vpop.f32.mrb[55].mxu0  ;;  %3753 = vmatmul.mubr.msk.f32.gmra.mrb[160].mxu0 %vm256_vm4, %v94_v8  ;;  %v1703_v18 = vadd.f32 %v5442_v2, %v1702_v13  ;;  %v3934_v19 = vpop.f32.mrb[55].mxu1  ;;  %v99_v5 = vld [vmem:[%s6545_s0 + $0x2a8] sm:$0xff] }
 0x158   :  { %2827 = vst [vmem:[%s6547_s3 + $0xd0] sm:$0xff] %v2602_v14  ;;  %2940 = vst [vmem:[%s6547_s3 + $0x458] sm:$0xff] %v2715_v15  ;;  %4092 = vmatmul.mubr.msk.f32.gmra.mrb[160].mxu1 %vm256_vm4, %v207_v9  ;;  %3755 = vmatprep.mubr.msk.f32.mxu0 %vm4221_vm0, %v4222_v6  ;;  %v213_v19 = vld [vmem:[%s6545_s0 + $0x638] sm:$0xff] }
 0x159   :  { %vm2153_vm2 = vcmp.gt.f32.partialorder %v1138_v16, 0.0  ;;  %v2378_v22 = vmul.f32 0.1, %v1138_v16  ;;  %vm2266_vm3 = vcmp.gt.f32.partialorder %v1703_v18, 0.0  ;;  %v2491_v23 = vmul.f32 0.1, %v1703_v18  ;;  %4094 = vmatprep.mubr.msk.f32.mxu1 %vm4221_vm0, %v4222_v6 }
 0x15a   :  { %v1142_v24 = vpop.f32.mrb[56].mxu0  ;;  %v1707_v25 = vpop.f32.mrb[56].mxu1 }
 0x15b   :  { %v2603_v26 = vsel %vm2153_vm2, %v1138_v16, %v2378_v22  ;;  %v2716_v27 = vsel %vm2266_vm3, %v1703_v18, %v2491_v23  ;;  %v1143_v28 = vadd.f32 %v5442_v2, %v1142_v24  ;;  %v3598_v29 = vpop.f32.mrb[57].mxu0  ;;  %3756 = vmatmul.mubr.msk.f32.gmra.mrb[162].mxu0 %vm256_vm4, %v95_v20  ;;  %v1708_v30 = vadd.f32 %v5442_v2, %v1707_v25  ;;  %v3937_v31 = vpop.f32.mrb[57].mxu1  ;;  %v100_v18 = vld [vmem:[%s6545_s0 + $0x2b0] sm:$0xff] }
 0x15c   :  { %2828 = vst [vmem:[%s6547_s3 + $0xd8] sm:$0xff] %v2603_v26  ;;  %2941 = vst [vmem:[%s6547_s3 + $0x460] sm:$0xff] %v2716_v27  ;;  %4095 = vmatmul.mubr.msk.f32.gmra.mrb[162].mxu1 %vm256_vm4, %v208_v21  ;;  %3758 = vmatprep.mubr.msk.f32.mxu0 %vm4221_vm0, %v4222_v6  ;;  %v214_v31 = vld [vmem:[%s6545_s0 + $0x640] sm:$0xff] }
 0x15d   :  { %vm2154_vm5 = vcmp.gt.f32.partialorder %v1143_v28, 0.0  ;;  %v2379_v34 = vmul.f32 0.1, %v1143_v28  ;;  %vm2267_vm6 = vcmp.gt.f32.partialorder %v1708_v30, 0.0  ;;  %v2492_v35 = vmul.f32 0.1, %v1708_v30  ;;  %4097 = vmatprep.mubr.msk.f32.mxu1 %vm4221_vm0, %v4222_v6 }
 0x15e   :  { %v1147_v36 = vpop.f32.mrb[58].mxu0  ;;  %v1712_v37 = vpop.f32.mrb[58].mxu1 }
 0x15f   :  { %v2604_v38 = vsel %vm2154_vm5, %v1143_v28, %v2379_v34  ;;  %v2717_v39 = vsel %vm2267_vm6, %v1708_v30, %v2492_v35  ;;  %v1148_v40 = vadd.f32 %v5442_v2, %v1147_v36  ;;  %v3601_v41 = vpop.f32.mrb[59].mxu0  ;;  %3759 = vmatmul.mubr.msk.f32.gmra.mrb[164].mxu0 %vm256_vm4, %v96_v32  ;;  %v1713_v42 = vadd.f32 %v5442_v2, %v1712_v37  ;;  %v3940_v43 = vpop.f32.mrb[59].mxu1  ;;  %v101_v30 = vld [vmem:[%s6545_s0 + $0x2b8] sm:$0xff] }
 0x160   :  { %2829 = vst [vmem:[%s6547_s3 + $0xe0] sm:$0xff] %v2604_v38  ;;  %2942 = vst [vmem:[%s6547_s3 + $0x468] sm:$0xff] %v2717_v39  ;;  %4098 = vmatmul.mubr.msk.f32.gmra.mrb[164].mxu1 %vm256_vm4, %v209_v33  ;;  %3761 = vmatprep.mubr.msk.f32.mxu0 %vm4221_vm0, %v4222_v6  ;;  %v215_v43 = vld [vmem:[%s6545_s0 + $0x648] sm:$0xff] }
 0x161   :  { %vm2155_vm7 = vcmp.gt.f32.partialorder %v1148_v40, 0.0  ;;  %v2380_v46 = vmul.f32 0.1, %v1148_v40  ;;  %vm2268_vm8 = vcmp.gt.f32.partialorder %v1713_v42, 0.0  ;;  %v2493_v47 = vmul.f32 0.1, %v1713_v42  ;;  %4100 = vmatprep.mubr.msk.f32.mxu1 %vm4221_vm0, %v4222_v6 }
 0x162   :  { %v1152_v48 = vpop.f32.mrb[60].mxu0  ;;  %v1717_v49 = vpop.f32.mrb[60].mxu1 }
 0x163   :  { %v2605_v50 = vsel %vm2155_vm7, %v1148_v40, %v2380_v46  ;;  %v2718_v51 = vsel %vm2268_vm8, %v1713_v42, %v2493_v47  ;;  %v1153_v52 = vadd.f32 %v5442_v2, %v1152_v48  ;;  %v3604_v53 = vpop.f32.mrb[61].mxu0  ;;  %3762 = vmatmul.mubr.msk.f32.gmra.mrb[166].mxu0 %vm256_vm4, %v97_v44  ;;  %v1718_v54 = vadd.f32 %v5442_v2, %v1717_v49  ;;  %v3943_v55 = vpop.f32.mrb[61].mxu1  ;;  %v102_v42 = vld [vmem:[%s6545_s0 + $0x2c0] sm:$0xff] }
 0x164   :  { %2830 = vst [vmem:[%s6547_s3 + $0xe8] sm:$0xff] %v2605_v50  ;;  %2943 = vst [vmem:[%s6547_s3 + $0x470] sm:$0xff] %v2718_v51  ;;  %4101 = vmatmul.mubr.msk.f32.gmra.mrb[166].mxu1 %vm256_vm4, %v210_v45  ;;  %3764 = vmatprep.mubr.msk.f32.mxu0 %vm4221_vm0, %v4222_v6  ;;  %v216_v55 = vld [vmem:[%s6545_s0 + $0x650] sm:$0xff] }
 0x165   :  { %vm2156_vm9 = vcmp.gt.f32.partialorder %v1153_v52, 0.0  ;;  %v2381_v58 = vmul.f32 0.1, %v1153_v52  ;;  %vm2269_vm10 = vcmp.gt.f32.partialorder %v1718_v54, 0.0  ;;  %v2494_v60 = vmul.f32 0.1, %v1718_v54  ;;  %4103 = vmatprep.mubr.msk.f32.mxu1 %vm4221_vm0, %v4222_v6 }
 0x166   :  { %v1157_v59 = vpop.f32.mrb[62].mxu0  ;;  %v1722_v61 = vpop.f32.mrb[62].mxu1 }
 0x167   :  { %v2606_v62 = vsel %vm2156_vm9, %v1153_v52, %v2381_v58  ;;  %v2719_v63 = vsel %vm2269_vm10, %v1718_v54, %v2494_v60  ;;  %v1158_v0 = vadd.f32 %v5442_v2, %v1157_v59  ;;  %v3607_v1 = vpop.f32.mrb[63].mxu0  ;;  %3765 = vmatmul.mubr.msk.f32.gmra.mrb[168].mxu0 %vm256_vm4, %v98_v56  ;;  %v1723_v3 = vadd.f32 %v5442_v2, %v1722_v61  ;;  %v3946_v4 = vpop.f32.mrb[63].mxu1  ;;  %v103_v54 = vld [vmem:[%s6545_s0 + $0x2c8] sm:$0xff] }
 0x168   :  { %2831 = vst [vmem:[%s6547_s3 + $0xf0] sm:$0xff] %v2606_v62  ;;  %2944 = vst [vmem:[%s6547_s3 + $0x478] sm:$0xff] %v2719_v63  ;;  %4104 = vmatmul.mubr.msk.f32.gmra.mrb[168].mxu1 %vm256_vm4, %v211_v57  ;;  %3767 = vmatprep.mubr.msk.f32.mxu0 %vm4221_vm0, %v4222_v6  ;;  %v217_v4 = vld [vmem:[%s6545_s0 + $0x658] sm:$0xff] }
 0x169   :  { %vm2157_vm11 = vcmp.gt.f32.partialorder %v1158_v0, 0.0  ;;  %v2382_v8 = vmul.f32 0.1, %v1158_v0  ;;  %vm2270_vm12 = vcmp.gt.f32.partialorder %v1723_v3, 0.0  ;;  %v2495_v9 = vmul.f32 0.1, %v1723_v3  ;;  %4106 = vmatprep.mubr.msk.f32.mxu1 %vm4221_vm0, %v4222_v6 }
 0x16a   :  { %v1162_v10 = vpop.f32.mrb[64].mxu0  ;;  %v1727_v11 = vpop.f32.mrb[64].mxu1 }
 0x16b   :  { %v2607_v12 = vsel %vm2157_vm11, %v1158_v0, %v2382_v8  ;;  %v2720_v13 = vsel %vm2270_vm12, %v1723_v3, %v2495_v9  ;;  %v1163_v14 = vadd.f32 %v5442_v2, %v1162_v10  ;;  %v3610_v15 = vpop.f32.mrb[65].mxu0  ;;  %3768 = vmatmul.mubr.msk.f32.gmra.mrb[170].mxu0 %vm256_vm4, %v99_v5  ;;  %v1728_v16 = vadd.f32 %v5442_v2, %v1727_v11  ;;  %v3949_v17 = vpop.f32.mrb[65].mxu1  ;;  %v104_v3 = vld [vmem:[%s6545_s0 + $0x2d0] sm:$0xff] }
 0x16c   :  { %2832 = vst [vmem:[%s6547_s3 + $0xf8] sm:$0xff] %v2607_v12  ;;  %2945 = vst [vmem:[%s6547_s3 + $0x480] sm:$0xff] %v2720_v13  ;;  %4107 = vmatmul.mubr.msk.f32.gmra.mrb[170].mxu1 %vm256_vm4, %v212_v7  ;;  %3770 = vmatprep.mubr.msk.f32.mxu0 %vm4221_vm0, %v4222_v6  ;;  %v218_v17 = vld [vmem:[%s6545_s0 + $0x660] sm:$0xff] }
 0x16d   :  { %vm2158_vm13 = vcmp.gt.f32.partialorder %v1163_v14, 0.0  ;;  %v2383_v20 = vmul.f32 0.1, %v1163_v14  ;;  %vm2271_vm14 = vcmp.gt.f32.partialorder %v1728_v16, 0.0  ;;  %v2496_v21 = vmul.f32 0.1, %v1728_v16  ;;  %4109 = vmatprep.mubr.msk.f32.mxu1 %vm4221_vm0, %v4222_v6 }
 0x16e   :  { %v1167_v22 = vpop.f32.mrb[66].mxu0  ;;  %v1732_v23 = vpop.f32.mrb[66].mxu1 }
 0x16f   :  { %v2608_v24 = vsel %vm2158_vm13, %v1163_v14, %v2383_v20  ;;  %v2721_v25 = vsel %vm2271_vm14, %v1728_v16, %v2496_v21  ;;  %v1168_v26 = vadd.f32 %v5442_v2, %v1167_v22  ;;  %v3613_v27 = vpop.f32.mrb[67].mxu0  ;;  %3771 = vmatmul.mubr.msk.f32.gmra.mrb[172].mxu0 %vm256_vm4, %v100_v18  ;;  %v1733_v28 = vadd.f32 %v5442_v2, %v1732_v23  ;;  %v3952_v29 = vpop.f32.mrb[67].mxu1  ;;  %v105_v16 = vld [vmem:[%s6545_s0 + $0x2d8] sm:$0xff] }
 0x170   :  { %2833 = vst [vmem:[%s6547_s3 + $0x100] sm:$0xff] %v2608_v24  ;;  %2946 = vst [vmem:[%s6547_s3 + $0x488] sm:$0xff] %v2721_v25  ;;  %4110 = vmatmul.mubr.msk.f32.gmra.mrb[172].mxu1 %vm256_vm4, %v213_v19  ;;  %3773 = vmatprep.mubr.msk.f32.mxu0 %vm4221_vm0, %v4222_v6  ;;  %v219_v29 = vld [vmem:[%s6545_s0 + $0x668] sm:$0xff] }
 0x171   :  { %vm2159_vm15 = vcmp.gt.f32.partialorder %v1168_v26, 0.0  ;;  %v2384_v32 = vmul.f32 0.1, %v1168_v26  ;;  %vm2272_vm1 = vcmp.gt.f32.partialorder %v1733_v28, 0.0  ;;  %v2497_v33 = vmul.f32 0.1, %v1733_v28  ;;  %4112 = vmatprep.mubr.msk.f32.mxu1 %vm4221_vm0, %v4222_v6 }
 0x172   :  { %v1172_v34 = vpop.f32.mrb[68].mxu0  ;;  %v1737_v35 = vpop.f32.mrb[68].mxu1 }
 0x173   :  { %v2609_v36 = vsel %vm2159_vm15, %v1168_v26, %v2384_v32  ;;  %v2722_v37 = vsel %vm2272_vm1, %v1733_v28, %v2497_v33  ;;  %v1173_v38 = vadd.f32 %v5442_v2, %v1172_v34  ;;  %v3616_v39 = vpop.f32.mrb[69].mxu0  ;;  %3774 = vmatmul.mubr.msk.f32.gmra.mrb[174].mxu0 %vm256_vm4, %v101_v30  ;;  %v1738_v40 = vadd.f32 %v5442_v2, %v1737_v35  ;;  %v3955_v41 = vpop.f32.mrb[69].mxu1  ;;  %v106_v28 = vld [vmem:[%s6545_s0 + $0x2e0] sm:$0xff] }
 0x174   :  { %2834 = vst [vmem:[%s6547_s3 + $0x108] sm:$0xff] %v2609_v36  ;;  %2947 = vst [vmem:[%s6547_s3 + $0x490] sm:$0xff] %v2722_v37  ;;  %4113 = vmatmul.mubr.msk.f32.gmra.mrb[174].mxu1 %vm256_vm4, %v214_v31  ;;  %3776 = vmatprep.mubr.msk.f32.mxu0 %vm4221_vm0, %v4222_v6  ;;  %v220_v41 = vld [vmem:[%s6545_s0 + $0x670] sm:$0xff] }
 0x175   :  { %vm2160_vm2 = vcmp.gt.f32.partialorder %v1173_v38, 0.0  ;;  %v2385_v44 = vmul.f32 0.1, %v1173_v38  ;;  %vm2273_vm3 = vcmp.gt.f32.partialorder %v1738_v40, 0.0  ;;  %v2498_v45 = vmul.f32 0.1, %v1738_v40  ;;  %4115 = vmatprep.mubr.msk.f32.mxu1 %vm4221_vm0, %v4222_v6 }
 0x176   :  { %v1177_v46 = vpop.f32.mrb[70].mxu0  ;;  %v1742_v47 = vpop.f32.mrb[70].mxu1 }
 0x177   :  { %v2610_v48 = vsel %vm2160_vm2, %v1173_v38, %v2385_v44  ;;  %v2723_v49 = vsel %vm2273_vm3, %v1738_v40, %v2498_v45  ;;  %v1178_v50 = vadd.f32 %v5442_v2, %v1177_v46  ;;  %v3619_v51 = vpop.f32.mrb[71].mxu0  ;;  %3777 = vmatmul.mubr.msk.f32.gmra.mrb[176].mxu0 %vm256_vm4, %v102_v42  ;;  %v1743_v52 = vadd.f32 %v5442_v2, %v1742_v47  ;;  %v3958_v53 = vpop.f32.mrb[71].mxu1  ;;  %v107_v40 = vld [vmem:[%s6545_s0 + $0x2e8] sm:$0xff] }
 0x178   :  { %2835 = vst [vmem:[%s6547_s3 + $0x110] sm:$0xff] %v2610_v48  ;;  %2948 = vst [vmem:[%s6547_s3 + $0x498] sm:$0xff] %v2723_v49  ;;  %4116 = vmatmul.mubr.msk.f32.gmra.mrb[176].mxu1 %vm256_vm4, %v215_v43  ;;  %3779 = vmatprep.mubr.msk.f32.mxu0 %vm4221_vm0, %v4222_v6  ;;  %v221_v53 = vld [vmem:[%s6545_s0 + $0x678] sm:$0xff] }
 0x179   :  { %vm2161_vm5 = vcmp.gt.f32.partialorder %v1178_v50, 0.0  ;;  %v2386_v56 = vmul.f32 0.1, %v1178_v50  ;;  %vm2274_vm6 = vcmp.gt.f32.partialorder %v1743_v52, 0.0  ;;  %v2499_v57 = vmul.f32 0.1, %v1743_v52  ;;  %4118 = vmatprep.mubr.msk.f32.mxu1 %vm4221_vm0, %v4222_v6 }
 0x17a   :  { %v1182_v58 = vpop.f32.mrb[72].mxu0  ;;  %v1747_v60 = vpop.f32.mrb[72].mxu1 }
 0x17b   :  { %v2611_v59 = vsel %vm2161_vm5, %v1178_v50, %v2386_v56  ;;  %v2724_v61 = vsel %vm2274_vm6, %v1743_v52, %v2499_v57  ;;  %v1183_v62 = vadd.f32 %v5442_v2, %v1182_v58  ;;  %v3622_v63 = vpop.f32.mrb[73].mxu0  ;;  %3780 = vmatmul.mubr.msk.f32.gmra.mrb[178].mxu0 %vm256_vm4, %v103_v54  ;;  %v1748_v0 = vadd.f32 %v5442_v2, %v1747_v60  ;;  %v3961_v1 = vpop.f32.mrb[73].mxu1  ;;  %v108_v52 = vld [vmem:[%s6545_s0 + $0x2f0] sm:$0xff] }
 0x17c   :  { %2836 = vst [vmem:[%s6547_s3 + $0x118] sm:$0xff] %v2611_v59  ;;  %2949 = vst [vmem:[%s6547_s3 + $0x4a0] sm:$0xff] %v2724_v61  ;;  %4119 = vmatmul.mubr.msk.f32.gmra.mrb[178].mxu1 %vm256_vm4, %v216_v55  ;;  %3782 = vmatprep.mubr.msk.f32.mxu0 %vm4221_vm0, %v4222_v6  ;;  %v222_v1 = vld [vmem:[%s6545_s0 + $0x680] sm:$0xff] }
 0x17d   :  { %vm2162_vm7 = vcmp.gt.f32.partialorder %v1183_v62, 0.0  ;;  %v2387_v5 = vmul.f32 0.1, %v1183_v62  ;;  %vm2275_vm8 = vcmp.gt.f32.partialorder %v1748_v0, 0.0  ;;  %v2500_v7 = vmul.f32 0.1, %v1748_v0  ;;  %4121 = vmatprep.mubr.msk.f32.mxu1 %vm4221_vm0, %v4222_v6 }
 0x17e   :  { %v1187_v8 = vpop.f32.mrb[74].mxu0  ;;  %v1752_v9 = vpop.f32.mrb[74].mxu1 }
 0x17f   :  { %v2612_v10 = vsel %vm2162_vm7, %v1183_v62, %v2387_v5  ;;  %v2725_v11 = vsel %vm2275_vm8, %v1748_v0, %v2500_v7  ;;  %v1188_v12 = vadd.f32 %v5442_v2, %v1187_v8  ;;  %v3625_v13 = vpop.f32.mrb[75].mxu0  ;;  %3783 = vmatmul.mubr.msk.f32.gmra.mrb[180].mxu0 %vm256_vm4, %v104_v3  ;;  %v1753_v14 = vadd.f32 %v5442_v2, %v1752_v9  ;;  %v3964_v15 = vpop.f32.mrb[75].mxu1  ;;  %v109_v0 = vld [vmem:[%s6545_s0 + $0x2f8] sm:$0xff] }
 0x180   :  { %2837 = vst [vmem:[%s6547_s3 + $0x120] sm:$0xff] %v2612_v10  ;;  %2950 = vst [vmem:[%s6547_s3 + $0x4a8] sm:$0xff] %v2725_v11  ;;  %4122 = vmatmul.mubr.msk.f32.gmra.mrb[180].mxu1 %vm256_vm4, %v217_v4  ;;  %3785 = vmatprep.mubr.msk.f32.mxu0 %vm4221_vm0, %v4222_v6  ;;  %v223_v15 = vld [vmem:[%s6545_s0 + $0x688] sm:$0xff] }
 0x181   :  { %vm2163_vm9 = vcmp.gt.f32.partialorder %v1188_v12, 0.0  ;;  %v2388_v18 = vmul.f32 0.1, %v1188_v12  ;;  %vm2276_vm10 = vcmp.gt.f32.partialorder %v1753_v14, 0.0  ;;  %v2501_v19 = vmul.f32 0.1, %v1753_v14  ;;  %4124 = vmatprep.mubr.msk.f32.mxu1 %vm4221_vm0, %v4222_v6 }
 0x182   :  { %v1192_v20 = vpop.f32.mrb[76].mxu0  ;;  %v1757_v21 = vpop.f32.mrb[76].mxu1 }
 0x183   :  { %v2613_v22 = vsel %vm2163_vm9, %v1188_v12, %v2388_v18  ;;  %v2726_v23 = vsel %vm2276_vm10, %v1753_v14, %v2501_v19  ;;  %v1193_v24 = vadd.f32 %v5442_v2, %v1192_v20  ;;  %v3628_v25 = vpop.f32.mrb[77].mxu0  ;;  %3786 = vmatmul.mubr.msk.f32.gmra.mrb[182].mxu0 %vm256_vm4, %v105_v16  ;;  %v1758_v26 = vadd.f32 %v5442_v2, %v1757_v21  ;;  %v3967_v27 = vpop.f32.mrb[77].mxu1  ;;  %v110_v14 = vld [vmem:[%s6545_s0 + $0x300] sm:$0xff] }
 0x184   :  { %2838 = vst [vmem:[%s6547_s3 + $0x128] sm:$0xff] %v2613_v22  ;;  %2951 = vst [vmem:[%s6547_s3 + $0x4b0] sm:$0xff] %v2726_v23  ;;  %4125 = vmatmul.mubr.msk.f32.gmra.mrb[182].mxu1 %vm256_vm4, %v218_v17  ;;  %3788 = vmatprep.mubr.msk.f32.mxu0 %vm4221_vm0, %v4222_v6  ;;  %v224_v27 = vld [vmem:[%s6545_s0 + $0x690] sm:$0xff] }
 0x185   :  { %vm2164_vm11 = vcmp.gt.f32.partialorder %v1193_v24, 0.0  ;;  %v2389_v30 = vmul.f32 0.1, %v1193_v24  ;;  %vm2277_vm12 = vcmp.gt.f32.partialorder %v1758_v26, 0.0  ;;  %v2502_v31 = vmul.f32 0.1, %v1758_v26  ;;  %4127 = vmatprep.mubr.msk.f32.mxu1 %vm4221_vm0, %v4222_v6 }
 0x186   :  { %v1197_v32 = vpop.f32.mrb[78].mxu0  ;;  %v1762_v33 = vpop.f32.mrb[78].mxu1 }
 0x187   :  { %v2614_v34 = vsel %vm2164_vm11, %v1193_v24, %v2389_v30  ;;  %v2727_v35 = vsel %vm2277_vm12, %v1758_v26, %v2502_v31  ;;  %v1198_v36 = vadd.f32 %v5442_v2, %v1197_v32  ;;  %v3631_v37 = vpop.f32.mrb[79].mxu0  ;;  %3789 = vmatmul.mubr.msk.f32.gmra.mrb[184].mxu0 %vm256_vm4, %v106_v28  ;;  %v1763_v38 = vadd.f32 %v5442_v2, %v1762_v33  ;;  %v3970_v39 = vpop.f32.mrb[79].mxu1  ;;  %v111_v26 = vld [vmem:[%s6545_s0 + $0x308] sm:$0xff] }
 0x188   :  { %2839 = vst [vmem:[%s6547_s3 + $0x130] sm:$0xff] %v2614_v34  ;;  %2952 = vst [vmem:[%s6547_s3 + $0x4b8] sm:$0xff] %v2727_v35  ;;  %4128 = vmatmul.mubr.msk.f32.gmra.mrb[184].mxu1 %vm256_vm4, %v219_v29  ;;  %3791 = vmatprep.mubr.msk.f32.mxu0 %vm4221_vm0, %v4222_v6  ;;  %v225_v39 = vld [vmem:[%s6545_s0 + $0x698] sm:$0xff] }
 0x189   :  { %vm2165_vm13 = vcmp.gt.f32.partialorder %v1198_v36, 0.0  ;;  %v2390_v42 = vmul.f32 0.1, %v1198_v36  ;;  %vm2278_vm14 = vcmp.gt.f32.partialorder %v1763_v38, 0.0  ;;  %v2503_v43 = vmul.f32 0.1, %v1763_v38  ;;  %4130 = vmatprep.mubr.msk.f32.mxu1 %vm4221_vm0, %v4222_v6 }
 0x18a   :  { %v1202_v44 = vpop.f32.mrb[80].mxu0  ;;  %v1767_v45 = vpop.f32.mrb[80].mxu1 }
 0x18b   :  { %v2615_v46 = vsel %vm2165_vm13, %v1198_v36, %v2390_v42  ;;  %v2728_v47 = vsel %vm2278_vm14, %v1763_v38, %v2503_v43  ;;  %v1203_v48 = vadd.f32 %v5442_v2, %v1202_v44  ;;  %v3634_v49 = vpop.f32.mrb[81].mxu0  ;;  %3792 = vmatmul.mubr.msk.f32.gmra.mrb[186].mxu0 %vm256_vm4, %v107_v40  ;;  %v1768_v50 = vadd.f32 %v5442_v2, %v1767_v45  ;;  %v3973_v51 = vpop.f32.mrb[81].mxu1  ;;  %v112_v38 = vld [vmem:[%s6545_s0 + $0x310] sm:$0xff] }
 0x18c   :  { %2840 = vst [vmem:[%s6547_s3 + $0x138] sm:$0xff] %v2615_v46  ;;  %2953 = vst [vmem:[%s6547_s3 + $0x4c0] sm:$0xff] %v2728_v47  ;;  %4131 = vmatmul.mubr.msk.f32.gmra.mrb[186].mxu1 %vm256_vm4, %v220_v41  ;;  %3794 = vmatprep.mubr.msk.f32.mxu0 %vm4221_vm0, %v4222_v6  ;;  %v226_v51 = vld [vmem:[%s6545_s0 + $0x6a0] sm:$0xff] }
 0x18d   :  { %vm2166_vm15 = vcmp.gt.f32.partialorder %v1203_v48, 0.0  ;;  %v2391_v54 = vmul.f32 0.1, %v1203_v48  ;;  %vm2279_vm1 = vcmp.gt.f32.partialorder %v1768_v50, 0.0  ;;  %v2504_v55 = vmul.f32 0.1, %v1768_v50  ;;  %4133 = vmatprep.mubr.msk.f32.mxu1 %vm4221_vm0, %v4222_v6 }
 0x18e   :  { %v1207_v56 = vpop.f32.mrb[82].mxu0  ;;  %v1772_v57 = vpop.f32.mrb[82].mxu1 }
 0x18f   :  { %v2616_v58 = vsel %vm2166_vm15, %v1203_v48, %v2391_v54  ;;  %v2729_v60 = vsel %vm2279_vm1, %v1768_v50, %v2504_v55  ;;  %v1208_v59 = vadd.f32 %v5442_v2, %v1207_v56  ;;  %v3637_v61 = vpop.f32.mrb[83].mxu0  ;;  %3795 = vmatmul.mubr.msk.f32.gmra.mrb[188].mxu0 %vm256_vm4, %v108_v52  ;;  %v1773_v62 = vadd.f32 %v5442_v2, %v1772_v57  ;;  %v3976_v63 = vpop.f32.mrb[83].mxu1  ;;  %v113_v50 = vld [vmem:[%s6545_s0 + $0x318] sm:$0xff] }
 0x190   :  { %2841 = vst [vmem:[%s6547_s3 + $0x140] sm:$0xff] %v2616_v58  ;;  %2954 = vst [vmem:[%s6547_s3 + $0x4c8] sm:$0xff] %v2729_v60  ;;  %4134 = vmatmul.mubr.msk.f32.gmra.mrb[188].mxu1 %vm256_vm4, %v221_v53  ;;  %3797 = vmatprep.mubr.msk.f32.mxu0 %vm4221_vm0, %v4222_v6  ;;  %v227_v63 = vld [vmem:[%s6545_s0 + $0x6a8] sm:$0xff] }
 0x191   :  { %vm2167_vm2 = vcmp.gt.f32.partialorder %v1208_v59, 0.0  ;;  %v2392_v3 = vmul.f32 0.1, %v1208_v59  ;;  %vm2280_vm3 = vcmp.gt.f32.partialorder %v1773_v62, 0.0  ;;  %v2505_v4 = vmul.f32 0.1, %v1773_v62  ;;  %4136 = vmatprep.mubr.msk.f32.mxu1 %vm4221_vm0, %v4222_v6 }
 0x192   :  { %v1212_v5 = vpop.f32.mrb[84].mxu0  ;;  %v1777_v7 = vpop.f32.mrb[84].mxu1 }
 0x193   :  { %v2617_v8 = vsel %vm2167_vm2, %v1208_v59, %v2392_v3  ;;  %v2730_v9 = vsel %vm2280_vm3, %v1773_v62, %v2505_v4  ;;  %v1213_v10 = vadd.f32 %v5442_v2, %v1212_v5  ;;  %v3640_v11 = vpop.f32.mrb[85].mxu0  ;;  %3798 = vmatmul.mubr.msk.f32.gmra.mrb[190].mxu0 %vm256_vm4, %v109_v0  ;;  %v1778_v12 = vadd.f32 %v5442_v2, %v1777_v7  ;;  %v3979_v13 = vpop.f32.mrb[85].mxu1  ;;  %v114_v62 = vld [vmem:[%s6545_s0 + $0x320] sm:$0xff] }
 0x194   :  { %2842 = vst [vmem:[%s6547_s3 + $0x148] sm:$0xff] %v2617_v8  ;;  %2955 = vst [vmem:[%s6547_s3 + $0x4d0] sm:$0xff] %v2730_v9  ;;  %4137 = vmatmul.mubr.msk.f32.gmra.mrb[190].mxu1 %vm256_vm4, %v222_v1  ;;  %3800 = vmatprep.mubr.msk.f32.mxu0 %vm4221_vm0, %v4222_v6  ;;  %v228_v13 = vld [vmem:[%s6545_s0 + $0x6b0] sm:$0xff] }
 0x195   :  { %vm2168_vm5 = vcmp.gt.f32.partialorder %v1213_v10, 0.0  ;;  %v2393_v16 = vmul.f32 0.1, %v1213_v10  ;;  %vm2281_vm6 = vcmp.gt.f32.partialorder %v1778_v12, 0.0  ;;  %v2506_v17 = vmul.f32 0.1, %v1778_v12  ;;  %4139 = vmatprep.mubr.msk.f32.mxu1 %vm4221_vm0, %v4222_v6 }
 0x196   :  { %v1217_v18 = vpop.f32.mrb[86].mxu0  ;;  %v1782_v19 = vpop.f32.mrb[86].mxu1 }
 0x197   :  { %v2618_v20 = vsel %vm2168_vm5, %v1213_v10, %v2393_v16  ;;  %v2731_v21 = vsel %vm2281_vm6, %v1778_v12, %v2506_v17  ;;  %v1218_v22 = vadd.f32 %v5442_v2, %v1217_v18  ;;  %v3643_v23 = vpop.f32.mrb[87].mxu0  ;;  %3801 = vmatmul.mubr.msk.f32.gmra.mrb[192].mxu0 %vm256_vm4, %v110_v14  ;;  %v1783_v24 = vadd.f32 %v5442_v2, %v1782_v19  ;;  %v3982_v25 = vpop.f32.mrb[87].mxu1  ;;  %v115_v12 = vld [vmem:[%s6545_s0 + $0x328] sm:$0xff] }
 0x198   :  { %2843 = vst [vmem:[%s6547_s3 + $0x150] sm:$0xff] %v2618_v20  ;;  %2956 = vst [vmem:[%s6547_s3 + $0x4d8] sm:$0xff] %v2731_v21  ;;  %4140 = vmatmul.mubr.msk.f32.gmra.mrb[192].mxu1 %vm256_vm4, %v223_v15  ;;  %3803 = vmatprep.mubr.msk.f32.mxu0 %vm4221_vm0, %v4222_v6  ;;  %v229_v25 = vld [vmem:[%s6545_s0 + $0x6b8] sm:$0xff] }
 0x199   :  { %vm2169_vm7 = vcmp.gt.f32.partialorder %v1218_v22, 0.0  ;;  %v2394_v28 = vmul.f32 0.1, %v1218_v22  ;;  %vm2282_vm8 = vcmp.gt.f32.partialorder %v1783_v24, 0.0  ;;  %v2507_v29 = vmul.f32 0.1, %v1783_v24  ;;  %4142 = vmatprep.mubr.msk.f32.mxu1 %vm4221_vm0, %v4222_v6 }
 0x19a   :  { %v1222_v30 = vpop.f32.mrb[88].mxu0  ;;  %v1787_v31 = vpop.f32.mrb[88].mxu1 }
 0x19b   :  { %v2619_v32 = vsel %vm2169_vm7, %v1218_v22, %v2394_v28  ;;  %v2732_v33 = vsel %vm2282_vm8, %v1783_v24, %v2507_v29  ;;  %v1223_v34 = vadd.f32 %v5442_v2, %v1222_v30  ;;  %v3646_v35 = vpop.f32.mrb[89].mxu0  ;;  %3804 = vmatmul.mubr.msk.f32.gmra.mrb[194].mxu0 %vm256_vm4, %v111_v26  ;;  %v1788_v36 = vadd.f32 %v5442_v2, %v1787_v31  ;;  %v3985_v37 = vpop.f32.mrb[89].mxu1  ;;  %v116_v24 = vld [vmem:[%s6545_s0 + $0x330] sm:$0xff] }
 0x19c   :  { %2844 = vst [vmem:[%s6547_s3 + $0x158] sm:$0xff] %v2619_v32  ;;  %2957 = vst [vmem:[%s6547_s3 + $0x4e0] sm:$0xff] %v2732_v33  ;;  %4143 = vmatmul.mubr.msk.f32.gmra.mrb[194].mxu1 %vm256_vm4, %v224_v27  ;;  %3806 = vmatprep.mubr.msk.f32.mxu0 %vm4221_vm0, %v4222_v6  ;;  %v230_v37 = vld [vmem:[%s6545_s0 + $0x6c0] sm:$0xff] }
 0x19d   :  { %vm2170_vm9 = vcmp.gt.f32.partialorder %v1223_v34, 0.0  ;;  %v2395_v40 = vmul.f32 0.1, %v1223_v34  ;;  %vm2283_vm10 = vcmp.gt.f32.partialorder %v1788_v36, 0.0  ;;  %v2508_v41 = vmul.f32 0.1, %v1788_v36  ;;  %4145 = vmatprep.mubr.msk.f32.mxu1 %vm4221_vm0, %v4222_v6 }
 0x19e   :  { %v1227_v42 = vpop.f32.mrb[90].mxu0  ;;  %v1792_v43 = vpop.f32.mrb[90].mxu1 }
 0x19f   :  { %v2620_v44 = vsel %vm2170_vm9, %v1223_v34, %v2395_v40  ;;  %v2733_v45 = vsel %vm2283_vm10, %v1788_v36, %v2508_v41  ;;  %v1228_v46 = vadd.f32 %v5442_v2, %v1227_v42  ;;  %v3649_v47 = vpop.f32.mrb[91].mxu0  ;;  %3807 = vmatmul.mubr.msk.f32.gmra.mrb[196].mxu0 %vm256_vm4, %v112_v38  ;;  %v1793_v48 = vadd.f32 %v5442_v2, %v1792_v43  ;;  %v3988_v49 = vpop.f32.mrb[91].mxu1  ;;  %v117_v36 = vld [vmem:[%s6545_s0 + $0x338] sm:$0xff] }
 0x1a0   :  { %2845 = vst [vmem:[%s6547_s3 + $0x160] sm:$0xff] %v2620_v44  ;;  %2958 = vst [vmem:[%s6547_s3 + $0x4e8] sm:$0xff] %v2733_v45  ;;  %4146 = vmatmul.mubr.msk.f32.gmra.mrb[196].mxu1 %vm256_vm4, %v225_v39  ;;  %3809 = vmatprep.mubr.msk.f32.mxu0 %vm4221_vm0, %v4222_v6  ;;  %v231_v49 = vld [vmem:[%s6545_s0 + $0x6c8] sm:$0xff] }
 0x1a1   :  { %vm2171_vm11 = vcmp.gt.f32.partialorder %v1228_v46, 0.0  ;;  %v2396_v52 = vmul.f32 0.1, %v1228_v46  ;;  %vm2284_vm12 = vcmp.gt.f32.partialorder %v1793_v48, 0.0  ;;  %v2509_v53 = vmul.f32 0.1, %v1793_v48  ;;  %4148 = vmatprep.mubr.msk.f32.mxu1 %vm4221_vm0, %v4222_v6 }
 0x1a2   :  { %v1232_v54 = vpop.f32.mrb[92].mxu0  ;;  %v1797_v55 = vpop.f32.mrb[92].mxu1 }
 0x1a3   :  { %v2621_v56 = vsel %vm2171_vm11, %v1228_v46, %v2396_v52  ;;  %v2734_v57 = vsel %vm2284_vm12, %v1793_v48, %v2509_v53  ;;  %v1233_v58 = vadd.f32 %v5442_v2, %v1232_v54  ;;  %v3652_v60 = vpop.f32.mrb[93].mxu0  ;;  %3810 = vmatmul.mubr.msk.f32.gmra.mrb[198].mxu0 %vm256_vm4, %v113_v50  ;;  %v1798_v59 = vadd.f32 %v5442_v2, %v1797_v55  ;;  %v3991_v61 = vpop.f32.mrb[93].mxu1  ;;  %v118_v48 = vld [vmem:[%s6545_s0 + $0x340] sm:$0xff] }
 0x1a4   :  { %2846 = vst [vmem:[%s6547_s3 + $0x168] sm:$0xff] %v2621_v56  ;;  %2959 = vst [vmem:[%s6547_s3 + $0x4f0] sm:$0xff] %v2734_v57  ;;  %4149 = vmatmul.mubr.msk.f32.gmra.mrb[198].mxu1 %vm256_vm4, %v226_v51  ;;  %3812 = vmatprep.mubr.msk.f32.mxu0 %vm4221_vm0, %v4222_v6 }
 0x1a5   :  { %vm2172_vm13 = vcmp.gt.f32.partialorder %v1233_v58, 0.0  ;;  %v2397_v0 = vmul.f32 0.1, %v1233_v58  ;;  %vm2285_vm14 = vcmp.gt.f32.partialorder %v1798_v59, 0.0  ;;  %v2510_v1 = vmul.f32 0.1, %v1798_v59  ;;  %4151 = vmatprep.mubr.msk.f32.mxu1 %vm4221_vm0, %v4222_v6 }
 0x1a6   :  { %v1237_v3 = vpop.f32.mrb[94].mxu0  ;;  %v1802_v4 = vpop.f32.mrb[94].mxu1 }
 0x1a7   :  { %v2622_v5 = vsel %vm2172_vm13, %v1233_v58, %v2397_v0  ;;  %v2735_v7 = vsel %vm2285_vm14, %v1798_v59, %v2510_v1  ;;  %v1238_v8 = vadd.f32 %v5442_v2, %v1237_v3  ;;  %v3655_v9 = vpop.f32.mrb[95].mxu0  ;;  %3813 = vmatmul.mubr.msk.f32.gmra.mrb[200].mxu0 %vm256_vm4, %v114_v62  ;;  %v1803_v10 = vadd.f32 %v5442_v2, %v1802_v4  ;;  %v3994_v11 = vpop.f32.mrb[95].mxu1  ;;  %v119_v59 = vld [vmem:[%s6545_s0 + $0x348] sm:$0xff]  ;;  %v5967_v4 = vld [vmem:[%s6546_s2] ss:$0 sm:$0xff] }
 0x1a8   :  { %2847 = vst [vmem:[%s6547_s3 + $0x170] sm:$0xff] %v2622_v5  ;;  %2960 = vst [vmem:[%s6547_s3 + $0x4f8] sm:$0xff] %v2735_v7  ;;  %4152 = vmatmul.mubr.msk.f32.gmra.mrb[200].mxu1 %vm256_vm4, %v227_v63  ;;  %3815 = vmatprep.mubr.msk.f32.mxu0 %vm4221_vm0, %v4222_v6  ;;  %v233_v11 = vld [vmem:[%s6545_s0 + $0x6d8] sm:$0xff] }
 0x1a9   :  { %vm2173_vm15 = vcmp.gt.f32.partialorder %v1238_v8, 0.0  ;;  %v2398_v14 = vmul.f32 0.1, %v1238_v8  ;;  %vm2286_vm1 = vcmp.gt.f32.partialorder %v1803_v10, 0.0  ;;  %v2511_v15 = vmul.f32 0.1, %v1803_v10  ;;  %4154 = vmatprep.mubr.msk.f32.mxu1 %vm4221_vm0, %v4222_v6 }
 0x1aa   :  { %v1242_v16 = vpop.f32.mrb[96].mxu0  ;;  %v1807_v17 = vpop.f32.mrb[96].mxu1 }
 0x1ab   :  { %v2623_v18 = vsel %vm2173_vm15, %v1238_v8, %v2398_v14  ;;  %v2736_v19 = vsel %vm2286_vm1, %v1803_v10, %v2511_v15  ;;  %v1243_v20 = vadd.f32 %v5442_v2, %v1242_v16  ;;  %v3658_v21 = vpop.f32.mrb[97].mxu0  ;;  %3816 = vmatmul.mubr.msk.f32.gmra.mrb[202].mxu0 %vm256_vm4, %v115_v12  ;;  %v1808_v22 = vadd.f32 %v5442_v2, %v1807_v17  ;;  %v3997_v23 = vpop.f32.mrb[97].mxu1  ;;  %v120_v10 = vld [vmem:[%s6545_s0 + $0x350] sm:$0xff] }
 0x1ac   :  { %2848 = vst [vmem:[%s6547_s3 + $0x178] sm:$0xff] %v2623_v18  ;;  %2961 = vst [vmem:[%s6547_s3 + $0x500] sm:$0xff] %v2736_v19  ;;  %4155 = vmatmul.mubr.msk.f32.gmra.mrb[202].mxu1 %vm256_vm4, %v228_v13  ;;  %3818 = vmatprep.mubr.msk.f32.mxu0 %vm4221_vm0, %v4222_v6  ;;  %v234_v23 = vld [vmem:[%s6545_s0 + $0x6e0] sm:$0xff] }
 0x1ad   :  { %vm2174_vm2 = vcmp.gt.f32.partialorder %v1243_v20, 0.0  ;;  %v2399_v26 = vmul.f32 0.1, %v1243_v20  ;;  %vm2287_vm3 = vcmp.gt.f32.partialorder %v1808_v22, 0.0  ;;  %v2512_v27 = vmul.f32 0.1, %v1808_v22  ;;  %4157 = vmatprep.mubr.msk.f32.mxu1 %vm4221_vm0, %v4222_v6 }
 0x1ae   :  { %v1247_v28 = vpop.f32.mrb[98].mxu0  ;;  %v1812_v29 = vpop.f32.mrb[98].mxu1 }
 0x1af   :  { %v2624_v30 = vsel %vm2174_vm2, %v1243_v20, %v2399_v26  ;;  %v2737_v31 = vsel %vm2287_vm3, %v1808_v22, %v2512_v27  ;;  %v1248_v32 = vadd.f32 %v5442_v2, %v1247_v28  ;;  %v3661_v33 = vpop.f32.mrb[99].mxu0  ;;  %3819 = vmatmul.mubr.msk.f32.gmra.mrb[204].mxu0 %vm256_vm4, %v116_v24  ;;  %v1813_v34 = vadd.f32 %v5442_v2, %v1812_v29  ;;  %v4000_v35 = vpop.f32.mrb[99].mxu1  ;;  %v121_v22 = vld [vmem:[%s6545_s0 + $0x358] sm:$0xff] }
 0x1b0   :  { %2849 = vst [vmem:[%s6547_s3 + $0x180] sm:$0xff] %v2624_v30  ;;  %2962 = vst [vmem:[%s6547_s3 + $0x508] sm:$0xff] %v2737_v31  ;;  %4158 = vmatmul.mubr.msk.f32.gmra.mrb[204].mxu1 %vm256_vm4, %v229_v25  ;;  %3821 = vmatprep.mubr.msk.f32.mxu0 %vm4221_vm0, %v4222_v6 }
 0x1b1   :  { %vm2175_vm5 = vcmp.gt.f32.partialorder %v1248_v32, 0.0  ;;  %v2400_v38 = vmul.f32 0.1, %v1248_v32  ;;  %vm2288_vm6 = vcmp.gt.f32.partialorder %v1813_v34, 0.0  ;;  %v2513_v39 = vmul.f32 0.1, %v1813_v34  ;;  %4160 = vmatprep.mubr.msk.f32.mxu1 %vm4221_vm0, %v4222_v6 }
 0x1b2   :  { %v1252_v40 = vpop.f32.mrb[100].mxu0  ;;  %v1817_v41 = vpop.f32.mrb[100].mxu1 }
 0x1b3   :  { %v2625_v42 = vsel %vm2175_vm5, %v1248_v32, %v2400_v38  ;;  %v2738_v43 = vsel %vm2288_vm6, %v1813_v34, %v2513_v39  ;;  %v1253_v44 = vadd.f32 %v5442_v2, %v1252_v40  ;;  %v3664_v45 = vpop.f32.mrb[101].mxu0  ;;  %3822 = vmatmul.mubr.msk.f32.gmra.mrb[206].mxu0 %vm256_vm4, %v117_v36  ;;  %v1818_v46 = vadd.f32 %v5442_v2, %v1817_v41  ;;  %v4003_v47 = vpop.f32.mrb[101].mxu1  ;;  %v122_v34 = vld [vmem:[%s6545_s0 + $0x360] sm:$0xff]  ;;  %v235_v36 = vld [vmem:[%s6545_s0 + $0x6e8] sm:$0xff] }
 0x1b4   :  { %2850 = vst [vmem:[%s6547_s3 + $0x188] sm:$0xff] %v2625_v42  ;;  %2963 = vst [vmem:[%s6547_s3 + $0x510] sm:$0xff] %v2738_v43  ;;  %4161 = vmatmul.mubr.msk.f32.gmra.mrb[206].mxu1 %vm256_vm4, %v230_v37  ;;  %3824 = vmatprep.mubr.msk.f32.mxu0 %vm4221_vm0, %v4222_v6 }
 0x1b5   :  { %vm2176_vm7 = vcmp.gt.f32.partialorder %v1253_v44, 0.0  ;;  %v2401_v50 = vmul.f32 0.1, %v1253_v44  ;;  %vm2289_vm8 = vcmp.gt.f32.partialorder %v1818_v46, 0.0  ;;  %v2514_v51 = vmul.f32 0.1, %v1818_v46  ;;  %4163 = vmatprep.mubr.msk.f32.mxu1 %vm4221_vm0, %v4222_v6 }
 0x1b6   :  { %v1257_v52 = vpop.f32.mrb[102].mxu0  ;;  %v1822_v53 = vpop.f32.mrb[102].mxu1 }
 0x1b7   :  { %v2626_v54 = vsel %vm2176_vm7, %v1253_v44, %v2401_v50  ;;  %v2739_v55 = vsel %vm2289_vm8, %v1818_v46, %v2514_v51  ;;  %v1258_v56 = vadd.f32 %v5442_v2, %v1257_v52  ;;  %v3667_v57 = vpop.f32.mrb[103].mxu0  ;;  %3825 = vmatmul.mubr.msk.f32.gmra.mrb[208].mxu0 %vm256_vm4, %v118_v48  ;;  %v1823_v58 = vadd.f32 %v5442_v2, %v1822_v53  ;;  %v4006_v60 = vpop.f32.mrb[103].mxu1  ;;  %v232_v2 = vld [vmem:[%s6545_s0 + $0x6d0] sm:$0xff]  ;;  %v123_v46 = vld [vmem:[%s6545_s0 + $0x368] sm:$0xff] }
 0x1b8   :  { %2851 = vst [vmem:[%s6547_s3 + $0x190] sm:$0xff] %v2626_v54  ;;  %2964 = vst [vmem:[%s6547_s3 + $0x518] sm:$0xff] %v2739_v55  ;;  %4164 = vmatmul.mubr.msk.f32.gmra.mrb[208].mxu1 %vm256_vm4, %v231_v49  ;;  %3827 = vmatprep.mubr.msk.f32.mxu0 %vm4221_vm0, %v4222_v6  ;;  %v236_v48 = vld [vmem:[%s6545_s0 + $0x6f0] sm:$0xff] }
 0x1b9   :  { %vm2177_vm9 = vcmp.gt.f32.partialorder %v1258_v56, 0.0  ;;  %v2402_v61 = vmul.f32 0.1, %v1258_v56  ;;  %vm2290_vm10 = vcmp.gt.f32.partialorder %v1823_v58, 0.0  ;;  %v2515_v62 = vmul.f32 0.1, %v1823_v58  ;;  %4166 = vmatprep.mubr.msk.f32.mxu1 %vm4221_vm0, %v4222_v6 }
 0x1ba   :  { %v1262_v63 = vpop.f32.mrb[104].mxu0  ;;  %v1827_v0 = vpop.f32.mrb[104].mxu1 }
 0x1bb   :  { %v2627_v1 = vsel %vm2177_vm9, %v1258_v56, %v2402_v61  ;;  %v2740_v3 = vsel %vm2290_vm10, %v1823_v58, %v2515_v62  ;;  %v1263_v5 = vadd.f32 %v5967_v4, %v1262_v63  ;;  %v3670_v7 = vpop.f32.mrb[105].mxu0  ;;  %3828 = vmatmul.mubr.msk.f32.gmra.mrb[210].mxu0 %vm256_vm4, %v119_v59  ;;  %v1828_v8 = vadd.f32 %v5967_v4, %v1827_v0  ;;  %v4009_v9 = vpop.f32.mrb[105].mxu1  ;;  %v124_v58 = vld [vmem:[%s6545_s0 + $0x370] sm:$0xff]  ;;  %v237_v59 = vld [vmem:[%s6545_s0 + $0x6f8] sm:$0xff] }
 0x1bc   :  { %2852 = vst [vmem:[%s6547_s3 + $0x198] sm:$0xff] %v2627_v1  ;;  %2965 = vst [vmem:[%s6547_s3 + $0x520] sm:$0xff] %v2740_v3  ;;  %4167 = vmatmul.mubr.msk.f32.gmra.mrb[210].mxu1 %vm256_vm4, %v232_v2  ;;  %3830 = vmatprep.mubr.msk.f32.mxu0 %vm4221_vm0, %v4222_v6 }
 0x1bd   :  { %vm2178_vm11 = vcmp.gt.f32.partialorder %v1263_v5, 0.0  ;;  %v2403_v12 = vmul.f32 0.1, %v1263_v5  ;;  %vm2291_vm12 = vcmp.gt.f32.partialorder %v1828_v8, 0.0  ;;  %v2516_v13 = vmul.f32 0.1, %v1828_v8  ;;  %4169 = vmatprep.mubr.msk.f32.mxu1 %vm4221_vm0, %v4222_v6 }
 0x1be   :  { %v1267_v14 = vpop.f32.mrb[106].mxu0  ;;  %v1832_v15 = vpop.f32.mrb[106].mxu1 }
 0x1bf   :  { %v2628_v16 = vsel %vm2178_vm11, %v1263_v5, %v2403_v12  ;;  %v2741_v17 = vsel %vm2291_vm12, %v1828_v8, %v2516_v13  ;;  %v1268_v18 = vadd.f32 %v5967_v4, %v1267_v14  ;;  %v3673_v19 = vpop.f32.mrb[107].mxu0  ;;  %3831 = vmatmul.mubr.msk.f32.gmra.mrb[212].mxu0 %vm256_vm4, %v120_v10  ;;  %v1833_v20 = vadd.f32 %v5967_v4, %v1832_v15  ;;  %v4012_v21 = vpop.f32.mrb[107].mxu1  ;;  %v125_v8 = vld [vmem:[%s6545_s0 + $0x378] sm:$0xff]  ;;  %v238_v10 = vld [vmem:[%s6545_s0 + $0x700] sm:$0xff] }
 0x1c0   :  { %2853 = vst [vmem:[%s6547_s3 + $0x1a0] sm:$0xff] %v2628_v16  ;;  %2966 = vst [vmem:[%s6547_s3 + $0x528] sm:$0xff] %v2741_v17  ;;  %4170 = vmatmul.mubr.msk.f32.gmra.mrb[212].mxu1 %vm256_vm4, %v233_v11  ;;  %3833 = vmatprep.mubr.msk.f32.mxu0 %vm4221_vm0, %v4222_v6 }
 0x1c1   :  { %vm2179_vm13 = vcmp.gt.f32.partialorder %v1268_v18, 0.0  ;;  %v2404_v24 = vmul.f32 0.1, %v1268_v18  ;;  %vm2292_vm14 = vcmp.gt.f32.partialorder %v1833_v20, 0.0  ;;  %v2517_v25 = vmul.f32 0.1, %v1833_v20  ;;  %4172 = vmatprep.mubr.msk.f32.mxu1 %vm4221_vm0, %v4222_v6 }
 0x1c2   :  { %v1272_v26 = vpop.f32.mrb[108].mxu0 }
 0x1c3   :  { %v2629_v27 = vsel %vm2179_vm13, %v1268_v18, %v2404_v24  ;;  %v2742_v28 = vsel %vm2292_vm14, %v1833_v20, %v2517_v25  ;;  %v1273_v29 = vadd.f32 %v5967_v4, %v1272_v26  ;;  %v3676_v30 = vpop.f32.mrb[109].mxu0  ;;  %3834 = vmatmul.mubr.msk.f32.gmra.mrb[214].mxu0 %vm256_vm4, %v121_v22  ;;  %v1837_v31 = vpop.f32.mrb[108].mxu1  ;;  %v126_v20 = vld [vmem:[%s6545_s0 + $0x380] sm:$0xff] }
 0x1c4   :  { %2854 = vst [vmem:[%s6547_s3 + $0x1a8] sm:$0xff] %v2629_v27  ;;  %2967 = vst [vmem:[%s6547_s3 + $0x530] sm:$0xff] %v2742_v28  ;;  %v1838_v32 = vadd.f32 %v5967_v4, %v1837_v31  ;;  %4173 = vmatmul.mubr.msk.f32.gmra.mrb[214].mxu1 %vm256_vm4, %v234_v23  ;;  %3836 = vmatprep.mubr.msk.f32.mxu0 %vm4221_vm0, %v4222_v6  ;;  %v4015_v33 = vpop.f32.mrb[109].mxu1 }
 0x1c5   :  { %vm2180_vm15 = vcmp.gt.f32.partialorder %v1273_v29, 0.0  ;;  %v2405_v35 = vmul.f32 0.1, %v1273_v29  ;;  %4175 = vmatprep.mubr.msk.f32.mxu1 %vm4221_vm0, %v4222_v6 }
 0x1c6   :  { %vm2293_vm1 = vcmp.gt.f32.partialorder %v1838_v32, 0.0  ;;  %v2518_v37 = vmul.f32 0.1, %v1838_v32  ;;  %v1277_v38 = vpop.f32.mrb[110].mxu0 }
 0x1c7   :  { %v2630_v39 = vsel %vm2180_vm15, %v1273_v29, %v2405_v35  ;;  %v1278_v40 = vadd.f32 %v5967_v4, %v1277_v38  ;;  %v3679_v41 = vpop.f32.mrb[111].mxu0  ;;  %3837 = vmatmul.mubr.msk.f32.gmra.mrb[216].mxu0 %vm256_vm4, %v122_v34  ;;  %v1842_v42 = vpop.f32.mrb[110].mxu1 }
 0x1c8   :  { %2855 = vst [vmem:[%s6547_s3 + $0x1b0] sm:$0xff] %v2630_v39  ;;  %v2743_v43 = vsel %vm2293_vm1, %v1838_v32, %v2518_v37  ;;  %v1843_v44 = vadd.f32 %v5967_v4, %v1842_v42  ;;  %4176 = vmatmul.mubr.msk.f32.gmra.mrb[216].mxu1 %vm256_vm4, %v235_v36  ;;  %3839 = vmatprep.mubr.msk.f32.mxu0 %vm4221_vm0, %v4222_v6  ;;  %v4018_v45 = vpop.f32.mrb[111].mxu1 }
 0x1c9   :  { %2968 = vst [vmem:[%s6547_s3 + $0x538] sm:$0xff] %v2743_v43  ;;  %vm2181_vm2 = vcmp.gt.f32.partialorder %v1278_v40, 0.0  ;;  %v2406_v47 = vmul.f32 0.1, %v1278_v40  ;;  %4178 = vmatprep.mubr.msk.f32.mxu1 %vm4221_vm0, %v4222_v6 }
 0x1ca   :  { %vm2294_vm3 = vcmp.gt.f32.partialorder %v1843_v44, 0.0  ;;  %v2519_v49 = vmul.f32 0.1, %v1843_v44  ;;  %v1282_v50 = vpop.f32.mrb[112].mxu0 }
 0x1cb   :  { %v2631_v51 = vsel %vm2181_vm2, %v1278_v40, %v2406_v47  ;;  %v1283_v52 = vadd.f32 %v5967_v4, %v1282_v50  ;;  %v3682_v53 = vpop.f32.mrb[113].mxu0  ;;  %3840 = vmatmul.mubr.msk.f32.gmra.mrb[218].mxu0 %vm256_vm4, %v123_v46  ;;  %v1847_v54 = vpop.f32.mrb[112].mxu1 }
 0x1cc   :  { %2856 = vst [vmem:[%s6547_s3 + $0x1b8] sm:$0xff] %v2631_v51  ;;  %v2744_v55 = vsel %vm2294_vm3, %v1843_v44, %v2519_v49  ;;  %v1848_v56 = vadd.f32 %v5967_v4, %v1847_v54  ;;  %4179 = vmatmul.mubr.msk.f32.gmra.mrb[218].mxu1 %vm256_vm4, %v236_v48  ;;  %3842 = vmatprep.mubr.msk.f32.mxu0 %vm4221_vm0, %v4222_v6  ;;  %v4021_v57 = vpop.f32.mrb[113].mxu1 }
 0x1cd   :  { %2969 = vst [vmem:[%s6547_s3 + $0x540] sm:$0xff] %v2744_v55  ;;  %vm2182_vm5 = vcmp.gt.f32.partialorder %v1283_v52, 0.0  ;;  %v2407_v60 = vmul.f32 0.1, %v1283_v52  ;;  %4181 = vmatprep.mubr.msk.f32.mxu1 %vm4221_vm0, %v4222_v6 }
 0x1ce   :  { %vm2295_vm6 = vcmp.gt.f32.partialorder %v1848_v56, 0.0  ;;  %v2520_v2 = vmul.f32 0.1, %v1848_v56  ;;  %v1287_v61 = vpop.f32.mrb[114].mxu0 }
 0x1cf   :  { %v2632_v62 = vsel %vm2182_vm5, %v1283_v52, %v2407_v60  ;;  %v1288_v63 = vadd.f32 %v5967_v4, %v1287_v61  ;;  %v3685_v0 = vpop.f32.mrb[115].mxu0  ;;  %3843 = vmatmul.mubr.msk.f32.gmra.mrb[220].mxu0 %vm256_vm4, %v124_v58  ;;  %v1852_v1 = vpop.f32.mrb[114].mxu1 }
 0x1d0   :  { %2857 = vst [vmem:[%s6547_s3 + $0x1c0] sm:$0xff] %v2632_v62  ;;  %v2745_v3 = vsel %vm2295_vm6, %v1848_v56, %v2520_v2  ;;  %v1853_v5 = vadd.f32 %v5967_v4, %v1852_v1  ;;  %4182 = vmatmul.mubr.msk.f32.gmra.mrb[220].mxu1 %vm256_vm4, %v237_v59  ;;  %3845 = vmatprep.mubr.msk.f32.mxu0 %vm4221_vm0, %v4222_v6  ;;  %v4024_v7 = vpop.f32.mrb[115].mxu1 }
 0x1d1   :  { %2970 = vst [vmem:[%s6547_s3 + $0x548] sm:$0xff] %v2745_v3  ;;  %vm2183_vm7 = vcmp.gt.f32.partialorder %v1288_v63, 0.0  ;;  %v2408_v9 = vmul.f32 0.1, %v1288_v63  ;;  %4184 = vmatprep.mubr.msk.f32.mxu1 %vm4221_vm0, %v4222_v6 }
 0x1d2   :  { %vm2296_vm8 = vcmp.gt.f32.partialorder %v1853_v5, 0.0  ;;  %v2521_v11 = vmul.f32 0.1, %v1853_v5  ;;  %v1292_v12 = vpop.f32.mrb[116].mxu0 }
 0x1d3   :  { %v2633_v13 = vsel %vm2183_vm7, %v1288_v63, %v2408_v9  ;;  %v1293_v14 = vadd.f32 %v5967_v4, %v1292_v12  ;;  %v3688_v15 = vpop.f32.mrb[117].mxu0  ;;  %3846 = vmatmul.mubr.msk.f32.gmra.mrb[222].mxu0 %vm256_vm4, %v125_v8  ;;  %v1857_v16 = vpop.f32.mrb[116].mxu1 }
 0x1d4   :  { %2858 = vst [vmem:[%s6547_s3 + $0x1c8] sm:$0xff] %v2633_v13  ;;  %v2746_v17 = vsel %vm2296_vm8, %v1853_v5, %v2521_v11  ;;  %v1858_v18 = vadd.f32 %v5967_v4, %v1857_v16  ;;  %4185 = vmatmul.mubr.msk.f32.gmra.mrb[222].mxu1 %vm256_vm4, %v238_v10  ;;  %3848 = vmatprep.mubr.msk.f32.mxu0 %vm4221_vm0, %v4222_v6  ;;  %v4027_v19 = vpop.f32.mrb[117].mxu1 }
 0x1d5   :  { %2971 = vst [vmem:[%s6547_s3 + $0x550] sm:$0xff] %v2746_v17  ;;  %vm2184_vm9 = vcmp.gt.f32.partialorder %v1293_v14, 0.0  ;;  %v2409_v21 = vmul.f32 0.1, %v1293_v14 }
 0x1d6   :  { %vm2297_vm10 = vcmp.gt.f32.partialorder %v1858_v18, 0.0  ;;  %v2522_v22 = vmul.f32 0.1, %v1858_v18  ;;  %v1297_v23 = vpop.f32.mrb[118].mxu0 }
 0x1d7   :  { %v2634_v24 = vsel %vm2184_vm9, %v1293_v14, %v2409_v21  ;;  %v1298_v25 = vadd.f32 %v5967_v4, %v1297_v23  ;;  %v3691_v26 = vpop.f32.mrb[119].mxu0  ;;  %3849 = vmatmul.mubr.msk.f32.gmra.mrb[224].mxu0 %vm256_vm4, %v126_v20  ;;  %v1862_v6 = vpop.f32.mrb[118].mxu1 }
 0x1d8   :  { %2859 = vst [vmem:[%s6547_s3 + $0x1d0] sm:$0xff] %v2634_v24  ;;  %v2747_v27 = vsel %vm2297_vm10, %v1858_v18, %v2522_v22  ;;  %v1863_v28 = vadd.f32 %v5967_v4, %v1862_v6  ;;  %v4030_v29 = vpop.f32.mrb[119].mxu1 }
 0x1d9   :  { %2972 = vst [vmem:[%s6547_s3 + $0x558] sm:$0xff] %v2747_v27  ;;  %vm2185_vm0 = vcmp.gt.f32.partialorder %v1298_v25, 0.0  ;;  %v2410_v30 = vmul.f32 0.1, %v1298_v25 }
 0x1da   :  { %vm2298_vm11 = vcmp.gt.f32.partialorder %v1863_v28, 0.0  ;;  %v2523_v31 = vmul.f32 0.1, %v1863_v28  ;;  %v1302_v32 = vpop.f32.mrb[120].mxu0 }
 0x1db   :  { %v2635_v33 = vsel %vm2185_vm0, %v1298_v25, %v2410_v30  ;;  %v1303_v34 = vadd.f32 %v5967_v4, %v1302_v32  ;;  %v3694_v35 = vpop.f32.mrb[121].mxu0  ;;  %v1867_v36 = vpop.f32.mrb[120].mxu1 }
 0x1dc   :  { %2860 = vst [vmem:[%s6547_s3 + $0x1d8] sm:$0xff] %v2635_v33  ;;  %v2748_v37 = vsel %vm2298_vm11, %v1863_v28, %v2523_v31  ;;  %v1868_v38 = vadd.f32 %v5967_v4, %v1867_v36  ;;  %v4033_v39 = vpop.f32.mrb[121].mxu1 }
 0x1dd   :  { %2973 = vst [vmem:[%s6547_s3 + $0x560] sm:$0xff] %v2748_v37  ;;  %vm2186_vm4 = vcmp.gt.f32.partialorder %v1303_v34, 0.0  ;;  %v2411_v40 = vmul.f32 0.1, %v1303_v34 }
 0x1de   :  { %vm2299_vm12 = vcmp.gt.f32.partialorder %v1868_v38, 0.0  ;;  %v2524_v41 = vmul.f32 0.1, %v1868_v38  ;;  %v1307_v42 = vpop.f32.mrb[122].mxu0 }
 0x1df   :  { %v2636_v43 = vsel %vm2186_vm4, %v1303_v34, %v2411_v40  ;;  %v1308_v44 = vadd.f32 %v5967_v4, %v1307_v42  ;;  %v3697_v45 = vpop.f32.mrb[123].mxu0  ;;  %v1872_v46 = vpop.f32.mrb[122].mxu1 }
 0x1e0   :  { %2861 = vst [vmem:[%s6547_s3 + $0x1e0] sm:$0xff] %v2636_v43  ;;  %v2749_v47 = vsel %vm2299_vm12, %v1868_v38, %v2524_v41  ;;  %v1873_v48 = vadd.f32 %v5967_v4, %v1872_v46  ;;  %v4036_v49 = vpop.f32.mrb[123].mxu1 }
 0x1e1   :  { %2974 = vst [vmem:[%s6547_s3 + $0x568] sm:$0xff] %v2749_v47  ;;  %vm2187_vm13 = vcmp.gt.f32.partialorder %v1308_v44, 0.0  ;;  %v2412_v50 = vmul.f32 0.1, %v1308_v44 }
 0x1e2   :  { %vm2300_vm14 = vcmp.gt.f32.partialorder %v1873_v48, 0.0  ;;  %v2525_v51 = vmul.f32 0.1, %v1873_v48  ;;  %v1312_v52 = vpop.f32.mrb[124].mxu0 }
 0x1e3   :  { %v2637_v53 = vsel %vm2187_vm13, %v1308_v44, %v2412_v50  ;;  %v1313_v54 = vadd.f32 %v5967_v4, %v1312_v52  ;;  %v3700_v55 = vpop.f32.mrb[125].mxu0  ;;  %v1877_v56 = vpop.f32.mrb[124].mxu1 }
 0x1e4   :  { %2862 = vst [vmem:[%s6547_s3 + $0x1e8] sm:$0xff] %v2637_v53  ;;  %v2750_v57 = vsel %vm2300_vm14, %v1873_v48, %v2525_v51  ;;  %v1878_v58 = vadd.f32 %v5967_v4, %v1877_v56  ;;  %v4039_v60 = vpop.f32.mrb[125].mxu1 }
 0x1e5   :  { %2975 = vst [vmem:[%s6547_s3 + $0x570] sm:$0xff] %v2750_v57  ;;  %vm2188_vm15 = vcmp.gt.f32.partialorder %v1313_v54, 0.0  ;;  %v2413_v59 = vmul.f32 0.1, %v1313_v54 }
 0x1e6   :  { %vm2301_vm1 = vcmp.gt.f32.partialorder %v1878_v58, 0.0  ;;  %v2526_v2 = vmul.f32 0.1, %v1878_v58  ;;  %v1317_v61 = vpop.f32.mrb[126].mxu0 }
 0x1e7   :  { %v2638_v62 = vsel %vm2188_vm15, %v1313_v54, %v2413_v59  ;;  %v1318_v63 = vadd.f32 %v5967_v4, %v1317_v61  ;;  %v3703_v0 = vpop.f32.mrb[127].mxu0  ;;  %v1882_v1 = vpop.f32.mrb[126].mxu1 }
 0x1e8   :  { %2863 = vst [vmem:[%s6547_s3 + $0x1f0] sm:$0xff] %v2638_v62  ;;  %v2751_v3 = vsel %vm2301_vm1, %v1878_v58, %v2526_v2  ;;  %v1883_v5 = vadd.f32 %v5967_v4, %v1882_v1  ;;  %v4042_v7 = vpop.f32.mrb[127].mxu1 }
 0x1e9   :  { %2976 = vst [vmem:[%s6547_s3 + $0x578] sm:$0xff] %v2751_v3  ;;  %vm2189_vm2 = vcmp.gt.f32.partialorder %v1318_v63, 0.0  ;;  %v2414_v8 = vmul.f32 0.1, %v1318_v63 }
 0x1ea   :  { %vm2302_vm3 = vcmp.gt.f32.partialorder %v1883_v5, 0.0  ;;  %v2527_v9 = vmul.f32 0.1, %v1883_v5  ;;  %v1322_v10 = vpop.f32.mrb[128].mxu0 }
 0x1eb   :  { %v2639_v11 = vsel %vm2189_vm2, %v1318_v63, %v2414_v8  ;;  %v1323_v12 = vadd.f32 %v5967_v4, %v1322_v10  ;;  %v3706_v13 = vpop.f32.mrb[129].mxu0  ;;  %v1887_v14 = vpop.f32.mrb[128].mxu1 }
 0x1ec   :  { %2864 = vst [vmem:[%s6547_s3 + $0x1f8] sm:$0xff] %v2639_v11  ;;  %v2752_v15 = vsel %vm2302_vm3, %v1883_v5, %v2527_v9  ;;  %v1888_v16 = vadd.f32 %v5967_v4, %v1887_v14  ;;  %v4045_v17 = vpop.f32.mrb[129].mxu1 }
 0x1ed   :  { %2977 = vst [vmem:[%s6547_s3 + $0x580] sm:$0xff] %v2752_v15  ;;  %vm2190_vm5 = vcmp.gt.f32.partialorder %v1323_v12, 0.0  ;;  %v2415_v18 = vmul.f32 0.1, %v1323_v12 }
 0x1ee   :  { %vm2303_vm6 = vcmp.gt.f32.partialorder %v1888_v16, 0.0  ;;  %v2528_v19 = vmul.f32 0.1, %v1888_v16  ;;  %v1327_v20 = vpop.f32.mrb[130].mxu0 }
 0x1ef   :  { %v2640_v21 = vsel %vm2190_vm5, %v1323_v12, %v2415_v18  ;;  %v1328_v22 = vadd.f32 %v5967_v4, %v1327_v20  ;;  %v3709_v23 = vpop.f32.mrb[131].mxu0  ;;  %v1892_v24 = vpop.f32.mrb[130].mxu1 }
 0x1f0   :  { %2865 = vst [vmem:[%s6547_s3 + $0x200] sm:$0xff] %v2640_v21  ;;  %v2753_v25 = vsel %vm2303_vm6, %v1888_v16, %v2528_v19  ;;  %v1893_v26 = vadd.f32 %v5967_v4, %v1892_v24  ;;  %v4048_v6 = vpop.f32.mrb[131].mxu1 }
 0x1f1   :  { %2978 = vst [vmem:[%s6547_s3 + $0x588] sm:$0xff] %v2753_v25  ;;  %vm2191_vm7 = vcmp.gt.f32.partialorder %v1328_v22, 0.0  ;;  %v2416_v27 = vmul.f32 0.1, %v1328_v22 }
 0x1f2   :  { %vm2304_vm8 = vcmp.gt.f32.partialorder %v1893_v26, 0.0  ;;  %v2529_v28 = vmul.f32 0.1, %v1893_v26  ;;  %v1332_v29 = vpop.f32.mrb[132].mxu0 }
 0x1f3   :  { %v2641_v30 = vsel %vm2191_vm7, %v1328_v22, %v2416_v27  ;;  %v1333_v31 = vadd.f32 %v5967_v4, %v1332_v29  ;;  %v3712_v32 = vpop.f32.mrb[133].mxu0  ;;  %v1897_v33 = vpop.f32.mrb[132].mxu1 }
 0x1f4   :  { %2866 = vst [vmem:[%s6547_s3 + $0x208] sm:$0xff] %v2641_v30  ;;  %v2754_v34 = vsel %vm2304_vm8, %v1893_v26, %v2529_v28  ;;  %v1898_v35 = vadd.f32 %v5967_v4, %v1897_v33  ;;  %v4051_v36 = vpop.f32.mrb[133].mxu1 }
 0x1f5   :  { %2979 = vst [vmem:[%s6547_s3 + $0x590] sm:$0xff] %v2754_v34  ;;  %vm2192_vm9 = vcmp.gt.f32.partialorder %v1333_v31, 0.0  ;;  %v2417_v37 = vmul.f32 0.1, %v1333_v31 }
 0x1f6   :  { %vm2305_vm10 = vcmp.gt.f32.partialorder %v1898_v35, 0.0  ;;  %v2530_v38 = vmul.f32 0.1, %v1898_v35  ;;  %v1337_v39 = vpop.f32.mrb[134].mxu0 }
 0x1f7   :  { %v2642_v40 = vsel %vm2192_vm9, %v1333_v31, %v2417_v37  ;;  %v1338_v41 = vadd.f32 %v5967_v4, %v1337_v39  ;;  %v3715_v42 = vpop.f32.mrb[135].mxu0  ;;  %v1902_v43 = vpop.f32.mrb[134].mxu1 }
 0x1f8   :  { %2867 = vst [vmem:[%s6547_s3 + $0x210] sm:$0xff] %v2642_v40  ;;  %v2755_v44 = vsel %vm2305_vm10, %v1898_v35, %v2530_v38  ;;  %v1903_v45 = vadd.f32 %v5967_v4, %v1902_v43  ;;  %v4054_v46 = vpop.f32.mrb[135].mxu1 }
 0x1f9   :  { %2980 = vst [vmem:[%s6547_s3 + $0x598] sm:$0xff] %v2755_v44  ;;  %vm2193_vm0 = vcmp.gt.f32.partialorder %v1338_v41, 0.0  ;;  %v2418_v47 = vmul.f32 0.1, %v1338_v41 }
 0x1fa   :  { %vm2306_vm11 = vcmp.gt.f32.partialorder %v1903_v45, 0.0  ;;  %v2531_v48 = vmul.f32 0.1, %v1903_v45  ;;  %v1342_v49 = vpop.f32.mrb[136].mxu0 }
 0x1fb   :  { %v2643_v50 = vsel %vm2193_vm0, %v1338_v41, %v2418_v47  ;;  %v1343_v51 = vadd.f32 %v5967_v4, %v1342_v49  ;;  %v3718_v52 = vpop.f32.mrb[137].mxu0  ;;  %v1907_v53 = vpop.f32.mrb[136].mxu1 }
 0x1fc   :  { %2868 = vst [vmem:[%s6547_s3 + $0x218] sm:$0xff] %v2643_v50  ;;  %v2756_v54 = vsel %vm2306_vm11, %v1903_v45, %v2531_v48  ;;  %v1908_v55 = vadd.f32 %v5967_v4, %v1907_v53  ;;  %v4057_v56 = vpop.f32.mrb[137].mxu1 }
 0x1fd   :  { %2981 = vst [vmem:[%s6547_s3 + $0x5a0] sm:$0xff] %v2756_v54  ;;  %vm2194_vm4 = vcmp.gt.f32.partialorder %v1343_v51, 0.0  ;;  %v2419_v57 = vmul.f32 0.1, %v1343_v51 }
 0x1fe   :  { %vm2307_vm12 = vcmp.gt.f32.partialorder %v1908_v55, 0.0  ;;  %v2532_v58 = vmul.f32 0.1, %v1908_v55  ;;  %v1347_v60 = vpop.f32.mrb[138].mxu0 }
 0x1ff   :  { %v2644_v59 = vsel %vm2194_vm4, %v1343_v51, %v2419_v57  ;;  %v1348_v2 = vadd.f32 %v5967_v4, %v1347_v60  ;;  %v3721_v61 = vpop.f32.mrb[139].mxu0  ;;  %v1912_v62 = vpop.f32.mrb[138].mxu1 }
 0x200   :  { %2869 = vst [vmem:[%s6547_s3 + $0x220] sm:$0xff] %v2644_v59  ;;  %v2757_v63 = vsel %vm2307_vm12, %v1908_v55, %v2532_v58  ;;  %v1913_v0 = vadd.f32 %v5967_v4, %v1912_v62  ;;  %v4060_v1 = vpop.f32.mrb[139].mxu1 }
 0x201   :  { %2982 = vst [vmem:[%s6547_s3 + $0x5a8] sm:$0xff] %v2757_v63  ;;  %vm2195_vm13 = vcmp.gt.f32.partialorder %v1348_v2, 0.0  ;;  %v2420_v3 = vmul.f32 0.1, %v1348_v2 }
 0x202   :  { %vm2308_vm14 = vcmp.gt.f32.partialorder %v1913_v0, 0.0  ;;  %v2533_v5 = vmul.f32 0.1, %v1913_v0  ;;  %v1352_v7 = vpop.f32.mrb[140].mxu0 }
 0x203   :  { %v2645_v8 = vsel %vm2195_vm13, %v1348_v2, %v2420_v3  ;;  %v1353_v9 = vadd.f32 %v5967_v4, %v1352_v7  ;;  %v3724_v10 = vpop.f32.mrb[141].mxu0  ;;  %v1917_v11 = vpop.f32.mrb[140].mxu1 }
 0x204   :  { %2870 = vst [vmem:[%s6547_s3 + $0x228] sm:$0xff] %v2645_v8  ;;  %v2758_v12 = vsel %vm2308_vm14, %v1913_v0, %v2533_v5  ;;  %v1918_v13 = vadd.f32 %v5967_v4, %v1917_v11  ;;  %v4063_v14 = vpop.f32.mrb[141].mxu1 }
 0x205   :  { %2983 = vst [vmem:[%s6547_s3 + $0x5b0] sm:$0xff] %v2758_v12  ;;  %vm2196_vm15 = vcmp.gt.f32.partialorder %v1353_v9, 0.0  ;;  %v2421_v15 = vmul.f32 0.1, %v1353_v9 }
 0x206   :  { %vm2309_vm1 = vcmp.gt.f32.partialorder %v1918_v13, 0.0  ;;  %v2534_v16 = vmul.f32 0.1, %v1918_v13  ;;  %v1357_v17 = vpop.f32.mrb[142].mxu0 }
 0x207   :  { %v2646_v18 = vsel %vm2196_vm15, %v1353_v9, %v2421_v15  ;;  %v1358_v19 = vadd.f32 %v5967_v4, %v1357_v17  ;;  %v3727_v20 = vpop.f32.mrb[143].mxu0  ;;  %v1922_v21 = vpop.f32.mrb[142].mxu1 }
 0x208   :  { %2871 = vst [vmem:[%s6547_s3 + $0x230] sm:$0xff] %v2646_v18  ;;  %v2759_v22 = vsel %vm2309_vm1, %v1918_v13, %v2534_v16  ;;  %v1923_v23 = vadd.f32 %v5967_v4, %v1922_v21  ;;  %v4066_v24 = vpop.f32.mrb[143].mxu1 }
 0x209   :  { %2984 = vst [vmem:[%s6547_s3 + $0x5b8] sm:$0xff] %v2759_v22  ;;  %vm2197_vm2 = vcmp.gt.f32.partialorder %v1358_v19, 0.0  ;;  %v2422_v25 = vmul.f32 0.1, %v1358_v19 }
 0x20a   :  { %vm2310_vm3 = vcmp.gt.f32.partialorder %v1923_v23, 0.0  ;;  %v2535_v26 = vmul.f32 0.1, %v1923_v23  ;;  %v1362_v6 = vpop.f32.mrb[144].mxu0 }
 0x20b   :  { %v2647_v27 = vsel %vm2197_vm2, %v1358_v19, %v2422_v25  ;;  %v1363_v28 = vadd.f32 %v5967_v4, %v1362_v6  ;;  %v3730_v29 = vpop.f32.mrb[145].mxu0  ;;  %v1927_v30 = vpop.f32.mrb[144].mxu1 }
 0x20c   :  { %2872 = vst [vmem:[%s6547_s3 + $0x238] sm:$0xff] %v2647_v27  ;;  %v2760_v31 = vsel %vm2310_vm3, %v1923_v23, %v2535_v26  ;;  %v1928_v32 = vadd.f32 %v5967_v4, %v1927_v30  ;;  %v4069_v33 = vpop.f32.mrb[145].mxu1 }
 0x20d   :  { %2985 = vst [vmem:[%s6547_s3 + $0x5c0] sm:$0xff] %v2760_v31  ;;  %vm2198_vm5 = vcmp.gt.f32.partialorder %v1363_v28, 0.0  ;;  %v2423_v34 = vmul.f32 0.1, %v1363_v28 }
 0x20e   :  { %vm2311_vm6 = vcmp.gt.f32.partialorder %v1928_v32, 0.0  ;;  %v2536_v35 = vmul.f32 0.1, %v1928_v32  ;;  %v1367_v36 = vpop.f32.mrb[146].mxu0 }
 0x20f   :  { %v2648_v37 = vsel %vm2198_vm5, %v1363_v28, %v2423_v34  ;;  %v1368_v38 = vadd.f32 %v5967_v4, %v1367_v36  ;;  %v3733_v39 = vpop.f32.mrb[147].mxu0  ;;  %v1932_v40 = vpop.f32.mrb[146].mxu1 }
 0x210   :  { %2873 = vst [vmem:[%s6547_s3 + $0x240] sm:$0xff] %v2648_v37  ;;  %v2761_v41 = vsel %vm2311_vm6, %v1928_v32, %v2536_v35  ;;  %v1933_v42 = vadd.f32 %v5967_v4, %v1932_v40  ;;  %v4072_v43 = vpop.f32.mrb[147].mxu1 }
 0x211   :  { %2986 = vst [vmem:[%s6547_s3 + $0x5c8] sm:$0xff] %v2761_v41  ;;  %vm2199_vm7 = vcmp.gt.f32.partialorder %v1368_v38, 0.0  ;;  %v2424_v44 = vmul.f32 0.1, %v1368_v38 }
 0x212   :  { %vm2312_vm8 = vcmp.gt.f32.partialorder %v1933_v42, 0.0  ;;  %v2537_v45 = vmul.f32 0.1, %v1933_v42  ;;  %v1372_v46 = vpop.f32.mrb[148].mxu0 }
 0x213   :  { %v2649_v47 = vsel %vm2199_vm7, %v1368_v38, %v2424_v44  ;;  %v1373_v48 = vadd.f32 %v5967_v4, %v1372_v46  ;;  %v3736_v49 = vpop.f32.mrb[149].mxu0  ;;  %v1937_v50 = vpop.f32.mrb[148].mxu1 }
 0x214   :  { %2874 = vst [vmem:[%s6547_s3 + $0x248] sm:$0xff] %v2649_v47  ;;  %v2762_v51 = vsel %vm2312_vm8, %v1933_v42, %v2537_v45  ;;  %v1938_v52 = vadd.f32 %v5967_v4, %v1937_v50  ;;  %v4075_v53 = vpop.f32.mrb[149].mxu1 }
 0x215   :  { %2987 = vst [vmem:[%s6547_s3 + $0x5d0] sm:$0xff] %v2762_v51  ;;  %vm2200_vm9 = vcmp.gt.f32.partialorder %v1373_v48, 0.0  ;;  %v2425_v54 = vmul.f32 0.1, %v1373_v48 }
 0x216   :  { %vm2313_vm10 = vcmp.gt.f32.partialorder %v1938_v52, 0.0  ;;  %v2538_v55 = vmul.f32 0.1, %v1938_v52  ;;  %v1377_v56 = vpop.f32.mrb[150].mxu0 }
 0x217   :  { %v2650_v57 = vsel %vm2200_vm9, %v1373_v48, %v2425_v54  ;;  %v1378_v58 = vadd.f32 %v5967_v4, %v1377_v56  ;;  %v3739_v60 = vpop.f32.mrb[151].mxu0  ;;  %v1942_v59 = vpop.f32.mrb[150].mxu1 }
 0x218   :  { %2875 = vst [vmem:[%s6547_s3 + $0x250] sm:$0xff] %v2650_v57  ;;  %v2763_v2 = vsel %vm2313_vm10, %v1938_v52, %v2538_v55  ;;  %v1943_v61 = vadd.f32 %v5967_v4, %v1942_v59  ;;  %v4078_v62 = vpop.f32.mrb[151].mxu1 }
 0x219   :  { %2988 = vst [vmem:[%s6547_s3 + $0x5d8] sm:$0xff] %v2763_v2  ;;  %vm2201_vm0 = vcmp.gt.f32.partialorder %v1378_v58, 0.0  ;;  %v2426_v63 = vmul.f32 0.1, %v1378_v58 }
 0x21a   :  { %vm2314_vm11 = vcmp.gt.f32.partialorder %v1943_v61, 0.0  ;;  %v2539_v0 = vmul.f32 0.1, %v1943_v61  ;;  %v1382_v1 = vpop.f32.mrb[152].mxu0 }
 0x21b   :  { %v2651_v3 = vsel %vm2201_vm0, %v1378_v58, %v2426_v63  ;;  %v1383_v5 = vadd.f32 %v5967_v4, %v1382_v1  ;;  %v3742_v7 = vpop.f32.mrb[153].mxu0  ;;  %v1947_v8 = vpop.f32.mrb[152].mxu1 }
 0x21c   :  { %2876 = vst [vmem:[%s6547_s3 + $0x258] sm:$0xff] %v2651_v3  ;;  %v2764_v9 = vsel %vm2314_vm11, %v1943_v61, %v2539_v0  ;;  %v1948_v10 = vadd.f32 %v5967_v4, %v1947_v8  ;;  %v4081_v11 = vpop.f32.mrb[153].mxu1 }
 0x21d   :  { %2989 = vst [vmem:[%s6547_s3 + $0x5e0] sm:$0xff] %v2764_v9  ;;  %vm2202_vm4 = vcmp.gt.f32.partialorder %v1383_v5, 0.0  ;;  %v2427_v12 = vmul.f32 0.1, %v1383_v5 }
 0x21e   :  { %vm2315_vm12 = vcmp.gt.f32.partialorder %v1948_v10, 0.0  ;;  %v2540_v13 = vmul.f32 0.1, %v1948_v10  ;;  %v1387_v14 = vpop.f32.mrb[154].mxu0 }
 0x21f   :  { %v2652_v15 = vsel %vm2202_vm4, %v1383_v5, %v2427_v12  ;;  %v1388_v16 = vadd.f32 %v5967_v4, %v1387_v14  ;;  %v3745_v17 = vpop.f32.mrb[155].mxu0  ;;  %v1952_v18 = vpop.f32.mrb[154].mxu1 }
 0x220   :  { %2877 = vst [vmem:[%s6547_s3 + $0x260] sm:$0xff] %v2652_v15  ;;  %v2765_v19 = vsel %vm2315_vm12, %v1948_v10, %v2540_v13  ;;  %v1953_v20 = vadd.f32 %v5967_v4, %v1952_v18  ;;  %v4084_v21 = vpop.f32.mrb[155].mxu1 }
 0x221   :  { %2990 = vst [vmem:[%s6547_s3 + $0x5e8] sm:$0xff] %v2765_v19  ;;  %vm2203_vm13 = vcmp.gt.f32.partialorder %v1388_v16, 0.0  ;;  %v2428_v22 = vmul.f32 0.1, %v1388_v16 }
 0x222   :  { %vm2316_vm14 = vcmp.gt.f32.partialorder %v1953_v20, 0.0  ;;  %v2541_v23 = vmul.f32 0.1, %v1953_v20  ;;  %v1392_v24 = vpop.f32.mrb[156].mxu0 }
 0x223   :  { %v2653_v25 = vsel %vm2203_vm13, %v1388_v16, %v2428_v22  ;;  %v1393_v26 = vadd.f32 %v5967_v4, %v1392_v24  ;;  %v3748_v6 = vpop.f32.mrb[157].mxu0  ;;  %v1957_v27 = vpop.f32.mrb[156].mxu1 }
 0x224   :  { %2878 = vst [vmem:[%s6547_s3 + $0x268] sm:$0xff] %v2653_v25  ;;  %v2766_v28 = vsel %vm2316_vm14, %v1953_v20, %v2541_v23  ;;  %v1958_v29 = vadd.f32 %v5967_v4, %v1957_v27  ;;  %v4087_v30 = vpop.f32.mrb[157].mxu1 }
 0x225   :  { %2991 = vst [vmem:[%s6547_s3 + $0x5f0] sm:$0xff] %v2766_v28  ;;  %vm2204_vm15 = vcmp.gt.f32.partialorder %v1393_v26, 0.0  ;;  %v2429_v31 = vmul.f32 0.1, %v1393_v26 }
 0x226   :  { %vm2317_vm1 = vcmp.gt.f32.partialorder %v1958_v29, 0.0  ;;  %v2542_v32 = vmul.f32 0.1, %v1958_v29  ;;  %v1397_v33 = vpop.f32.mrb[158].mxu0 }
 0x227   :  { %v2654_v34 = vsel %vm2204_vm15, %v1393_v26, %v2429_v31  ;;  %v1398_v35 = vadd.f32 %v5967_v4, %v1397_v33  ;;  %v3751_v36 = vpop.f32.mrb[159].mxu0  ;;  %v1962_v37 = vpop.f32.mrb[158].mxu1 }
 0x228   :  { %2879 = vst [vmem:[%s6547_s3 + $0x270] sm:$0xff] %v2654_v34  ;;  %v2767_v38 = vsel %vm2317_vm1, %v1958_v29, %v2542_v32  ;;  %v1963_v39 = vadd.f32 %v5967_v4, %v1962_v37  ;;  %v4090_v40 = vpop.f32.mrb[159].mxu1 }
 0x229   :  { %2992 = vst [vmem:[%s6547_s3 + $0x5f8] sm:$0xff] %v2767_v38  ;;  %vm2205_vm2 = vcmp.gt.f32.partialorder %v1398_v35, 0.0  ;;  %v2430_v41 = vmul.f32 0.1, %v1398_v35 }
 0x22a   :  { %vm2318_vm3 = vcmp.gt.f32.partialorder %v1963_v39, 0.0  ;;  %v2543_v42 = vmul.f32 0.1, %v1963_v39  ;;  %v1402_v43 = vpop.f32.mrb[160].mxu0 }
 0x22b   :  { %v2655_v44 = vsel %vm2205_vm2, %v1398_v35, %v2430_v41  ;;  %v1403_v45 = vadd.f32 %v5967_v4, %v1402_v43  ;;  %v3754_v46 = vpop.f32.mrb[161].mxu0  ;;  %v1967_v47 = vpop.f32.mrb[160].mxu1 }
 0x22c   :  { %2880 = vst [vmem:[%s6547_s3 + $0x278] sm:$0xff] %v2655_v44  ;;  %v2768_v48 = vsel %vm2318_vm3, %v1963_v39, %v2543_v42  ;;  %v1968_v49 = vadd.f32 %v5967_v4, %v1967_v47  ;;  %v4093_v50 = vpop.f32.mrb[161].mxu1  ;;  %v6324_v42 = vld [vmem:[%s6546_s2] ss:$0 sm:$0xff] }
 0x22d   :  { %2993 = vst [vmem:[%s6547_s3 + $0x600] sm:$0xff] %v2768_v48  ;;  %vm2206_vm5 = vcmp.gt.f32.partialorder %v1403_v45, 0.0  ;;  %v2431_v51 = vmul.f32 0.1, %v1403_v45 }
 0x22e   :  { %vm2319_vm6 = vcmp.gt.f32.partialorder %v1968_v49, 0.0  ;;  %v2544_v52 = vmul.f32 0.1, %v1968_v49  ;;  %v1407_v53 = vpop.f32.mrb[162].mxu0 }
 0x22f   :  { %v2656_v54 = vsel %vm2206_vm5, %v1403_v45, %v2431_v51  ;;  %v1408_v55 = vadd.f32 %v5967_v4, %v1407_v53  ;;  %v3757_v56 = vpop.f32.mrb[163].mxu0  ;;  %v1972_v57 = vpop.f32.mrb[162].mxu1 }
 0x230   :  { %2881 = vst [vmem:[%s6547_s3 + $0x280] sm:$0xff] %v2656_v54  ;;  %v2769_v58 = vsel %vm2319_vm6, %v1968_v49, %v2544_v52  ;;  %v1973_v60 = vadd.f32 %v5967_v4, %v1972_v57  ;;  %v4096_v59 = vpop.f32.mrb[163].mxu1 }
 0x231   :  { %2994 = vst [vmem:[%s6547_s3 + $0x608] sm:$0xff] %v2769_v58  ;;  %vm2207_vm7 = vcmp.gt.f32.partialorder %v1408_v55, 0.0  ;;  %v2432_v2 = vmul.f32 0.1, %v1408_v55 }
 0x232   :  { %vm2320_vm8 = vcmp.gt.f32.partialorder %v1973_v60, 0.0  ;;  %v2545_v61 = vmul.f32 0.1, %v1973_v60  ;;  %v1412_v62 = vpop.f32.mrb[164].mxu0 }
 0x233   :  { %v2657_v63 = vsel %vm2207_vm7, %v1408_v55, %v2432_v2  ;;  %v1413_v0 = vadd.f32 %v5967_v4, %v1412_v62  ;;  %v3760_v1 = vpop.f32.mrb[165].mxu0  ;;  %v1977_v3 = vpop.f32.mrb[164].mxu1 }
 0x234   :  { %2882 = vst [vmem:[%s6547_s3 + $0x288] sm:$0xff] %v2657_v63  ;;  %v2770_v5 = vsel %vm2320_vm8, %v1973_v60, %v2545_v61  ;;  %v1978_v7 = vadd.f32 %v5967_v4, %v1977_v3  ;;  %v4099_v8 = vpop.f32.mrb[165].mxu1 }
 0x235   :  { %2995 = vst [vmem:[%s6547_s3 + $0x610] sm:$0xff] %v2770_v5  ;;  %vm2208_vm9 = vcmp.gt.f32.partialorder %v1413_v0, 0.0  ;;  %v2433_v9 = vmul.f32 0.1, %v1413_v0 }
 0x236   :  { %vm2321_vm10 = vcmp.gt.f32.partialorder %v1978_v7, 0.0  ;;  %v2546_v10 = vmul.f32 0.1, %v1978_v7  ;;  %v1417_v11 = vpop.f32.mrb[166].mxu0 }
 0x237   :  { %v2658_v12 = vsel %vm2208_vm9, %v1413_v0, %v2433_v9  ;;  %v1418_v13 = vadd.f32 %v5967_v4, %v1417_v11  ;;  %v3763_v14 = vpop.f32.mrb[167].mxu0  ;;  %v1982_v15 = vpop.f32.mrb[166].mxu1 }
 0x238   :  { %2883 = vst [vmem:[%s6547_s3 + $0x290] sm:$0xff] %v2658_v12  ;;  %v2771_v16 = vsel %vm2321_vm10, %v1978_v7, %v2546_v10  ;;  %v1983_v17 = vadd.f32 %v5967_v4, %v1982_v15  ;;  %v4102_v18 = vpop.f32.mrb[167].mxu1 }
 0x239   :  { %2996 = vst [vmem:[%s6547_s3 + $0x618] sm:$0xff] %v2771_v16  ;;  %vm2209_vm0 = vcmp.gt.f32.partialorder %v1418_v13, 0.0  ;;  %v2434_v19 = vmul.f32 0.1, %v1418_v13 }
 0x23a   :  { %vm2322_vm11 = vcmp.gt.f32.partialorder %v1983_v17, 0.0  ;;  %v2547_v20 = vmul.f32 0.1, %v1983_v17  ;;  %v1422_v21 = vpop.f32.mrb[168].mxu0 }
 0x23b   :  { %v2659_v22 = vsel %vm2209_vm0, %v1418_v13, %v2434_v19  ;;  %v1423_v23 = vadd.f32 %v5967_v4, %v1422_v21  ;;  %v3766_v24 = vpop.f32.mrb[169].mxu0  ;;  %v1987_v25 = vpop.f32.mrb[168].mxu1 }
 0x23c   :  { %2884 = vst [vmem:[%s6547_s3 + $0x298] sm:$0xff] %v2659_v22  ;;  %v2772_v26 = vsel %vm2322_vm11, %v1983_v17, %v2547_v20  ;;  %v1988_v6 = vadd.f32 %v5967_v4, %v1987_v25  ;;  %v4105_v27 = vpop.f32.mrb[169].mxu1 }
 0x23d   :  { %2997 = vst [vmem:[%s6547_s3 + $0x620] sm:$0xff] %v2772_v26  ;;  %vm2210_vm4 = vcmp.gt.f32.partialorder %v1423_v23, 0.0  ;;  %v2435_v28 = vmul.f32 0.1, %v1423_v23 }
 0x23e   :  { %vm2323_vm12 = vcmp.gt.f32.partialorder %v1988_v6, 0.0  ;;  %v2548_v29 = vmul.f32 0.1, %v1988_v6  ;;  %v1427_v30 = vpop.f32.mrb[170].mxu0 }
 0x23f   :  { %v2660_v31 = vsel %vm2210_vm4, %v1423_v23, %v2435_v28  ;;  %v1428_v32 = vadd.f32 %v5967_v4, %v1427_v30  ;;  %v3769_v33 = vpop.f32.mrb[171].mxu0  ;;  %v1992_v34 = vpop.f32.mrb[170].mxu1 }
 0x240   :  { %2885 = vst [vmem:[%s6547_s3 + $0x2a0] sm:$0xff] %v2660_v31  ;;  %v2773_v35 = vsel %vm2323_vm12, %v1988_v6, %v2548_v29  ;;  %v1993_v36 = vadd.f32 %v5967_v4, %v1992_v34  ;;  %v4108_v37 = vpop.f32.mrb[171].mxu1 }
 0x241   :  { %2998 = vst [vmem:[%s6547_s3 + $0x628] sm:$0xff] %v2773_v35  ;;  %vm2211_vm13 = vcmp.gt.f32.partialorder %v1428_v32, 0.0  ;;  %v2436_v38 = vmul.f32 0.1, %v1428_v32 }
 0x242   :  { %vm2324_vm14 = vcmp.gt.f32.partialorder %v1993_v36, 0.0  ;;  %v2549_v39 = vmul.f32 0.1, %v1993_v36  ;;  %v1432_v40 = vpop.f32.mrb[172].mxu0 }
 0x243   :  { %v2661_v41 = vsel %vm2211_vm13, %v1428_v32, %v2436_v38  ;;  %v1433_v43 = vadd.f32 %v6324_v42, %v1432_v40  ;;  %v3772_v44 = vpop.f32.mrb[173].mxu0  ;;  %v1997_v4 = vpop.f32.mrb[172].mxu1 }
 0x244   :  { %2886 = vst [vmem:[%s6547_s3 + $0x2a8] sm:$0xff] %v2661_v41  ;;  %v2774_v45 = vsel %vm2324_vm14, %v1993_v36, %v2549_v39  ;;  %v1998_v46 = vadd.f32 %v6324_v42, %v1997_v4  ;;  %v4111_v47 = vpop.f32.mrb[173].mxu1 }
 0x245   :  { %2999 = vst [vmem:[%s6547_s3 + $0x630] sm:$0xff] %v2774_v45  ;;  %vm2212_vm15 = vcmp.gt.f32.partialorder %v1433_v43, 0.0  ;;  %v2437_v48 = vmul.f32 0.1, %v1433_v43 }
 0x246   :  { %vm2325_vm1 = vcmp.gt.f32.partialorder %v1998_v46, 0.0  ;;  %v2550_v49 = vmul.f32 0.1, %v1998_v46  ;;  %v1437_v50 = vpop.f32.mrb[174].mxu0 }
 0x247   :  { %v2662_v51 = vsel %vm2212_vm15, %v1433_v43, %v2437_v48  ;;  %v1438_v52 = vadd.f32 %v6324_v42, %v1437_v50  ;;  %v3775_v53 = vpop.f32.mrb[175].mxu0  ;;  %v2002_v54 = vpop.f32.mrb[174].mxu1 }
 0x248   :  { %2887 = vst [vmem:[%s6547_s3 + $0x2b0] sm:$0xff] %v2662_v51  ;;  %v2775_v55 = vsel %vm2325_vm1, %v1998_v46, %v2550_v49  ;;  %v2003_v56 = vadd.f32 %v6324_v42, %v2002_v54  ;;  %v4114_v57 = vpop.f32.mrb[175].mxu1 }
 0x249   :  { %3000 = vst [vmem:[%s6547_s3 + $0x638] sm:$0xff] %v2775_v55  ;;  %vm2213_vm2 = vcmp.gt.f32.partialorder %v1438_v52, 0.0  ;;  %v2438_v58 = vmul.f32 0.1, %v1438_v52 }
 0x24a   :  { %vm2326_vm3 = vcmp.gt.f32.partialorder %v2003_v56, 0.0  ;;  %v2551_v60 = vmul.f32 0.1, %v2003_v56  ;;  %v1442_v59 = vpop.f32.mrb[176].mxu0 }
 0x24b   :  { %v2663_v2 = vsel %vm2213_vm2, %v1438_v52, %v2438_v58  ;;  %v1443_v61 = vadd.f32 %v6324_v42, %v1442_v59  ;;  %v3778_v62 = vpop.f32.mrb[177].mxu0  ;;  %v2007_v63 = vpop.f32.mrb[176].mxu1 }
 0x24c   :  { %2888 = vst [vmem:[%s6547_s3 + $0x2b8] sm:$0xff] %v2663_v2  ;;  %v2776_v0 = vsel %vm2326_vm3, %v2003_v56, %v2551_v60  ;;  %v2008_v1 = vadd.f32 %v6324_v42, %v2007_v63  ;;  %v4117_v3 = vpop.f32.mrb[177].mxu1 }
 0x24d   :  { %3001 = vst [vmem:[%s6547_s3 + $0x640] sm:$0xff] %v2776_v0  ;;  %vm2214_vm5 = vcmp.gt.f32.partialorder %v1443_v61, 0.0  ;;  %v2439_v5 = vmul.f32 0.1, %v1443_v61 }
 0x24e   :  { %vm2327_vm6 = vcmp.gt.f32.partialorder %v2008_v1, 0.0  ;;  %v2552_v7 = vmul.f32 0.1, %v2008_v1  ;;  %v1447_v8 = vpop.f32.mrb[178].mxu0 }
 0x24f   :  { %v2664_v9 = vsel %vm2214_vm5, %v1443_v61, %v2439_v5  ;;  %v1448_v10 = vadd.f32 %v6324_v42, %v1447_v8  ;;  %v3781_v11 = vpop.f32.mrb[179].mxu0  ;;  %v2012_v12 = vpop.f32.mrb[178].mxu1 }
 0x250   :  { %2889 = vst [vmem:[%s6547_s3 + $0x2c0] sm:$0xff] %v2664_v9  ;;  %v2777_v13 = vsel %vm2327_vm6, %v2008_v1, %v2552_v7  ;;  %v2013_v14 = vadd.f32 %v6324_v42, %v2012_v12  ;;  %v4120_v15 = vpop.f32.mrb[179].mxu1 }
 0x251   :  { %3002 = vst [vmem:[%s6547_s3 + $0x648] sm:$0xff] %v2777_v13  ;;  %vm2215_vm7 = vcmp.gt.f32.partialorder %v1448_v10, 0.0  ;;  %v2440_v16 = vmul.f32 0.1, %v1448_v10 }
 0x252   :  { %vm2328_vm8 = vcmp.gt.f32.partialorder %v2013_v14, 0.0  ;;  %v2553_v17 = vmul.f32 0.1, %v2013_v14  ;;  %v1452_v18 = vpop.f32.mrb[180].mxu0 }
 0x253   :  { %v2665_v19 = vsel %vm2215_vm7, %v1448_v10, %v2440_v16  ;;  %v1453_v20 = vadd.f32 %v6324_v42, %v1452_v18  ;;  %v3784_v21 = vpop.f32.mrb[181].mxu0  ;;  %v2017_v22 = vpop.f32.mrb[180].mxu1 }
 0x254   :  { %2890 = vst [vmem:[%s6547_s3 + $0x2c8] sm:$0xff] %v2665_v19  ;;  %v2778_v23 = vsel %vm2328_vm8, %v2013_v14, %v2553_v17  ;;  %v2018_v24 = vadd.f32 %v6324_v42, %v2017_v22  ;;  %v4123_v25 = vpop.f32.mrb[181].mxu1 }
 0x255   :  { %3003 = vst [vmem:[%s6547_s3 + $0x650] sm:$0xff] %v2778_v23  ;;  %vm2216_vm9 = vcmp.gt.f32.partialorder %v1453_v20, 0.0  ;;  %v2441_v26 = vmul.f32 0.1, %v1453_v20 }
 0x256   :  { %vm2329_vm10 = vcmp.gt.f32.partialorder %v2018_v24, 0.0  ;;  %v2554_v6 = vmul.f32 0.1, %v2018_v24  ;;  %v1457_v27 = vpop.f32.mrb[182].mxu0 }
 0x257   :  { %v2666_v28 = vsel %vm2216_vm9, %v1453_v20, %v2441_v26  ;;  %v1458_v29 = vadd.f32 %v6324_v42, %v1457_v27  ;;  %v3787_v30 = vpop.f32.mrb[183].mxu0  ;;  %v2022_v31 = vpop.f32.mrb[182].mxu1 }
 0x258   :  { %2891 = vst [vmem:[%s6547_s3 + $0x2d0] sm:$0xff] %v2666_v28  ;;  %v2779_v32 = vsel %vm2329_vm10, %v2018_v24, %v2554_v6  ;;  %v2023_v33 = vadd.f32 %v6324_v42, %v2022_v31  ;;  %v4126_v34 = vpop.f32.mrb[183].mxu1 }
 0x259   :  { %3004 = vst [vmem:[%s6547_s3 + $0x658] sm:$0xff] %v2779_v32  ;;  %vm2217_vm0 = vcmp.gt.f32.partialorder %v1458_v29, 0.0  ;;  %v2442_v35 = vmul.f32 0.1, %v1458_v29 }
 0x25a   :  { %vm2330_vm11 = vcmp.gt.f32.partialorder %v2023_v33, 0.0  ;;  %v2555_v36 = vmul.f32 0.1, %v2023_v33  ;;  %v1462_v37 = vpop.f32.mrb[184].mxu0 }
 0x25b   :  { %v2667_v38 = vsel %vm2217_vm0, %v1458_v29, %v2442_v35  ;;  %v1463_v39 = vadd.f32 %v6324_v42, %v1462_v37  ;;  %v3790_v40 = vpop.f32.mrb[185].mxu0  ;;  %v2027_v41 = vpop.f32.mrb[184].mxu1 }
 0x25c   :  { %2892 = vst [vmem:[%s6547_s3 + $0x2d8] sm:$0xff] %v2667_v38  ;;  %v2780_v43 = vsel %vm2330_vm11, %v2023_v33, %v2555_v36  ;;  %v2028_v44 = vadd.f32 %v6324_v42, %v2027_v41  ;;  %v4129_v4 = vpop.f32.mrb[185].mxu1 }
 0x25d   :  { %3005 = vst [vmem:[%s6547_s3 + $0x660] sm:$0xff] %v2780_v43  ;;  %vm2218_vm4 = vcmp.gt.f32.partialorder %v1463_v39, 0.0  ;;  %v2443_v45 = vmul.f32 0.1, %v1463_v39 }
 0x25e   :  { %vm2331_vm12 = vcmp.gt.f32.partialorder %v2028_v44, 0.0  ;;  %v2556_v46 = vmul.f32 0.1, %v2028_v44  ;;  %v1467_v47 = vpop.f32.mrb[186].mxu0 }
 0x25f   :  { %v2668_v48 = vsel %vm2218_vm4, %v1463_v39, %v2443_v45  ;;  %v1468_v49 = vadd.f32 %v6324_v42, %v1467_v47  ;;  %v3793_v50 = vpop.f32.mrb[187].mxu0  ;;  %v2032_v51 = vpop.f32.mrb[186].mxu1 }
 0x260   :  { %2893 = vst [vmem:[%s6547_s3 + $0x2e0] sm:$0xff] %v2668_v48  ;;  %v2781_v52 = vsel %vm2331_vm12, %v2028_v44, %v2556_v46  ;;  %v2033_v53 = vadd.f32 %v6324_v42, %v2032_v51  ;;  %v4132_v54 = vpop.f32.mrb[187].mxu1 }
 0x261   :  { %3006 = vst [vmem:[%s6547_s3 + $0x668] sm:$0xff] %v2781_v52  ;;  %vm2219_vm13 = vcmp.gt.f32.partialorder %v1468_v49, 0.0  ;;  %v2444_v55 = vmul.f32 0.1, %v1468_v49 }
 0x262   :  { %vm2332_vm14 = vcmp.gt.f32.partialorder %v2033_v53, 0.0  ;;  %v2557_v56 = vmul.f32 0.1, %v2033_v53  ;;  %v1472_v57 = vpop.f32.mrb[188].mxu0 }
 0x263   :  { %v2669_v58 = vsel %vm2219_vm13, %v1468_v49, %v2444_v55  ;;  %v1473_v60 = vadd.f32 %v6324_v42, %v1472_v57  ;;  %v3796_v59 = vpop.f32.mrb[189].mxu0  ;;  %v2037_v2 = vpop.f32.mrb[188].mxu1 }
 0x264   :  { %2894 = vst [vmem:[%s6547_s3 + $0x2e8] sm:$0xff] %v2669_v58  ;;  %v2782_v61 = vsel %vm2332_vm14, %v2033_v53, %v2557_v56  ;;  %v2038_v62 = vadd.f32 %v6324_v42, %v2037_v2  ;;  %v4135_v63 = vpop.f32.mrb[189].mxu1 }
 0x265   :  { %3007 = vst [vmem:[%s6547_s3 + $0x670] sm:$0xff] %v2782_v61  ;;  %vm2220_vm15 = vcmp.gt.f32.partialorder %v1473_v60, 0.0  ;;  %v2445_v0 = vmul.f32 0.1, %v1473_v60 }
 0x266   :  { %vm2333_vm1 = vcmp.gt.f32.partialorder %v2038_v62, 0.0  ;;  %v2558_v1 = vmul.f32 0.1, %v2038_v62  ;;  %v1477_v3 = vpop.f32.mrb[190].mxu0 }
 0x267   :  { %v2670_v5 = vsel %vm2220_vm15, %v1473_v60, %v2445_v0  ;;  %v1478_v7 = vadd.f32 %v6324_v42, %v1477_v3  ;;  %v3799_v8 = vpop.f32.mrb[191].mxu0  ;;  %v2042_v9 = vpop.f32.mrb[190].mxu1 }
 0x268   :  { %2895 = vst [vmem:[%s6547_s3 + $0x2f0] sm:$0xff] %v2670_v5  ;;  %v2783_v10 = vsel %vm2333_vm1, %v2038_v62, %v2558_v1  ;;  %v2043_v11 = vadd.f32 %v6324_v42, %v2042_v9  ;;  %v4138_v12 = vpop.f32.mrb[191].mxu1 }
 0x269   :  { %3008 = vst [vmem:[%s6547_s3 + $0x678] sm:$0xff] %v2783_v10  ;;  %vm2221_vm2 = vcmp.gt.f32.partialorder %v1478_v7, 0.0  ;;  %v2446_v13 = vmul.f32 0.1, %v1478_v7 }
 0x26a   :  { %vm2334_vm3 = vcmp.gt.f32.partialorder %v2043_v11, 0.0  ;;  %v2559_v14 = vmul.f32 0.1, %v2043_v11  ;;  %v1482_v15 = vpop.f32.mrb[192].mxu0 }
 0x26b   :  { %v2671_v16 = vsel %vm2221_vm2, %v1478_v7, %v2446_v13  ;;  %v1483_v17 = vadd.f32 %v6324_v42, %v1482_v15  ;;  %v3802_v18 = vpop.f32.mrb[193].mxu0  ;;  %v2047_v19 = vpop.f32.mrb[192].mxu1 }
 0x26c   :  { %2896 = vst [vmem:[%s6547_s3 + $0x2f8] sm:$0xff] %v2671_v16  ;;  %v2784_v20 = vsel %vm2334_vm3, %v2043_v11, %v2559_v14  ;;  %v2048_v21 = vadd.f32 %v6324_v42, %v2047_v19  ;;  %v4141_v22 = vpop.f32.mrb[193].mxu1 }
 0x26d   :  { %3009 = vst [vmem:[%s6547_s3 + $0x680] sm:$0xff] %v2784_v20  ;;  %vm2222_vm5 = vcmp.gt.f32.partialorder %v1483_v17, 0.0  ;;  %v2447_v23 = vmul.f32 0.1, %v1483_v17 }
 0x26e   :  { %vm2335_vm6 = vcmp.gt.f32.partialorder %v2048_v21, 0.0  ;;  %v2560_v24 = vmul.f32 0.1, %v2048_v21  ;;  %v1487_v25 = vpop.f32.mrb[194].mxu0 }
 0x26f   :  { %v2672_v26 = vsel %vm2222_vm5, %v1483_v17, %v2447_v23  ;;  %v1488_v6 = vadd.f32 %v6324_v42, %v1487_v25  ;;  %v3805_v27 = vpop.f32.mrb[195].mxu0  ;;  %v2052_v28 = vpop.f32.mrb[194].mxu1 }
 0x270   :  { %2897 = vst [vmem:[%s6547_s3 + $0x300] sm:$0xff] %v2672_v26  ;;  %v2785_v29 = vsel %vm2335_vm6, %v2048_v21, %v2560_v24  ;;  %v2053_v30 = vadd.f32 %v6324_v42, %v2052_v28  ;;  %v4144_v31 = vpop.f32.mrb[195].mxu1 }
 0x271   :  { %3010 = vst [vmem:[%s6547_s3 + $0x688] sm:$0xff] %v2785_v29  ;;  %vm2223_vm7 = vcmp.gt.f32.partialorder %v1488_v6, 0.0  ;;  %v2448_v32 = vmul.f32 0.1, %v1488_v6 }
 0x272   :  { %vm2336_vm8 = vcmp.gt.f32.partialorder %v2053_v30, 0.0  ;;  %v2561_v33 = vmul.f32 0.1, %v2053_v30  ;;  %v1492_v34 = vpop.f32.mrb[196].mxu0 }
 0x273   :  { %v2673_v35 = vsel %vm2223_vm7, %v1488_v6, %v2448_v32  ;;  %v1493_v36 = vadd.f32 %v6324_v42, %v1492_v34  ;;  %v3808_v37 = vpop.f32.mrb[197].mxu0  ;;  %v2057_v38 = vpop.f32.mrb[196].mxu1 }
 0x274   :  { %2898 = vst [vmem:[%s6547_s3 + $0x308] sm:$0xff] %v2673_v35  ;;  %v2786_v39 = vsel %vm2336_vm8, %v2053_v30, %v2561_v33  ;;  %v2058_v40 = vadd.f32 %v6324_v42, %v2057_v38  ;;  %v4147_v41 = vpop.f32.mrb[197].mxu1 }
 0x275   :  { %3011 = vst [vmem:[%s6547_s3 + $0x690] sm:$0xff] %v2786_v39  ;;  %vm2224_vm9 = vcmp.gt.f32.partialorder %v1493_v36, 0.0  ;;  %v2449_v43 = vmul.f32 0.1, %v1493_v36 }
 0x276   :  { %vm2337_vm10 = vcmp.gt.f32.partialorder %v2058_v40, 0.0  ;;  %v2562_v44 = vmul.f32 0.1, %v2058_v40  ;;  %v1497_v4 = vpop.f32.mrb[198].mxu0 }
 0x277   :  { %v2674_v45 = vsel %vm2224_vm9, %v1493_v36, %v2449_v43  ;;  %v1498_v46 = vadd.f32 %v6324_v42, %v1497_v4  ;;  %v3811_v47 = vpop.f32.mrb[199].mxu0  ;;  %v2062_v48 = vpop.f32.mrb[198].mxu1 }
 0x278   :  { %2899 = vst [vmem:[%s6547_s3 + $0x310] sm:$0xff] %v2674_v45  ;;  %v2787_v49 = vsel %vm2337_vm10, %v2058_v40, %v2562_v44  ;;  %v2063_v50 = vadd.f32 %v6324_v42, %v2062_v48  ;;  %v4150_v51 = vpop.f32.mrb[199].mxu1 }
 0x279   :  { %3012 = vst [vmem:[%s6547_s3 + $0x698] sm:$0xff] %v2787_v49  ;;  %vm2225_vm0 = vcmp.gt.f32.partialorder %v1498_v46, 0.0  ;;  %v2450_v52 = vmul.f32 0.1, %v1498_v46 }
 0x27a   :  { %vm2338_vm11 = vcmp.gt.f32.partialorder %v2063_v50, 0.0  ;;  %v2563_v53 = vmul.f32 0.1, %v2063_v50  ;;  %v1502_v54 = vpop.f32.mrb[200].mxu0 }
 0x27b   :  { %v2675_v55 = vsel %vm2225_vm0, %v1498_v46, %v2450_v52  ;;  %v1503_v56 = vadd.f32 %v6324_v42, %v1502_v54  ;;  %v3814_v57 = vpop.f32.mrb[201].mxu0  ;;  %v2067_v58 = vpop.f32.mrb[200].mxu1 }
 0x27c   :  { %2900 = vst [vmem:[%s6547_s3 + $0x318] sm:$0xff] %v2675_v55  ;;  %v2788_v60 = vsel %vm2338_vm11, %v2063_v50, %v2563_v53  ;;  %v2068_v59 = vadd.f32 %v6324_v42, %v2067_v58  ;;  %v4153_v2 = vpop.f32.mrb[201].mxu1 }
 0x27d   :  { %3013 = vst [vmem:[%s6547_s3 + $0x6a0] sm:$0xff] %v2788_v60  ;;  %vm2226_vm4 = vcmp.gt.f32.partialorder %v1503_v56, 0.0  ;;  %v2451_v61 = vmul.f32 0.1, %v1503_v56 }
 0x27e   :  { %vm2339_vm12 = vcmp.gt.f32.partialorder %v2068_v59, 0.0  ;;  %v2564_v62 = vmul.f32 0.1, %v2068_v59  ;;  %v1507_v63 = vpop.f32.mrb[202].mxu0 }
 0x27f   :  { %v2676_v0 = vsel %vm2226_vm4, %v1503_v56, %v2451_v61  ;;  %v1508_v1 = vadd.f32 %v6324_v42, %v1507_v63  ;;  %v3817_v3 = vpop.f32.mrb[203].mxu0  ;;  %v2072_v5 = vpop.f32.mrb[202].mxu1 }
 0x280   :  { %2901 = vst [vmem:[%s6547_s3 + $0x320] sm:$0xff] %v2676_v0  ;;  %v2789_v7 = vsel %vm2339_vm12, %v2068_v59, %v2564_v62  ;;  %v2073_v8 = vadd.f32 %v6324_v42, %v2072_v5  ;;  %v4156_v9 = vpop.f32.mrb[203].mxu1 }
 0x281   :  { %3014 = vst [vmem:[%s6547_s3 + $0x6a8] sm:$0xff] %v2789_v7  ;;  %vm2227_vm13 = vcmp.gt.f32.partialorder %v1508_v1, 0.0  ;;  %v2452_v10 = vmul.f32 0.1, %v1508_v1 }
 0x282   :  { %vm2340_vm14 = vcmp.gt.f32.partialorder %v2073_v8, 0.0  ;;  %v2565_v11 = vmul.f32 0.1, %v2073_v8  ;;  %v1512_v12 = vpop.f32.mrb[204].mxu0 }
 0x283   :  { %v2677_v13 = vsel %vm2227_vm13, %v1508_v1, %v2452_v10  ;;  %v1513_v14 = vadd.f32 %v6324_v42, %v1512_v12  ;;  %v3820_v15 = vpop.f32.mrb[205].mxu0  ;;  %v2077_v16 = vpop.f32.mrb[204].mxu1 }
 0x284   :  { %2902 = vst [vmem:[%s6547_s3 + $0x328] sm:$0xff] %v2677_v13  ;;  %v2790_v17 = vsel %vm2340_vm14, %v2073_v8, %v2565_v11  ;;  %v2078_v18 = vadd.f32 %v6324_v42, %v2077_v16  ;;  %v4159_v19 = vpop.f32.mrb[205].mxu1 }
 0x285   :  { %3015 = vst [vmem:[%s6547_s3 + $0x6b0] sm:$0xff] %v2790_v17  ;;  %vm2228_vm15 = vcmp.gt.f32.partialorder %v1513_v14, 0.0  ;;  %v2453_v20 = vmul.f32 0.1, %v1513_v14 }
 0x286   :  { %vm2341_vm1 = vcmp.gt.f32.partialorder %v2078_v18, 0.0  ;;  %v2566_v21 = vmul.f32 0.1, %v2078_v18  ;;  %v1517_v22 = vpop.f32.mrb[206].mxu0 }
 0x287   :  { %v2678_v23 = vsel %vm2228_vm15, %v1513_v14, %v2453_v20  ;;  %v1518_v24 = vadd.f32 %v6324_v42, %v1517_v22  ;;  %v3823_v25 = vpop.f32.mrb[207].mxu0  ;;  %v2082_v26 = vpop.f32.mrb[206].mxu1 }
 0x288   :  { %2903 = vst [vmem:[%s6547_s3 + $0x330] sm:$0xff] %v2678_v23  ;;  %v2791_v6 = vsel %vm2341_vm1, %v2078_v18, %v2566_v21  ;;  %v2083_v27 = vadd.f32 %v6324_v42, %v2082_v26  ;;  %v4162_v28 = vpop.f32.mrb[207].mxu1 }
 0x289   :  { %3016 = vst [vmem:[%s6547_s3 + $0x6b8] sm:$0xff] %v2791_v6  ;;  %vm2229_vm2 = vcmp.gt.f32.partialorder %v1518_v24, 0.0  ;;  %v2454_v29 = vmul.f32 0.1, %v1518_v24 }
 0x28a   :  { %vm2342_vm3 = vcmp.gt.f32.partialorder %v2083_v27, 0.0  ;;  %v2567_v30 = vmul.f32 0.1, %v2083_v27  ;;  %v1522_v31 = vpop.f32.mrb[208].mxu0 }
 0x28b   :  { %v2679_v32 = vsel %vm2229_vm2, %v1518_v24, %v2454_v29  ;;  %v1523_v33 = vadd.f32 %v6324_v42, %v1522_v31  ;;  %v3826_v34 = vpop.f32.mrb[209].mxu0  ;;  %v2087_v35 = vpop.f32.mrb[208].mxu1 }
 0x28c   :  { %2904 = vst [vmem:[%s6547_s3 + $0x338] sm:$0xff] %v2679_v32  ;;  %v2792_v36 = vsel %vm2342_vm3, %v2083_v27, %v2567_v30  ;;  %v2088_v37 = vadd.f32 %v6324_v42, %v2087_v35  ;;  %v4165_v38 = vpop.f32.mrb[209].mxu1 }
 0x28d   :  { %3017 = vst [vmem:[%s6547_s3 + $0x6c0] sm:$0xff] %v2792_v36  ;;  %vm2230_vm5 = vcmp.gt.f32.partialorder %v1523_v33, 0.0  ;;  %v2455_v39 = vmul.f32 0.1, %v1523_v33 }
 0x28e   :  { %vm2343_vm6 = vcmp.gt.f32.partialorder %v2088_v37, 0.0  ;;  %v2568_v40 = vmul.f32 0.1, %v2088_v37  ;;  %v1527_v41 = vpop.f32.mrb[210].mxu0 }
 0x28f   :  { %v2680_v43 = vsel %vm2230_vm5, %v1523_v33, %v2455_v39  ;;  %v1528_v44 = vadd.f32 %v6324_v42, %v1527_v41  ;;  %v3829_v4 = vpop.f32.mrb[211].mxu0  ;;  %v2092_v45 = vpop.f32.mrb[210].mxu1 }
 0x290   :  { %2905 = vst [vmem:[%s6547_s3 + $0x340] sm:$0xff] %v2680_v43  ;;  %v2793_v46 = vsel %vm2343_vm6, %v2088_v37, %v2568_v40  ;;  %v2093_v47 = vadd.f32 %v6324_v42, %v2092_v45  ;;  %v4168_v48 = vpop.f32.mrb[211].mxu1 }
 0x291   :  { %3018 = vst [vmem:[%s6547_s3 + $0x6c8] sm:$0xff] %v2793_v46  ;;  %vm2231_vm7 = vcmp.gt.f32.partialorder %v1528_v44, 0.0  ;;  %v2456_v49 = vmul.f32 0.1, %v1528_v44 }
 0x292   :  { %vm2344_vm8 = vcmp.gt.f32.partialorder %v2093_v47, 0.0  ;;  %v2569_v50 = vmul.f32 0.1, %v2093_v47  ;;  %v1532_v51 = vpop.f32.mrb[212].mxu0 }
 0x293   :  { %v2681_v52 = vsel %vm2231_vm7, %v1528_v44, %v2456_v49  ;;  %v1533_v53 = vadd.f32 %v6324_v42, %v1532_v51  ;;  %v3832_v54 = vpop.f32.mrb[213].mxu0  ;;  %v2097_v55 = vpop.f32.mrb[212].mxu1 }
 0x294   :  { %2906 = vst [vmem:[%s6547_s3 + $0x348] sm:$0xff] %v2681_v52  ;;  %v2794_v56 = vsel %vm2344_vm8, %v2093_v47, %v2569_v50  ;;  %v2098_v57 = vadd.f32 %v6324_v42, %v2097_v55  ;;  %v4171_v58 = vpop.f32.mrb[213].mxu1 }
 0x295   :  { %3019 = vst [vmem:[%s6547_s3 + $0x6d0] sm:$0xff] %v2794_v56  ;;  %vm2232_vm9 = vcmp.gt.f32.partialorder %v1533_v53, 0.0  ;;  %v2457_v60 = vmul.f32 0.1, %v1533_v53 }
 0x296   :  { %vm2345_vm10 = vcmp.gt.f32.partialorder %v2098_v57, 0.0  ;;  %v2570_v59 = vmul.f32 0.1, %v2098_v57  ;;  %v1537_v2 = vpop.f32.mrb[214].mxu0 }
 0x297   :  { %v2682_v61 = vsel %vm2232_vm9, %v1533_v53, %v2457_v60  ;;  %v1538_v62 = vadd.f32 %v6324_v42, %v1537_v2  ;;  %v3835_v63 = vpop.f32.mrb[215].mxu0  ;;  %v2102_v0 = vpop.f32.mrb[214].mxu1 }
 0x298   :  { %2907 = vst [vmem:[%s6547_s3 + $0x350] sm:$0xff] %v2682_v61  ;;  %v2795_v1 = vsel %vm2345_vm10, %v2098_v57, %v2570_v59  ;;  %v2103_v3 = vadd.f32 %v6324_v42, %v2102_v0  ;;  %v4174_v5 = vpop.f32.mrb[215].mxu1 }
 0x299   :  { %3020 = vst [vmem:[%s6547_s3 + $0x6d8] sm:$0xff] %v2795_v1  ;;  %vm2233_vm0 = vcmp.gt.f32.partialorder %v1538_v62, 0.0  ;;  %v2458_v7 = vmul.f32 0.1, %v1538_v62 }
 0x29a   :  { %vm2346_vm11 = vcmp.gt.f32.partialorder %v2103_v3, 0.0  ;;  %v2571_v8 = vmul.f32 0.1, %v2103_v3  ;;  %v1542_v9 = vpop.f32.mrb[216].mxu0 }
 0x29b   :  { %v2683_v10 = vsel %vm2233_vm0, %v1538_v62, %v2458_v7  ;;  %v1543_v11 = vadd.f32 %v6324_v42, %v1542_v9  ;;  %v3838_v12 = vpop.f32.mrb[217].mxu0  ;;  %v2107_v13 = vpop.f32.mrb[216].mxu1 }
 0x29c   :  { %2908 = vst [vmem:[%s6547_s3 + $0x358] sm:$0xff] %v2683_v10  ;;  %v2796_v14 = vsel %vm2346_vm11, %v2103_v3, %v2571_v8  ;;  %v2108_v15 = vadd.f32 %v6324_v42, %v2107_v13  ;;  %v4177_v16 = vpop.f32.mrb[217].mxu1 }
 0x29d   :  { %3021 = vst [vmem:[%s6547_s3 + $0x6e0] sm:$0xff] %v2796_v14  ;;  %vm2234_vm4 = vcmp.gt.f32.partialorder %v1543_v11, 0.0  ;;  %v2459_v17 = vmul.f32 0.1, %v1543_v11 }
 0x29e   :  { %vm2347_vm12 = vcmp.gt.f32.partialorder %v2108_v15, 0.0  ;;  %v2572_v18 = vmul.f32 0.1, %v2108_v15  ;;  %v1547_v19 = vpop.f32.mrb[218].mxu0 }
 0x29f   :  { %v2684_v20 = vsel %vm2234_vm4, %v1543_v11, %v2459_v17  ;;  %v1548_v21 = vadd.f32 %v6324_v42, %v1547_v19  ;;  %v3841_v22 = vpop.f32.mrb[219].mxu0  ;;  %v2112_v23 = vpop.f32.mrb[218].mxu1 }
 0x2a0   :  { %2909 = vst [vmem:[%s6547_s3 + $0x360] sm:$0xff] %v2684_v20  ;;  %v2797_v24 = vsel %vm2347_vm12, %v2108_v15, %v2572_v18  ;;  %v2113_v25 = vadd.f32 %v6324_v42, %v2112_v23  ;;  %v4180_v26 = vpop.f32.mrb[219].mxu1 }
 0x2a1   :  { %3022 = vst [vmem:[%s6547_s3 + $0x6e8] sm:$0xff] %v2797_v24  ;;  %vm2235_vm13 = vcmp.gt.f32.partialorder %v1548_v21, 0.0  ;;  %v2460_v6 = vmul.f32 0.1, %v1548_v21 }
 0x2a2   :  { %vm2348_vm14 = vcmp.gt.f32.partialorder %v2113_v25, 0.0  ;;  %v2573_v27 = vmul.f32 0.1, %v2113_v25  ;;  %v1552_v28 = vpop.f32.mrb[220].mxu0 }
 0x2a3   :  { %v2685_v29 = vsel %vm2235_vm13, %v1548_v21, %v2460_v6  ;;  %v1553_v30 = vadd.f32 %v6324_v42, %v1552_v28  ;;  %v3844_v31 = vpop.f32.mrb[221].mxu0  ;;  %v2117_v32 = vpop.f32.mrb[220].mxu1 }
 0x2a4   :  { %2910 = vst [vmem:[%s6547_s3 + $0x368] sm:$0xff] %v2685_v29  ;;  %v2798_v33 = vsel %vm2348_vm14, %v2113_v25, %v2573_v27  ;;  %v2118_v34 = vadd.f32 %v6324_v42, %v2117_v32  ;;  %v4183_v35 = vpop.f32.mrb[221].mxu1 }
 0x2a5   :  { %3023 = vst [vmem:[%s6547_s3 + $0x6f0] sm:$0xff] %v2798_v33  ;;  %vm2236_vm15 = vcmp.gt.f32.partialorder %v1553_v30, 0.0  ;;  %v2461_v36 = vmul.f32 0.1, %v1553_v30 }
 0x2a6   :  { %vm2349_vm1 = vcmp.gt.f32.partialorder %v2118_v34, 0.0  ;;  %v2574_v37 = vmul.f32 0.1, %v2118_v34  ;;  %v1557_v38 = vpop.f32.mrb[222].mxu0 }
 0x2a7   :  { %v2686_v39 = vsel %vm2236_vm15, %v1553_v30, %v2461_v36  ;;  %v1558_v40 = vadd.f32 %v6324_v42, %v1557_v38  ;;  %v3847_v41 = vpop.f32.mrb[223].mxu0  ;;  %v2122_v43 = vpop.f32.mrb[222].mxu1 }
 0x2a8   :  { %2911 = vst [vmem:[%s6547_s3 + $0x370] sm:$0xff] %v2686_v39  ;;  %v2799_v44 = vsel %vm2349_vm1, %v2118_v34, %v2574_v37  ;;  %v2123_v4 = vadd.f32 %v6324_v42, %v2122_v43  ;;  %v4186_v45 = vpop.f32.mrb[223].mxu1 }
 0x2a9   :  { %3024 = vst [vmem:[%s6547_s3 + $0x6f8] sm:$0xff] %v2799_v44  ;;  %vm2237_vm2 = vcmp.gt.f32.partialorder %v1558_v40, 0.0  ;;  %v2462_v46 = vmul.f32 0.1, %v1558_v40 }
 0x2aa   :  { %vm2350_vm3 = vcmp.gt.f32.partialorder %v2123_v4, 0.0  ;;  %v2575_v47 = vmul.f32 0.1, %v2123_v4  ;;  %v1562_v48 = vpop.f32.mrb[224].mxu0 }
 0x2ab   :  { %v2687_v49 = vsel %vm2237_vm2, %v1558_v40, %v2462_v46  ;;  %v1563_v50 = vadd.f32 %v6324_v42, %v1562_v48  ;;  %v3850_v51 = vpop.f32.mrb[225].mxu0 }
 0x2ac   :  { %2912 = vst [vmem:[%s6547_s3 + $0x378] sm:$0xff] %v2687_v49  ;;  %v2800_v52 = vsel %vm2350_vm3, %v2123_v4, %v2575_v47 }
 0x2ad   :  { %3025 = vst [vmem:[%s6547_s3 + $0x700] sm:$0xff] %v2800_v52  ;;  %vm2238_vm5 = vcmp.gt.f32.partialorder %v1563_v50, 0.0  ;;  %v2463_v53 = vmul.f32 0.1, %v1563_v50 }
 0x2af   :  { %v2688_v54 = vsel %vm2238_vm5, %v1563_v50, %v2463_v53 }
 0x2b0   :  { %2913 = vst [vmem:[%s6547_s3 + $0x380] sm:$0xff] %v2688_v54 }

// kernel: feature_extractor_forward.5
= control target key start
LH: loop header
LB: loop body
LE: loop exit
PB: predicated region body
PF: predicated region fallthrough
CT: control target
= control target key end

     0   :  { %v891_v0 = vmov 0.0|0.0   ;;  %vm137_vm0 = vcmask 130048   ;;  %s1528_s1 = inlined_call_operand.vmem [shape: f32[144,128], index: 1, kind: input, shape index: {}]   ;;  %s1529_s0 = inlined_call_operand.vmem [shape: f32[392,144], index: 0, kind: input, shape index: {}]   ;;  %s1530_s2 = inlined_call_operand.vmem [shape: f32[1,128], index: 2, kind: input, shape index: {}]   ;;  %s1531_s3 = inlined_call_operand.vmem [shape: f32[392,128], index: 3, kind: output, shape index: {}]  }
   0x1   :  { %845 = vmatprep.subr.bf16.mxu0 %v891_v0  ;;  %v112_v1 = vld [vmem:[%s1528_s1] sm:$0xff]  ;;  %v113_v2 = vld [vmem:[%s1528_s1 + $0x8] sm:$0xff]  ;;  %872 = vmatprep.subr.bf16.mxu1 %v891_v0  ;;  %v114_v3 = vld [vmem:[%s1528_s1 + $0x10] sm:$0xff] }
   0x2   :  { %v846_v4 = vpack.c.bf16 %v113_v2, %v112_v1  ;;  %v115_v5 = vld [vmem:[%s1528_s1 + $0x18] sm:$0xff]  ;;  %v116_v7 = vld [vmem:[%s1528_s1 + $0x20] sm:$0xff]  ;;  %v117_v8 = vld [vmem:[%s1528_s1 + $0x28] sm:$0xff] }
   0x3   :  { %v849_v6 = vpack.c.bf16 %v115_v5, %v114_v3  ;;  %v15_v9 = vld [vmem:[%s1529_s0 + $0x8] sm:$0xff]  ;;  %v65_v10 = vld [vmem:[%s1529_s0 + $0x198] sm:$0xff]  ;;  %v852_v11 = vpack.c.bf16 %v117_v8, %v116_v7  ;;  %v118_v12 = vld [vmem:[%s1528_s1 + $0x30] sm:$0xff] }
   0x4   :  { %847 = vmatpush1.bf16.msra.mxu0 %v846_v4  ;;  %881 = vmatpush1.bf16.msra.mxu1 %v846_v4  ;;  %v119_v13 = vld [vmem:[%s1528_s1 + $0x38] sm:$0xff]  ;;  %v120_v15 = vld [vmem:[%s1528_s1 + $0x40] sm:$0xff]  ;;  %v121_v16 = vld [vmem:[%s1528_s1 + $0x48] sm:$0xff] }
   0x5   :  { %848 = vmatprep.subr.bf16.mxu0 %v891_v0  ;;  %873 = vmatprep.subr.bf16.mxu1 %v891_v0  ;;  %v855_v14 = vpack.c.bf16 %v119_v13, %v118_v12  ;;  %v858_v17 = vpack.c.bf16 %v121_v16, %v120_v15  ;;  %v122_v18 = vld [vmem:[%s1528_s1 + $0x50] sm:$0xff]  ;;  %v123_v19 = vld [vmem:[%s1528_s1 + $0x58] sm:$0xff]  ;;  %v124_v21 = vld [vmem:[%s1528_s1 + $0x60] sm:$0xff] }
   0x6   :  { %796 = vmatprep.mubr.msk.f32.mxu0 %vm137_vm0, %v15_v9  ;;  %821 = vmatprep.mubr.msk.f32.mxu1 %vm137_vm0, %v65_v10  ;;  %v861_v20 = vpack.c.bf16 %v123_v19, %v122_v18  ;;  %v125_v22 = vld [vmem:[%s1528_s1 + $0x68] sm:$0xff]  ;;  %v126_v24 = vld [vmem:[%s1528_s1 + $0x70] sm:$0xff]  ;;  %v127_v25 = vld [vmem:[%s1528_s1 + $0x78] sm:$0xff] }
   0x7   :  { %v864_v23 = vpack.c.bf16 %v125_v22, %v124_v21  ;;  %v867_v26 = vpack.c.bf16 %v127_v25, %v126_v24  ;;  %v128_v27 = vld [vmem:[%s1528_s1 + $0x80] sm:$0xff]  ;;  %v129_v28 = vld [vmem:[%s1528_s1 + $0x88] sm:$0xff]  ;;  %v64_v31 = vld [vmem:[%s1529_s0 + $0x190] sm:$0xff] }
   0x8   :  { %850 = vmatpush1.bf16.msra.mxu0 %v849_v6  ;;  %882 = vmatpush1.bf16.msra.mxu1 %v849_v6  ;;  %v870_v29 = vpack.c.bf16 %v129_v28, %v128_v27  ;;  %v14_v30 = vld [vmem:[%s1529_s0] sm:$0xff]  ;;  %v17_v32 = vld [vmem:[%s1529_s0 + $0x18] sm:$0xff]  ;;  %v67_v33 = vld [vmem:[%s1529_s0 + $0x1a8] sm:$0xff] }
   0x9   :  { %851 = vmatprep.subr.bf16.mxu0 %v891_v0  ;;  %874 = vmatprep.subr.bf16.mxu1 %v891_v0  ;;  %v16_v34 = vld [vmem:[%s1529_s0 + $0x10] sm:$0xff]  ;;  %v66_v35 = vld [vmem:[%s1529_s0 + $0x1a0] sm:$0xff]  ;;  %v19_v36 = vld [vmem:[%s1529_s0 + $0x28] sm:$0xff] }
   0xa   :  { %v69_v37 = vld [vmem:[%s1529_s0 + $0x1b8] sm:$0xff]  ;;  %v18_v38 = vld [vmem:[%s1529_s0 + $0x20] sm:$0xff]  ;;  %v68_v39 = vld [vmem:[%s1529_s0 + $0x1b0] sm:$0xff] }
   0xb   :  { %v21_v40 = vld [vmem:[%s1529_s0 + $0x38] sm:$0xff]  ;;  %v71_v41 = vld [vmem:[%s1529_s0 + $0x1c8] sm:$0xff]  ;;  %v20_v42 = vld [vmem:[%s1529_s0 + $0x30] sm:$0xff] }
   0xc   :  { %853 = vmatpush1.bf16.msra.mxu0 %v852_v11  ;;  %883 = vmatpush1.bf16.msra.mxu1 %v852_v11  ;;  %v70_v43 = vld [vmem:[%s1529_s0 + $0x1c0] sm:$0xff]  ;;  %v23_v44 = vld [vmem:[%s1529_s0 + $0x48] sm:$0xff]  ;;  %v73_v45 = vld [vmem:[%s1529_s0 + $0x1d8] sm:$0xff] }
   0xd   :  { %854 = vmatprep.subr.bf16.mxu0 %v891_v0  ;;  %875 = vmatprep.subr.bf16.mxu1 %v891_v0  ;;  %v22_v46 = vld [vmem:[%s1529_s0 + $0x40] sm:$0xff]  ;;  %v72_v47 = vld [vmem:[%s1529_s0 + $0x1d0] sm:$0xff]  ;;  %v25_v48 = vld [vmem:[%s1529_s0 + $0x58] sm:$0xff] }
   0xe   :  { %v75_v49 = vld [vmem:[%s1529_s0 + $0x1e8] sm:$0xff]  ;;  %v24_v50 = vld [vmem:[%s1529_s0 + $0x50] sm:$0xff]  ;;  %v74_v51 = vld [vmem:[%s1529_s0 + $0x1e0] sm:$0xff] }
   0xf   :  { %v27_v52 = vld [vmem:[%s1529_s0 + $0x68] sm:$0xff]  ;;  %v77_v53 = vld [vmem:[%s1529_s0 + $0x1f8] sm:$0xff]  ;;  %v26_v54 = vld [vmem:[%s1529_s0 + $0x60] sm:$0xff] }
  0x10   :  { %856 = vmatpush1.bf16.msra.mxu0 %v855_v14  ;;  %884 = vmatpush1.bf16.msra.mxu1 %v855_v14  ;;  %v76_v55 = vld [vmem:[%s1529_s0 + $0x1f0] sm:$0xff]  ;;  %v29_v56 = vld [vmem:[%s1529_s0 + $0x78] sm:$0xff]  ;;  %v79_v57 = vld [vmem:[%s1529_s0 + $0x208] sm:$0xff] }
  0x11   :  { %857 = vmatprep.subr.bf16.mxu0 %v891_v0  ;;  %876 = vmatprep.subr.bf16.mxu1 %v891_v0  ;;  %v28_v58 = vld [vmem:[%s1529_s0 + $0x70] sm:$0xff]  ;;  %v78_v59 = vld [vmem:[%s1529_s0 + $0x200] sm:$0xff]  ;;  %v31_v60 = vld [vmem:[%s1529_s0 + $0x88] sm:$0xff] }
  0x12   :  { %v81_v61 = vld [vmem:[%s1529_s0 + $0x218] sm:$0xff]  ;;  %v30_v62 = vld [vmem:[%s1529_s0 + $0x80] sm:$0xff]  ;;  %v80_v63 = vld [vmem:[%s1529_s0 + $0x210] sm:$0xff] }
  0x13   :  { %v83_v1 = vld [vmem:[%s1529_s0 + $0x228] sm:$0xff]  ;;  %v32_v2 = vld [vmem:[%s1529_s0 + $0x90] sm:$0xff]  ;;  %v82_v3 = vld [vmem:[%s1529_s0 + $0x220] sm:$0xff] }
  0x14   :  { %859 = vmatpush1.bf16.msra.mxu0 %v858_v17  ;;  %885 = vmatpush1.bf16.msra.mxu1 %v858_v17  ;;  %v35_v4 = vld [vmem:[%s1529_s0 + $0xa8] sm:$0xff]  ;;  %v85_v5 = vld [vmem:[%s1529_s0 + $0x238] sm:$0xff]  ;;  %v34_v6 = vld [vmem:[%s1529_s0 + $0xa0] sm:$0xff] }
  0x15   :  { %860 = vmatprep.subr.bf16.mxu0 %v891_v0  ;;  %877 = vmatprep.subr.bf16.mxu1 %v891_v0  ;;  %v84_v7 = vld [vmem:[%s1529_s0 + $0x230] sm:$0xff]  ;;  %v37_v8 = vld [vmem:[%s1529_s0 + $0xb8] sm:$0xff]  ;;  %v87_v9 = vld [vmem:[%s1529_s0 + $0x248] sm:$0xff] }
  0x16   :  { %v36_v10 = vld [vmem:[%s1529_s0 + $0xb0] sm:$0xff]  ;;  %v86_v11 = vld [vmem:[%s1529_s0 + $0x240] sm:$0xff]  ;;  %v39_v12 = vld [vmem:[%s1529_s0 + $0xc8] sm:$0xff] }
  0x17   :  { %v89_v13 = vld [vmem:[%s1529_s0 + $0x258] sm:$0xff]  ;;  %v38_v14 = vld [vmem:[%s1529_s0 + $0xc0] sm:$0xff]  ;;  %v88_v15 = vld [vmem:[%s1529_s0 + $0x250] sm:$0xff] }
  0x18   :  { %862 = vmatpush1.bf16.msra.mxu0 %v861_v20  ;;  %886 = vmatpush1.bf16.msra.mxu1 %v861_v20  ;;  %v41_v16 = vld [vmem:[%s1529_s0 + $0xd8] sm:$0xff]  ;;  %v91_v17 = vld [vmem:[%s1529_s0 + $0x268] sm:$0xff]  ;;  %v40_v18 = vld [vmem:[%s1529_s0 + $0xd0] sm:$0xff] }
  0x19   :  { %863 = vmatprep.subr.bf16.mxu0 %v891_v0  ;;  %878 = vmatprep.subr.bf16.mxu1 %v891_v0  ;;  %v90_v19 = vld [vmem:[%s1529_s0 + $0x260] sm:$0xff]  ;;  %v43_v20 = vld [vmem:[%s1529_s0 + $0xe8] sm:$0xff]  ;;  %v93_v21 = vld [vmem:[%s1529_s0 + $0x278] sm:$0xff] }
  0x1a   :  { %v42_v22 = vld [vmem:[%s1529_s0 + $0xe0] sm:$0xff]  ;;  %v45_v24 = vld [vmem:[%s1529_s0 + $0xf8] sm:$0xff]  ;;  %v95_v25 = vld [vmem:[%s1529_s0 + $0x288] sm:$0xff] }
  0x1b   :  { %v94_v27 = vld [vmem:[%s1529_s0 + $0x280] sm:$0xff]  ;;  %v47_v28 = vld [vmem:[%s1529_s0 + $0x108] sm:$0xff] }
  0x1c   :  { %865 = vmatpush1.bf16.msra.mxu0 %v864_v23  ;;  %887 = vmatpush1.bf16.msra.mxu1 %v864_v23  ;;  %v92_v23 = vld [vmem:[%s1529_s0 + $0x270] sm:$0xff] }
  0x1d   :  { %866 = vmatprep.subr.bf16.mxu0 %v891_v0  ;;  %879 = vmatprep.subr.bf16.mxu1 %v891_v0 }
  0x20   :  { %868 = vmatpush1.bf16.msra.mxu0 %v867_v26  ;;  %888 = vmatpush1.bf16.msra.mxu1 %v867_v26  ;;  %v44_v26 = vld [vmem:[%s1529_s0 + $0xf0] sm:$0xff] }
  0x21   :  { %869 = vmatprep.subr.bf16.mxu0 %v891_v0  ;;  %880 = vmatprep.subr.bf16.mxu1 %v891_v0  ;;  %v33_v0 = vld [vmem:[%s1529_s0 + $0x98] sm:$0xff] }
  0x24   :  { %871 = vmatpush1.bf16.msra.mxu0 %v870_v29  ;;  %889 = vmatpush1.bf16.msra.mxu1 %v870_v29  ;;  %v97_v29 = vld [vmem:[%s1529_s0 + $0x298] sm:$0xff] }
  0x27   :  { %350 = vmatmul.mubr.f32.vlgmr.msra.gmra.mrb[0].mxu0 %v14_v30  ;;  %475 = vmatmul.mubr.f32.vlgmr.msra.gmra.mrb[0].mxu1 %v64_v31  ;;  %v46_v30 = vld [vmem:[%s1529_s0 + $0x100] sm:$0xff]  ;;  %v96_v31 = vld [vmem:[%s1529_s0 + $0x290] sm:$0xff] }
  0x28   :  { %797 = vmatprep.mubr.msk.f32.mxu0 %vm137_vm0, %v17_v32  ;;  %822 = vmatprep.mubr.msk.f32.mxu1 %vm137_vm0, %v67_v33  ;;  %v49_v32 = vld [vmem:[%s1529_s0 + $0x118] sm:$0xff]  ;;  %v99_v33 = vld [vmem:[%s1529_s0 + $0x2a8] sm:$0xff] }
  0x2b   :  { %355 = vmatmul.mubr.f32.gmra.mrb[2].mxu0 %v16_v34  ;;  %480 = vmatmul.mubr.f32.gmra.mrb[2].mxu1 %v66_v35  ;;  %v48_v34 = vld [vmem:[%s1529_s0 + $0x110] sm:$0xff]  ;;  %v98_v35 = vld [vmem:[%s1529_s0 + $0x2a0] sm:$0xff] }
  0x2c   :  { %798 = vmatprep.mubr.msk.f32.mxu0 %vm137_vm0, %v19_v36  ;;  %823 = vmatprep.mubr.msk.f32.mxu1 %vm137_vm0, %v69_v37  ;;  %v51_v36 = vld [vmem:[%s1529_s0 + $0x128] sm:$0xff]  ;;  %v101_v37 = vld [vmem:[%s1529_s0 + $0x2b8] sm:$0xff] }
  0x2f   :  { %360 = vmatmul.mubr.f32.gmra.mrb[4].mxu0 %v18_v38  ;;  %485 = vmatmul.mubr.f32.gmra.mrb[4].mxu1 %v68_v39  ;;  %v50_v38 = vld [vmem:[%s1529_s0 + $0x120] sm:$0xff]  ;;  %v100_v39 = vld [vmem:[%s1529_s0 + $0x2b0] sm:$0xff] }
  0x30   :  { %799 = vmatprep.mubr.msk.f32.mxu0 %vm137_vm0, %v21_v40  ;;  %824 = vmatprep.mubr.msk.f32.mxu1 %vm137_vm0, %v71_v41  ;;  %v53_v40 = vld [vmem:[%s1529_s0 + $0x138] sm:$0xff]  ;;  %v103_v41 = vld [vmem:[%s1529_s0 + $0x2c8] sm:$0xff] }
  0x33   :  { %365 = vmatmul.mubr.f32.gmra.mrb[6].mxu0 %v20_v42  ;;  %490 = vmatmul.mubr.f32.gmra.mrb[6].mxu1 %v70_v43  ;;  %v52_v42 = vld [vmem:[%s1529_s0 + $0x130] sm:$0xff]  ;;  %v102_v43 = vld [vmem:[%s1529_s0 + $0x2c0] sm:$0xff] }
  0x34   :  { %800 = vmatprep.mubr.msk.f32.mxu0 %vm137_vm0, %v23_v44  ;;  %825 = vmatprep.mubr.msk.f32.mxu1 %vm137_vm0, %v73_v45  ;;  %v55_v44 = vld [vmem:[%s1529_s0 + $0x148] sm:$0xff]  ;;  %v105_v45 = vld [vmem:[%s1529_s0 + $0x2d8] sm:$0xff] }
  0x37   :  { %370 = vmatmul.mubr.f32.gmra.mrb[8].mxu0 %v22_v46  ;;  %495 = vmatmul.mubr.f32.gmra.mrb[8].mxu1 %v72_v47  ;;  %v54_v46 = vld [vmem:[%s1529_s0 + $0x140] sm:$0xff]  ;;  %v104_v47 = vld [vmem:[%s1529_s0 + $0x2d0] sm:$0xff] }
  0x38   :  { %801 = vmatprep.mubr.msk.f32.mxu0 %vm137_vm0, %v25_v48  ;;  %826 = vmatprep.mubr.msk.f32.mxu1 %vm137_vm0, %v75_v49  ;;  %v57_v48 = vld [vmem:[%s1529_s0 + $0x158] sm:$0xff]  ;;  %v107_v49 = vld [vmem:[%s1529_s0 + $0x2e8] sm:$0xff] }
  0x3b   :  { %375 = vmatmul.mubr.f32.gmra.mrb[10].mxu0 %v24_v50  ;;  %500 = vmatmul.mubr.f32.gmra.mrb[10].mxu1 %v74_v51  ;;  %v56_v50 = vld [vmem:[%s1529_s0 + $0x150] sm:$0xff]  ;;  %v106_v51 = vld [vmem:[%s1529_s0 + $0x2e0] sm:$0xff] }
  0x3c   :  { %802 = vmatprep.mubr.msk.f32.mxu0 %vm137_vm0, %v27_v52  ;;  %827 = vmatprep.mubr.msk.f32.mxu1 %vm137_vm0, %v77_v53  ;;  %v59_v52 = vld [vmem:[%s1529_s0 + $0x168] sm:$0xff]  ;;  %v109_v53 = vld [vmem:[%s1529_s0 + $0x2f8] sm:$0xff] }
  0x3f   :  { %380 = vmatmul.mubr.f32.gmra.mrb[12].mxu0 %v26_v54  ;;  %505 = vmatmul.mubr.f32.gmra.mrb[12].mxu1 %v76_v55  ;;  %v58_v54 = vld [vmem:[%s1529_s0 + $0x160] sm:$0xff]  ;;  %v108_v55 = vld [vmem:[%s1529_s0 + $0x2f0] sm:$0xff] }
  0x40   :  { %803 = vmatprep.mubr.msk.f32.mxu0 %vm137_vm0, %v29_v56  ;;  %828 = vmatprep.mubr.msk.f32.mxu1 %vm137_vm0, %v79_v57  ;;  %v61_v56 = vld [vmem:[%s1529_s0 + $0x178] sm:$0xff]  ;;  %v111_v57 = vld [vmem:[%s1529_s0 + $0x308] sm:$0xff] }
  0x43   :  { %385 = vmatmul.mubr.f32.gmra.mrb[14].mxu0 %v28_v58  ;;  %510 = vmatmul.mubr.f32.gmra.mrb[14].mxu1 %v78_v59  ;;  %v60_v58 = vld [vmem:[%s1529_s0 + $0x170] sm:$0xff]  ;;  %v110_v59 = vld [vmem:[%s1529_s0 + $0x300] sm:$0xff] }
  0x44   :  { %804 = vmatprep.mubr.msk.f32.mxu0 %vm137_vm0, %v31_v60  ;;  %829 = vmatprep.mubr.msk.f32.mxu1 %vm137_vm0, %v81_v61  ;;  %v63_v60 = vld [vmem:[%s1529_s0 + $0x188] sm:$0xff]  ;;  %v62_v61 = vld [vmem:[%s1529_s0 + $0x180] sm:$0xff] }
  0x47   :  { %390 = vmatmul.mubr.f32.gmra.mrb[16].mxu0 %v30_v62  ;;  %515 = vmatmul.mubr.f32.gmra.mrb[16].mxu1 %v80_v63  ;;  %v1330_v62 = vld [vmem:[%s1530_s2] ss:$0 sm:$0xff] }
  0x48   :  { %805 = vmatprep.mubr.msk.f32.mxu0 %vm137_vm0, %v33_v0  ;;  %830 = vmatprep.mubr.msk.f32.mxu1 %vm137_vm0, %v83_v1 }
  0x4b   :  { %395 = vmatmul.mubr.f32.gmra.mrb[18].mxu0 %v32_v2  ;;  %520 = vmatmul.mubr.f32.gmra.mrb[18].mxu1 %v82_v3 }
  0x4c   :  { %806 = vmatprep.mubr.msk.f32.mxu0 %vm137_vm0, %v35_v4  ;;  %831 = vmatprep.mubr.msk.f32.mxu1 %vm137_vm0, %v85_v5 }
  0x4f   :  { %400 = vmatmul.mubr.f32.gmra.mrb[20].mxu0 %v34_v6  ;;  %525 = vmatmul.mubr.f32.gmra.mrb[20].mxu1 %v84_v7 }
  0x50   :  { %807 = vmatprep.mubr.msk.f32.mxu0 %vm137_vm0, %v37_v8  ;;  %832 = vmatprep.mubr.msk.f32.mxu1 %vm137_vm0, %v87_v9 }
  0x53   :  { %405 = vmatmul.mubr.f32.gmra.mrb[22].mxu0 %v36_v10  ;;  %530 = vmatmul.mubr.f32.gmra.mrb[22].mxu1 %v86_v11 }
  0x54   :  { %808 = vmatprep.mubr.msk.f32.mxu0 %vm137_vm0, %v39_v12  ;;  %833 = vmatprep.mubr.msk.f32.mxu1 %vm137_vm0, %v89_v13 }
  0x57   :  { %410 = vmatmul.mubr.f32.gmra.mrb[24].mxu0 %v38_v14  ;;  %535 = vmatmul.mubr.f32.gmra.mrb[24].mxu1 %v88_v15 }
  0x58   :  { %809 = vmatprep.mubr.msk.f32.mxu0 %vm137_vm0, %v41_v16  ;;  %834 = vmatprep.mubr.msk.f32.mxu1 %vm137_vm0, %v91_v17 }
  0x5b   :  { %415 = vmatmul.mubr.f32.gmra.mrb[26].mxu0 %v40_v18  ;;  %540 = vmatmul.mubr.f32.gmra.mrb[26].mxu1 %v90_v19 }
  0x5c   :  { %810 = vmatprep.mubr.msk.f32.mxu0 %vm137_vm0, %v43_v20  ;;  %835 = vmatprep.mubr.msk.f32.mxu1 %vm137_vm0, %v93_v21 }
  0x5f   :  { %420 = vmatmul.mubr.f32.gmra.mrb[28].mxu0 %v42_v22  ;;  %545 = vmatmul.mubr.f32.gmra.mrb[28].mxu1 %v92_v23 }
  0x60   :  { %811 = vmatprep.mubr.msk.f32.mxu0 %vm137_vm0, %v45_v24  ;;  %836 = vmatprep.mubr.msk.f32.mxu1 %vm137_vm0, %v95_v25 }
  0x63   :  { %425 = vmatmul.mubr.f32.gmra.mrb[30].mxu0 %v44_v26  ;;  %550 = vmatmul.mubr.f32.gmra.mrb[30].mxu1 %v94_v27 }
  0x64   :  { %812 = vmatprep.mubr.msk.f32.mxu0 %vm137_vm0, %v47_v28  ;;  %837 = vmatprep.mubr.msk.f32.mxu1 %vm137_vm0, %v97_v29 }
  0x67   :  { %430 = vmatmul.mubr.f32.gmra.mrb[32].mxu0 %v46_v30  ;;  %555 = vmatmul.mubr.f32.gmra.mrb[32].mxu1 %v96_v31 }
  0x68   :  { %813 = vmatprep.mubr.msk.f32.mxu0 %vm137_vm0, %v49_v32  ;;  %838 = vmatprep.mubr.msk.f32.mxu1 %vm137_vm0, %v99_v33 }
  0x6b   :  { %435 = vmatmul.mubr.f32.gmra.mrb[34].mxu0 %v48_v34  ;;  %560 = vmatmul.mubr.f32.gmra.mrb[34].mxu1 %v98_v35 }
  0x6c   :  { %814 = vmatprep.mubr.msk.f32.mxu0 %vm137_vm0, %v51_v36  ;;  %839 = vmatprep.mubr.msk.f32.mxu1 %vm137_vm0, %v101_v37 }
  0x6f   :  { %440 = vmatmul.mubr.f32.gmra.mrb[36].mxu0 %v50_v38  ;;  %565 = vmatmul.mubr.f32.gmra.mrb[36].mxu1 %v100_v39 }
  0x70   :  { %815 = vmatprep.mubr.msk.f32.mxu0 %vm137_vm0, %v53_v40  ;;  %840 = vmatprep.mubr.msk.f32.mxu1 %vm137_vm0, %v103_v41 }
  0x73   :  { %445 = vmatmul.mubr.f32.gmra.mrb[38].mxu0 %v52_v42  ;;  %570 = vmatmul.mubr.f32.gmra.mrb[38].mxu1 %v102_v43 }
  0x74   :  { %816 = vmatprep.mubr.msk.f32.mxu0 %vm137_vm0, %v55_v44  ;;  %841 = vmatprep.mubr.msk.f32.mxu1 %vm137_vm0, %v105_v45 }
  0x77   :  { %450 = vmatmul.mubr.f32.gmra.mrb[40].mxu0 %v54_v46  ;;  %575 = vmatmul.mubr.f32.gmra.mrb[40].mxu1 %v104_v47 }
  0x78   :  { %817 = vmatprep.mubr.msk.f32.mxu0 %vm137_vm0, %v57_v48  ;;  %842 = vmatprep.mubr.msk.f32.mxu1 %vm137_vm0, %v107_v49 }
  0x7b   :  { %455 = vmatmul.mubr.f32.gmra.mrb[42].mxu0 %v56_v50  ;;  %580 = vmatmul.mubr.f32.gmra.mrb[42].mxu1 %v106_v51 }
  0x7c   :  { %818 = vmatprep.mubr.msk.f32.mxu0 %vm137_vm0, %v59_v52  ;;  %843 = vmatprep.mubr.msk.f32.mxu1 %vm137_vm0, %v109_v53 }
  0x7f   :  { %460 = vmatmul.mubr.f32.gmra.mrb[44].mxu0 %v58_v54  ;;  %585 = vmatmul.mubr.f32.gmra.mrb[44].mxu1 %v108_v55 }
  0x80   :  { %819 = vmatprep.mubr.msk.f32.mxu0 %vm137_vm0, %v61_v56  ;;  %844 = vmatprep.mubr.msk.f32.mxu1 %vm137_vm0, %v111_v57 }
  0x83   :  { %465 = vmatmul.mubr.f32.gmra.mrb[46].mxu0 %v60_v58  ;;  %590 = vmatmul.mubr.f32.gmra.mrb[46].mxu1 %v110_v59 }
  0x84   :  { %820 = vmatprep.mubr.msk.f32.mxu0 %vm137_vm0, %v63_v60 }
  0x87   :  { %470 = vmatmul.mubr.f32.gmra.mrb[48].mxu0 %v62_v61 }
  0xfa   :  { %v351_v63 = vpop.f32.mrb[0].mxu0  ;;  %v476_v0 = vpop.f32.mrb[0].mxu1 }
  0xfb   :  { %v352_v1 = vadd.f32 %v1330_v62, %v351_v63  ;;  %v353_v2 = vpop.f32.mrb[1].mxu0  ;;  %v477_v3 = vadd.f32 %v1330_v62, %v476_v0  ;;  %v478_v4 = vpop.f32.mrb[1].mxu1 }
  0xfd   :  { %vm595_vm1 = vcmp.gt.f32.partialorder %v352_v1, 0.0  ;;  %v644_v5 = vmul.f32 0.1, %v352_v1  ;;  %vm620_vm2 = vcmp.gt.f32.partialorder %v477_v3, 0.0  ;;  %v669_v6 = vmul.f32 0.1, %v477_v3 }
  0xfe   :  { %v356_v7 = vpop.f32.mrb[2].mxu0  ;;  %v481_v8 = vpop.f32.mrb[2].mxu1 }
  0xff   :  { %v693_v9 = vsel %vm595_vm1, %v352_v1, %v644_v5  ;;  %v718_v10 = vsel %vm620_vm2, %v477_v3, %v669_v6  ;;  %v357_v11 = vadd.f32 %v1330_v62, %v356_v7  ;;  %v358_v12 = vpop.f32.mrb[3].mxu0  ;;  %v482_v13 = vadd.f32 %v1330_v62, %v481_v8  ;;  %v483_v14 = vpop.f32.mrb[3].mxu1 }
 0x100   :  { %742 = vst [vmem:[%s1531_s3] sm:$0xff] %v693_v9  ;;  %767 = vst [vmem:[%s1531_s3 + $0xc8] sm:$0xff] %v718_v10 }
 0x101   :  { %vm596_vm3 = vcmp.gt.f32.partialorder %v357_v11, 0.0  ;;  %v645_v15 = vmul.f32 0.1, %v357_v11  ;;  %vm621_vm4 = vcmp.gt.f32.partialorder %v482_v13, 0.0  ;;  %v670_v16 = vmul.f32 0.1, %v482_v13 }
 0x102   :  { %v361_v17 = vpop.f32.mrb[4].mxu0  ;;  %v486_v18 = vpop.f32.mrb[4].mxu1 }
 0x103   :  { %v694_v19 = vsel %vm596_vm3, %v357_v11, %v645_v15  ;;  %v719_v20 = vsel %vm621_vm4, %v482_v13, %v670_v16  ;;  %v362_v21 = vadd.f32 %v1330_v62, %v361_v17  ;;  %v363_v22 = vpop.f32.mrb[5].mxu0  ;;  %v487_v23 = vadd.f32 %v1330_v62, %v486_v18  ;;  %v488_v24 = vpop.f32.mrb[5].mxu1 }
 0x104   :  { %743 = vst [vmem:[%s1531_s3 + $0x8] sm:$0xff] %v694_v19  ;;  %768 = vst [vmem:[%s1531_s3 + $0xd0] sm:$0xff] %v719_v20 }
 0x105   :  { %vm597_vm5 = vcmp.gt.f32.partialorder %v362_v21, 0.0  ;;  %v646_v25 = vmul.f32 0.1, %v362_v21  ;;  %vm622_vm6 = vcmp.gt.f32.partialorder %v487_v23, 0.0  ;;  %v671_v26 = vmul.f32 0.1, %v487_v23 }
 0x106   :  { %v366_v27 = vpop.f32.mrb[6].mxu0  ;;  %v491_v28 = vpop.f32.mrb[6].mxu1 }
 0x107   :  { %v695_v29 = vsel %vm597_vm5, %v362_v21, %v646_v25  ;;  %v720_v30 = vsel %vm622_vm6, %v487_v23, %v671_v26  ;;  %v367_v31 = vadd.f32 %v1330_v62, %v366_v27  ;;  %v368_v32 = vpop.f32.mrb[7].mxu0  ;;  %v492_v33 = vadd.f32 %v1330_v62, %v491_v28  ;;  %v493_v34 = vpop.f32.mrb[7].mxu1 }
 0x108   :  { %744 = vst [vmem:[%s1531_s3 + $0x10] sm:$0xff] %v695_v29  ;;  %769 = vst [vmem:[%s1531_s3 + $0xd8] sm:$0xff] %v720_v30 }
 0x109   :  { %vm598_vm7 = vcmp.gt.f32.partialorder %v367_v31, 0.0  ;;  %v647_v35 = vmul.f32 0.1, %v367_v31  ;;  %vm623_vm8 = vcmp.gt.f32.partialorder %v492_v33, 0.0  ;;  %v672_v36 = vmul.f32 0.1, %v492_v33 }
 0x10a   :  { %v371_v37 = vpop.f32.mrb[8].mxu0  ;;  %v496_v38 = vpop.f32.mrb[8].mxu1 }
 0x10b   :  { %v696_v39 = vsel %vm598_vm7, %v367_v31, %v647_v35  ;;  %v721_v40 = vsel %vm623_vm8, %v492_v33, %v672_v36  ;;  %v372_v41 = vadd.f32 %v1330_v62, %v371_v37  ;;  %v373_v42 = vpop.f32.mrb[9].mxu0  ;;  %v497_v43 = vadd.f32 %v1330_v62, %v496_v38  ;;  %v498_v44 = vpop.f32.mrb[9].mxu1 }
 0x10c   :  { %745 = vst [vmem:[%s1531_s3 + $0x18] sm:$0xff] %v696_v39  ;;  %770 = vst [vmem:[%s1531_s3 + $0xe0] sm:$0xff] %v721_v40 }
 0x10d   :  { %vm599_vm9 = vcmp.gt.f32.partialorder %v372_v41, 0.0  ;;  %v648_v45 = vmul.f32 0.1, %v372_v41  ;;  %vm624_vm10 = vcmp.gt.f32.partialorder %v497_v43, 0.0  ;;  %v673_v46 = vmul.f32 0.1, %v497_v43 }
 0x10e   :  { %v376_v47 = vpop.f32.mrb[10].mxu0  ;;  %v501_v48 = vpop.f32.mrb[10].mxu1 }
 0x10f   :  { %v697_v49 = vsel %vm599_vm9, %v372_v41, %v648_v45  ;;  %v722_v50 = vsel %vm624_vm10, %v497_v43, %v673_v46  ;;  %v377_v51 = vadd.f32 %v1330_v62, %v376_v47  ;;  %v378_v52 = vpop.f32.mrb[11].mxu0  ;;  %v502_v53 = vadd.f32 %v1330_v62, %v501_v48  ;;  %v503_v54 = vpop.f32.mrb[11].mxu1 }
 0x110   :  { %746 = vst [vmem:[%s1531_s3 + $0x20] sm:$0xff] %v697_v49  ;;  %771 = vst [vmem:[%s1531_s3 + $0xe8] sm:$0xff] %v722_v50 }
 0x111   :  { %vm600_vm11 = vcmp.gt.f32.partialorder %v377_v51, 0.0  ;;  %v649_v55 = vmul.f32 0.1, %v377_v51  ;;  %vm625_vm12 = vcmp.gt.f32.partialorder %v502_v53, 0.0  ;;  %v674_v56 = vmul.f32 0.1, %v502_v53 }
 0x112   :  { %v381_v57 = vpop.f32.mrb[12].mxu0  ;;  %v506_v58 = vpop.f32.mrb[12].mxu1 }
 0x113   :  { %v698_v59 = vsel %vm600_vm11, %v377_v51, %v649_v55  ;;  %v723_v60 = vsel %vm625_vm12, %v502_v53, %v674_v56  ;;  %v382_v61 = vadd.f32 %v1330_v62, %v381_v57  ;;  %v383_v63 = vpop.f32.mrb[13].mxu0  ;;  %v507_v0 = vadd.f32 %v1330_v62, %v506_v58  ;;  %v508_v1 = vpop.f32.mrb[13].mxu1 }
 0x114   :  { %747 = vst [vmem:[%s1531_s3 + $0x28] sm:$0xff] %v698_v59  ;;  %772 = vst [vmem:[%s1531_s3 + $0xf0] sm:$0xff] %v723_v60 }
 0x115   :  { %vm601_vm13 = vcmp.gt.f32.partialorder %v382_v61, 0.0  ;;  %v650_v2 = vmul.f32 0.1, %v382_v61  ;;  %vm626_vm14 = vcmp.gt.f32.partialorder %v507_v0, 0.0  ;;  %v675_v3 = vmul.f32 0.1, %v507_v0 }
 0x116   :  { %v386_v4 = vpop.f32.mrb[14].mxu0  ;;  %v511_v5 = vpop.f32.mrb[14].mxu1 }
 0x117   :  { %v699_v6 = vsel %vm601_vm13, %v382_v61, %v650_v2  ;;  %v724_v7 = vsel %vm626_vm14, %v507_v0, %v675_v3  ;;  %v387_v8 = vadd.f32 %v1330_v62, %v386_v4  ;;  %v388_v9 = vpop.f32.mrb[15].mxu0  ;;  %v512_v10 = vadd.f32 %v1330_v62, %v511_v5  ;;  %v513_v11 = vpop.f32.mrb[15].mxu1 }
 0x118   :  { %748 = vst [vmem:[%s1531_s3 + $0x30] sm:$0xff] %v699_v6  ;;  %773 = vst [vmem:[%s1531_s3 + $0xf8] sm:$0xff] %v724_v7 }
 0x119   :  { %vm602_vm15 = vcmp.gt.f32.partialorder %v387_v8, 0.0  ;;  %v651_v12 = vmul.f32 0.1, %v387_v8  ;;  %vm627_vm0 = vcmp.gt.f32.partialorder %v512_v10, 0.0  ;;  %v676_v13 = vmul.f32 0.1, %v512_v10 }
 0x11a   :  { %v391_v14 = vpop.f32.mrb[16].mxu0  ;;  %v516_v15 = vpop.f32.mrb[16].mxu1 }
 0x11b   :  { %v700_v16 = vsel %vm602_vm15, %v387_v8, %v651_v12  ;;  %v725_v17 = vsel %vm627_vm0, %v512_v10, %v676_v13  ;;  %v392_v18 = vadd.f32 %v1330_v62, %v391_v14  ;;  %v393_v19 = vpop.f32.mrb[17].mxu0  ;;  %v517_v20 = vadd.f32 %v1330_v62, %v516_v15  ;;  %v518_v21 = vpop.f32.mrb[17].mxu1 }
 0x11c   :  { %749 = vst [vmem:[%s1531_s3 + $0x38] sm:$0xff] %v700_v16  ;;  %774 = vst [vmem:[%s1531_s3 + $0x100] sm:$0xff] %v725_v17 }
 0x11d   :  { %vm603_vm1 = vcmp.gt.f32.partialorder %v392_v18, 0.0  ;;  %v652_v22 = vmul.f32 0.1, %v392_v18  ;;  %vm628_vm2 = vcmp.gt.f32.partialorder %v517_v20, 0.0  ;;  %v677_v23 = vmul.f32 0.1, %v517_v20 }
 0x11e   :  { %v396_v24 = vpop.f32.mrb[18].mxu0  ;;  %v521_v25 = vpop.f32.mrb[18].mxu1 }
 0x11f   :  { %v701_v26 = vsel %vm603_vm1, %v392_v18, %v652_v22  ;;  %v726_v27 = vsel %vm628_vm2, %v517_v20, %v677_v23  ;;  %v397_v28 = vadd.f32 %v1330_v62, %v396_v24  ;;  %v398_v29 = vpop.f32.mrb[19].mxu0  ;;  %v522_v30 = vadd.f32 %v1330_v62, %v521_v25  ;;  %v523_v31 = vpop.f32.mrb[19].mxu1 }
 0x120   :  { %750 = vst [vmem:[%s1531_s3 + $0x40] sm:$0xff] %v701_v26  ;;  %775 = vst [vmem:[%s1531_s3 + $0x108] sm:$0xff] %v726_v27 }
 0x121   :  { %vm604_vm3 = vcmp.gt.f32.partialorder %v397_v28, 0.0  ;;  %v653_v32 = vmul.f32 0.1, %v397_v28  ;;  %vm629_vm4 = vcmp.gt.f32.partialorder %v522_v30, 0.0  ;;  %v678_v33 = vmul.f32 0.1, %v522_v30 }
 0x122   :  { %v401_v34 = vpop.f32.mrb[20].mxu0  ;;  %v526_v35 = vpop.f32.mrb[20].mxu1 }
 0x123   :  { %v702_v36 = vsel %vm604_vm3, %v397_v28, %v653_v32  ;;  %v727_v37 = vsel %vm629_vm4, %v522_v30, %v678_v33  ;;  %v402_v38 = vadd.f32 %v1330_v62, %v401_v34  ;;  %v403_v39 = vpop.f32.mrb[21].mxu0  ;;  %v527_v40 = vadd.f32 %v1330_v62, %v526_v35  ;;  %v528_v41 = vpop.f32.mrb[21].mxu1 }
 0x124   :  { %751 = vst [vmem:[%s1531_s3 + $0x48] sm:$0xff] %v702_v36  ;;  %776 = vst [vmem:[%s1531_s3 + $0x110] sm:$0xff] %v727_v37 }
 0x125   :  { %vm605_vm5 = vcmp.gt.f32.partialorder %v402_v38, 0.0  ;;  %v654_v42 = vmul.f32 0.1, %v402_v38  ;;  %vm630_vm6 = vcmp.gt.f32.partialorder %v527_v40, 0.0  ;;  %v679_v43 = vmul.f32 0.1, %v527_v40 }
 0x126   :  { %v406_v44 = vpop.f32.mrb[22].mxu0  ;;  %v531_v45 = vpop.f32.mrb[22].mxu1 }
 0x127   :  { %v703_v46 = vsel %vm605_vm5, %v402_v38, %v654_v42  ;;  %v728_v47 = vsel %vm630_vm6, %v527_v40, %v679_v43  ;;  %v407_v48 = vadd.f32 %v1330_v62, %v406_v44  ;;  %v408_v49 = vpop.f32.mrb[23].mxu0  ;;  %v532_v50 = vadd.f32 %v1330_v62, %v531_v45  ;;  %v533_v51 = vpop.f32.mrb[23].mxu1 }
 0x128   :  { %752 = vst [vmem:[%s1531_s3 + $0x50] sm:$0xff] %v703_v46  ;;  %777 = vst [vmem:[%s1531_s3 + $0x118] sm:$0xff] %v728_v47 }
 0x129   :  { %vm606_vm7 = vcmp.gt.f32.partialorder %v407_v48, 0.0  ;;  %v655_v52 = vmul.f32 0.1, %v407_v48  ;;  %vm631_vm8 = vcmp.gt.f32.partialorder %v532_v50, 0.0  ;;  %v680_v53 = vmul.f32 0.1, %v532_v50 }
 0x12a   :  { %v411_v54 = vpop.f32.mrb[24].mxu0  ;;  %v536_v55 = vpop.f32.mrb[24].mxu1 }
 0x12b   :  { %v704_v56 = vsel %vm606_vm7, %v407_v48, %v655_v52  ;;  %v729_v57 = vsel %vm631_vm8, %v532_v50, %v680_v53  ;;  %v412_v58 = vadd.f32 %v1330_v62, %v411_v54  ;;  %v413_v59 = vpop.f32.mrb[25].mxu0  ;;  %v537_v60 = vadd.f32 %v1330_v62, %v536_v55  ;;  %v538_v61 = vpop.f32.mrb[25].mxu1 }
 0x12c   :  { %753 = vst [vmem:[%s1531_s3 + $0x58] sm:$0xff] %v704_v56  ;;  %778 = vst [vmem:[%s1531_s3 + $0x120] sm:$0xff] %v729_v57 }
 0x12d   :  { %vm607_vm9 = vcmp.gt.f32.partialorder %v412_v58, 0.0  ;;  %v656_v63 = vmul.f32 0.1, %v412_v58  ;;  %vm632_vm10 = vcmp.gt.f32.partialorder %v537_v60, 0.0  ;;  %v681_v0 = vmul.f32 0.1, %v537_v60 }
 0x12e   :  { %v416_v1 = vpop.f32.mrb[26].mxu0  ;;  %v541_v2 = vpop.f32.mrb[26].mxu1 }
 0x12f   :  { %v705_v3 = vsel %vm607_vm9, %v412_v58, %v656_v63  ;;  %v730_v4 = vsel %vm632_vm10, %v537_v60, %v681_v0  ;;  %v417_v5 = vadd.f32 %v1330_v62, %v416_v1  ;;  %v418_v6 = vpop.f32.mrb[27].mxu0  ;;  %v542_v7 = vadd.f32 %v1330_v62, %v541_v2  ;;  %v543_v8 = vpop.f32.mrb[27].mxu1 }
 0x130   :  { %754 = vst [vmem:[%s1531_s3 + $0x60] sm:$0xff] %v705_v3  ;;  %779 = vst [vmem:[%s1531_s3 + $0x128] sm:$0xff] %v730_v4 }
 0x131   :  { %vm608_vm11 = vcmp.gt.f32.partialorder %v417_v5, 0.0  ;;  %v657_v9 = vmul.f32 0.1, %v417_v5  ;;  %vm633_vm12 = vcmp.gt.f32.partialorder %v542_v7, 0.0  ;;  %v682_v10 = vmul.f32 0.1, %v542_v7 }
 0x132   :  { %v421_v11 = vpop.f32.mrb[28].mxu0  ;;  %v546_v12 = vpop.f32.mrb[28].mxu1 }
 0x133   :  { %v706_v13 = vsel %vm608_vm11, %v417_v5, %v657_v9  ;;  %v731_v14 = vsel %vm633_vm12, %v542_v7, %v682_v10  ;;  %v422_v15 = vadd.f32 %v1330_v62, %v421_v11  ;;  %v423_v16 = vpop.f32.mrb[29].mxu0  ;;  %v547_v17 = vadd.f32 %v1330_v62, %v546_v12  ;;  %v548_v18 = vpop.f32.mrb[29].mxu1 }
 0x134   :  { %755 = vst [vmem:[%s1531_s3 + $0x68] sm:$0xff] %v706_v13  ;;  %780 = vst [vmem:[%s1531_s3 + $0x130] sm:$0xff] %v731_v14 }
 0x135   :  { %vm609_vm13 = vcmp.gt.f32.partialorder %v422_v15, 0.0  ;;  %v658_v19 = vmul.f32 0.1, %v422_v15  ;;  %vm634_vm14 = vcmp.gt.f32.partialorder %v547_v17, 0.0  ;;  %v683_v20 = vmul.f32 0.1, %v547_v17 }
 0x136   :  { %v426_v21 = vpop.f32.mrb[30].mxu0  ;;  %v551_v22 = vpop.f32.mrb[30].mxu1 }
 0x137   :  { %v707_v23 = vsel %vm609_vm13, %v422_v15, %v658_v19  ;;  %v732_v24 = vsel %vm634_vm14, %v547_v17, %v683_v20  ;;  %v427_v25 = vadd.f32 %v1330_v62, %v426_v21  ;;  %v428_v26 = vpop.f32.mrb[31].mxu0  ;;  %v552_v27 = vadd.f32 %v1330_v62, %v551_v22  ;;  %v553_v28 = vpop.f32.mrb[31].mxu1 }
 0x138   :  { %756 = vst [vmem:[%s1531_s3 + $0x70] sm:$0xff] %v707_v23  ;;  %781 = vst [vmem:[%s1531_s3 + $0x138] sm:$0xff] %v732_v24 }
 0x139   :  { %vm610_vm15 = vcmp.gt.f32.partialorder %v427_v25, 0.0  ;;  %v659_v29 = vmul.f32 0.1, %v427_v25  ;;  %vm635_vm0 = vcmp.gt.f32.partialorder %v552_v27, 0.0  ;;  %v684_v30 = vmul.f32 0.1, %v552_v27 }
 0x13a   :  { %v431_v31 = vpop.f32.mrb[32].mxu0  ;;  %v556_v32 = vpop.f32.mrb[32].mxu1 }
 0x13b   :  { %v708_v33 = vsel %vm610_vm15, %v427_v25, %v659_v29  ;;  %v733_v34 = vsel %vm635_vm0, %v552_v27, %v684_v30  ;;  %v432_v35 = vadd.f32 %v1330_v62, %v431_v31  ;;  %v433_v36 = vpop.f32.mrb[33].mxu0  ;;  %v557_v37 = vadd.f32 %v1330_v62, %v556_v32  ;;  %v558_v38 = vpop.f32.mrb[33].mxu1 }
 0x13c   :  { %757 = vst [vmem:[%s1531_s3 + $0x78] sm:$0xff] %v708_v33  ;;  %782 = vst [vmem:[%s1531_s3 + $0x140] sm:$0xff] %v733_v34 }
 0x13d   :  { %vm611_vm1 = vcmp.gt.f32.partialorder %v432_v35, 0.0  ;;  %v660_v39 = vmul.f32 0.1, %v432_v35  ;;  %vm636_vm2 = vcmp.gt.f32.partialorder %v557_v37, 0.0  ;;  %v685_v40 = vmul.f32 0.1, %v557_v37 }
 0x13e   :  { %v436_v41 = vpop.f32.mrb[34].mxu0  ;;  %v561_v42 = vpop.f32.mrb[34].mxu1 }
 0x13f   :  { %v709_v43 = vsel %vm611_vm1, %v432_v35, %v660_v39  ;;  %v734_v44 = vsel %vm636_vm2, %v557_v37, %v685_v40  ;;  %v437_v45 = vadd.f32 %v1330_v62, %v436_v41  ;;  %v438_v46 = vpop.f32.mrb[35].mxu0  ;;  %v562_v47 = vadd.f32 %v1330_v62, %v561_v42  ;;  %v563_v48 = vpop.f32.mrb[35].mxu1 }
 0x140   :  { %758 = vst [vmem:[%s1531_s3 + $0x80] sm:$0xff] %v709_v43  ;;  %783 = vst [vmem:[%s1531_s3 + $0x148] sm:$0xff] %v734_v44 }
 0x141   :  { %vm612_vm3 = vcmp.gt.f32.partialorder %v437_v45, 0.0  ;;  %v661_v49 = vmul.f32 0.1, %v437_v45  ;;  %vm637_vm4 = vcmp.gt.f32.partialorder %v562_v47, 0.0  ;;  %v686_v50 = vmul.f32 0.1, %v562_v47 }
 0x142   :  { %v441_v51 = vpop.f32.mrb[36].mxu0  ;;  %v566_v52 = vpop.f32.mrb[36].mxu1 }
 0x143   :  { %v710_v53 = vsel %vm612_vm3, %v437_v45, %v661_v49  ;;  %v735_v54 = vsel %vm637_vm4, %v562_v47, %v686_v50  ;;  %v442_v55 = vadd.f32 %v1330_v62, %v441_v51  ;;  %v443_v56 = vpop.f32.mrb[37].mxu0  ;;  %v567_v57 = vadd.f32 %v1330_v62, %v566_v52  ;;  %v568_v58 = vpop.f32.mrb[37].mxu1 }
 0x144   :  { %759 = vst [vmem:[%s1531_s3 + $0x88] sm:$0xff] %v710_v53  ;;  %784 = vst [vmem:[%s1531_s3 + $0x150] sm:$0xff] %v735_v54 }
 0x145   :  { %vm613_vm5 = vcmp.gt.f32.partialorder %v442_v55, 0.0  ;;  %v662_v59 = vmul.f32 0.1, %v442_v55  ;;  %vm638_vm6 = vcmp.gt.f32.partialorder %v567_v57, 0.0  ;;  %v687_v60 = vmul.f32 0.1, %v567_v57 }
 0x146   :  { %v446_v61 = vpop.f32.mrb[38].mxu0  ;;  %v571_v63 = vpop.f32.mrb[38].mxu1 }
 0x147   :  { %v711_v0 = vsel %vm613_vm5, %v442_v55, %v662_v59  ;;  %v736_v1 = vsel %vm638_vm6, %v567_v57, %v687_v60  ;;  %v447_v2 = vadd.f32 %v1330_v62, %v446_v61  ;;  %v448_v3 = vpop.f32.mrb[39].mxu0  ;;  %v572_v4 = vadd.f32 %v1330_v62, %v571_v63  ;;  %v573_v5 = vpop.f32.mrb[39].mxu1 }
 0x148   :  { %760 = vst [vmem:[%s1531_s3 + $0x90] sm:$0xff] %v711_v0  ;;  %785 = vst [vmem:[%s1531_s3 + $0x158] sm:$0xff] %v736_v1 }
 0x149   :  { %vm614_vm7 = vcmp.gt.f32.partialorder %v447_v2, 0.0  ;;  %v663_v6 = vmul.f32 0.1, %v447_v2  ;;  %vm639_vm8 = vcmp.gt.f32.partialorder %v572_v4, 0.0  ;;  %v688_v7 = vmul.f32 0.1, %v572_v4 }
 0x14a   :  { %v451_v8 = vpop.f32.mrb[40].mxu0  ;;  %v576_v9 = vpop.f32.mrb[40].mxu1 }
 0x14b   :  { %v712_v10 = vsel %vm614_vm7, %v447_v2, %v663_v6  ;;  %v737_v11 = vsel %vm639_vm8, %v572_v4, %v688_v7  ;;  %v452_v12 = vadd.f32 %v1330_v62, %v451_v8  ;;  %v453_v13 = vpop.f32.mrb[41].mxu0  ;;  %v577_v14 = vadd.f32 %v1330_v62, %v576_v9  ;;  %v578_v15 = vpop.f32.mrb[41].mxu1 }
 0x14c   :  { %761 = vst [vmem:[%s1531_s3 + $0x98] sm:$0xff] %v712_v10  ;;  %786 = vst [vmem:[%s1531_s3 + $0x160] sm:$0xff] %v737_v11 }
 0x14d   :  { %vm615_vm9 = vcmp.gt.f32.partialorder %v452_v12, 0.0  ;;  %v664_v16 = vmul.f32 0.1, %v452_v12  ;;  %vm640_vm10 = vcmp.gt.f32.partialorder %v577_v14, 0.0  ;;  %v689_v17 = vmul.f32 0.1, %v577_v14 }
 0x14e   :  { %v456_v18 = vpop.f32.mrb[42].mxu0  ;;  %v581_v19 = vpop.f32.mrb[42].mxu1 }
 0x14f   :  { %v713_v20 = vsel %vm615_vm9, %v452_v12, %v664_v16  ;;  %v738_v21 = vsel %vm640_vm10, %v577_v14, %v689_v17  ;;  %v457_v22 = vadd.f32 %v1330_v62, %v456_v18  ;;  %v458_v23 = vpop.f32.mrb[43].mxu0  ;;  %v582_v24 = vadd.f32 %v1330_v62, %v581_v19  ;;  %v583_v25 = vpop.f32.mrb[43].mxu1 }
 0x150   :  { %762 = vst [vmem:[%s1531_s3 + $0xa0] sm:$0xff] %v713_v20  ;;  %787 = vst [vmem:[%s1531_s3 + $0x168] sm:$0xff] %v738_v21 }
 0x151   :  { %vm616_vm11 = vcmp.gt.f32.partialorder %v457_v22, 0.0  ;;  %v665_v26 = vmul.f32 0.1, %v457_v22  ;;  %vm641_vm12 = vcmp.gt.f32.partialorder %v582_v24, 0.0  ;;  %v690_v27 = vmul.f32 0.1, %v582_v24 }
 0x152   :  { %v461_v28 = vpop.f32.mrb[44].mxu0  ;;  %v586_v29 = vpop.f32.mrb[44].mxu1 }
 0x153   :  { %v714_v30 = vsel %vm616_vm11, %v457_v22, %v665_v26  ;;  %v739_v31 = vsel %vm641_vm12, %v582_v24, %v690_v27  ;;  %v462_v32 = vadd.f32 %v1330_v62, %v461_v28  ;;  %v463_v33 = vpop.f32.mrb[45].mxu0  ;;  %v587_v34 = vadd.f32 %v1330_v62, %v586_v29  ;;  %v588_v35 = vpop.f32.mrb[45].mxu1 }
 0x154   :  { %763 = vst [vmem:[%s1531_s3 + $0xa8] sm:$0xff] %v714_v30  ;;  %788 = vst [vmem:[%s1531_s3 + $0x170] sm:$0xff] %v739_v31 }
 0x155   :  { %vm617_vm13 = vcmp.gt.f32.partialorder %v462_v32, 0.0  ;;  %v666_v36 = vmul.f32 0.1, %v462_v32  ;;  %vm642_vm14 = vcmp.gt.f32.partialorder %v587_v34, 0.0  ;;  %v691_v37 = vmul.f32 0.1, %v587_v34 }
 0x156   :  { %v466_v38 = vpop.f32.mrb[46].mxu0  ;;  %v591_v39 = vpop.f32.mrb[46].mxu1 }
 0x157   :  { %v715_v40 = vsel %vm617_vm13, %v462_v32, %v666_v36  ;;  %v740_v41 = vsel %vm642_vm14, %v587_v34, %v691_v37  ;;  %v467_v42 = vadd.f32 %v1330_v62, %v466_v38  ;;  %v468_v43 = vpop.f32.mrb[47].mxu0  ;;  %v592_v44 = vadd.f32 %v1330_v62, %v591_v39  ;;  %v593_v45 = vpop.f32.mrb[47].mxu1 }
 0x158   :  { %764 = vst [vmem:[%s1531_s3 + $0xb0] sm:$0xff] %v715_v40  ;;  %789 = vst [vmem:[%s1531_s3 + $0x178] sm:$0xff] %v740_v41 }
 0x159   :  { %vm618_vm15 = vcmp.gt.f32.partialorder %v467_v42, 0.0  ;;  %v667_v46 = vmul.f32 0.1, %v467_v42  ;;  %vm643_vm0 = vcmp.gt.f32.partialorder %v592_v44, 0.0  ;;  %v692_v47 = vmul.f32 0.1, %v592_v44 }
 0x15a   :  { %v471_v48 = vpop.f32.mrb[48].mxu0 }
 0x15b   :  { %v716_v49 = vsel %vm618_vm15, %v467_v42, %v667_v46  ;;  %v741_v50 = vsel %vm643_vm0, %v592_v44, %v692_v47  ;;  %v472_v51 = vadd.f32 %v1330_v62, %v471_v48  ;;  %v473_v52 = vpop.f32.mrb[49].mxu0 }
 0x15c   :  { %765 = vst [vmem:[%s1531_s3 + $0xb8] sm:$0xff] %v716_v49  ;;  %790 = vst [vmem:[%s1531_s3 + $0x180] sm:$0xff] %v741_v50 }
 0x15d   :  { %vm619_vm1 = vcmp.gt.f32.partialorder %v472_v51, 0.0  ;;  %v668_v53 = vmul.f32 0.1, %v472_v51 }
 0x15f   :  { %v717_v54 = vsel %vm619_vm1, %v472_v51, %v668_v53 }
 0x160   :  { %766 = vst [vmem:[%s1531_s3 + $0xc0] sm:$0xff] %v717_v54 }

// kernel: feature_extractor_forward.6
= control target key start
LH: loop header
LB: loop body
LE: loop exit
PB: predicated region body
PF: predicated region fallthrough
CT: control target
= control target key end

     0   :  { %v1140_v0 = vmov 0.0|0.0   ;;  %vm165_vm0 = vcmask 261120   ;;  %s1846_s1 = inlined_call_operand.vmem [shape: f32[288,128], index: 1, kind: input, shape index: {}]   ;;  %s1847_s0 = inlined_call_operand.vmem [shape: f32[288,288], index: 0, kind: input, shape index: {}]   ;;  %s1848_s2 = inlined_call_operand.vmem [shape: f32[1,128], index: 2, kind: input, shape index: {}]   ;;  %s1849_s3 = inlined_call_operand.vmem [shape: f32[288,128], index: 3, kind: output, shape index: {}]  }
   0x1   :  { %1051 = vmatprep.subr.bf16.mxu0 %v1140_v0  ;;  %1107 = vmatprep.subr.bf16.mxu1 %v1140_v0  ;;  %v122_v1 = vld [vmem:[%s1846_s1] sm:$0xff]  ;;  %v123_v2 = vld [vmem:[%s1846_s1 + $0x8] sm:$0xff]  ;;  %v124_v3 = vld [vmem:[%s1846_s1 + $0x10] sm:$0xff] }
   0x2   :  { %v1052_v4 = vpack.c.bf16 %v123_v2, %v122_v1  ;;  %v125_v5 = vld [vmem:[%s1846_s1 + $0x18] sm:$0xff]  ;;  %v126_v7 = vld [vmem:[%s1846_s1 + $0x20] sm:$0xff]  ;;  %v127_v8 = vld [vmem:[%s1846_s1 + $0x28] sm:$0xff] }
   0x3   :  { %v1055_v6 = vpack.c.bf16 %v125_v5, %v124_v3  ;;  %v1058_v9 = vpack.c.bf16 %v127_v8, %v126_v7  ;;  %v128_v10 = vld [vmem:[%s1846_s1 + $0x30] sm:$0xff]  ;;  %v129_v11 = vld [vmem:[%s1846_s1 + $0x38] sm:$0xff]  ;;  %v15_v12 = vld [vmem:[%s1847_s0 + $0x8] sm:$0xff] }
   0x4   :  { %1053 = vmatpush1.bf16.msra.mxu0 %v1052_v4  ;;  %1123 = vmatpush1.bf16.msra.mxu1 %v1052_v4  ;;  %v1061_v13 = vpack.c.bf16 %v129_v11, %v128_v10  ;;  %v96_v14 = vld [vmem:[%s1847_s0 + $0x290] sm:$0xff]  ;;  %v130_v15 = vld [vmem:[%s1846_s1 + $0x40] sm:$0xff]  ;;  %v131_v16 = vld [vmem:[%s1846_s1 + $0x48] sm:$0xff] }
   0x5   :  { %1054 = vmatprep.subr.bf16.mxu0 %v1140_v0  ;;  %1108 = vmatprep.subr.bf16.mxu1 %v1140_v0  ;;  %v1064_v17 = vpack.c.bf16 %v131_v16, %v130_v15  ;;  %v132_v18 = vld [vmem:[%s1846_s1 + $0x50] sm:$0xff]  ;;  %v133_v19 = vld [vmem:[%s1846_s1 + $0x58] sm:$0xff]  ;;  %v134_v21 = vld [vmem:[%s1846_s1 + $0x60] sm:$0xff] }
   0x6   :  { %338 = vmatprep.mubr.f32.mxu0 %v15_v12  ;;  %473 = vmatprep.mubr.f32.mxu1 %v96_v14  ;;  %v1067_v20 = vpack.c.bf16 %v133_v19, %v132_v18  ;;  %v135_v22 = vld [vmem:[%s1846_s1 + $0x68] sm:$0xff]  ;;  %v136_v24 = vld [vmem:[%s1846_s1 + $0x70] sm:$0xff]  ;;  %v137_v25 = vld [vmem:[%s1846_s1 + $0x78] sm:$0xff] }
   0x7   :  { %v1070_v23 = vpack.c.bf16 %v135_v22, %v134_v21  ;;  %v1073_v26 = vpack.c.bf16 %v137_v25, %v136_v24  ;;  %v138_v27 = vld [vmem:[%s1846_s1 + $0x80] sm:$0xff]  ;;  %v139_v28 = vld [vmem:[%s1846_s1 + $0x88] sm:$0xff]  ;;  %v140_v30 = vld [vmem:[%s1846_s1 + $0x90] sm:$0xff] }
   0x8   :  { %1056 = vmatpush1.bf16.msra.mxu0 %v1055_v6  ;;  %1124 = vmatpush1.bf16.msra.mxu1 %v1055_v6  ;;  %v1076_v29 = vpack.c.bf16 %v139_v28, %v138_v27  ;;  %v141_v31 = vld [vmem:[%s1846_s1 + $0x98] sm:$0xff]  ;;  %v142_v33 = vld [vmem:[%s1846_s1 + $0xa0] sm:$0xff]  ;;  %v143_v34 = vld [vmem:[%s1846_s1 + $0xa8] sm:$0xff] }
   0x9   :  { %1057 = vmatprep.subr.bf16.mxu0 %v1140_v0  ;;  %1109 = vmatprep.subr.bf16.mxu1 %v1140_v0  ;;  %v1079_v32 = vpack.c.bf16 %v141_v31, %v140_v30  ;;  %v1082_v35 = vpack.c.bf16 %v143_v34, %v142_v33  ;;  %v144_v36 = vld [vmem:[%s1846_s1 + $0xb0] sm:$0xff]  ;;  %v145_v37 = vld [vmem:[%s1846_s1 + $0xb8] sm:$0xff]  ;;  %v146_v39 = vld [vmem:[%s1846_s1 + $0xc0] sm:$0xff] }
   0xa   :  { %v1085_v38 = vpack.c.bf16 %v145_v37, %v144_v36  ;;  %v147_v40 = vld [vmem:[%s1846_s1 + $0xc8] sm:$0xff]  ;;  %v148_v42 = vld [vmem:[%s1846_s1 + $0xd0] sm:$0xff]  ;;  %v149_v43 = vld [vmem:[%s1846_s1 + $0xd8] sm:$0xff] }
   0xb   :  { %v1088_v41 = vpack.c.bf16 %v147_v40, %v146_v39  ;;  %v1091_v44 = vpack.c.bf16 %v149_v43, %v148_v42  ;;  %v150_v45 = vld [vmem:[%s1846_s1 + $0xe0] sm:$0xff]  ;;  %v151_v46 = vld [vmem:[%s1846_s1 + $0xe8] sm:$0xff]  ;;  %v152_v48 = vld [vmem:[%s1846_s1 + $0xf0] sm:$0xff] }
   0xc   :  { %1059 = vmatpush1.bf16.msra.mxu0 %v1058_v9  ;;  %1125 = vmatpush1.bf16.msra.mxu1 %v1058_v9  ;;  %v1094_v47 = vpack.c.bf16 %v151_v46, %v150_v45  ;;  %v153_v49 = vld [vmem:[%s1846_s1 + $0xf8] sm:$0xff]  ;;  %v154_v50 = vld [vmem:[%s1846_s1 + $0x100] sm:$0xff]  ;;  %v155_v51 = vld [vmem:[%s1846_s1 + $0x108] sm:$0xff] }
   0xd   :  { %1060 = vmatprep.subr.bf16.mxu0 %v1140_v0  ;;  %1110 = vmatprep.subr.bf16.mxu1 %v1140_v0  ;;  %v1097_v52 = vpack.c.bf16 %v153_v49, %v152_v48  ;;  %v1099_v53 = vpack.c.bf16 %v155_v51, %v154_v50  ;;  %v156_v54 = vld [vmem:[%s1846_s1 + $0x110] sm:$0xff]  ;;  %v157_v55 = vld [vmem:[%s1846_s1 + $0x118] sm:$0xff]  ;;  %v14_v56 = vld [vmem:[%s1847_s0] sm:$0xff] }
   0xe   :  { %v95_v57 = vld [vmem:[%s1847_s0 + $0x288] sm:$0xff]  ;;  %v18_v58 = vld [vmem:[%s1847_s0 + $0x20] sm:$0xff]  ;;  %v1103_v59 = vpack.c.bf16 %v157_v55, %v156_v54  ;;  %v17_v61 = vld [vmem:[%s1847_s0 + $0x18] sm:$0xff] }
   0xf   :  { %v99_v60 = vld [vmem:[%s1847_s0 + $0x2a8] sm:$0xff]  ;;  %v98_v62 = vld [vmem:[%s1847_s0 + $0x2a0] sm:$0xff]  ;;  %v21_v63 = vld [vmem:[%s1847_s0 + $0x38] sm:$0xff] }
  0x10   :  { %1062 = vmatpush1.bf16.msra.mxu0 %v1061_v13  ;;  %1126 = vmatpush1.bf16.msra.mxu1 %v1061_v13  ;;  %v20_v1 = vld [vmem:[%s1847_s0 + $0x30] sm:$0xff]  ;;  %v101_v2 = vld [vmem:[%s1847_s0 + $0x2b8] sm:$0xff]  ;;  %v23_v5 = vld [vmem:[%s1847_s0 + $0x48] sm:$0xff] }
  0x11   :  { %1063 = vmatprep.subr.bf16.mxu0 %v1140_v0  ;;  %1111 = vmatprep.subr.bf16.mxu1 %v1140_v0  ;;  %v24_v3 = vld [vmem:[%s1847_s0 + $0x50] sm:$0xff]  ;;  %v105_v4 = vld [vmem:[%s1847_s0 + $0x2d8] sm:$0xff]  ;;  %v27_v7 = vld [vmem:[%s1847_s0 + $0x68] sm:$0xff] }
  0x12   :  { %v104_v6 = vld [vmem:[%s1847_s0 + $0x2d0] sm:$0xff]  ;;  %v26_v9 = vld [vmem:[%s1847_s0 + $0x60] sm:$0xff]  ;;  %v107_v10 = vld [vmem:[%s1847_s0 + $0x2e8] sm:$0xff] }
  0x13   :  { %v108_v8 = vld [vmem:[%s1847_s0 + $0x2f0] sm:$0xff]  ;;  %v30_v11 = vld [vmem:[%s1847_s0 + $0x80] sm:$0xff]  ;;  %v111_v12 = vld [vmem:[%s1847_s0 + $0x308] sm:$0xff] }
  0x14   :  { %1065 = vmatpush1.bf16.msra.mxu0 %v1064_v17  ;;  %1127 = vmatpush1.bf16.msra.mxu1 %v1064_v17  ;;  %v29_v13 = vld [vmem:[%s1847_s0 + $0x78] sm:$0xff]  ;;  %v110_v14 = vld [vmem:[%s1847_s0 + $0x300] sm:$0xff]  ;;  %v32_v17 = vld [vmem:[%s1847_s0 + $0x90] sm:$0xff] }
  0x15   :  { %1066 = vmatprep.subr.bf16.mxu0 %v1140_v0  ;;  %1112 = vmatprep.subr.bf16.mxu1 %v1140_v0  ;;  %v33_v15 = vld [vmem:[%s1847_s0 + $0x98] sm:$0xff]  ;;  %v114_v16 = vld [vmem:[%s1847_s0 + $0x320] sm:$0xff]  ;;  %v36_v19 = vld [vmem:[%s1847_s0 + $0xb0] sm:$0xff] }
  0x16   :  { %v113_v18 = vld [vmem:[%s1847_s0 + $0x318] sm:$0xff]  ;;  %v35_v21 = vld [vmem:[%s1847_s0 + $0xa8] sm:$0xff]  ;;  %v116_v22 = vld [vmem:[%s1847_s0 + $0x330] sm:$0xff] }
  0x17   :  { %v120_v24 = vld [vmem:[%s1847_s0 + $0x350] sm:$0xff]  ;;  %v38_v25 = vld [vmem:[%s1847_s0 + $0xc0] sm:$0xff]  ;;  %v19_v30 = vld [vmem:[%s1847_s0 + $0x28] sm:$0xff] }
  0x18   :  { %1068 = vmatpush1.bf16.msra.mxu0 %v1067_v20  ;;  %1128 = vmatpush1.bf16.msra.mxu1 %v1067_v20  ;;  %v117_v20 = vld [vmem:[%s1847_s0 + $0x338] sm:$0xff]  ;;  %v42_v27 = vld [vmem:[%s1847_s0 + $0xe0] sm:$0xff]  ;;  %v16_v28 = vld [vmem:[%s1847_s0 + $0x10] sm:$0xff] }
  0x19   :  { %1069 = vmatprep.subr.bf16.mxu0 %v1140_v0  ;;  %1113 = vmatprep.subr.bf16.mxu1 %v1140_v0  ;;  %v45_v31 = vld [vmem:[%s1847_s0 + $0xf8] sm:$0xff]  ;;  %v44_v33 = vld [vmem:[%s1847_s0 + $0xf0] sm:$0xff]  ;;  %v47_v37 = vld [vmem:[%s1847_s0 + $0x108] sm:$0xff] }
  0x1a   :  { %v25_v34 = vld [vmem:[%s1847_s0 + $0x58] sm:$0xff]  ;;  %v28_v36 = vld [vmem:[%s1847_s0 + $0x70] sm:$0xff]  ;;  %v51_v39 = vld [vmem:[%s1847_s0 + $0x128] sm:$0xff] }
  0x1b   :  { %v34_v40 = vld [vmem:[%s1847_s0 + $0xa0] sm:$0xff]  ;;  %v37_v42 = vld [vmem:[%s1847_s0 + $0xb8] sm:$0xff]  ;;  %v43_v46 = vld [vmem:[%s1847_s0 + $0xe8] sm:$0xff] }
  0x1c   :  { %1071 = vmatpush1.bf16.msra.mxu0 %v1070_v23  ;;  %1129 = vmatpush1.bf16.msra.mxu1 %v1070_v23  ;;  %v39_v23 = vld [vmem:[%s1847_s0 + $0xc8] sm:$0xff]  ;;  %v54_v43 = vld [vmem:[%s1847_s0 + $0x140] sm:$0xff]  ;;  %v53_v45 = vld [vmem:[%s1847_s0 + $0x138] sm:$0xff] }
  0x1d   :  { %1072 = vmatprep.subr.bf16.mxu0 %v1140_v0  ;;  %1114 = vmatprep.subr.bf16.mxu1 %v1140_v0  ;;  %v46_v48 = vld [vmem:[%s1847_s0 + $0x100] sm:$0xff]  ;;  %v56_v49 = vld [vmem:[%s1847_s0 + $0x150] sm:$0xff]  ;;  %v49_v50 = vld [vmem:[%s1847_s0 + $0x118] sm:$0xff] }
  0x1e   :  { %v60_v51 = vld [vmem:[%s1847_s0 + $0x170] sm:$0xff]  ;;  %v55_v54 = vld [vmem:[%s1847_s0 + $0x148] sm:$0xff] }
  0x1f   :  { %v63_v55 = vld [vmem:[%s1847_s0 + $0x188] sm:$0xff] }
  0x20   :  { %1074 = vmatpush1.bf16.msra.mxu0 %v1073_v26  ;;  %1130 = vmatpush1.bf16.msra.mxu1 %v1073_v26  ;;  %v119_v26 = vld [vmem:[%s1847_s0 + $0x348] sm:$0xff] }
  0x21   :  { %1075 = vmatprep.subr.bf16.mxu0 %v1140_v0  ;;  %1115 = vmatprep.subr.bf16.mxu1 %v1140_v0 }
  0x24   :  { %1077 = vmatpush1.bf16.msra.mxu0 %v1076_v29  ;;  %1131 = vmatpush1.bf16.msra.mxu1 %v1076_v29  ;;  %v41_v29 = vld [vmem:[%s1847_s0 + $0xd8] sm:$0xff] }
  0x25   :  { %1078 = vmatprep.subr.bf16.mxu0 %v1140_v0  ;;  %1116 = vmatprep.subr.bf16.mxu1 %v1140_v0 }
  0x28   :  { %1080 = vmatpush1.bf16.msra.mxu0 %v1079_v32  ;;  %1132 = vmatpush1.bf16.msra.mxu1 %v1079_v32  ;;  %v22_v32 = vld [vmem:[%s1847_s0 + $0x40] sm:$0xff] }
  0x29   :  { %1081 = vmatprep.subr.bf16.mxu0 %v1140_v0  ;;  %1117 = vmatprep.subr.bf16.mxu1 %v1140_v0 }
  0x2c   :  { %1083 = vmatpush1.bf16.msra.mxu0 %v1082_v35  ;;  %1133 = vmatpush1.bf16.msra.mxu1 %v1082_v35  ;;  %v48_v35 = vld [vmem:[%s1847_s0 + $0x110] sm:$0xff] }
  0x2d   :  { %1084 = vmatprep.subr.bf16.mxu0 %v1140_v0  ;;  %1118 = vmatprep.subr.bf16.mxu1 %v1140_v0 }
  0x30   :  { %1086 = vmatpush1.bf16.msra.mxu0 %v1085_v38  ;;  %1134 = vmatpush1.bf16.msra.mxu1 %v1085_v38  ;;  %v31_v38 = vld [vmem:[%s1847_s0 + $0x88] sm:$0xff] }
  0x31   :  { %1087 = vmatprep.subr.bf16.mxu0 %v1140_v0  ;;  %1119 = vmatprep.subr.bf16.mxu1 %v1140_v0 }
  0x34   :  { %1089 = vmatpush1.bf16.msra.mxu0 %v1088_v41  ;;  %1135 = vmatpush1.bf16.msra.mxu1 %v1088_v41  ;;  %v50_v41 = vld [vmem:[%s1847_s0 + $0x120] sm:$0xff] }
  0x35   :  { %1090 = vmatprep.subr.bf16.mxu0 %v1140_v0  ;;  %1120 = vmatprep.subr.bf16.mxu1 %v1140_v0 }
  0x38   :  { %1092 = vmatpush1.bf16.msra.mxu0 %v1091_v44  ;;  %1136 = vmatpush1.bf16.msra.mxu1 %v1091_v44  ;;  %v40_v44 = vld [vmem:[%s1847_s0 + $0xd0] sm:$0xff] }
  0x39   :  { %1093 = vmatprep.subr.bf16.mxu0 %v1140_v0  ;;  %1121 = vmatprep.subr.bf16.mxu1 %v1140_v0 }
  0x3c   :  { %1095 = vmatpush1.bf16.msra.mxu0 %v1094_v47  ;;  %1137 = vmatpush1.bf16.msra.mxu1 %v1094_v47  ;;  %v57_v47 = vld [vmem:[%s1847_s0 + $0x158] sm:$0xff] }
  0x3d   :  { %1096 = vmatprep.subr.bf16.mxu0 %v1140_v0  ;;  %1122 = vmatprep.subr.bf16.mxu1 %v1140_v0  ;;  %v102_v0 = vld [vmem:[%s1847_s0 + $0x2c0] sm:$0xff] }
  0x40   :  { %1098 = vmatpush1.bf16.msra.mxu0 %v1097_v52  ;;  %1138 = vmatpush1.bf16.msra.mxu1 %v1097_v52  ;;  %v52_v52 = vld [vmem:[%s1847_s0 + $0x130] sm:$0xff] }
  0x41   :  { %1100 = vmatprep.subr.bf16.mxu1 %v1099_v53 }
  0x43   :  { %339 = vmatmul.mubr.f32.vlgmr.msra.gmra.mrb[0].mxu0 %v14_v56  ;;  %474 = vmatmul.mubr.f32.vlgmr.msra.gmra.mrb[0].mxu1 %v95_v57  ;;  %v58_v56 = vld [vmem:[%s1847_s0 + $0x160] sm:$0xff] }
  0x44   :  { %1102 = vmatpush3.bf16.msra.mxu1 %v1099_v53  ;;  %343 = vmatprep.mubr.f32.mxu0 %v18_v58  ;;  %v59_v53 = vld [vmem:[%s1847_s0 + $0x168] sm:$0xff]  ;;  %v62_v57 = vld [vmem:[%s1847_s0 + $0x180] sm:$0xff]  ;;  %v61_v58 = vld [vmem:[%s1847_s0 + $0x178] sm:$0xff] }
  0x45   :  { %478 = vmatprep.mubr.f32.mxu1 %v99_v60  ;;  %1104 = vmatprep.subr.bf16.mxu1 %v1103_v59  ;;  %v64_v60 = vld [vmem:[%s1847_s0 + $0x190] sm:$0xff] }
  0x47   :  { %344 = vmatmul.mubr.f32.gmra.mrb[2].mxu0 %v17_v61  ;;  %479 = vmatmul.mubr.f32.gmra.mrb[2].mxu1 %v98_v62  ;;  %v65_v61 = vld [vmem:[%s1847_s0 + $0x198] sm:$0xff]  ;;  %v67_v62 = vld [vmem:[%s1847_s0 + $0x1a8] sm:$0xff] }
  0x48   :  { %348 = vmatprep.mubr.f32.mxu0 %v21_v63  ;;  %483 = vmatprep.mubr.f32.mxu1 %v102_v0  ;;  %v69_v63 = vld [vmem:[%s1847_s0 + $0x1b8] sm:$0xff]  ;;  %v70_v0 = vld [vmem:[%s1847_s0 + $0x1c0] sm:$0xff] }
  0x49   :  { %1106 = vmatpush3.bf16.msra.mxu1 %v1103_v59  ;;  %v66_v59 = vld [vmem:[%s1847_s0 + $0x1a0] sm:$0xff] }
  0x4b   :  { %349 = vmatmul.mubr.f32.gmra.mrb[4].mxu0 %v20_v1  ;;  %484 = vmatmul.mubr.f32.gmra.mrb[4].mxu1 %v101_v2  ;;  %v68_v1 = vld [vmem:[%s1847_s0 + $0x1b0] sm:$0xff]  ;;  %v73_v2 = vld [vmem:[%s1847_s0 + $0x1d8] sm:$0xff] }
  0x4c   :  { %353 = vmatprep.mubr.f32.mxu0 %v24_v3  ;;  %488 = vmatprep.mubr.f32.mxu1 %v105_v4  ;;  %v72_v3 = vld [vmem:[%s1847_s0 + $0x1d0] sm:$0xff] }
  0x4d   :  { %v76_v4 = vld [vmem:[%s1847_s0 + $0x1f0] sm:$0xff] }
  0x4f   :  { %354 = vmatmul.mubr.f32.gmra.mrb[6].mxu0 %v23_v5  ;;  %489 = vmatmul.mubr.f32.gmra.mrb[6].mxu1 %v104_v6  ;;  %v71_v5 = vld [vmem:[%s1847_s0 + $0x1c8] sm:$0xff] }
  0x50   :  { %358 = vmatprep.mubr.f32.mxu0 %v27_v7  ;;  %493 = vmatprep.mubr.f32.mxu1 %v108_v8  ;;  %v79_v6 = vld [vmem:[%s1847_s0 + $0x208] sm:$0xff]  ;;  %v82_v8 = vld [vmem:[%s1847_s0 + $0x220] sm:$0xff] }
  0x51   :  { %v75_v7 = vld [vmem:[%s1847_s0 + $0x1e8] sm:$0xff] }
  0x53   :  { %359 = vmatmul.mubr.f32.gmra.mrb[8].mxu0 %v26_v9  ;;  %494 = vmatmul.mubr.f32.gmra.mrb[8].mxu1 %v107_v10  ;;  %v74_v9 = vld [vmem:[%s1847_s0 + $0x1e0] sm:$0xff]  ;;  %v85_v10 = vld [vmem:[%s1847_s0 + $0x238] sm:$0xff] }
  0x54   :  { %363 = vmatprep.mubr.f32.mxu0 %v30_v11  ;;  %498 = vmatprep.mubr.f32.mxu1 %v111_v12  ;;  %v78_v11 = vld [vmem:[%s1847_s0 + $0x200] sm:$0xff]  ;;  %v88_v12 = vld [vmem:[%s1847_s0 + $0x250] sm:$0xff] }
  0x57   :  { %364 = vmatmul.mubr.f32.gmra.mrb[10].mxu0 %v29_v13  ;;  %499 = vmatmul.mubr.f32.gmra.mrb[10].mxu1 %v110_v14  ;;  %v77_v13 = vld [vmem:[%s1847_s0 + $0x1f8] sm:$0xff]  ;;  %v91_v14 = vld [vmem:[%s1847_s0 + $0x268] sm:$0xff] }
  0x58   :  { %368 = vmatprep.mubr.f32.mxu0 %v33_v15  ;;  %503 = vmatprep.mubr.f32.mxu1 %v114_v16  ;;  %v81_v15 = vld [vmem:[%s1847_s0 + $0x218] sm:$0xff]  ;;  %v94_v16 = vld [vmem:[%s1847_s0 + $0x280] sm:$0xff] }
  0x5b   :  { %369 = vmatmul.mubr.f32.gmra.mrb[12].mxu0 %v32_v17  ;;  %504 = vmatmul.mubr.f32.gmra.mrb[12].mxu1 %v113_v18  ;;  %v80_v17 = vld [vmem:[%s1847_s0 + $0x210] sm:$0xff]  ;;  %v97_v18 = vld [vmem:[%s1847_s0 + $0x298] sm:$0xff] }
  0x5c   :  { %373 = vmatprep.mubr.f32.mxu0 %v36_v19  ;;  %508 = vmatprep.mubr.f32.mxu1 %v117_v20  ;;  %v84_v19 = vld [vmem:[%s1847_s0 + $0x230] sm:$0xff] }
  0x5d   :  { %v100_v20 = vld [vmem:[%s1847_s0 + $0x2b0] sm:$0xff] }
  0x5f   :  { %374 = vmatmul.mubr.f32.gmra.mrb[14].mxu0 %v35_v21  ;;  %509 = vmatmul.mubr.f32.gmra.mrb[14].mxu1 %v116_v22  ;;  %v83_v21 = vld [vmem:[%s1847_s0 + $0x228] sm:$0xff] }
  0x60   :  { %378 = vmatprep.mubr.f32.mxu0 %v39_v23  ;;  %513 = vmatprep.mubr.f32.mxu1 %v120_v24  ;;  %v103_v22 = vld [vmem:[%s1847_s0 + $0x2c8] sm:$0xff]  ;;  %v106_v24 = vld [vmem:[%s1847_s0 + $0x2e0] sm:$0xff] }
  0x61   :  { %v87_v23 = vld [vmem:[%s1847_s0 + $0x248] sm:$0xff] }
  0x63   :  { %379 = vmatmul.mubr.f32.gmra.mrb[16].mxu0 %v38_v25  ;;  %514 = vmatmul.mubr.f32.gmra.mrb[16].mxu1 %v119_v26  ;;  %v86_v25 = vld [vmem:[%s1847_s0 + $0x240] sm:$0xff]  ;;  %v109_v26 = vld [vmem:[%s1847_s0 + $0x2f8] sm:$0xff] }
  0x64   :  { %383 = vmatprep.mubr.f32.mxu0 %v42_v27  ;;  %997 = vmatprep.mubr.msk.f32.mxu1 %vm165_vm0, %v16_v28  ;;  %v90_v27 = vld [vmem:[%s1847_s0 + $0x260] sm:$0xff]  ;;  %v112_v28 = vld [vmem:[%s1847_s0 + $0x310] sm:$0xff] }
  0x67   :  { %384 = vmatmul.mubr.f32.gmra.mrb[18].mxu0 %v41_v29  ;;  %998 = vmatmul.mubr.msk.f32.vlgmr.msra.gmra.mrb[18].mxu1 %vm165_vm0, %v19_v30  ;;  %v89_v29 = vld [vmem:[%s1847_s0 + $0x258] sm:$0xff]  ;;  %v115_v30 = vld [vmem:[%s1847_s0 + $0x328] sm:$0xff] }
  0x68   :  { %388 = vmatprep.mubr.f32.mxu0 %v45_v31  ;;  %1000 = vmatprep.mubr.msk.f32.mxu1 %vm165_vm0, %v22_v32  ;;  %v93_v31 = vld [vmem:[%s1847_s0 + $0x278] sm:$0xff]  ;;  %v118_v32 = vld [vmem:[%s1847_s0 + $0x340] sm:$0xff] }
  0x6b   :  { %389 = vmatmul.mubr.f32.gmra.mrb[20].mxu0 %v44_v33  ;;  %1001 = vmatmul.mubr.msk.f32.gmra.mrb[20].mxu1 %vm165_vm0, %v25_v34  ;;  %v92_v33 = vld [vmem:[%s1847_s0 + $0x270] sm:$0xff]  ;;  %v121_v34 = vld [vmem:[%s1847_s0 + $0x358] sm:$0xff] }
  0x6c   :  { %393 = vmatprep.mubr.f32.mxu0 %v48_v35  ;;  %1003 = vmatprep.mubr.msk.f32.mxu1 %vm165_vm0, %v28_v36 }
  0x6f   :  { %394 = vmatmul.mubr.f32.gmra.mrb[22].mxu0 %v47_v37  ;;  %1004 = vmatmul.mubr.msk.f32.gmra.mrb[22].mxu1 %vm165_vm0, %v31_v38 }
  0x70   :  { %398 = vmatprep.mubr.f32.mxu0 %v51_v39  ;;  %1006 = vmatprep.mubr.msk.f32.mxu1 %vm165_vm0, %v34_v40 }
  0x73   :  { %399 = vmatmul.mubr.f32.gmra.mrb[24].mxu0 %v50_v41  ;;  %1007 = vmatmul.mubr.msk.f32.gmra.mrb[24].mxu1 %vm165_vm0, %v37_v42 }
  0x74   :  { %403 = vmatprep.mubr.f32.mxu0 %v54_v43  ;;  %1009 = vmatprep.mubr.msk.f32.mxu1 %vm165_vm0, %v40_v44 }
  0x77   :  { %404 = vmatmul.mubr.f32.gmra.mrb[26].mxu0 %v53_v45  ;;  %1010 = vmatmul.mubr.msk.f32.gmra.mrb[26].mxu1 %vm165_vm0, %v43_v46 }
  0x78   :  { %408 = vmatprep.mubr.f32.mxu0 %v57_v47  ;;  %1012 = vmatprep.mubr.msk.f32.mxu1 %vm165_vm0, %v46_v48 }
  0x7b   :  { %409 = vmatmul.mubr.f32.gmra.mrb[28].mxu0 %v56_v49  ;;  %1013 = vmatmul.mubr.msk.f32.gmra.mrb[28].mxu1 %vm165_vm0, %v49_v50 }
  0x7c   :  { %413 = vmatprep.mubr.f32.mxu0 %v60_v51  ;;  %1015 = vmatprep.mubr.msk.f32.mxu1 %vm165_vm0, %v52_v52 }
  0x7f   :  { %414 = vmatmul.mubr.f32.gmra.mrb[30].mxu0 %v59_v53  ;;  %1016 = vmatmul.mubr.msk.f32.gmra.mrb[30].mxu1 %vm165_vm0, %v55_v54 }
  0x80   :  { %418 = vmatprep.mubr.f32.mxu0 %v63_v55  ;;  %1018 = vmatprep.mubr.msk.f32.mxu1 %vm165_vm0, %v58_v56 }
  0x83   :  { %419 = vmatmul.mubr.f32.gmra.mrb[32].mxu0 %v62_v57  ;;  %1019 = vmatmul.mubr.msk.f32.gmra.mrb[32].mxu1 %vm165_vm0, %v61_v58 }
  0x84   :  { %423 = vmatprep.mubr.f32.mxu0 %v66_v59  ;;  %1021 = vmatprep.mubr.msk.f32.mxu1 %vm165_vm0, %v64_v60 }
  0x87   :  { %424 = vmatmul.mubr.f32.gmra.mrb[34].mxu0 %v65_v61  ;;  %1022 = vmatmul.mubr.msk.f32.gmra.mrb[34].mxu1 %vm165_vm0, %v67_v62 }
  0x88   :  { %428 = vmatprep.mubr.f32.mxu0 %v69_v63  ;;  %1024 = vmatprep.mubr.msk.f32.mxu1 %vm165_vm0, %v70_v0 }
  0x8b   :  { %429 = vmatmul.mubr.f32.gmra.mrb[36].mxu0 %v68_v1  ;;  %1025 = vmatmul.mubr.msk.f32.gmra.mrb[36].mxu1 %vm165_vm0, %v73_v2 }
  0x8c   :  { %433 = vmatprep.mubr.f32.mxu0 %v72_v3  ;;  %1027 = vmatprep.mubr.msk.f32.mxu1 %vm165_vm0, %v76_v4 }
  0x8f   :  { %434 = vmatmul.mubr.f32.gmra.mrb[38].mxu0 %v71_v5  ;;  %1028 = vmatmul.mubr.msk.f32.gmra.mrb[38].mxu1 %vm165_vm0, %v79_v6  ;;  %v1684_v5 = vld [vmem:[%s1848_s2] ss:$0 sm:$0xff] }
  0x90   :  { %438 = vmatprep.mubr.f32.mxu0 %v75_v7  ;;  %1030 = vmatprep.mubr.msk.f32.mxu1 %vm165_vm0, %v82_v8 }
  0x93   :  { %439 = vmatmul.mubr.f32.gmra.mrb[40].mxu0 %v74_v9  ;;  %1031 = vmatmul.mubr.msk.f32.gmra.mrb[40].mxu1 %vm165_vm0, %v85_v10 }
  0x94   :  { %443 = vmatprep.mubr.f32.mxu0 %v78_v11  ;;  %1033 = vmatprep.mubr.msk.f32.mxu1 %vm165_vm0, %v88_v12 }
  0x97   :  { %444 = vmatmul.mubr.f32.gmra.mrb[42].mxu0 %v77_v13  ;;  %1034 = vmatmul.mubr.msk.f32.gmra.mrb[42].mxu1 %vm165_vm0, %v91_v14 }
  0x98   :  { %448 = vmatprep.mubr.f32.mxu0 %v81_v15  ;;  %1036 = vmatprep.mubr.msk.f32.mxu1 %vm165_vm0, %v94_v16 }
  0x9b   :  { %449 = vmatmul.mubr.f32.gmra.mrb[44].mxu0 %v80_v17  ;;  %1037 = vmatmul.mubr.msk.f32.gmra.mrb[44].mxu1 %vm165_vm0, %v97_v18 }
  0x9c   :  { %453 = vmatprep.mubr.f32.mxu0 %v84_v19  ;;  %1039 = vmatprep.mubr.msk.f32.mxu1 %vm165_vm0, %v100_v20 }
  0x9f   :  { %454 = vmatmul.mubr.f32.gmra.mrb[46].mxu0 %v83_v21  ;;  %1040 = vmatmul.mubr.msk.f32.gmra.mrb[46].mxu1 %vm165_vm0, %v103_v22 }
  0xa0   :  { %458 = vmatprep.mubr.f32.mxu0 %v87_v23  ;;  %1042 = vmatprep.mubr.msk.f32.mxu1 %vm165_vm0, %v106_v24 }
  0xa3   :  { %459 = vmatmul.mubr.f32.gmra.mrb[48].mxu0 %v86_v25  ;;  %1043 = vmatmul.mubr.msk.f32.gmra.mrb[48].mxu1 %vm165_vm0, %v109_v26 }
  0xa4   :  { %463 = vmatprep.mubr.f32.mxu0 %v90_v27  ;;  %1045 = vmatprep.mubr.msk.f32.mxu1 %vm165_vm0, %v112_v28 }
  0xa7   :  { %464 = vmatmul.mubr.f32.gmra.mrb[50].mxu0 %v89_v29  ;;  %1046 = vmatmul.mubr.msk.f32.gmra.mrb[50].mxu1 %vm165_vm0, %v115_v30 }
  0xa8   :  { %468 = vmatprep.mubr.f32.mxu0 %v93_v31  ;;  %1048 = vmatprep.mubr.msk.f32.mxu1 %vm165_vm0, %v118_v32 }
  0xab   :  { %469 = vmatmul.mubr.f32.gmra.mrb[52].mxu0 %v92_v33  ;;  %1049 = vmatmul.mubr.msk.f32.gmra.mrb[52].mxu1 %vm165_vm0, %v121_v34 }
 0x116   :  { %v340_v35 = vpop.f32.mrb[0].mxu0  ;;  %v1661_v36 = vpop.f32.mrb[0].mxu1 }
 0x117   :  { %v342_v37 = vpop.f32.mrb[1].mxu0  ;;  %v477_v38 = vpop.f32.mrb[1].mxu1  ;;  %v341_v9 = vadd.f32 %v1684_v5, %v340_v35 }
 0x11a   :  { %v345_v39 = vpop.f32.mrb[2].mxu0  ;;  %v1663_v40 = vpop.f32.mrb[2].mxu1 }
 0x11b   :  { %v347_v41 = vpop.f32.mrb[3].mxu0  ;;  %v482_v42 = vpop.f32.mrb[3].mxu1  ;;  %v346_v8 = vadd.f32 %v1684_v5, %v345_v39 }
 0x11e   :  { %v350_v43 = vpop.f32.mrb[4].mxu0  ;;  %v1665_v44 = vpop.f32.mrb[4].mxu1 }
 0x11f   :  { %v352_v45 = vpop.f32.mrb[5].mxu0  ;;  %v487_v46 = vpop.f32.mrb[5].mxu1  ;;  %v351_v18 = vadd.f32 %v1684_v5, %v350_v43 }
 0x122   :  { %v355_v47 = vpop.f32.mrb[6].mxu0  ;;  %v1667_v48 = vpop.f32.mrb[6].mxu1 }
 0x123   :  { %v357_v49 = vpop.f32.mrb[7].mxu0  ;;  %v492_v50 = vpop.f32.mrb[7].mxu1  ;;  %v356_v16 = vadd.f32 %v1684_v5, %v355_v47 }
 0x126   :  { %v360_v51 = vpop.f32.mrb[8].mxu0  ;;  %v1669_v52 = vpop.f32.mrb[8].mxu1 }
 0x127   :  { %v362_v53 = vpop.f32.mrb[9].mxu0  ;;  %v497_v54 = vpop.f32.mrb[9].mxu1  ;;  %v361_v30 = vadd.f32 %v1684_v5, %v360_v51 }
 0x12a   :  { %v365_v55 = vpop.f32.mrb[10].mxu0  ;;  %v1671_v56 = vpop.f32.mrb[10].mxu1 }
 0x12b   :  { %v367_v57 = vpop.f32.mrb[11].mxu0  ;;  %v502_v58 = vpop.f32.mrb[11].mxu1  ;;  %v366_v28 = vadd.f32 %v1684_v5, %v365_v55 }
 0x12e   :  { %v370_v59 = vpop.f32.mrb[12].mxu0  ;;  %v1673_v60 = vpop.f32.mrb[12].mxu1 }
 0x12f   :  { %v372_v61 = vpop.f32.mrb[13].mxu0  ;;  %v507_v62 = vpop.f32.mrb[13].mxu1  ;;  %v371_v45 = vadd.f32 %v1684_v5, %v370_v59 }
 0x132   :  { %v375_v63 = vpop.f32.mrb[14].mxu0  ;;  %v1675_v0 = vpop.f32.mrb[14].mxu1 }
 0x133   :  { %v377_v1 = vpop.f32.mrb[15].mxu0  ;;  %v512_v2 = vpop.f32.mrb[15].mxu1  ;;  %v376_v42 = vadd.f32 %v1684_v5, %v375_v63 }
 0x136   :  { %v1677_v3 = vpop.f32.mrb[16].mxu0  ;;  %v1679_v4 = vpop.f32.mrb[16].mxu1 }
 0x137   :  { %v382_v6 = vpop.f32.mrb[17].mxu0  ;;  %v517_v7 = vpop.f32.mrb[17].mxu1  ;;  %v381_v61 = vadd.f32 %v1684_v5, %v1677_v3 }
 0x13a   :  { %v385_v10 = vpop.f32.mrb[18].mxu0  ;;  %v999_v11 = vpop.f32.mrb[18].mxu1 }
 0x13b   :  { %v591_v12 = vadd.f32 %v999_v11, %v346_v8  ;;  %v387_v13 = vpop.f32.mrb[19].mxu0  ;;  %v585_v14 = vpop.f32.mrb[19].mxu1  ;;  %v386_v58 = vadd.f32 %v1684_v5, %v385_v10 }
 0x13c   :  { %v586_v15 = vadd.f32 %v585_v14, %v341_v9 }
 0x13d   :  { %vm765_vm1 = vcmp.gt.f32.partialorder %v591_v12, 0.0  ;;  %v801_v17 = vmul.f32 0.1, %v591_v12 }
 0x13e   :  { %vm764_vm2 = vcmp.gt.f32.partialorder %v586_v15, 0.0  ;;  %v800_v19 = vmul.f32 0.1, %v586_v15  ;;  %v390_v20 = vpop.f32.mrb[20].mxu0  ;;  %v1002_v21 = vpop.f32.mrb[20].mxu1 }
 0x13f   :  { %v837_v22 = vsel %vm765_vm1, %v591_v12, %v801_v17  ;;  %v601_v23 = vadd.f32 %v1002_v21, %v356_v16  ;;  %v392_v24 = vpop.f32.mrb[21].mxu0  ;;  %v595_v25 = vpop.f32.mrb[21].mxu1  ;;  %v391_v12 = vadd.f32 %v1684_v5, %v390_v20 }
 0x140   :  { %873 = vst [vmem:[%s1849_s3 + $0x8] sm:$0xff] %v837_v22  ;;  %v836_v26 = vsel %vm764_vm2, %v586_v15, %v800_v19  ;;  %v596_v27 = vadd.f32 %v595_v25, %v351_v18 }
 0x141   :  { %872 = vst [vmem:[%s1849_s3] sm:$0xff] %v836_v26  ;;  %vm767_vm3 = vcmp.gt.f32.partialorder %v601_v23, 0.0  ;;  %v803_v29 = vmul.f32 0.1, %v601_v23 }
 0x142   :  { %vm766_vm4 = vcmp.gt.f32.partialorder %v596_v27, 0.0  ;;  %v802_v31 = vmul.f32 0.1, %v596_v27  ;;  %v395_v32 = vpop.f32.mrb[22].mxu0  ;;  %v1005_v33 = vpop.f32.mrb[22].mxu1 }
 0x143   :  { %v839_v34 = vsel %vm767_vm3, %v601_v23, %v803_v29  ;;  %v611_v35 = vadd.f32 %v1005_v33, %v366_v28  ;;  %v397_v37 = vpop.f32.mrb[23].mxu0  ;;  %v605_v38 = vpop.f32.mrb[23].mxu1  ;;  %v396_v11 = vadd.f32 %v1684_v5, %v395_v32 }
 0x144   :  { %875 = vst [vmem:[%s1849_s3 + $0x18] sm:$0xff] %v839_v34  ;;  %v838_v39 = vsel %vm766_vm4, %v596_v27, %v802_v31  ;;  %v606_v41 = vadd.f32 %v605_v38, %v361_v30 }
 0x145   :  { %874 = vst [vmem:[%s1849_s3 + $0x10] sm:$0xff] %v838_v39  ;;  %vm769_vm5 = vcmp.gt.f32.partialorder %v611_v35, 0.0  ;;  %v805_v43 = vmul.f32 0.1, %v611_v35 }
 0x146   :  { %vm768_vm6 = vcmp.gt.f32.partialorder %v606_v41, 0.0  ;;  %v804_v46 = vmul.f32 0.1, %v606_v41  ;;  %v400_v47 = vpop.f32.mrb[24].mxu0  ;;  %v1008_v49 = vpop.f32.mrb[24].mxu1 }
 0x147   :  { %v841_v50 = vsel %vm769_vm5, %v611_v35, %v805_v43  ;;  %v621_v51 = vadd.f32 %v1008_v49, %v376_v42  ;;  %v402_v53 = vpop.f32.mrb[25].mxu0  ;;  %v615_v54 = vpop.f32.mrb[25].mxu1  ;;  %v401_v24 = vadd.f32 %v1684_v5, %v400_v47 }
 0x148   :  { %877 = vst [vmem:[%s1849_s3 + $0x28] sm:$0xff] %v841_v50  ;;  %v840_v55 = vsel %vm768_vm6, %v606_v41, %v804_v46  ;;  %v616_v57 = vadd.f32 %v615_v54, %v371_v45 }
 0x149   :  { %876 = vst [vmem:[%s1849_s3 + $0x20] sm:$0xff] %v840_v55  ;;  %vm771_vm7 = vcmp.gt.f32.partialorder %v621_v51, 0.0  ;;  %v807_v59 = vmul.f32 0.1, %v621_v51 }
 0x14a   :  { %vm770_vm8 = vcmp.gt.f32.partialorder %v616_v57, 0.0  ;;  %v806_v62 = vmul.f32 0.1, %v616_v57  ;;  %v405_v63 = vpop.f32.mrb[26].mxu0  ;;  %v1011_v1 = vpop.f32.mrb[26].mxu1 }
 0x14b   :  { %v843_v2 = vsel %vm771_vm7, %v621_v51, %v807_v59  ;;  %v631_v6 = vadd.f32 %v1011_v1, %v386_v58  ;;  %v407_v7 = vpop.f32.mrb[27].mxu0  ;;  %v625_v8 = vpop.f32.mrb[27].mxu1  ;;  %v406_v23 = vadd.f32 %v1684_v5, %v405_v63 }
 0x14c   :  { %879 = vst [vmem:[%s1849_s3 + $0x38] sm:$0xff] %v843_v2  ;;  %v842_v9 = vsel %vm770_vm8, %v616_v57, %v806_v62  ;;  %v626_v10 = vadd.f32 %v625_v8, %v381_v61 }
 0x14d   :  { %878 = vst [vmem:[%s1849_s3 + $0x30] sm:$0xff] %v842_v9  ;;  %vm773_vm9 = vcmp.gt.f32.partialorder %v631_v6, 0.0  ;;  %v809_v3 = vmul.f32 0.1, %v631_v6 }
 0x14e   :  { %vm772_vm10 = vcmp.gt.f32.partialorder %v626_v10, 0.0  ;;  %v808_v13 = vmul.f32 0.1, %v626_v10  ;;  %v410_v14 = vpop.f32.mrb[28].mxu0  ;;  %v1014_v15 = vpop.f32.mrb[28].mxu1 }
 0x14f   :  { %v845_v16 = vsel %vm773_vm9, %v631_v6, %v809_v3  ;;  %v641_v17 = vadd.f32 %v1014_v15, %v396_v11  ;;  %v412_v18 = vpop.f32.mrb[29].mxu0  ;;  %v635_v19 = vpop.f32.mrb[29].mxu1  ;;  %v411_v37 = vadd.f32 %v1684_v5, %v410_v14 }
 0x150   :  { %881 = vst [vmem:[%s1849_s3 + $0x48] sm:$0xff] %v845_v16  ;;  %v844_v21 = vsel %vm772_vm10, %v626_v10, %v808_v13  ;;  %v636_v22 = vadd.f32 %v635_v19, %v391_v12 }
 0x151   :  { %880 = vst [vmem:[%s1849_s3 + $0x40] sm:$0xff] %v844_v21  ;;  %vm775_vm11 = vcmp.gt.f32.partialorder %v641_v17, 0.0  ;;  %v811_v20 = vmul.f32 0.1, %v641_v17 }
 0x152   :  { %vm774_vm12 = vcmp.gt.f32.partialorder %v636_v22, 0.0  ;;  %v810_v25 = vmul.f32 0.1, %v636_v22  ;;  %v415_v26 = vpop.f32.mrb[30].mxu0  ;;  %v1017_v27 = vpop.f32.mrb[30].mxu1 }
 0x153   :  { %v847_v28 = vsel %vm775_vm11, %v641_v17, %v811_v20  ;;  %v651_v29 = vadd.f32 %v1017_v27, %v406_v23  ;;  %v417_v30 = vpop.f32.mrb[31].mxu0  ;;  %v645_v31 = vpop.f32.mrb[31].mxu1  ;;  %v416_v34 = vadd.f32 %v1684_v5, %v415_v26 }
 0x154   :  { %883 = vst [vmem:[%s1849_s3 + $0x58] sm:$0xff] %v847_v28  ;;  %v846_v32 = vsel %vm774_vm12, %v636_v22, %v810_v25  ;;  %v646_v33 = vadd.f32 %v645_v31, %v401_v24 }
 0x155   :  { %882 = vst [vmem:[%s1849_s3 + $0x50] sm:$0xff] %v846_v32  ;;  %vm777_vm13 = vcmp.gt.f32.partialorder %v651_v29, 0.0  ;;  %v813_v35 = vmul.f32 0.1, %v651_v29 }
 0x156   :  { %vm776_vm14 = vcmp.gt.f32.partialorder %v646_v33, 0.0  ;;  %v812_v38 = vmul.f32 0.1, %v646_v33  ;;  %v420_v39 = vpop.f32.mrb[32].mxu0  ;;  %v1020_v41 = vpop.f32.mrb[32].mxu1 }
 0x157   :  { %v849_v42 = vsel %vm777_vm13, %v651_v29, %v813_v35  ;;  %v661_v43 = vadd.f32 %v1020_v41, %v416_v34  ;;  %v422_v45 = vpop.f32.mrb[33].mxu0  ;;  %v655_v46 = vpop.f32.mrb[33].mxu1  ;;  %v421_v51 = vadd.f32 %v1684_v5, %v420_v39 }
 0x158   :  { %885 = vst [vmem:[%s1849_s3 + $0x68] sm:$0xff] %v849_v42  ;;  %v848_v47 = vsel %vm776_vm14, %v646_v33, %v812_v38  ;;  %v656_v49 = vadd.f32 %v655_v46, %v411_v37  ;;  %v476_v37 = vadd.f32 %v1684_v5, %v1661_v36 }
 0x159   :  { %884 = vst [vmem:[%s1849_s3 + $0x60] sm:$0xff] %v848_v47  ;;  %vm779_vm15 = vcmp.gt.f32.partialorder %v661_v43, 0.0  ;;  %v815_v50 = vmul.f32 0.1, %v661_v43 }
 0x15a   :  { %vm778_vm0 = vcmp.gt.f32.partialorder %v656_v49, 0.0  ;;  %v814_v53 = vmul.f32 0.1, %v656_v49  ;;  %v425_v54 = vpop.f32.mrb[34].mxu0  ;;  %v1023_v55 = vpop.f32.mrb[34].mxu1 }
 0x15b   :  { %v851_v57 = vsel %vm779_vm15, %v661_v43, %v815_v50  ;;  %v426_v58 = vadd.f32 %v1684_v5, %v425_v54  ;;  %v427_v59 = vpop.f32.mrb[35].mxu0  ;;  %v665_v61 = vpop.f32.mrb[35].mxu1  ;;  %v486_v54 = vadd.f32 %v1684_v5, %v1665_v44  ;;  %v496_v44 = vadd.f32 %v1684_v5, %v1669_v52 }
 0x15c   :  { %887 = vst [vmem:[%s1849_s3 + $0x78] sm:$0xff] %v851_v57  ;;  %v850_v62 = vsel %vm778_vm0, %v656_v49, %v814_v53  ;;  %v666_v63 = vadd.f32 %v665_v61, %v421_v51  ;;  %v481_v53 = vadd.f32 %v1684_v5, %v1663_v40 }
 0x15d   :  { %886 = vst [vmem:[%s1849_s3 + $0x70] sm:$0xff] %v850_v62  ;;  %v671_v1 = vadd.f32 %v1023_v55, %v426_v58 }
 0x15e   :  { %vm780_vm1 = vcmp.gt.f32.partialorder %v666_v63, 0.0  ;;  %v816_v2 = vmul.f32 0.1, %v666_v63  ;;  %v430_v6 = vpop.f32.mrb[36].mxu0  ;;  %v1026_v7 = vpop.f32.mrb[36].mxu1 }
 0x15f   :  { %vm781_vm2 = vcmp.gt.f32.partialorder %v671_v1, 0.0  ;;  %v817_v8 = vmul.f32 0.1, %v671_v1  ;;  %v431_v9 = vadd.f32 %v1684_v5, %v430_v6  ;;  %v432_v10 = vpop.f32.mrb[37].mxu0  ;;  %v675_v11 = vpop.f32.mrb[37].mxu1 }
 0x160   :  { %v852_v3 = vsel %vm780_vm1, %v666_v63, %v816_v2 }
 0x161   :  { %v853_v12 = vsel %vm781_vm2, %v671_v1, %v817_v8  ;;  %888 = vst [vmem:[%s1849_s3 + $0x80] sm:$0xff] %v852_v3  ;;  %v676_v13 = vadd.f32 %v675_v11, %v431_v9  ;;  %v491_v9 = vadd.f32 %v1684_v5, %v1667_v48 }
 0x162   :  { %889 = vst [vmem:[%s1849_s3 + $0x88] sm:$0xff] %v853_v12  ;;  %v435_v14 = vpop.f32.mrb[38].mxu0  ;;  %v1029_v15 = vpop.f32.mrb[38].mxu1 }
 0x163   :  { %vm782_vm3 = vcmp.gt.f32.partialorder %v676_v13, 0.0  ;;  %v818_v16 = vmul.f32 0.1, %v676_v13  ;;  %v436_v17 = vadd.f32 %v1684_v5, %v435_v14  ;;  %v437_v18 = vpop.f32.mrb[39].mxu0  ;;  %v685_v19 = vpop.f32.mrb[39].mxu1 }
 0x164   :  { %v506_v18 = vadd.f32 %v1684_v5, %v1673_v60 }
 0x165   :  { %v854_v21 = vsel %vm782_vm3, %v676_v13, %v818_v16  ;;  %v681_v22 = vadd.f32 %v1026_v7, %v436_v17  ;;  %v501_v17 = vadd.f32 %v1684_v5, %v1671_v56 }
 0x166   :  { %890 = vst [vmem:[%s1849_s3 + $0x90] sm:$0xff] %v854_v21  ;;  %v440_v23 = vpop.f32.mrb[40].mxu0  ;;  %v1032_v20 = vpop.f32.mrb[40].mxu1  ;;  %v511_v21 = vadd.f32 %v1684_v5, %v1675_v0 }
 0x167   :  { %vm783_vm4 = vcmp.gt.f32.partialorder %v681_v22, 0.0  ;;  %v819_v24 = vmul.f32 0.1, %v681_v22  ;;  %v441_v25 = vadd.f32 %v1684_v5, %v440_v23  ;;  %v442_v26 = vpop.f32.mrb[41].mxu0  ;;  %v695_v27 = vpop.f32.mrb[41].mxu1 }
 0x169   :  { %v855_v28 = vsel %vm783_vm4, %v681_v22, %v819_v24  ;;  %v686_v29 = vadd.f32 %v685_v19, %v441_v25 }
 0x16a   :  { %891 = vst [vmem:[%s1849_s3 + $0x98] sm:$0xff] %v855_v28  ;;  %v445_v30 = vpop.f32.mrb[42].mxu0  ;;  %v1768_v31 = vpop.f32.mrb[42].mxu1 }
 0x16b   :  { %vm784_vm5 = vcmp.gt.f32.partialorder %v686_v29, 0.0  ;;  %v820_v32 = vmul.f32 0.1, %v686_v29  ;;  %v446_v33 = vadd.f32 %v1684_v5, %v445_v30  ;;  %v447_v34 = vpop.f32.mrb[43].mxu0  ;;  %v705_v35 = vpop.f32.mrb[43].mxu1 }
 0x16c   :  { %v516_v34 = vadd.f32 %v1684_v5, %v1679_v4 }
 0x16d   :  { %v856_v38 = vsel %vm784_vm5, %v686_v29, %v820_v32  ;;  %v691_v39 = vadd.f32 %v1029_v15, %v446_v33 }
 0x16e   :  { %892 = vst [vmem:[%s1849_s3 + $0xa0] sm:$0xff] %v856_v38  ;;  %v450_v41 = vpop.f32.mrb[44].mxu0  ;;  %v1038_v42 = vpop.f32.mrb[44].mxu1 }
 0x16f   :  { %vm785_vm6 = vcmp.gt.f32.partialorder %v691_v39, 0.0  ;;  %v821_v43 = vmul.f32 0.1, %v691_v39  ;;  %v451_v45 = vadd.f32 %v1684_v5, %v450_v41  ;;  %v721_v46 = vadd.f32 %v1038_v42, %v476_v37  ;;  %v452_v47 = vpop.f32.mrb[45].mxu0  ;;  %v1777_v49 = vpop.f32.mrb[45].mxu1 }
 0x171   :  { %v857_v50 = vsel %vm785_vm6, %v691_v39, %v821_v43  ;;  %v696_v51 = vadd.f32 %v695_v27, %v451_v45  ;;  %vm791_vm7 = vcmp.gt.f32.partialorder %v721_v46, 0.0  ;;  %v827_v36 = vmul.f32 0.1, %v721_v46 }
 0x172   :  { %893 = vst [vmem:[%s1849_s3 + $0xa8] sm:$0xff] %v857_v50  ;;  %v455_v55 = vpop.f32.mrb[46].mxu0  ;;  %v1041_v57 = vpop.f32.mrb[46].mxu1 }
 0x173   :  { %vm786_vm8 = vcmp.gt.f32.partialorder %v696_v51, 0.0  ;;  %v822_v58 = vmul.f32 0.1, %v696_v51  ;;  %v863_v59 = vsel %vm791_vm7, %v721_v46, %v827_v36  ;;  %v456_v61 = vadd.f32 %v1684_v5, %v455_v55  ;;  %v457_v62 = vpop.f32.mrb[47].mxu0  ;;  %v725_v63 = vpop.f32.mrb[47].mxu1 }
 0x174   :  { %899 = vst [vmem:[%s1849_s3 + $0xd8] sm:$0xff] %v863_v59  ;;  %v731_v40 = vadd.f32 %v1041_v57, %v486_v54  ;;  %v726_v1 = vadd.f32 %v725_v63, %v481_v53 }
 0x175   :  { %v858_v2 = vsel %vm786_vm8, %v696_v51, %v822_v58  ;;  %v701_v6 = vadd.f32 %v1032_v20, %v456_v61 }
 0x176   :  { %894 = vst [vmem:[%s1849_s3 + $0xb0] sm:$0xff] %v858_v2  ;;  %vm793_vm9 = vcmp.gt.f32.partialorder %v731_v40, 0.0  ;;  %v829_v7 = vmul.f32 0.1, %v731_v40  ;;  %vm792_vm10 = vcmp.gt.f32.partialorder %v726_v1, 0.0  ;;  %v460_v11 = vpop.f32.mrb[48].mxu0 }
 0x177   :  { %v828_v8 = vmul.f32 0.1, %v726_v1  ;;  %vm787_vm11 = vcmp.gt.f32.partialorder %v701_v6, 0.0  ;;  %v823_v10 = vmul.f32 0.1, %v701_v6  ;;  %v1044_v3 = vpop.f32.mrb[48].mxu1  ;;  %v461_v52 = vadd.f32 %v1684_v5, %v460_v11 }
 0x178   :  { %v865_v12 = vsel %vm793_vm9, %v731_v40, %v829_v7  ;;  %v741_v14 = vadd.f32 %v1044_v3, %v496_v44  ;;  %v462_v15 = vpop.f32.mrb[49].mxu0  ;;  %v735_v16 = vpop.f32.mrb[49].mxu1 }
 0x179   :  { %v864_v13 = vsel %vm792_vm10, %v726_v1, %v828_v8  ;;  %v859_v19 = vsel %vm787_vm11, %v701_v6, %v823_v10  ;;  %901 = vst [vmem:[%s1849_s3 + $0xe8] sm:$0xff] %v865_v12  ;;  %v736_v48 = vadd.f32 %v735_v16, %v491_v9  ;;  %v706_v56 = vadd.f32 %v705_v35, %v461_v52 }
 0x17a   :  { %900 = vst [vmem:[%s1849_s3 + $0xe0] sm:$0xff] %v864_v13  ;;  %895 = vst [vmem:[%s1849_s3 + $0xb8] sm:$0xff] %v859_v19  ;;  %vm795_vm12 = vcmp.gt.f32.partialorder %v741_v14, 0.0  ;;  %v831_v60 = vmul.f32 0.1, %v741_v14  ;;  %v465_v22 = vpop.f32.mrb[50].mxu0 }
 0x17b   :  { %v1047_v23 = vpop.f32.mrb[50].mxu1  ;;  %vm794_vm13 = vcmp.gt.f32.partialorder %v736_v48, 0.0  ;;  %v830_v20 = vmul.f32 0.1, %v736_v48  ;;  %v466_v24 = vadd.f32 %v1684_v5, %v465_v22  ;;  %v467_v26 = vpop.f32.mrb[51].mxu0  ;;  %vm788_vm14 = vcmp.gt.f32.partialorder %v706_v56, 0.0 }
 0x17c   :  { %v751_v25 = vadd.f32 %v1047_v23, %v506_v18  ;;  %v745_v27 = vpop.f32.mrb[51].mxu1  ;;  %v824_v28 = vmul.f32 0.1, %v706_v56  ;;  %v867_v29 = vsel %vm795_vm12, %v741_v14, %v831_v60 }
 0x17d   :  { %v746_v0 = vadd.f32 %v745_v27, %v501_v17  ;;  %903 = vst [vmem:[%s1849_s3 + $0xf8] sm:$0xff] %v867_v29  ;;  %v866_v30 = vsel %vm794_vm13, %v736_v48, %v830_v20  ;;  %v711_v32 = vadd.f32 %v1768_v31, %v466_v24 }
 0x17e   :  { %vm797_vm15 = vcmp.gt.f32.partialorder %v751_v25, 0.0  ;;  %v833_v33 = vmul.f32 0.1, %v751_v25  ;;  %v860_v35 = vsel %vm788_vm14, %v706_v56, %v824_v28  ;;  %902 = vst [vmem:[%s1849_s3 + $0xf0] sm:$0xff] %v866_v30  ;;  %v470_v38 = vpop.f32.mrb[52].mxu0  ;;  %v1050_v39 = vpop.f32.mrb[52].mxu1 }
 0x17f   :  { %vm796_vm0 = vcmp.gt.f32.partialorder %v746_v0, 0.0  ;;  %v832_v37 = vmul.f32 0.1, %v746_v0  ;;  %896 = vst [vmem:[%s1849_s3 + $0xc0] sm:$0xff] %v860_v35  ;;  %vm789_vm1 = vcmp.gt.f32.partialorder %v711_v32, 0.0  ;;  %v471_v42 = vadd.f32 %v1684_v5, %v470_v38  ;;  %v472_v43 = vpop.f32.mrb[53].mxu0 }
 0x180   :  { %v825_v31 = vmul.f32 0.1, %v711_v32  ;;  %v869_v41 = vsel %vm797_vm15, %v751_v25, %v833_v33  ;;  %v755_v4 = vpop.f32.mrb[53].mxu1  ;;  %v761_v46 = vadd.f32 %v1050_v39, %v516_v34 }
 0x181   :  { %905 = vst [vmem:[%s1849_s3 + $0x108] sm:$0xff] %v869_v41  ;;  %v868_v45 = vsel %vm796_vm0, %v746_v0, %v832_v37  ;;  %v756_v47 = vadd.f32 %v755_v4, %v511_v21  ;;  %v716_v51 = vadd.f32 %v1777_v49, %v471_v42 }
 0x182   :  { %v861_v50 = vsel %vm789_vm1, %v711_v32, %v825_v31  ;;  %904 = vst [vmem:[%s1849_s3 + $0x100] sm:$0xff] %v868_v45  ;;  %vm799_vm2 = vcmp.gt.f32.partialorder %v761_v46, 0.0  ;;  %v835_v5 = vmul.f32 0.1, %v761_v46 }
 0x183   :  { %897 = vst [vmem:[%s1849_s3 + $0xc8] sm:$0xff] %v861_v50  ;;  %vm798_vm3 = vcmp.gt.f32.partialorder %v756_v47, 0.0  ;;  %v834_v36 = vmul.f32 0.1, %v756_v47  ;;  %vm790_vm4 = vcmp.gt.f32.partialorder %v716_v51, 0.0 }
 0x184   :  { %v826_v53 = vmul.f32 0.1, %v716_v51  ;;  %v871_v54 = vsel %vm799_vm2, %v761_v46, %v835_v5 }
 0x185   :  { %v870_v55 = vsel %vm798_vm3, %v756_v47, %v834_v36  ;;  %907 = vst [vmem:[%s1849_s3 + $0x118] sm:$0xff] %v871_v54 }
 0x186   :  { %v862_v57 = vsel %vm790_vm4, %v716_v51, %v826_v53  ;;  %906 = vst [vmem:[%s1849_s3 + $0x110] sm:$0xff] %v870_v55 }
 0x187   :  { %898 = vst [vmem:[%s1849_s3 + $0xd0] sm:$0xff] %v862_v57 }

// kernel: feature_extractor_forward.7
= control target key start
LH: loop header
LB: loop body
LE: loop exit
PB: predicated region body
PF: predicated region fallthrough
CT: control target
= control target key end

     0   :  { %s8223_s18 = smov 0   ;;  %s9184_s0 = inlined_call_operand.vmem [shape: bf16[2,2560], index: 0, kind: input, shape index: {}]   ;;  %s9185_s1 = inlined_call_operand.vmem [shape: bf16[2,2560,512], index: 1, kind: input, shape index: {}]   ;;  %s9186_s2 = inlined_call_operand.vmem [shape: f32[1,1024], index: 2, kind: input, shape index: {}]   ;;  %s9187_s3 = inlined_call_operand.vmem [shape: bf16[1024,512], index: 3, kind: input, shape index: {}]   ;;  %s9188_s4 = inlined_call_operand.vmem [shape: f32[1,512], index: 4, kind: input, shape index: {}]   ;;  %s9189_s5 = inlined_call_operand.vmem [shape: f32[2,512], index: 5, kind: output, shape index: {}]  }
   0x1 LB: > { %s8229_s19 = sadd.s32 4294967295, %s8188_s18   ;;  %p6150_p0 = scmp.ge.s32.totalorder %s8188_s18, 1  ;;  %s8188_s18 = sphi %s8223_s18, %s15_s18  }
   0x2   : > { %p204_p1 = scmp.lt.s32.totalorder %s8188_s18, 3 }
   0x4   : > { %p205_p2 = pnand %p6150_p0, %p204_p1 }
   0x5   : > { %p237_p3 = scmp.lt.s32.totalorder (!%p205_p2), %s8229_s19, 1  ;;  %s6152_s20 = sshll.u32 (!%p205_p2), %s8229_s19, 2 }
   0x6   : > { %208 = sbr.rel (%p205_p2) target bundleno = 1182 (0x49e), region = 40  ;;  %p243_p4 = scmp.lt.s32.totalorder (!%p205_p2), %s6152_s20, 7 }
   0x7   : > { %s6153_s21 = sshll.u32 (!%p205_p2), %s8229_s19, 6  ;;  %p6156_p6 = scmp.ne.s32.totalorder (!%p205_p2), %s8229_s19, 0 }
   0x8   : > { %p248_p5 = scmp.lt.s32.totalorder (!%p205_p2), %s6153_s21, 127 }
   0xd   : > { %s238_s22 = scalar_select %p237_p3, %s8229_s19, 1 }
   0xe   : > { %s9191_s20 = smov (!%p243_p4, %s6152_s20), 7  ;;  %s9193_s21 = smov (!%p248_p5, %s6153_s21), 127 }
   0xf   : > { %s7014_s23 = smul.u32 5120, %s238_s22  ;;  %s245_s26 = scalar_lea.vmem %s9186_s2, %s9191_s20  ;;  %v8190_v0 = vmov (!%p6156_p6), 0.0  }
  0x10   : > { %s6929_s30 = sshll.u32 %s9193_s21, 4  ;;  %257 = sbr.rel (%p6156_p6) target bundleno = 23 (0x17), region = 44  ;;  %258 = vst [vmem:[%s9189_s5] sm:$0xff] (!%p6156_p6), %v8190_v0 }
  0x11   : > { %s8246_s29 = scalar_lea.vmem %s9185_s1, %s7014_s23  ;;  %s8251_s8 = scalar_lea.vmem %s9187_s3, %s6929_s30 }
  0x17 PF: > { %v7026_v1 = vld [vmem:[%s8246_s29 + $0x4] ss:$16 sps:$4 sm:$0xff]   ;;  %v7028_v2 = vld [vmem:[%s8246_s29 + $0xc] ss:$16 sps:$4 sm:$0xff]   ;;  %v7030_v3 = vld [vmem:[%s8246_s29] ss:$16 sps:$4 sm:$0xff]   ;;  %v904_v37 = vlaneseq }
  0x18   : > { %4269 = vmatprep.subr.bf16.mxu0 %v7026_v1  ;;  %v7031_v4 = vld [vmem:[%s8246_s29 + $0x8] ss:$16 sps:$4 sm:$0xff]   ;;  %4679 = vmatprep.subr.bf16.mxu1 %v7028_v2  ;;  %v7032_v5 = vld [vmem:[%s8246_s29 + $0x24] ss:$16 sps:$4 sm:$0xff]   ;;  %v7034_v6 = vld [vmem:[%s8246_s29 + $0x2c] ss:$16 sps:$4 sm:$0xff]  }
  0x19   : > { %4270 = vmatpush1.bf16.msra.mxu0 %v7030_v3  ;;  %4680 = vmatpush1.bf16.msra.mxu1 %v7031_v4  ;;  %v7036_v7 = vld [vmem:[%s8246_s29 + $0x20] ss:$16 sps:$4 sm:$0xff]   ;;  %v7037_v8 = vld [vmem:[%s8246_s29 + $0x28] ss:$16 sps:$4 sm:$0xff]   ;;  %v7038_v9 = vld [vmem:[%s8246_s29 + $0x44] ss:$16 sps:$4 sm:$0xff]  }
  0x1a   : > { %4271 = vmatprep.subr.bf16.mxu0 %v7032_v5  ;;  %4681 = vmatprep.subr.bf16.mxu1 %v7034_v6  ;;  %v7040_v10 = vld [vmem:[%s8246_s29 + $0x4c] ss:$16 sps:$4 sm:$0xff]   ;;  %v7042_v11 = vld [vmem:[%s8246_s29 + $0x40] ss:$16 sps:$4 sm:$0xff]   ;;  %v7043_v12 = vld [vmem:[%s8246_s29 + $0x48] ss:$16 sps:$4 sm:$0xff]  }
  0x1b   : > { %v7044_v13 = vld [vmem:[%s8246_s29 + $0x64] ss:$16 sps:$4 sm:$0xff]   ;;  %v7046_v14 = vld [vmem:[%s8246_s29 + $0x6c] ss:$16 sps:$4 sm:$0xff]   ;;  %v7048_v15 = vld [vmem:[%s8246_s29 + $0x60] ss:$16 sps:$4 sm:$0xff]  }
  0x1c   : > { %v7049_v16 = vld [vmem:[%s8246_s29 + $0x68] ss:$16 sps:$4 sm:$0xff]   ;;  %v7050_v17 = vld [vmem:[%s8246_s29 + $0x84] ss:$16 sps:$4 sm:$0xff]   ;;  %v7052_v18 = vld [vmem:[%s8246_s29 + $0x8c] ss:$16 sps:$4 sm:$0xff]  }
  0x1d   : > { %4272 = vmatpush1.bf16.msra.mxu0 %v7036_v7  ;;  %4682 = vmatpush1.bf16.msra.mxu1 %v7037_v8  ;;  %v7054_v19 = vld [vmem:[%s8246_s29 + $0x80] ss:$16 sps:$4 sm:$0xff]   ;;  %v7055_v20 = vld [vmem:[%s8246_s29 + $0x88] ss:$16 sps:$4 sm:$0xff]   ;;  %v7056_v21 = vld [vmem:[%s8246_s29 + $0xa4] ss:$16 sps:$4 sm:$0xff]  }
  0x1e   : > { %4273 = vmatprep.subr.bf16.mxu0 %v7038_v9  ;;  %4683 = vmatprep.subr.bf16.mxu1 %v7040_v10  ;;  %v7058_v22 = vld [vmem:[%s8246_s29 + $0xac] ss:$16 sps:$4 sm:$0xff]   ;;  %v7060_v23 = vld [vmem:[%s8246_s29 + $0xa0] ss:$16 sps:$4 sm:$0xff]   ;;  %v7061_v24 = vld [vmem:[%s8246_s29 + $0xa8] ss:$16 sps:$4 sm:$0xff]  }
  0x1f   : > { %v7062_v25 = vld [vmem:[%s8246_s29 + $0xc4] ss:$16 sps:$4 sm:$0xff]   ;;  %v7064_v26 = vld [vmem:[%s8246_s29 + $0xcc] ss:$16 sps:$4 sm:$0xff]   ;;  %v7066_v27 = vld [vmem:[%s8246_s29 + $0xc0] ss:$16 sps:$4 sm:$0xff]  }
  0x20   : > { %v7067_v28 = vld [vmem:[%s8246_s29 + $0xc8] ss:$16 sps:$4 sm:$0xff]   ;;  %v7068_v29 = vld [vmem:[%s8246_s29 + $0xe4] ss:$16 sps:$4 sm:$0xff]   ;;  %v7070_v30 = vld [vmem:[%s8246_s29 + $0xec] ss:$16 sps:$4 sm:$0xff]  }
  0x21   : > { %4274 = vmatpush1.bf16.msra.mxu0 %v7042_v11  ;;  %4684 = vmatpush1.bf16.msra.mxu1 %v7043_v12  ;;  %v7072_v31 = vld [vmem:[%s8246_s29 + $0xe0] ss:$16 sps:$4 sm:$0xff]   ;;  %v7073_v32 = vld [vmem:[%s8246_s29 + $0xe8] ss:$16 sps:$4 sm:$0xff]   ;;  %v7074_v33 = vld [vmem:[%s8246_s29 + $0x104] ss:$16 sps:$4 sm:$0xff]  }
  0x22   : > { %4275 = vmatprep.subr.bf16.mxu0 %v7044_v13  ;;  %4685 = vmatprep.subr.bf16.mxu1 %v7046_v14  ;;  %v7076_v34 = vld [vmem:[%s8246_s29 + $0x10c] ss:$16 sps:$4 sm:$0xff]   ;;  %v7078_v35 = vld [vmem:[%s8246_s29 + $0x100] ss:$16 sps:$4 sm:$0xff]   ;;  %v7079_v36 = vld [vmem:[%s8246_s29 + $0x108] ss:$16 sps:$4 sm:$0xff]  }
  0x23   : > { %v8191_v38 = vmov 1966171168   ;;  %v7080_v40 = vld [vmem:[%s8246_s29 + $0x124] ss:$16 sps:$4 sm:$0xff]   ;;  %v7082_v41 = vld [vmem:[%s8246_s29 + $0x12c] ss:$16 sps:$4 sm:$0xff]  }
  0x24   : > { %v929_v39 = vunpack.c.l.s4 %v8191_v38  ;;  %v7084_v42 = vld [vmem:[%s8246_s29 + $0x120] ss:$16 sps:$4 sm:$0xff]   ;;  %v8296_v43 = vshrl.u32 %v904_v37, 7  ;;  %v7085_v45 = vld [vmem:[%s8246_s29 + $0x128] ss:$16 sps:$4 sm:$0xff]   ;;  %p6926_p7 = scmp.ne.s32.totalorder %s8229_s19, 1 }
  0x25   : > { %4276 = vmatpush1.bf16.msra.mxu0 %v7048_v15  ;;  %4686 = vmatpush1.bf16.msra.mxu1 %v7049_v16  ;;  %v7086_v46 = vld [vmem:[%s8246_s29 + $0x144] ss:$16 sps:$4 sm:$0xff]   ;;  %v7088_v47 = vld [vmem:[%s8246_s29 + $0x14c] ss:$16 sps:$4 sm:$0xff]   ;;  %v7090_v48 = vld [vmem:[%s8246_s29 + $0x140] ss:$16 sps:$4 sm:$0xff]  }
  0x26   : > { %4277 = vmatprep.subr.bf16.mxu0 %v7050_v17  ;;  %4687 = vmatprep.subr.bf16.mxu1 %v7052_v18  ;;  %v930_v44 = vunpack.c.0.s8 %v929_v39  ;;  %v7091_v49 = vld [vmem:[%s8246_s29 + $0x148] ss:$16 sps:$4 sm:$0xff]   ;;  %v7092_v51 = vld [vmem:[%s8246_s29 + $0x164] ss:$16 sps:$4 sm:$0xff]   ;;  %v7094_v52 = vld [vmem:[%s8246_s29 + $0x16c] ss:$16 sps:$4 sm:$0xff]  }
  0x27   : > { %v8311_v53 = vld [vmem:[%s9184_s0] sm:$0xff]  ;;  %v7097_v56 = vld [vmem:[%s8246_s29 + $0x168] ss:$16 sps:$4 sm:$0xff]   ;;  %v7100_v58 = vld [vmem:[%s8246_s29 + $0x18c] ss:$16 sps:$4 sm:$0xff]  }
  0x28   : > { %v8304_v50 = vsub.s32 %v930_v44, %v8296_v43  ;;  %v7096_v54 = vld [vmem:[%s8246_s29 + $0x160] ss:$16 sps:$4 sm:$0xff]   ;;  %v7098_v57 = vld [vmem:[%s8246_s29 + $0x184] ss:$16 sps:$4 sm:$0xff]   ;;  %v7103_v62 = vld [vmem:[%s8246_s29 + $0x188] ss:$16 sps:$4 sm:$0xff]  }
  0x29   : > { %4278 = vmatpush1.bf16.msra.mxu0 %v7054_v19  ;;  %4688 = vmatpush1.bf16.msra.mxu1 %v7055_v20  ;;  %v7102_v60 = vld [vmem:[%s8246_s29 + $0x180] ss:$16 sps:$4 sm:$0xff]   ;;  %v7104_v63 = vld [vmem:[%s8246_s29 + $0x1a4] ss:$16 sps:$4 sm:$0xff]   ;;  %v7106_v0 = vld [vmem:[%s8246_s29 + $0x1ac] ss:$16 sps:$4 sm:$0xff]  }
  0x2a   : > { %4279 = vmatprep.subr.bf16.mxu0 %v7056_v21  ;;  %4689 = vmatprep.subr.bf16.mxu1 %v7058_v22  ;;  %v934_v55 = vrot.slane %v8311_v53, %v8304_v50  ;;  %v7108_v1 = vld [vmem:[%s8246_s29 + $0x1a0] ss:$16 sps:$4 sm:$0xff]   ;;  %v7109_v2 = vld [vmem:[%s8246_s29 + $0x1a8] ss:$16 sps:$4 sm:$0xff]   ;;  %v7110_v3 = vld [vmem:[%s8246_s29 + $0x1c4] ss:$16 sps:$4 sm:$0xff]  }
  0x2b   : > { %v7112_v4 = vld [vmem:[%s8246_s29 + $0x1cc] ss:$16 sps:$4 sm:$0xff]   ;;  %v7114_v5 = vld [vmem:[%s8246_s29 + $0x1c0] ss:$16 sps:$4 sm:$0xff]   ;;  %v7115_v6 = vld [vmem:[%s8246_s29 + $0x1c8] ss:$16 sps:$4 sm:$0xff]  }
  0x2c   : > { %v942_v59 = vcombine.high %v934_v55, %v934_v55  ;;  %v7116_v7 = vld [vmem:[%s8246_s29 + $0x1e4] ss:$16 sps:$4 sm:$0xff]   ;;  %v7118_v8 = vld [vmem:[%s8246_s29 + $0x1ec] ss:$16 sps:$4 sm:$0xff]   ;;  %v7120_v9 = vld [vmem:[%s8246_s29 + $0x1e0] ss:$16 sps:$4 sm:$0xff]   ;;  %v8338_v14 = vrot.slane %v934_v55, %v8304_v50 }
  0x2d   : > { %4280 = vmatpush1.bf16.msra.mxu0 %v7060_v23  ;;  %4690 = vmatpush1.bf16.msra.mxu1 %v7061_v24  ;;  %v7121_v10 = vld [vmem:[%s8246_s29 + $0x1e8] ss:$16 sps:$4 sm:$0xff]   ;;  %v7124_v11 = vld [vmem:[%s8246_s29 + $0x204] ss:$16 sps:$4 sm:$0xff]   ;;  %v7127_v12 = vld [vmem:[%s8246_s29 + $0x20c] ss:$16 sps:$4 sm:$0xff]  }
  0x2e   : > { %4281 = vmatprep.subr.bf16.mxu0 %v7062_v25  ;;  %4691 = vmatprep.subr.bf16.mxu1 %v7064_v26  ;;  %v964_v61 = vrot.slane %v942_v59, %v8304_v50  ;;  %v7122_v13 = vld [vmem:[%s8246_s29 + $0x200] ss:$16 sps:$4 sm:$0xff]   ;;  %v7125_v15 = vld [vmem:[%s8246_s29 + $0x208] ss:$16 sps:$4 sm:$0xff]   ;;  %v7130_v16 = vld [vmem:[%s8246_s29 + $0x224] ss:$16 sps:$4 sm:$0xff]  }
  0x2f   : > { %v7133_v17 = vld [vmem:[%s8246_s29 + $0x22c] ss:$16 sps:$4 sm:$0xff]   ;;  %v7128_v19 = vld [vmem:[%s8246_s29 + $0x220] ss:$16 sps:$4 sm:$0xff]   ;;  %v7131_v20 = vld [vmem:[%s8246_s29 + $0x228] ss:$16 sps:$4 sm:$0xff]  }
  0x30   : > { %4301 = vmatprep.mubr.bf16.mxu0 %v964_v61  ;;  %4711 = vmatprep.mubr.bf16.mxu1 %v964_v61  ;;  %v974_v18 = vcombine.high %v964_v61, %v964_v61  ;;  %v7136_v21 = vld [vmem:[%s8246_s29 + $0x244] ss:$16 sps:$4 sm:$0xff]   ;;  %v7139_v22 = vld [vmem:[%s8246_s29 + $0x24c] ss:$16 sps:$4 sm:$0xff]   ;;  %v7134_v23 = vld [vmem:[%s8246_s29 + $0x240] ss:$16 sps:$4 sm:$0xff]  }
  0x31   : > { %4282 = vmatpush1.bf16.msra.mxu0 %v7066_v27  ;;  %4692 = vmatpush1.bf16.msra.mxu1 %v7067_v28  ;;  %v7137_v24 = vld [vmem:[%s8246_s29 + $0x248] ss:$16 sps:$4 sm:$0xff]   ;;  %v7142_v25 = vld [vmem:[%s8246_s29 + $0x264] ss:$16 sps:$4 sm:$0xff]   ;;  %v7145_v26 = vld [vmem:[%s8246_s29 + $0x26c] ss:$16 sps:$4 sm:$0xff]  }
  0x32   : > { %4283 = vmatprep.subr.bf16.mxu0 %v7068_v29  ;;  %4693 = vmatprep.subr.bf16.mxu1 %v7070_v30  ;;  %v7140_v27 = vld [vmem:[%s8246_s29 + $0x260] ss:$16 sps:$4 sm:$0xff]   ;;  %v7143_v28 = vld [vmem:[%s8246_s29 + $0x268] ss:$16 sps:$4 sm:$0xff]   ;;  %v7148_v29 = vld [vmem:[%s8246_s29 + $0x284] ss:$16 sps:$4 sm:$0xff]  }
  0x33   : > { %v7151_v30 = vld [vmem:[%s8246_s29 + $0x28c] ss:$16 sps:$4 sm:$0xff]   ;;  %v7160_v37 = vld [vmem:[%s8246_s29 + $0x2c4] ss:$16 sps:$4 sm:$0xff]   ;;  %v7158_v39 = vld [vmem:[%s8246_s29 + $0x2c0] ss:$16 sps:$4 sm:$0xff]  }
  0x34   : > { %v7163_v38 = vld [vmem:[%s8246_s29 + $0x2cc] ss:$16 sps:$4 sm:$0xff]   ;;  %v7164_v44 = vld [vmem:[%s8246_s29 + $0x2e0] ss:$16 sps:$4 sm:$0xff]   ;;  %v7179_v55 = vld [vmem:[%s8246_s29 + $0x328] ss:$16 sps:$4 sm:$0xff]  }
  0x35   : > { %4284 = vmatpush1.bf16.msra.mxu0 %v7072_v31  ;;  %4694 = vmatpush1.bf16.msra.mxu1 %v7073_v32  ;;  %v7146_v31 = vld [vmem:[%s8246_s29 + $0x280] ss:$16 sps:$4 sm:$0xff]   ;;  %v7149_v32 = vld [vmem:[%s8246_s29 + $0x288] ss:$16 sps:$4 sm:$0xff]   ;;  %v7193_v61 = vld [vmem:[%s8246_s29 + $0x36c] ss:$16 sps:$4 sm:$0xff]  }
  0x36   : > { %4285 = vmatprep.subr.bf16.mxu0 %v7074_v33  ;;  %4695 = vmatprep.subr.bf16.mxu1 %v7076_v34  ;;  %v7154_v33 = vld [vmem:[%s8246_s29 + $0x2a4] ss:$16 sps:$4 sm:$0xff]   ;;  %v7157_v34 = vld [vmem:[%s8246_s29 + $0x2ac] ss:$16 sps:$4 sm:$0xff]   ;;  %v7185_v59 = vld [vmem:[%s8246_s29 + $0x348] ss:$16 sps:$4 sm:$0xff]  }
  0x39   : > { %4286 = vmatpush1.bf16.msra.mxu0 %v7078_v35  ;;  %4696 = vmatpush1.bf16.msra.mxu1 %v7079_v36  ;;  %v7152_v35 = vld [vmem:[%s8246_s29 + $0x2a0] ss:$16 sps:$4 sm:$0xff]   ;;  %v7155_v36 = vld [vmem:[%s8246_s29 + $0x2a8] ss:$16 sps:$4 sm:$0xff]  }
  0x3a   : > { %4287 = vmatprep.subr.bf16.mxu0 %v7080_v40  ;;  %4697 = vmatprep.subr.bf16.mxu1 %v7082_v41  ;;  %v7161_v40 = vld [vmem:[%s8246_s29 + $0x2c8] ss:$16 sps:$4 sm:$0xff]   ;;  %v7166_v41 = vld [vmem:[%s8246_s29 + $0x2e4] ss:$16 sps:$4 sm:$0xff]  }
  0x3d   : > { %4288 = vmatpush1.bf16.msra.mxu0 %v7084_v42  ;;  %4698 = vmatpush1.bf16.msra.mxu1 %v7085_v45  ;;  %v7169_v42 = vld [vmem:[%s8246_s29 + $0x2ec] ss:$16 sps:$4 sm:$0xff]   ;;  %v7167_v45 = vld [vmem:[%s8246_s29 + $0x2e8] ss:$16 sps:$4 sm:$0xff]  }
  0x3e   : > { %4289 = vmatprep.subr.bf16.mxu0 %v7086_v46  ;;  %4699 = vmatprep.subr.bf16.mxu1 %v7088_v47  ;;  %v7172_v46 = vld [vmem:[%s8246_s29 + $0x304] ss:$16 sps:$4 sm:$0xff]   ;;  %v7175_v47 = vld [vmem:[%s8246_s29 + $0x30c] ss:$16 sps:$4 sm:$0xff]  }
  0x41   : > { %4290 = vmatpush1.bf16.msra.mxu0 %v7090_v48  ;;  %4700 = vmatpush1.bf16.msra.mxu1 %v7091_v49  ;;  %v7170_v48 = vld [vmem:[%s8246_s29 + $0x300] ss:$16 sps:$4 sm:$0xff]   ;;  %v7173_v49 = vld [vmem:[%s8246_s29 + $0x308] ss:$16 sps:$4 sm:$0xff]  }
  0x42   : > { %4291 = vmatprep.subr.bf16.mxu0 %v7092_v51  ;;  %4701 = vmatprep.subr.bf16.mxu1 %v7094_v52  ;;  %v7178_v51 = vld [vmem:[%s8246_s29 + $0x324] ss:$16 sps:$4 sm:$0xff]   ;;  %v7181_v52 = vld [vmem:[%s8246_s29 + $0x32c] ss:$16 sps:$4 sm:$0xff]  }
  0x45   : > { %4292 = vmatpush1.bf16.msra.mxu0 %v7096_v54  ;;  %4702 = vmatpush1.bf16.msra.mxu1 %v7097_v56  ;;  %v7176_v54 = vld [vmem:[%s8246_s29 + $0x320] ss:$16 sps:$4 sm:$0xff]   ;;  %v7184_v56 = vld [vmem:[%s8246_s29 + $0x344] ss:$16 sps:$4 sm:$0xff]  }
  0x46   : > { %4293 = vmatprep.subr.bf16.mxu0 %v7098_v57  ;;  %4703 = vmatprep.subr.bf16.mxu1 %v7100_v58  ;;  %v7187_v57 = vld [vmem:[%s8246_s29 + $0x34c] ss:$16 sps:$4 sm:$0xff]   ;;  %v7182_v58 = vld [vmem:[%s8246_s29 + $0x340] ss:$16 sps:$4 sm:$0xff]  }
  0x49   : > { %4294 = vmatpush1.bf16.msra.mxu0 %v7102_v60  ;;  %4704 = vmatpush1.bf16.msra.mxu1 %v7103_v62  ;;  %v7190_v60 = vld [vmem:[%s8246_s29 + $0x364] ss:$16 sps:$4 sm:$0xff]   ;;  %v7188_v62 = vld [vmem:[%s8246_s29 + $0x360] ss:$16 sps:$4 sm:$0xff]  }
  0x4a   : > { %4295 = vmatprep.subr.bf16.mxu0 %v7104_v63  ;;  %4705 = vmatprep.subr.bf16.mxu1 %v7106_v0  ;;  %v7191_v63 = vld [vmem:[%s8246_s29 + $0x368] ss:$16 sps:$4 sm:$0xff]   ;;  %v7196_v0 = vld [vmem:[%s8246_s29 + $0x384] ss:$16 sps:$4 sm:$0xff]  }
  0x4d   : > { %4296 = vmatpush1.bf16.msra.mxu0 %v7108_v1  ;;  %4706 = vmatpush1.bf16.msra.mxu1 %v7109_v2  ;;  %v7199_v1 = vld [vmem:[%s8246_s29 + $0x38c] ss:$16 sps:$4 sm:$0xff]   ;;  %v7194_v2 = vld [vmem:[%s8246_s29 + $0x380] ss:$16 sps:$4 sm:$0xff]  }
  0x4e   : > { %4297 = vmatprep.subr.bf16.mxu0 %v7110_v3  ;;  %4707 = vmatprep.subr.bf16.mxu1 %v7112_v4  ;;  %v7197_v3 = vld [vmem:[%s8246_s29 + $0x388] ss:$16 sps:$4 sm:$0xff]   ;;  %v7202_v4 = vld [vmem:[%s8246_s29 + $0x3a4] ss:$16 sps:$4 sm:$0xff]  }
  0x51   : > { %4298 = vmatpush1.bf16.msra.mxu0 %v7114_v5  ;;  %4708 = vmatpush1.bf16.msra.mxu1 %v7115_v6  ;;  %v7205_v5 = vld [vmem:[%s8246_s29 + $0x3ac] ss:$16 sps:$4 sm:$0xff]   ;;  %v7200_v6 = vld [vmem:[%s8246_s29 + $0x3a0] ss:$16 sps:$4 sm:$0xff]  }
  0x52   : > { %4299 = vmatprep.subr.bf16.mxu0 %v7116_v7  ;;  %4709 = vmatprep.subr.bf16.mxu1 %v7118_v8  ;;  %v7203_v7 = vld [vmem:[%s8246_s29 + $0x3a8] ss:$16 sps:$4 sm:$0xff]   ;;  %v7208_v8 = vld [vmem:[%s8246_s29 + $0x3c4] ss:$16 sps:$4 sm:$0xff]  }
  0x55   : > { %4300 = vmatpush1.bf16.msra.mxu0 %v7120_v9  ;;  %4710 = vmatpush1.bf16.msra.mxu1 %v7121_v10  ;;  %v7211_v9 = vld [vmem:[%s8246_s29 + $0x3cc] ss:$16 sps:$4 sm:$0xff]   ;;  %v927_v10 = vcombine.high %v8311_v53, %v8311_v53  ;;  %v7215_v53 = vld [vmem:[%s8246_s29 + $0x3e8] ss:$16 sps:$4 sm:$0xff]  }
  0x56   : > { %4310 = vmatprep.subr.bf16.mxu0 %v7124_v11  ;;  %4720 = vmatprep.subr.bf16.mxu1 %v7127_v12  ;;  %v7206_v11 = vld [vmem:[%s8246_s29 + $0x3c0] ss:$16 sps:$4 sm:$0xff]   ;;  %v7209_v12 = vld [vmem:[%s8246_s29 + $0x3c8] ss:$16 sps:$4 sm:$0xff]  }
  0x58   : > { %4302 = vmatmul.mubr.bf16.vlgmr.msra.gmra.mrb[0].mxu0 %v8338_v14  ;;  %4712 = vmatmul.mubr.bf16.vlgmr.msra.gmra.mrb[0].mxu1 %v8338_v14 }
  0x59   : > { %4311 = vmatpush1.bf16.msra.mxu0 %v7122_v13  ;;  %4721 = vmatpush1.bf16.msra.mxu1 %v7125_v15  ;;  %v7214_v13 = vld [vmem:[%s8246_s29 + $0x3e4] ss:$16 sps:$4 sm:$0xff]   ;;  %v7217_v15 = vld [vmem:[%s8246_s29 + $0x3ec] ss:$16 sps:$4 sm:$0xff]  }
  0x5a   : > { %4312 = vmatprep.subr.bf16.mxu0 %v7130_v16  ;;  %4722 = vmatprep.subr.bf16.mxu1 %v7133_v17  ;;  %v8404_v16 = vrot.slane %v927_v10, %v8304_v50  ;;  %v7212_v17 = vld [vmem:[%s8246_s29 + $0x3e0] ss:$16 sps:$4 sm:$0xff]   ;;  %v7293_v10 = vld [vmem:[%s8246_s29 + $0x588] ss:$16 sps:$4 sm:$0xff]  }
  0x5b   : > { %4342 = vmatprep.mubr.bf16.mxu0 %v974_v18  ;;  %4752 = vmatprep.mubr.bf16.mxu1 %v974_v18  ;;  %v7220_v18 = vld [vmem:[%s8246_s29 + $0x404] ss:$16 sps:$4 sm:$0xff]  }
  0x5d   : > { %4313 = vmatpush1.bf16.msra.mxu0 %v7128_v19  ;;  %4723 = vmatpush1.bf16.msra.mxu1 %v7131_v20  ;;  %v7223_v19 = vld [vmem:[%s8246_s29 + $0x40c] ss:$16 sps:$4 sm:$0xff]   ;;  %v943_v20 = vcombine.high %v8404_v16, %v8404_v16 }
  0x5e   : > { %4314 = vmatprep.subr.bf16.mxu0 %v7136_v21  ;;  %4724 = vmatprep.subr.bf16.mxu1 %v7139_v22  ;;  %v7218_v21 = vld [vmem:[%s8246_s29 + $0x400] ss:$16 sps:$4 sm:$0xff]   ;;  %v972_v22 = vcombine.high %v8338_v14, %v8338_v14  ;;  %v7227_v14 = vld [vmem:[%s8246_s29 + $0x428] ss:$16 sps:$4 sm:$0xff]  }
  0x61   : > { %4315 = vmatpush1.bf16.msra.mxu0 %v7134_v23  ;;  %4725 = vmatpush1.bf16.msra.mxu1 %v7137_v24  ;;  %v7221_v23 = vld [vmem:[%s8246_s29 + $0x408] ss:$16 sps:$4 sm:$0xff]   ;;  %v7226_v24 = vld [vmem:[%s8246_s29 + $0x424] ss:$16 sps:$4 sm:$0xff]  }
  0x62   : > { %4316 = vmatprep.subr.bf16.mxu0 %v7142_v25  ;;  %4726 = vmatprep.subr.bf16.mxu1 %v7145_v26  ;;  %v7229_v25 = vld [vmem:[%s8246_s29 + $0x42c] ss:$16 sps:$4 sm:$0xff]   ;;  %v8419_v26 = vrot.slane %v943_v20, %v8304_v50  ;;  %v7310_v20 = vld [vmem:[%s8246_s29 + $0x5e4] ss:$16 sps:$4 sm:$0xff]  }
  0x65   : > { %4317 = vmatpush1.bf16.msra.mxu0 %v7140_v27  ;;  %4727 = vmatpush1.bf16.msra.mxu1 %v7143_v28  ;;  %v7224_v27 = vld [vmem:[%s8246_s29 + $0x420] ss:$16 sps:$4 sm:$0xff]   ;;  %v7232_v28 = vld [vmem:[%s8246_s29 + $0x444] ss:$16 sps:$4 sm:$0xff]  }
  0x66   : > { %4318 = vmatprep.subr.bf16.mxu0 %v7148_v29  ;;  %4728 = vmatprep.subr.bf16.mxu1 %v7151_v30  ;;  %v7235_v29 = vld [vmem:[%s8246_s29 + $0x44c] ss:$16 sps:$4 sm:$0xff]   ;;  %v7230_v30 = vld [vmem:[%s8246_s29 + $0x440] ss:$16 sps:$4 sm:$0xff]  }
  0x69   : > { %4319 = vmatpush1.bf16.msra.mxu0 %v7146_v31  ;;  %4729 = vmatpush1.bf16.msra.mxu1 %v7149_v32  ;;  %v7233_v31 = vld [vmem:[%s8246_s29 + $0x448] ss:$16 sps:$4 sm:$0xff]   ;;  %v7238_v32 = vld [vmem:[%s8246_s29 + $0x464] ss:$16 sps:$4 sm:$0xff]  }
  0x6a   : > { %4320 = vmatprep.subr.bf16.mxu0 %v7154_v33  ;;  %4730 = vmatprep.subr.bf16.mxu1 %v7157_v34  ;;  %v7241_v33 = vld [vmem:[%s8246_s29 + $0x46c] ss:$16 sps:$4 sm:$0xff]   ;;  %v7236_v34 = vld [vmem:[%s8246_s29 + $0x460] ss:$16 sps:$4 sm:$0xff]  }
  0x6d   : > { %4321 = vmatpush1.bf16.msra.mxu0 %v7152_v35  ;;  %4731 = vmatpush1.bf16.msra.mxu1 %v7155_v36  ;;  %v7239_v35 = vld [vmem:[%s8246_s29 + $0x468] ss:$16 sps:$4 sm:$0xff]   ;;  %v7244_v36 = vld [vmem:[%s8246_s29 + $0x484] ss:$16 sps:$4 sm:$0xff]  }
  0x6e   : > { %4322 = vmatprep.subr.bf16.mxu0 %v7160_v37  ;;  %4732 = vmatprep.subr.bf16.mxu1 %v7163_v38  ;;  %v7247_v37 = vld [vmem:[%s8246_s29 + $0x48c] ss:$16 sps:$4 sm:$0xff]   ;;  %v7242_v38 = vld [vmem:[%s8246_s29 + $0x480] ss:$16 sps:$4 sm:$0xff]  }
  0x71   : > { %4323 = vmatpush1.bf16.msra.mxu0 %v7158_v39  ;;  %4733 = vmatpush1.bf16.msra.mxu1 %v7161_v40  ;;  %v7245_v39 = vld [vmem:[%s8246_s29 + $0x488] ss:$16 sps:$4 sm:$0xff]   ;;  %v7250_v40 = vld [vmem:[%s8246_s29 + $0x4a4] ss:$16 sps:$4 sm:$0xff]  }
  0x72   : > { %4324 = vmatprep.subr.bf16.mxu0 %v7166_v41  ;;  %4734 = vmatprep.subr.bf16.mxu1 %v7169_v42  ;;  %v7253_v41 = vld [vmem:[%s8246_s29 + $0x4ac] ss:$16 sps:$4 sm:$0xff]   ;;  %v7248_v42 = vld [vmem:[%s8246_s29 + $0x4a0] ss:$16 sps:$4 sm:$0xff]  }
  0x75   : > { %4325 = vmatpush1.bf16.msra.mxu0 %v7164_v44  ;;  %4735 = vmatpush1.bf16.msra.mxu1 %v7167_v45  ;;  %v7251_v44 = vld [vmem:[%s8246_s29 + $0x4a8] ss:$16 sps:$4 sm:$0xff]   ;;  %v7256_v45 = vld [vmem:[%s8246_s29 + $0x4c4] ss:$16 sps:$4 sm:$0xff]  }
  0x76   : > { %4326 = vmatprep.subr.bf16.mxu0 %v7172_v46  ;;  %4736 = vmatprep.subr.bf16.mxu1 %v7175_v47  ;;  %v7259_v46 = vld [vmem:[%s8246_s29 + $0x4cc] ss:$16 sps:$4 sm:$0xff]   ;;  %v7254_v47 = vld [vmem:[%s8246_s29 + $0x4c0] ss:$16 sps:$4 sm:$0xff]  }
  0x79   : > { %4327 = vmatpush1.bf16.msra.mxu0 %v7170_v48  ;;  %4737 = vmatpush1.bf16.msra.mxu1 %v7173_v49  ;;  %v7257_v48 = vld [vmem:[%s8246_s29 + $0x4c8] ss:$16 sps:$4 sm:$0xff]   ;;  %v7262_v49 = vld [vmem:[%s8246_s29 + $0x4e4] ss:$16 sps:$4 sm:$0xff]  }
  0x7a   : > { %4328 = vmatprep.subr.bf16.mxu0 %v7178_v51  ;;  %4738 = vmatprep.subr.bf16.mxu1 %v7181_v52  ;;  %v7265_v51 = vld [vmem:[%s8246_s29 + $0x4ec] ss:$16 sps:$4 sm:$0xff]   ;;  %v7260_v52 = vld [vmem:[%s8246_s29 + $0x4e0] ss:$16 sps:$4 sm:$0xff]  }
  0x7d   : > { %4329 = vmatpush1.bf16.msra.mxu0 %v7176_v54  ;;  %4739 = vmatpush1.bf16.msra.mxu1 %v7179_v55  ;;  %v7263_v54 = vld [vmem:[%s8246_s29 + $0x4e8] ss:$16 sps:$4 sm:$0xff]   ;;  %v7268_v55 = vld [vmem:[%s8246_s29 + $0x504] ss:$16 sps:$4 sm:$0xff]  }
  0x7e   : > { %4330 = vmatprep.subr.bf16.mxu0 %v7184_v56  ;;  %4740 = vmatprep.subr.bf16.mxu1 %v7187_v57  ;;  %v7271_v56 = vld [vmem:[%s8246_s29 + $0x50c] ss:$16 sps:$4 sm:$0xff]   ;;  %v7266_v57 = vld [vmem:[%s8246_s29 + $0x500] ss:$16 sps:$4 sm:$0xff]  }
  0x81   : > { %4331 = vmatpush1.bf16.msra.mxu0 %v7182_v58  ;;  %4741 = vmatpush1.bf16.msra.mxu1 %v7185_v59  ;;  %v7269_v58 = vld [vmem:[%s8246_s29 + $0x508] ss:$16 sps:$4 sm:$0xff]   ;;  %v7274_v59 = vld [vmem:[%s8246_s29 + $0x524] ss:$16 sps:$4 sm:$0xff]  }
  0x82   : > { %4332 = vmatprep.subr.bf16.mxu0 %v7190_v60  ;;  %4742 = vmatprep.subr.bf16.mxu1 %v7193_v61  ;;  %v7277_v60 = vld [vmem:[%s8246_s29 + $0x52c] ss:$16 sps:$4 sm:$0xff]   ;;  %v7272_v61 = vld [vmem:[%s8246_s29 + $0x520] ss:$16 sps:$4 sm:$0xff]  }
  0x85   : > { %4333 = vmatpush1.bf16.msra.mxu0 %v7188_v62  ;;  %4743 = vmatpush1.bf16.msra.mxu1 %v7191_v63  ;;  %v7275_v62 = vld [vmem:[%s8246_s29 + $0x528] ss:$16 sps:$4 sm:$0xff]   ;;  %v7280_v63 = vld [vmem:[%s8246_s29 + $0x544] ss:$16 sps:$4 sm:$0xff]  }
  0x86   : > { %4334 = vmatprep.subr.bf16.mxu0 %v7196_v0  ;;  %4744 = vmatprep.subr.bf16.mxu1 %v7199_v1  ;;  %v7283_v0 = vld [vmem:[%s8246_s29 + $0x54c] ss:$16 sps:$4 sm:$0xff]   ;;  %v7278_v1 = vld [vmem:[%s8246_s29 + $0x540] ss:$16 sps:$4 sm:$0xff]  }
  0x89   : > { %4335 = vmatpush1.bf16.msra.mxu0 %v7194_v2  ;;  %4745 = vmatpush1.bf16.msra.mxu1 %v7197_v3  ;;  %v7281_v2 = vld [vmem:[%s8246_s29 + $0x548] ss:$16 sps:$4 sm:$0xff]   ;;  %v7286_v3 = vld [vmem:[%s8246_s29 + $0x564] ss:$16 sps:$4 sm:$0xff]  }
  0x8a   : > { %4336 = vmatprep.subr.bf16.mxu0 %v7202_v4  ;;  %4746 = vmatprep.subr.bf16.mxu1 %v7205_v5  ;;  %v7289_v4 = vld [vmem:[%s8246_s29 + $0x56c] ss:$16 sps:$4 sm:$0xff]   ;;  %v7284_v5 = vld [vmem:[%s8246_s29 + $0x560] ss:$16 sps:$4 sm:$0xff]  }
  0x8d   : > { %4337 = vmatpush1.bf16.msra.mxu0 %v7200_v6  ;;  %4747 = vmatpush1.bf16.msra.mxu1 %v7203_v7  ;;  %v7287_v6 = vld [vmem:[%s8246_s29 + $0x568] ss:$16 sps:$4 sm:$0xff]   ;;  %v7292_v7 = vld [vmem:[%s8246_s29 + $0x584] ss:$16 sps:$4 sm:$0xff]  }
  0x8e   : > { %4338 = vmatprep.subr.bf16.mxu0 %v7208_v8  ;;  %4748 = vmatprep.subr.bf16.mxu1 %v7211_v9  ;;  %v7295_v8 = vld [vmem:[%s8246_s29 + $0x58c] ss:$16 sps:$4 sm:$0xff]   ;;  %v7290_v9 = vld [vmem:[%s8246_s29 + $0x580] ss:$16 sps:$4 sm:$0xff]  }
  0x91   : > { %4339 = vmatpush1.bf16.msra.mxu0 %v7206_v11  ;;  %4749 = vmatpush1.bf16.msra.mxu1 %v7209_v12  ;;  %v7298_v11 = vld [vmem:[%s8246_s29 + $0x5a4] ss:$16 sps:$4 sm:$0xff]   ;;  %v7301_v12 = vld [vmem:[%s8246_s29 + $0x5ac] ss:$16 sps:$4 sm:$0xff]  }
  0x92   : > { %4340 = vmatprep.subr.bf16.mxu0 %v7214_v13  ;;  %4750 = vmatprep.subr.bf16.mxu1 %v7217_v15  ;;  %v7296_v13 = vld [vmem:[%s8246_s29 + $0x5a0] ss:$16 sps:$4 sm:$0xff]   ;;  %v7299_v15 = vld [vmem:[%s8246_s29 + $0x5a8] ss:$16 sps:$4 sm:$0xff]  }
  0x95   : > { %4341 = vmatpush1.bf16.msra.mxu0 %v7212_v17  ;;  %4751 = vmatpush1.bf16.msra.mxu1 %v7215_v53  ;;  %v7304_v17 = vld [vmem:[%s8246_s29 + $0x5c4] ss:$16 sps:$4 sm:$0xff]   ;;  %v7307_v53 = vld [vmem:[%s8246_s29 + $0x5cc] ss:$16 sps:$4 sm:$0xff]  }
  0x96   : > { %4351 = vmatprep.subr.bf16.mxu0 %v7220_v18  ;;  %4761 = vmatprep.subr.bf16.mxu1 %v7223_v19  ;;  %v7302_v18 = vld [vmem:[%s8246_s29 + $0x5c0] ss:$16 sps:$4 sm:$0xff]   ;;  %v7305_v19 = vld [vmem:[%s8246_s29 + $0x5c8] ss:$16 sps:$4 sm:$0xff]  }
  0x98   : > { %4343 = vmatmul.mubr.bf16.vlgmr.msra.gmra.mrb[0].mxu0 %v972_v22  ;;  %4753 = vmatmul.mubr.bf16.vlgmr.msra.gmra.mrb[0].mxu1 %v972_v22  ;;  %v7308_v22 = vld [vmem:[%s8246_s29 + $0x5e0] ss:$16 sps:$4 sm:$0xff]  }
  0x99   : > { %4352 = vmatpush1.bf16.msra.mxu0 %v7218_v21  ;;  %4762 = vmatpush1.bf16.msra.mxu1 %v7221_v23  ;;  %v7313_v21 = vld [vmem:[%s8246_s29 + $0x5ec] ss:$16 sps:$4 sm:$0xff]   ;;  %v7311_v23 = vld [vmem:[%s8246_s29 + $0x5e8] ss:$16 sps:$4 sm:$0xff]  }
  0x9a   : > { %4353 = vmatprep.subr.bf16.mxu0 %v7226_v24  ;;  %4763 = vmatprep.subr.bf16.mxu1 %v7229_v25  ;;  %v7317_v24 = vld [vmem:[%s8246_s29 + $0x604] ss:$16 sps:$4 sm:$0xff]   ;;  %v7320_v25 = vld [vmem:[%s8246_s29 + $0x60c] ss:$16 sps:$4 sm:$0xff]  }
  0x9b   : > { %4383 = vmatprep.mubr.bf16.mxu0 %v8419_v26  ;;  %4793 = vmatprep.mubr.bf16.mxu1 %v8419_v26 }
  0x9d   : > { %4354 = vmatpush1.bf16.msra.mxu0 %v7224_v27  ;;  %4764 = vmatpush1.bf16.msra.mxu1 %v7227_v14  ;;  %v7315_v27 = vld [vmem:[%s8246_s29 + $0x600] ss:$16 sps:$4 sm:$0xff]   ;;  %v8486_v14 = vrot.slane %v8404_v16, %v8304_v50 }
  0x9e   : > { %4355 = vmatprep.subr.bf16.mxu0 %v7232_v28  ;;  %4765 = vmatprep.subr.bf16.mxu1 %v7235_v29  ;;  %v7318_v28 = vld [vmem:[%s8246_s29 + $0x608] ss:$16 sps:$4 sm:$0xff]   ;;  %v7323_v29 = vld [vmem:[%s8246_s29 + $0x624] ss:$16 sps:$4 sm:$0xff]   ;;  %v7321_v16 = vld [vmem:[%s8246_s29 + $0x620] ss:$16 sps:$4 sm:$0xff]  }
  0xa1   : > { %4356 = vmatpush1.bf16.msra.mxu0 %v7230_v30  ;;  %4766 = vmatpush1.bf16.msra.mxu1 %v7233_v31  ;;  %v7326_v30 = vld [vmem:[%s8246_s29 + $0x62c] ss:$16 sps:$4 sm:$0xff]   ;;  %v975_v31 = vcombine.high %v8419_v26, %v8419_v26  ;;  %v7327_v26 = vld [vmem:[%s8246_s29 + $0x640] ss:$16 sps:$4 sm:$0xff]  }
  0xa2   : > { %4357 = vmatprep.subr.bf16.mxu0 %v7238_v32  ;;  %4767 = vmatprep.subr.bf16.mxu1 %v7241_v33  ;;  %v7324_v32 = vld [vmem:[%s8246_s29 + $0x628] ss:$16 sps:$4 sm:$0xff]   ;;  %v7329_v33 = vld [vmem:[%s8246_s29 + $0x644] ss:$16 sps:$4 sm:$0xff]  }
  0xa5   : > { %4358 = vmatpush1.bf16.msra.mxu0 %v7236_v34  ;;  %4768 = vmatpush1.bf16.msra.mxu1 %v7239_v35  ;;  %v7332_v34 = vld [vmem:[%s8246_s29 + $0x64c] ss:$16 sps:$4 sm:$0xff]   ;;  %v7330_v35 = vld [vmem:[%s8246_s29 + $0x648] ss:$16 sps:$4 sm:$0xff]  }
  0xa6   : > { %4359 = vmatprep.subr.bf16.mxu0 %v7244_v36  ;;  %4769 = vmatprep.subr.bf16.mxu1 %v7247_v37  ;;  %v7335_v36 = vld [vmem:[%s8246_s29 + $0x664] ss:$16 sps:$4 sm:$0xff]   ;;  %v7338_v37 = vld [vmem:[%s8246_s29 + $0x66c] ss:$16 sps:$4 sm:$0xff]  }
  0xa9   : > { %4360 = vmatpush1.bf16.msra.mxu0 %v7242_v38  ;;  %4770 = vmatpush1.bf16.msra.mxu1 %v7245_v39  ;;  %v7333_v38 = vld [vmem:[%s8246_s29 + $0x660] ss:$16 sps:$4 sm:$0xff]   ;;  %v7336_v39 = vld [vmem:[%s8246_s29 + $0x668] ss:$16 sps:$4 sm:$0xff]  }
  0xaa   : > { %4361 = vmatprep.subr.bf16.mxu0 %v7250_v40  ;;  %4771 = vmatprep.subr.bf16.mxu1 %v7253_v41  ;;  %v7341_v40 = vld [vmem:[%s8246_s29 + $0x684] ss:$16 sps:$4 sm:$0xff]   ;;  %v7344_v41 = vld [vmem:[%s8246_s29 + $0x68c] ss:$16 sps:$4 sm:$0xff]  }
  0xad   : > { %4362 = vmatpush1.bf16.msra.mxu0 %v7248_v42  ;;  %4772 = vmatpush1.bf16.msra.mxu1 %v7251_v44  ;;  %v7339_v42 = vld [vmem:[%s8246_s29 + $0x680] ss:$16 sps:$4 sm:$0xff]   ;;  %v7342_v44 = vld [vmem:[%s8246_s29 + $0x688] ss:$16 sps:$4 sm:$0xff]  }
  0xae   : > { %4363 = vmatprep.subr.bf16.mxu0 %v7256_v45  ;;  %4773 = vmatprep.subr.bf16.mxu1 %v7259_v46  ;;  %v7347_v45 = vld [vmem:[%s8246_s29 + $0x6a4] ss:$16 sps:$4 sm:$0xff]   ;;  %v7350_v46 = vld [vmem:[%s8246_s29 + $0x6ac] ss:$16 sps:$4 sm:$0xff]  }
  0xb1   : > { %4364 = vmatpush1.bf16.msra.mxu0 %v7254_v47  ;;  %4774 = vmatpush1.bf16.msra.mxu1 %v7257_v48  ;;  %v7345_v47 = vld [vmem:[%s8246_s29 + $0x6a0] ss:$16 sps:$4 sm:$0xff]   ;;  %v7348_v48 = vld [vmem:[%s8246_s29 + $0x6a8] ss:$16 sps:$4 sm:$0xff]  }
  0xb2   : > { %4365 = vmatprep.subr.bf16.mxu0 %v7262_v49  ;;  %4775 = vmatprep.subr.bf16.mxu1 %v7265_v51  ;;  %v7353_v49 = vld [vmem:[%s8246_s29 + $0x6c4] ss:$16 sps:$4 sm:$0xff]   ;;  %v7356_v51 = vld [vmem:[%s8246_s29 + $0x6cc] ss:$16 sps:$4 sm:$0xff]  }
  0xb5   : > { %4366 = vmatpush1.bf16.msra.mxu0 %v7260_v52  ;;  %4776 = vmatpush1.bf16.msra.mxu1 %v7263_v54  ;;  %v7351_v52 = vld [vmem:[%s8246_s29 + $0x6c0] ss:$16 sps:$4 sm:$0xff]   ;;  %v7354_v54 = vld [vmem:[%s8246_s29 + $0x6c8] ss:$16 sps:$4 sm:$0xff]  }
  0xb6   : > { %4367 = vmatprep.subr.bf16.mxu0 %v7268_v55  ;;  %4777 = vmatprep.subr.bf16.mxu1 %v7271_v56  ;;  %v7359_v55 = vld [vmem:[%s8246_s29 + $0x6e4] ss:$16 sps:$4 sm:$0xff]   ;;  %v7362_v56 = vld [vmem:[%s8246_s29 + $0x6ec] ss:$16 sps:$4 sm:$0xff]  }
  0xb9   : > { %4368 = vmatpush1.bf16.msra.mxu0 %v7266_v57  ;;  %4778 = vmatpush1.bf16.msra.mxu1 %v7269_v58  ;;  %v7357_v57 = vld [vmem:[%s8246_s29 + $0x6e0] ss:$16 sps:$4 sm:$0xff]   ;;  %v7360_v58 = vld [vmem:[%s8246_s29 + $0x6e8] ss:$16 sps:$4 sm:$0xff]  }
  0xba   : > { %4369 = vmatprep.subr.bf16.mxu0 %v7274_v59  ;;  %4779 = vmatprep.subr.bf16.mxu1 %v7277_v60  ;;  %v7365_v59 = vld [vmem:[%s8246_s29 + $0x704] ss:$16 sps:$4 sm:$0xff]   ;;  %v7368_v60 = vld [vmem:[%s8246_s29 + $0x70c] ss:$16 sps:$4 sm:$0xff]  }
  0xbd   : > { %4370 = vmatpush1.bf16.msra.mxu0 %v7272_v61  ;;  %4780 = vmatpush1.bf16.msra.mxu1 %v7275_v62  ;;  %v7363_v61 = vld [vmem:[%s8246_s29 + $0x700] ss:$16 sps:$4 sm:$0xff]   ;;  %v7366_v62 = vld [vmem:[%s8246_s29 + $0x708] ss:$16 sps:$4 sm:$0xff]  }
  0xbe   : > { %4371 = vmatprep.subr.bf16.mxu0 %v7280_v63  ;;  %4781 = vmatprep.subr.bf16.mxu1 %v7283_v0  ;;  %v7371_v63 = vld [vmem:[%s8246_s29 + $0x724] ss:$16 sps:$4 sm:$0xff]   ;;  %v7374_v0 = vld [vmem:[%s8246_s29 + $0x72c] ss:$16 sps:$4 sm:$0xff]  }
  0xc1   : > { %4372 = vmatpush1.bf16.msra.mxu0 %v7278_v1  ;;  %4782 = vmatpush1.bf16.msra.mxu1 %v7281_v2  ;;  %v7369_v1 = vld [vmem:[%s8246_s29 + $0x720] ss:$16 sps:$4 sm:$0xff]   ;;  %v7372_v2 = vld [vmem:[%s8246_s29 + $0x728] ss:$16 sps:$4 sm:$0xff]  }
  0xc2   : > { %4373 = vmatprep.subr.bf16.mxu0 %v7286_v3  ;;  %4783 = vmatprep.subr.bf16.mxu1 %v7289_v4  ;;  %v7377_v3 = vld [vmem:[%s8246_s29 + $0x744] ss:$16 sps:$4 sm:$0xff]   ;;  %v7380_v4 = vld [vmem:[%s8246_s29 + $0x74c] ss:$16 sps:$4 sm:$0xff]  }
  0xc5   : > { %4374 = vmatpush1.bf16.msra.mxu0 %v7284_v5  ;;  %4784 = vmatpush1.bf16.msra.mxu1 %v7287_v6  ;;  %v7375_v5 = vld [vmem:[%s8246_s29 + $0x740] ss:$16 sps:$4 sm:$0xff]   ;;  %v7378_v6 = vld [vmem:[%s8246_s29 + $0x748] ss:$16 sps:$4 sm:$0xff]  }
  0xc6   : > { %4375 = vmatprep.subr.bf16.mxu0 %v7292_v7  ;;  %4785 = vmatprep.subr.bf16.mxu1 %v7295_v8  ;;  %v7383_v7 = vld [vmem:[%s8246_s29 + $0x764] ss:$16 sps:$4 sm:$0xff]   ;;  %v7386_v8 = vld [vmem:[%s8246_s29 + $0x76c] ss:$16 sps:$4 sm:$0xff]  }
  0xc9   : > { %4376 = vmatpush1.bf16.msra.mxu0 %v7290_v9  ;;  %4786 = vmatpush1.bf16.msra.mxu1 %v7293_v10  ;;  %v7381_v9 = vld [vmem:[%s8246_s29 + $0x760] ss:$16 sps:$4 sm:$0xff]   ;;  %v7384_v10 = vld [vmem:[%s8246_s29 + $0x768] ss:$16 sps:$4 sm:$0xff]  }
  0xca   : > { %4377 = vmatprep.subr.bf16.mxu0 %v7298_v11  ;;  %4787 = vmatprep.subr.bf16.mxu1 %v7301_v12  ;;  %v7389_v11 = vld [vmem:[%s8246_s29 + $0x784] ss:$16 sps:$4 sm:$0xff]   ;;  %v7392_v12 = vld [vmem:[%s8246_s29 + $0x78c] ss:$16 sps:$4 sm:$0xff]  }
  0xcd   : > { %4378 = vmatpush1.bf16.msra.mxu0 %v7296_v13  ;;  %4788 = vmatpush1.bf16.msra.mxu1 %v7299_v15  ;;  %v7387_v13 = vld [vmem:[%s8246_s29 + $0x780] ss:$16 sps:$4 sm:$0xff]   ;;  %v7390_v15 = vld [vmem:[%s8246_s29 + $0x788] ss:$16 sps:$4 sm:$0xff]  }
  0xce   : > { %4379 = vmatprep.subr.bf16.mxu0 %v7304_v17  ;;  %4789 = vmatprep.subr.bf16.mxu1 %v7307_v53  ;;  %v7395_v17 = vld [vmem:[%s8246_s29 + $0x7a4] ss:$16 sps:$4 sm:$0xff]   ;;  %v7398_v53 = vld [vmem:[%s8246_s29 + $0x7ac] ss:$16 sps:$4 sm:$0xff]  }
  0xd1   : > { %4380 = vmatpush1.bf16.msra.mxu0 %v7302_v18  ;;  %4790 = vmatpush1.bf16.msra.mxu1 %v7305_v19  ;;  %v7393_v18 = vld [vmem:[%s8246_s29 + $0x7a0] ss:$16 sps:$4 sm:$0xff]   ;;  %v7396_v19 = vld [vmem:[%s8246_s29 + $0x7a8] ss:$16 sps:$4 sm:$0xff]  }
  0xd2   : > { %4381 = vmatprep.subr.bf16.mxu0 %v7310_v20  ;;  %4791 = vmatprep.subr.bf16.mxu1 %v7313_v21  ;;  %v7401_v20 = vld [vmem:[%s8246_s29 + $0x7c4] ss:$16 sps:$4 sm:$0xff]   ;;  %v7404_v21 = vld [vmem:[%s8246_s29 + $0x7cc] ss:$16 sps:$4 sm:$0xff]  }
  0xd5   : > { %4382 = vmatpush1.bf16.msra.mxu0 %v7308_v22  ;;  %4792 = vmatpush1.bf16.msra.mxu1 %v7311_v23  ;;  %v8550_v22 = vld.sshfl [vmem:[%s9184_s0 + $0x8] sm:$0xff pattern:$0x75316420]  ;;  %v7399_v23 = vld [vmem:[%s8246_s29 + $0x7c0] ss:$16 sps:$4 sm:$0xff]  }
  0xd6   : > { %4392 = vmatprep.subr.bf16.mxu0 %v7317_v24  ;;  %4802 = vmatprep.subr.bf16.mxu1 %v7320_v25  ;;  %v7402_v24 = vld [vmem:[%s8246_s29 + $0x7c8] ss:$16 sps:$4 sm:$0xff]   ;;  %v7407_v25 = vld [vmem:[%s8246_s29 + $0x7e4] ss:$16 sps:$4 sm:$0xff]  }
  0xd8   : > { %4384 = vmatmul.mubr.bf16.vlgmr.msra.gmra.mrb[0].mxu0 %v8486_v14  ;;  %4794 = vmatmul.mubr.bf16.vlgmr.msra.gmra.mrb[0].mxu1 %v8486_v14 }
  0xd9   : > { %4393 = vmatpush1.bf16.msra.mxu0 %v7315_v27  ;;  %4803 = vmatpush1.bf16.msra.mxu1 %v7318_v28  ;;  %v7410_v27 = vld [vmem:[%s8246_s29 + $0x7ec] ss:$16 sps:$4 sm:$0xff]   ;;  %v7405_v28 = vld [vmem:[%s8246_s29 + $0x7e0] ss:$16 sps:$4 sm:$0xff]  }
  0xda   : > { %4394 = vmatprep.subr.bf16.mxu0 %v7323_v29  ;;  %4804 = vmatprep.subr.bf16.mxu1 %v7326_v30  ;;  %v7408_v29 = vld [vmem:[%s8246_s29 + $0x7e8] ss:$16 sps:$4 sm:$0xff]   ;;  %v7413_v30 = vld [vmem:[%s8246_s29 + $0x804] ss:$16 sps:$4 sm:$0xff]  }
  0xdb   : > { %4424 = vmatprep.mubr.bf16.mxu0 %v975_v31  ;;  %4834 = vmatprep.mubr.bf16.mxu1 %v975_v31  ;;  %v7416_v31 = vld [vmem:[%s8246_s29 + $0x80c] ss:$16 sps:$4 sm:$0xff]  }
  0xdd   : > { %4395 = vmatpush1.bf16.msra.mxu0 %v7321_v16  ;;  %4805 = vmatpush1.bf16.msra.mxu1 %v7324_v32  ;;  %v991_v16 = vcombine.high %v8550_v22, %v8550_v22  ;;  %v973_v32 = vcombine.high %v8486_v14, %v8486_v14  ;;  %v7417_v14 = vld [vmem:[%s8246_s29 + $0x820] ss:$16 sps:$4 sm:$0xff]  }
  0xde   : > { %4396 = vmatprep.subr.bf16.mxu0 %v7329_v33  ;;  %4806 = vmatprep.subr.bf16.mxu1 %v7332_v34  ;;  %v7411_v33 = vld [vmem:[%s8246_s29 + $0x800] ss:$16 sps:$4 sm:$0xff]   ;;  %v7414_v34 = vld [vmem:[%s8246_s29 + $0x808] ss:$16 sps:$4 sm:$0xff]  }
  0xe1   : > { %4397 = vmatpush1.bf16.msra.mxu0 %v7327_v26  ;;  %4807 = vmatpush1.bf16.msra.mxu1 %v7330_v35  ;;  %v7419_v26 = vld [vmem:[%s8246_s29 + $0x824] ss:$16 sps:$4 sm:$0xff]   ;;  %v7422_v35 = vld [vmem:[%s8246_s29 + $0x82c] ss:$16 sps:$4 sm:$0xff]  }
  0xe2   : > { %4398 = vmatprep.subr.bf16.mxu0 %v7335_v36  ;;  %4808 = vmatprep.subr.bf16.mxu1 %v7338_v37  ;;  %v8569_v36 = vrot.slane %v991_v16, %v8304_v50  ;;  %v7420_v37 = vld [vmem:[%s8246_s29 + $0x828] ss:$16 sps:$4 sm:$0xff]   ;;  %v7503_v16 = vld [vmem:[%s8246_s29 + $0x9e4] ss:$16 sps:$4 sm:$0xff]  }
  0xe5   : > { %4399 = vmatpush1.bf16.msra.mxu0 %v7333_v38  ;;  %4809 = vmatpush1.bf16.msra.mxu1 %v7336_v39  ;;  %v7425_v38 = vld [vmem:[%s8246_s29 + $0x844] ss:$16 sps:$4 sm:$0xff]   ;;  %v7428_v39 = vld [vmem:[%s8246_s29 + $0x84c] ss:$16 sps:$4 sm:$0xff]  }
  0xe6   : > { %4400 = vmatprep.subr.bf16.mxu0 %v7341_v40  ;;  %4810 = vmatprep.subr.bf16.mxu1 %v7344_v41  ;;  %v7423_v40 = vld [vmem:[%s8246_s29 + $0x840] ss:$16 sps:$4 sm:$0xff]   ;;  %v7426_v41 = vld [vmem:[%s8246_s29 + $0x848] ss:$16 sps:$4 sm:$0xff]  }
  0xe9   : > { %4401 = vmatpush1.bf16.msra.mxu0 %v7339_v42  ;;  %4811 = vmatpush1.bf16.msra.mxu1 %v7342_v44  ;;  %v7431_v42 = vld [vmem:[%s8246_s29 + $0x864] ss:$16 sps:$4 sm:$0xff]   ;;  %v7434_v44 = vld [vmem:[%s8246_s29 + $0x86c] ss:$16 sps:$4 sm:$0xff]  }
  0xea   : > { %4402 = vmatprep.subr.bf16.mxu0 %v7347_v45  ;;  %4812 = vmatprep.subr.bf16.mxu1 %v7350_v46  ;;  %v7429_v45 = vld [vmem:[%s8246_s29 + $0x860] ss:$16 sps:$4 sm:$0xff]   ;;  %v7432_v46 = vld [vmem:[%s8246_s29 + $0x868] ss:$16 sps:$4 sm:$0xff]  }
  0xed   : > { %4403 = vmatpush1.bf16.msra.mxu0 %v7345_v47  ;;  %4813 = vmatpush1.bf16.msra.mxu1 %v7348_v48  ;;  %v7437_v47 = vld [vmem:[%s8246_s29 + $0x884] ss:$16 sps:$4 sm:$0xff]   ;;  %v7440_v48 = vld [vmem:[%s8246_s29 + $0x88c] ss:$16 sps:$4 sm:$0xff]  }
  0xee   : > { %4404 = vmatprep.subr.bf16.mxu0 %v7353_v49  ;;  %4814 = vmatprep.subr.bf16.mxu1 %v7356_v51  ;;  %v7435_v49 = vld [vmem:[%s8246_s29 + $0x880] ss:$16 sps:$4 sm:$0xff]   ;;  %v7438_v51 = vld [vmem:[%s8246_s29 + $0x888] ss:$16 sps:$4 sm:$0xff]  }
  0xf1   : > { %4405 = vmatpush1.bf16.msra.mxu0 %v7351_v52  ;;  %4815 = vmatpush1.bf16.msra.mxu1 %v7354_v54  ;;  %v7443_v52 = vld [vmem:[%s8246_s29 + $0x8a4] ss:$16 sps:$4 sm:$0xff]   ;;  %v7446_v54 = vld [vmem:[%s8246_s29 + $0x8ac] ss:$16 sps:$4 sm:$0xff]  }
  0xf2   : > { %4406 = vmatprep.subr.bf16.mxu0 %v7359_v55  ;;  %4816 = vmatprep.subr.bf16.mxu1 %v7362_v56  ;;  %v7441_v55 = vld [vmem:[%s8246_s29 + $0x8a0] ss:$16 sps:$4 sm:$0xff]   ;;  %v7444_v56 = vld [vmem:[%s8246_s29 + $0x8a8] ss:$16 sps:$4 sm:$0xff]  }
  0xf5   : > { %4407 = vmatpush1.bf16.msra.mxu0 %v7357_v57  ;;  %4817 = vmatpush1.bf16.msra.mxu1 %v7360_v58  ;;  %v7449_v57 = vld [vmem:[%s8246_s29 + $0x8c4] ss:$16 sps:$4 sm:$0xff]   ;;  %v7452_v58 = vld [vmem:[%s8246_s29 + $0x8cc] ss:$16 sps:$4 sm:$0xff]  }
  0xf6   : > { %4408 = vmatprep.subr.bf16.mxu0 %v7365_v59  ;;  %4818 = vmatprep.subr.bf16.mxu1 %v7368_v60  ;;  %v7447_v59 = vld [vmem:[%s8246_s29 + $0x8c0] ss:$16 sps:$4 sm:$0xff]   ;;  %v7450_v60 = vld [vmem:[%s8246_s29 + $0x8c8] ss:$16 sps:$4 sm:$0xff]  }
  0xf9   : > { %4409 = vmatpush1.bf16.msra.mxu0 %v7363_v61  ;;  %4819 = vmatpush1.bf16.msra.mxu1 %v7366_v62  ;;  %v7455_v61 = vld [vmem:[%s8246_s29 + $0x8e4] ss:$16 sps:$4 sm:$0xff]   ;;  %v7458_v62 = vld [vmem:[%s8246_s29 + $0x8ec] ss:$16 sps:$4 sm:$0xff]  }
  0xfa   : > { %4410 = vmatprep.subr.bf16.mxu0 %v7371_v63  ;;  %4820 = vmatprep.subr.bf16.mxu1 %v7374_v0  ;;  %v7453_v63 = vld [vmem:[%s8246_s29 + $0x8e0] ss:$16 sps:$4 sm:$0xff]   ;;  %v7456_v0 = vld [vmem:[%s8246_s29 + $0x8e8] ss:$16 sps:$4 sm:$0xff]  }
  0xfd   : > { %4411 = vmatpush1.bf16.msra.mxu0 %v7369_v1  ;;  %4821 = vmatpush1.bf16.msra.mxu1 %v7372_v2  ;;  %v7461_v1 = vld [vmem:[%s8246_s29 + $0x904] ss:$16 sps:$4 sm:$0xff]   ;;  %v7464_v2 = vld [vmem:[%s8246_s29 + $0x90c] ss:$16 sps:$4 sm:$0xff]  }
  0xfe   : > { %4412 = vmatprep.subr.bf16.mxu0 %v7377_v3  ;;  %4822 = vmatprep.subr.bf16.mxu1 %v7380_v4  ;;  %v7459_v3 = vld [vmem:[%s8246_s29 + $0x900] ss:$16 sps:$4 sm:$0xff]   ;;  %v7462_v4 = vld [vmem:[%s8246_s29 + $0x908] ss:$16 sps:$4 sm:$0xff]  }
 0x101   : > { %4413 = vmatpush1.bf16.msra.mxu0 %v7375_v5  ;;  %4823 = vmatpush1.bf16.msra.mxu1 %v7378_v6  ;;  %v7467_v5 = vld [vmem:[%s8246_s29 + $0x924] ss:$16 sps:$4 sm:$0xff]   ;;  %v7470_v6 = vld [vmem:[%s8246_s29 + $0x92c] ss:$16 sps:$4 sm:$0xff]  }
 0x102   : > { %4414 = vmatprep.subr.bf16.mxu0 %v7383_v7  ;;  %4824 = vmatprep.subr.bf16.mxu1 %v7386_v8  ;;  %v7465_v7 = vld [vmem:[%s8246_s29 + $0x920] ss:$16 sps:$4 sm:$0xff]   ;;  %v7468_v8 = vld [vmem:[%s8246_s29 + $0x928] ss:$16 sps:$4 sm:$0xff]  }
 0x105   : > { %4415 = vmatpush1.bf16.msra.mxu0 %v7381_v9  ;;  %4825 = vmatpush1.bf16.msra.mxu1 %v7384_v10  ;;  %v7473_v9 = vld [vmem:[%s8246_s29 + $0x944] ss:$16 sps:$4 sm:$0xff]   ;;  %v7476_v10 = vld [vmem:[%s8246_s29 + $0x94c] ss:$16 sps:$4 sm:$0xff]  }
 0x106   : > { %4416 = vmatprep.subr.bf16.mxu0 %v7389_v11  ;;  %4826 = vmatprep.subr.bf16.mxu1 %v7392_v12  ;;  %v7471_v11 = vld [vmem:[%s8246_s29 + $0x940] ss:$16 sps:$4 sm:$0xff]   ;;  %v7474_v12 = vld [vmem:[%s8246_s29 + $0x948] ss:$16 sps:$4 sm:$0xff]  }
 0x109   : > { %4417 = vmatpush1.bf16.msra.mxu0 %v7387_v13  ;;  %4827 = vmatpush1.bf16.msra.mxu1 %v7390_v15  ;;  %v7479_v13 = vld [vmem:[%s8246_s29 + $0x964] ss:$16 sps:$4 sm:$0xff]   ;;  %v7482_v15 = vld [vmem:[%s8246_s29 + $0x96c] ss:$16 sps:$4 sm:$0xff]  }
 0x10a   : > { %4418 = vmatprep.subr.bf16.mxu0 %v7395_v17  ;;  %4828 = vmatprep.subr.bf16.mxu1 %v7398_v53  ;;  %v7477_v17 = vld [vmem:[%s8246_s29 + $0x960] ss:$16 sps:$4 sm:$0xff]   ;;  %v7480_v53 = vld [vmem:[%s8246_s29 + $0x968] ss:$16 sps:$4 sm:$0xff]  }
 0x10d   : > { %4419 = vmatpush1.bf16.msra.mxu0 %v7393_v18  ;;  %4829 = vmatpush1.bf16.msra.mxu1 %v7396_v19  ;;  %v7485_v18 = vld [vmem:[%s8246_s29 + $0x984] ss:$16 sps:$4 sm:$0xff]   ;;  %v7488_v19 = vld [vmem:[%s8246_s29 + $0x98c] ss:$16 sps:$4 sm:$0xff]  }
 0x10e   : > { %4420 = vmatprep.subr.bf16.mxu0 %v7401_v20  ;;  %4830 = vmatprep.subr.bf16.mxu1 %v7404_v21  ;;  %v7483_v20 = vld [vmem:[%s8246_s29 + $0x980] ss:$16 sps:$4 sm:$0xff]   ;;  %v7486_v21 = vld [vmem:[%s8246_s29 + $0x988] ss:$16 sps:$4 sm:$0xff]  }
 0x111   : > { %4421 = vmatpush1.bf16.msra.mxu0 %v7399_v23  ;;  %4831 = vmatpush1.bf16.msra.mxu1 %v7402_v24  ;;  %v7491_v23 = vld [vmem:[%s8246_s29 + $0x9a4] ss:$16 sps:$4 sm:$0xff]   ;;  %v7494_v24 = vld [vmem:[%s8246_s29 + $0x9ac] ss:$16 sps:$4 sm:$0xff]  }
 0x112   : > { %4422 = vmatprep.subr.bf16.mxu0 %v7407_v25  ;;  %4832 = vmatprep.subr.bf16.mxu1 %v7410_v27  ;;  %v7489_v25 = vld [vmem:[%s8246_s29 + $0x9a0] ss:$16 sps:$4 sm:$0xff]   ;;  %v7492_v27 = vld [vmem:[%s8246_s29 + $0x9a8] ss:$16 sps:$4 sm:$0xff]  }
 0x115   : > { %4423 = vmatpush1.bf16.msra.mxu0 %v7405_v28  ;;  %4833 = vmatpush1.bf16.msra.mxu1 %v7408_v29  ;;  %v7497_v28 = vld [vmem:[%s8246_s29 + $0x9c4] ss:$16 sps:$4 sm:$0xff]   ;;  %v7500_v29 = vld [vmem:[%s8246_s29 + $0x9cc] ss:$16 sps:$4 sm:$0xff]  }
 0x116   : > { %4433 = vmatprep.subr.bf16.mxu0 %v7413_v30  ;;  %4843 = vmatprep.subr.bf16.mxu1 %v7416_v31  ;;  %v7495_v30 = vld [vmem:[%s8246_s29 + $0x9c0] ss:$16 sps:$4 sm:$0xff]   ;;  %v7498_v31 = vld [vmem:[%s8246_s29 + $0x9c8] ss:$16 sps:$4 sm:$0xff]  }
 0x118   : > { %4425 = vmatmul.mubr.bf16.vlgmr.msra.gmra.mrb[0].mxu0 %v973_v32  ;;  %4835 = vmatmul.mubr.bf16.vlgmr.msra.gmra.mrb[0].mxu1 %v973_v32  ;;  %v7506_v32 = vld [vmem:[%s8246_s29 + $0x9ec] ss:$16 sps:$4 sm:$0xff]  }
 0x119   : > { %4434 = vmatpush1.bf16.msra.mxu0 %v7411_v33  ;;  %4844 = vmatpush1.bf16.msra.mxu1 %v7414_v34  ;;  %v7501_v33 = vld [vmem:[%s8246_s29 + $0x9e0] ss:$16 sps:$4 sm:$0xff]   ;;  %v7504_v34 = vld [vmem:[%s8246_s29 + $0x9e8] ss:$16 sps:$4 sm:$0xff]  }
 0x11a   : > { %4435 = vmatprep.subr.bf16.mxu0 %v7419_v26  ;;  %4845 = vmatprep.subr.bf16.mxu1 %v7422_v35  ;;  %v7509_v26 = vld [vmem:[%s8246_s29 + $0xa04] ss:$16 sps:$4 sm:$0xff]   ;;  %v7512_v35 = vld [vmem:[%s8246_s29 + $0xa0c] ss:$16 sps:$4 sm:$0xff]  }
 0x11b   : > { %4465 = vmatprep.mubr.bf16.mxu0 %v8569_v36  ;;  %4875 = vmatprep.mubr.bf16.mxu1 %v8569_v36 }
 0x11d   : > { %4436 = vmatpush1.bf16.msra.mxu0 %v7417_v14  ;;  %4846 = vmatpush1.bf16.msra.mxu1 %v7420_v37  ;;  %v8635_v14 = vrot.slane %v8550_v22, %v8304_v50  ;;  %v7507_v37 = vld [vmem:[%s8246_s29 + $0xa00] ss:$16 sps:$4 sm:$0xff]  }
 0x11e   : > { %4437 = vmatprep.subr.bf16.mxu0 %v7425_v38  ;;  %4847 = vmatprep.subr.bf16.mxu1 %v7428_v39  ;;  %v7510_v38 = vld [vmem:[%s8246_s29 + $0xa08] ss:$16 sps:$4 sm:$0xff]   ;;  %v7515_v39 = vld [vmem:[%s8246_s29 + $0xa24] ss:$16 sps:$4 sm:$0xff]   ;;  %v7513_v22 = vld [vmem:[%s8246_s29 + $0xa20] ss:$16 sps:$4 sm:$0xff]  }
 0x121   : > { %4438 = vmatpush1.bf16.msra.mxu0 %v7423_v40  ;;  %4848 = vmatpush1.bf16.msra.mxu1 %v7426_v41  ;;  %v7518_v40 = vld [vmem:[%s8246_s29 + $0xa2c] ss:$16 sps:$4 sm:$0xff]   ;;  %v1023_v41 = vcombine.high %v8569_v36, %v8569_v36  ;;  %v7519_v36 = vld [vmem:[%s8246_s29 + $0xa40] ss:$16 sps:$4 sm:$0xff]  }
 0x122   : > { %4439 = vmatprep.subr.bf16.mxu0 %v7431_v42  ;;  %4849 = vmatprep.subr.bf16.mxu1 %v7434_v44  ;;  %v7516_v42 = vld [vmem:[%s8246_s29 + $0xa28] ss:$16 sps:$4 sm:$0xff]   ;;  %v7521_v44 = vld [vmem:[%s8246_s29 + $0xa44] ss:$16 sps:$4 sm:$0xff]  }
 0x125   : > { %4440 = vmatpush1.bf16.msra.mxu0 %v7429_v45  ;;  %4850 = vmatpush1.bf16.msra.mxu1 %v7432_v46  ;;  %v7524_v45 = vld [vmem:[%s8246_s29 + $0xa4c] ss:$16 sps:$4 sm:$0xff]   ;;  %v7522_v46 = vld [vmem:[%s8246_s29 + $0xa48] ss:$16 sps:$4 sm:$0xff]  }
 0x126   : > { %4441 = vmatprep.subr.bf16.mxu0 %v7437_v47  ;;  %4851 = vmatprep.subr.bf16.mxu1 %v7440_v48  ;;  %v7527_v47 = vld [vmem:[%s8246_s29 + $0xa64] ss:$16 sps:$4 sm:$0xff]   ;;  %v7530_v48 = vld [vmem:[%s8246_s29 + $0xa6c] ss:$16 sps:$4 sm:$0xff]  }
 0x129   : > { %4442 = vmatpush1.bf16.msra.mxu0 %v7435_v49  ;;  %4852 = vmatpush1.bf16.msra.mxu1 %v7438_v51  ;;  %v7525_v49 = vld [vmem:[%s8246_s29 + $0xa60] ss:$16 sps:$4 sm:$0xff]   ;;  %v7528_v51 = vld [vmem:[%s8246_s29 + $0xa68] ss:$16 sps:$4 sm:$0xff]  }
 0x12a   : > { %4443 = vmatprep.subr.bf16.mxu0 %v7443_v52  ;;  %4853 = vmatprep.subr.bf16.mxu1 %v7446_v54  ;;  %v7533_v52 = vld [vmem:[%s8246_s29 + $0xa84] ss:$16 sps:$4 sm:$0xff]   ;;  %v7536_v54 = vld [vmem:[%s8246_s29 + $0xa8c] ss:$16 sps:$4 sm:$0xff]  }
 0x12d   : > { %4444 = vmatpush1.bf16.msra.mxu0 %v7441_v55  ;;  %4854 = vmatpush1.bf16.msra.mxu1 %v7444_v56  ;;  %v7531_v55 = vld [vmem:[%s8246_s29 + $0xa80] ss:$16 sps:$4 sm:$0xff]   ;;  %v7534_v56 = vld [vmem:[%s8246_s29 + $0xa88] ss:$16 sps:$4 sm:$0xff]  }
 0x12e   : > { %4445 = vmatprep.subr.bf16.mxu0 %v7449_v57  ;;  %4855 = vmatprep.subr.bf16.mxu1 %v7452_v58  ;;  %v7539_v57 = vld [vmem:[%s8246_s29 + $0xaa4] ss:$16 sps:$4 sm:$0xff]   ;;  %v7542_v58 = vld [vmem:[%s8246_s29 + $0xaac] ss:$16 sps:$4 sm:$0xff]  }
 0x131   : > { %4446 = vmatpush1.bf16.msra.mxu0 %v7447_v59  ;;  %4856 = vmatpush1.bf16.msra.mxu1 %v7450_v60  ;;  %v7537_v59 = vld [vmem:[%s8246_s29 + $0xaa0] ss:$16 sps:$4 sm:$0xff]   ;;  %v7540_v60 = vld [vmem:[%s8246_s29 + $0xaa8] ss:$16 sps:$4 sm:$0xff]  }
 0x132   : > { %4447 = vmatprep.subr.bf16.mxu0 %v7455_v61  ;;  %4857 = vmatprep.subr.bf16.mxu1 %v7458_v62  ;;  %v7545_v61 = vld [vmem:[%s8246_s29 + $0xac4] ss:$16 sps:$4 sm:$0xff]   ;;  %v7548_v62 = vld [vmem:[%s8246_s29 + $0xacc] ss:$16 sps:$4 sm:$0xff]  }
 0x135   : > { %4448 = vmatpush1.bf16.msra.mxu0 %v7453_v63  ;;  %4858 = vmatpush1.bf16.msra.mxu1 %v7456_v0  ;;  %v7543_v63 = vld [vmem:[%s8246_s29 + $0xac0] ss:$16 sps:$4 sm:$0xff]   ;;  %v7546_v0 = vld [vmem:[%s8246_s29 + $0xac8] ss:$16 sps:$4 sm:$0xff]  }
 0x136   : > { %4449 = vmatprep.subr.bf16.mxu0 %v7461_v1  ;;  %4859 = vmatprep.subr.bf16.mxu1 %v7464_v2  ;;  %v7551_v1 = vld [vmem:[%s8246_s29 + $0xae4] ss:$16 sps:$4 sm:$0xff]   ;;  %v7554_v2 = vld [vmem:[%s8246_s29 + $0xaec] ss:$16 sps:$4 sm:$0xff]  }
 0x139   : > { %4450 = vmatpush1.bf16.msra.mxu0 %v7459_v3  ;;  %4860 = vmatpush1.bf16.msra.mxu1 %v7462_v4  ;;  %v7549_v3 = vld [vmem:[%s8246_s29 + $0xae0] ss:$16 sps:$4 sm:$0xff]   ;;  %v7552_v4 = vld [vmem:[%s8246_s29 + $0xae8] ss:$16 sps:$4 sm:$0xff]  }
 0x13a   : > { %4451 = vmatprep.subr.bf16.mxu0 %v7467_v5  ;;  %4861 = vmatprep.subr.bf16.mxu1 %v7470_v6  ;;  %v7557_v5 = vld [vmem:[%s8246_s29 + $0xb04] ss:$16 sps:$4 sm:$0xff]   ;;  %v7560_v6 = vld [vmem:[%s8246_s29 + $0xb0c] ss:$16 sps:$4 sm:$0xff]  }
 0x13d   : > { %4452 = vmatpush1.bf16.msra.mxu0 %v7465_v7  ;;  %4862 = vmatpush1.bf16.msra.mxu1 %v7468_v8  ;;  %v7555_v7 = vld [vmem:[%s8246_s29 + $0xb00] ss:$16 sps:$4 sm:$0xff]   ;;  %v7558_v8 = vld [vmem:[%s8246_s29 + $0xb08] ss:$16 sps:$4 sm:$0xff]  }
 0x13e   : > { %4453 = vmatprep.subr.bf16.mxu0 %v7473_v9  ;;  %4863 = vmatprep.subr.bf16.mxu1 %v7476_v10  ;;  %v7563_v9 = vld [vmem:[%s8246_s29 + $0xb24] ss:$16 sps:$4 sm:$0xff]   ;;  %v7566_v10 = vld [vmem:[%s8246_s29 + $0xb2c] ss:$16 sps:$4 sm:$0xff]  }
 0x141   : > { %4454 = vmatpush1.bf16.msra.mxu0 %v7471_v11  ;;  %4864 = vmatpush1.bf16.msra.mxu1 %v7474_v12  ;;  %v7561_v11 = vld [vmem:[%s8246_s29 + $0xb20] ss:$16 sps:$4 sm:$0xff]   ;;  %v7564_v12 = vld [vmem:[%s8246_s29 + $0xb28] ss:$16 sps:$4 sm:$0xff]  }
 0x142   : > { %4455 = vmatprep.subr.bf16.mxu0 %v7479_v13  ;;  %4865 = vmatprep.subr.bf16.mxu1 %v7482_v15  ;;  %v7569_v13 = vld [vmem:[%s8246_s29 + $0xb44] ss:$16 sps:$4 sm:$0xff]   ;;  %v7572_v15 = vld [vmem:[%s8246_s29 + $0xb4c] ss:$16 sps:$4 sm:$0xff]  }
 0x145   : > { %4456 = vmatpush1.bf16.msra.mxu0 %v7477_v17  ;;  %4866 = vmatpush1.bf16.msra.mxu1 %v7480_v53  ;;  %v7567_v17 = vld [vmem:[%s8246_s29 + $0xb40] ss:$16 sps:$4 sm:$0xff]   ;;  %v7570_v53 = vld [vmem:[%s8246_s29 + $0xb48] ss:$16 sps:$4 sm:$0xff]  }
 0x146   : > { %4457 = vmatprep.subr.bf16.mxu0 %v7485_v18  ;;  %4867 = vmatprep.subr.bf16.mxu1 %v7488_v19  ;;  %v7575_v18 = vld [vmem:[%s8246_s29 + $0xb64] ss:$16 sps:$4 sm:$0xff]   ;;  %v7578_v19 = vld [vmem:[%s8246_s29 + $0xb6c] ss:$16 sps:$4 sm:$0xff]  }
 0x149   : > { %4458 = vmatpush1.bf16.msra.mxu0 %v7483_v20  ;;  %4868 = vmatpush1.bf16.msra.mxu1 %v7486_v21  ;;  %v7573_v20 = vld [vmem:[%s8246_s29 + $0xb60] ss:$16 sps:$4 sm:$0xff]   ;;  %v7576_v21 = vld [vmem:[%s8246_s29 + $0xb68] ss:$16 sps:$4 sm:$0xff]  }
 0x14a   : > { %4459 = vmatprep.subr.bf16.mxu0 %v7491_v23  ;;  %4869 = vmatprep.subr.bf16.mxu1 %v7494_v24  ;;  %v7581_v23 = vld [vmem:[%s8246_s29 + $0xb84] ss:$16 sps:$4 sm:$0xff]   ;;  %v7584_v24 = vld [vmem:[%s8246_s29 + $0xb8c] ss:$16 sps:$4 sm:$0xff]  }
 0x14d   : > { %4460 = vmatpush1.bf16.msra.mxu0 %v7489_v25  ;;  %4870 = vmatpush1.bf16.msra.mxu1 %v7492_v27  ;;  %v7579_v25 = vld [vmem:[%s8246_s29 + $0xb80] ss:$16 sps:$4 sm:$0xff]   ;;  %v7582_v27 = vld [vmem:[%s8246_s29 + $0xb88] ss:$16 sps:$4 sm:$0xff]  }
 0x14e   : > { %4461 = vmatprep.subr.bf16.mxu0 %v7497_v28  ;;  %4871 = vmatprep.subr.bf16.mxu1 %v7500_v29  ;;  %v7587_v28 = vld [vmem:[%s8246_s29 + $0xba4] ss:$16 sps:$4 sm:$0xff]   ;;  %v7590_v29 = vld [vmem:[%s8246_s29 + $0xbac] ss:$16 sps:$4 sm:$0xff]  }
 0x151   : > { %4462 = vmatpush1.bf16.msra.mxu0 %v7495_v30  ;;  %4872 = vmatpush1.bf16.msra.mxu1 %v7498_v31  ;;  %v7585_v30 = vld [vmem:[%s8246_s29 + $0xba0] ss:$16 sps:$4 sm:$0xff]   ;;  %v7588_v31 = vld [vmem:[%s8246_s29 + $0xba8] ss:$16 sps:$4 sm:$0xff]  }
 0x152   : > { %4463 = vmatprep.subr.bf16.mxu0 %v7503_v16  ;;  %4873 = vmatprep.subr.bf16.mxu1 %v7506_v32  ;;  %v7593_v16 = vld [vmem:[%s8246_s29 + $0xbc4] ss:$16 sps:$4 sm:$0xff]   ;;  %v7596_v32 = vld [vmem:[%s8246_s29 + $0xbcc] ss:$16 sps:$4 sm:$0xff]  }
 0x155   : > { %4464 = vmatpush1.bf16.msra.mxu0 %v7501_v33  ;;  %4874 = vmatpush1.bf16.msra.mxu1 %v7504_v34  ;;  %v8180_v33 = vld [vmem:[%s9184_s0 + $0x8] sm:$0xff] }
 0x156   : > { %4474 = vmatprep.subr.bf16.mxu0 %v7509_v26  ;;  %4884 = vmatprep.subr.bf16.mxu1 %v7512_v35  ;;  %v976_v34 = vcombine.high %v8180_v33, %v8180_v33  ;;  %v7591_v26 = vld [vmem:[%s8246_s29 + $0xbc0] ss:$16 sps:$4 sm:$0xff]   ;;  %v7594_v35 = vld [vmem:[%s8246_s29 + $0xbc8] ss:$16 sps:$4 sm:$0xff]  }
 0x157   : > { %v7675_v33 = vld [vmem:[%s8246_s29 + $0xd80] ss:$16 sps:$4 sm:$0xff]  }
 0x158   : > { %4466 = vmatmul.mubr.bf16.vlgmr.msra.gmra.mrb[0].mxu0 %v8635_v14  ;;  %4876 = vmatmul.mubr.bf16.vlgmr.msra.gmra.mrb[0].mxu1 %v8635_v14 }
 0x159   : > { %4475 = vmatpush1.bf16.msra.mxu0 %v7507_v37  ;;  %4885 = vmatpush1.bf16.msra.mxu1 %v7510_v38  ;;  %v7599_v37 = vld [vmem:[%s8246_s29 + $0xbe4] ss:$16 sps:$4 sm:$0xff]   ;;  %v7602_v38 = vld [vmem:[%s8246_s29 + $0xbec] ss:$16 sps:$4 sm:$0xff]  }
 0x15a   : > { %4476 = vmatprep.subr.bf16.mxu0 %v7515_v39  ;;  %4886 = vmatprep.subr.bf16.mxu1 %v7518_v40  ;;  %v8705_v39 = vrot.slane %v976_v34, %v8304_v50  ;;  %v7597_v40 = vld [vmem:[%s8246_s29 + $0xbe0] ss:$16 sps:$4 sm:$0xff]   ;;  %v7678_v34 = vld [vmem:[%s8246_s29 + $0xd88] ss:$16 sps:$4 sm:$0xff]  }
 0x15b   : > { %4506 = vmatprep.mubr.bf16.mxu0 %v1023_v41  ;;  %4916 = vmatprep.mubr.bf16.mxu1 %v1023_v41  ;;  %v7600_v41 = vld [vmem:[%s8246_s29 + $0xbe8] ss:$16 sps:$4 sm:$0xff]  }
 0x15d   : > { %4477 = vmatpush1.bf16.msra.mxu0 %v7513_v22  ;;  %4887 = vmatpush1.bf16.msra.mxu1 %v7516_v42  ;;  %v7605_v22 = vld [vmem:[%s8246_s29 + $0xc04] ss:$16 sps:$4 sm:$0xff]   ;;  %v7608_v42 = vld [vmem:[%s8246_s29 + $0xc0c] ss:$16 sps:$4 sm:$0xff]  }
 0x15e   : > { %4478 = vmatprep.subr.bf16.mxu0 %v7521_v44  ;;  %4888 = vmatprep.subr.bf16.mxu1 %v7524_v45  ;;  %v992_v44 = vcombine.high %v8705_v39, %v8705_v39  ;;  %v1021_v45 = vcombine.high %v8635_v14, %v8635_v14  ;;  %v7609_v14 = vld [vmem:[%s8246_s29 + $0xc20] ss:$16 sps:$4 sm:$0xff]  }
 0x161   : > { %4479 = vmatpush1.bf16.msra.mxu0 %v7519_v36  ;;  %4889 = vmatpush1.bf16.msra.mxu1 %v7522_v46  ;;  %v7603_v36 = vld [vmem:[%s8246_s29 + $0xc00] ss:$16 sps:$4 sm:$0xff]   ;;  %v7606_v46 = vld [vmem:[%s8246_s29 + $0xc08] ss:$16 sps:$4 sm:$0xff]  }
 0x162   : > { %4480 = vmatprep.subr.bf16.mxu0 %v7527_v47  ;;  %4890 = vmatprep.subr.bf16.mxu1 %v7530_v48  ;;  %v7611_v47 = vld [vmem:[%s8246_s29 + $0xc24] ss:$16 sps:$4 sm:$0xff]   ;;  %v7614_v48 = vld [vmem:[%s8246_s29 + $0xc2c] ss:$16 sps:$4 sm:$0xff]  }
 0x165   : > { %4481 = vmatpush1.bf16.msra.mxu0 %v7525_v49  ;;  %4891 = vmatpush1.bf16.msra.mxu1 %v7528_v51  ;;  %v8720_v49 = vrot.slane %v992_v44, %v8304_v50  ;;  %v7612_v51 = vld [vmem:[%s8246_s29 + $0xc28] ss:$16 sps:$4 sm:$0xff]   ;;  %v7695_v44 = vld [vmem:[%s8246_s29 + $0xde4] ss:$16 sps:$4 sm:$0xff]  }
 0x166   : > { %4482 = vmatprep.subr.bf16.mxu0 %v7533_v52  ;;  %4892 = vmatprep.subr.bf16.mxu1 %v7536_v54  ;;  %v7617_v52 = vld [vmem:[%s8246_s29 + $0xc44] ss:$16 sps:$4 sm:$0xff]   ;;  %v7620_v54 = vld [vmem:[%s8246_s29 + $0xc4c] ss:$16 sps:$4 sm:$0xff]  }
 0x169   : > { %4483 = vmatpush1.bf16.msra.mxu0 %v7531_v55  ;;  %4893 = vmatpush1.bf16.msra.mxu1 %v7534_v56  ;;  %v7615_v55 = vld [vmem:[%s8246_s29 + $0xc40] ss:$16 sps:$4 sm:$0xff]   ;;  %v7618_v56 = vld [vmem:[%s8246_s29 + $0xc48] ss:$16 sps:$4 sm:$0xff]  }
 0x16a   : > { %4484 = vmatprep.subr.bf16.mxu0 %v7539_v57  ;;  %4894 = vmatprep.subr.bf16.mxu1 %v7542_v58  ;;  %v7623_v57 = vld [vmem:[%s8246_s29 + $0xc64] ss:$16 sps:$4 sm:$0xff]   ;;  %v7626_v58 = vld [vmem:[%s8246_s29 + $0xc6c] ss:$16 sps:$4 sm:$0xff]  }
 0x16d   : > { %4485 = vmatpush1.bf16.msra.mxu0 %v7537_v59  ;;  %4895 = vmatpush1.bf16.msra.mxu1 %v7540_v60  ;;  %v7621_v59 = vld [vmem:[%s8246_s29 + $0xc60] ss:$16 sps:$4 sm:$0xff]   ;;  %v7624_v60 = vld [vmem:[%s8246_s29 + $0xc68] ss:$16 sps:$4 sm:$0xff]  }
 0x16e   : > { %4486 = vmatprep.subr.bf16.mxu0 %v7545_v61  ;;  %4896 = vmatprep.subr.bf16.mxu1 %v7548_v62  ;;  %v7629_v61 = vld [vmem:[%s8246_s29 + $0xc84] ss:$16 sps:$4 sm:$0xff]   ;;  %v7632_v62 = vld [vmem:[%s8246_s29 + $0xc8c] ss:$16 sps:$4 sm:$0xff]  }
 0x171   : > { %4487 = vmatpush1.bf16.msra.mxu0 %v7543_v63  ;;  %4897 = vmatpush1.bf16.msra.mxu1 %v7546_v0  ;;  %v7627_v63 = vld [vmem:[%s8246_s29 + $0xc80] ss:$16 sps:$4 sm:$0xff]   ;;  %v7630_v0 = vld [vmem:[%s8246_s29 + $0xc88] ss:$16 sps:$4 sm:$0xff]  }
 0x172   : > { %4488 = vmatprep.subr.bf16.mxu0 %v7551_v1  ;;  %4898 = vmatprep.subr.bf16.mxu1 %v7554_v2  ;;  %v7635_v1 = vld [vmem:[%s8246_s29 + $0xca4] ss:$16 sps:$4 sm:$0xff]   ;;  %v7638_v2 = vld [vmem:[%s8246_s29 + $0xcac] ss:$16 sps:$4 sm:$0xff]  }
 0x175   : > { %4489 = vmatpush1.bf16.msra.mxu0 %v7549_v3  ;;  %4899 = vmatpush1.bf16.msra.mxu1 %v7552_v4  ;;  %v7633_v3 = vld [vmem:[%s8246_s29 + $0xca0] ss:$16 sps:$4 sm:$0xff]   ;;  %v7636_v4 = vld [vmem:[%s8246_s29 + $0xca8] ss:$16 sps:$4 sm:$0xff]  }
 0x176   : > { %4490 = vmatprep.subr.bf16.mxu0 %v7557_v5  ;;  %4900 = vmatprep.subr.bf16.mxu1 %v7560_v6  ;;  %v7641_v5 = vld [vmem:[%s8246_s29 + $0xcc4] ss:$16 sps:$4 sm:$0xff]   ;;  %v7644_v6 = vld [vmem:[%s8246_s29 + $0xccc] ss:$16 sps:$4 sm:$0xff]  }
 0x179   : > { %4491 = vmatpush1.bf16.msra.mxu0 %v7555_v7  ;;  %4901 = vmatpush1.bf16.msra.mxu1 %v7558_v8  ;;  %v7639_v7 = vld [vmem:[%s8246_s29 + $0xcc0] ss:$16 sps:$4 sm:$0xff]   ;;  %v7642_v8 = vld [vmem:[%s8246_s29 + $0xcc8] ss:$16 sps:$4 sm:$0xff]  }
 0x17a   : > { %4492 = vmatprep.subr.bf16.mxu0 %v7563_v9  ;;  %4902 = vmatprep.subr.bf16.mxu1 %v7566_v10  ;;  %v7647_v9 = vld [vmem:[%s8246_s29 + $0xce4] ss:$16 sps:$4 sm:$0xff]   ;;  %v7650_v10 = vld [vmem:[%s8246_s29 + $0xcec] ss:$16 sps:$4 sm:$0xff]  }
 0x17d   : > { %4493 = vmatpush1.bf16.msra.mxu0 %v7561_v11  ;;  %4903 = vmatpush1.bf16.msra.mxu1 %v7564_v12  ;;  %v7645_v11 = vld [vmem:[%s8246_s29 + $0xce0] ss:$16 sps:$4 sm:$0xff]   ;;  %v7648_v12 = vld [vmem:[%s8246_s29 + $0xce8] ss:$16 sps:$4 sm:$0xff]  }
 0x17e   : > { %4494 = vmatprep.subr.bf16.mxu0 %v7569_v13  ;;  %4904 = vmatprep.subr.bf16.mxu1 %v7572_v15  ;;  %v7653_v13 = vld [vmem:[%s8246_s29 + $0xd04] ss:$16 sps:$4 sm:$0xff]   ;;  %v7656_v15 = vld [vmem:[%s8246_s29 + $0xd0c] ss:$16 sps:$4 sm:$0xff]  }
 0x181   : > { %4495 = vmatpush1.bf16.msra.mxu0 %v7567_v17  ;;  %4905 = vmatpush1.bf16.msra.mxu1 %v7570_v53  ;;  %v7651_v17 = vld [vmem:[%s8246_s29 + $0xd00] ss:$16 sps:$4 sm:$0xff]   ;;  %v7654_v53 = vld [vmem:[%s8246_s29 + $0xd08] ss:$16 sps:$4 sm:$0xff]  }
 0x182   : > { %4496 = vmatprep.subr.bf16.mxu0 %v7575_v18  ;;  %4906 = vmatprep.subr.bf16.mxu1 %v7578_v19  ;;  %v7659_v18 = vld [vmem:[%s8246_s29 + $0xd24] ss:$16 sps:$4 sm:$0xff]   ;;  %v7662_v19 = vld [vmem:[%s8246_s29 + $0xd2c] ss:$16 sps:$4 sm:$0xff]  }
 0x185   : > { %4497 = vmatpush1.bf16.msra.mxu0 %v7573_v20  ;;  %4907 = vmatpush1.bf16.msra.mxu1 %v7576_v21  ;;  %v7657_v20 = vld [vmem:[%s8246_s29 + $0xd20] ss:$16 sps:$4 sm:$0xff]   ;;  %v7660_v21 = vld [vmem:[%s8246_s29 + $0xd28] ss:$16 sps:$4 sm:$0xff]  }
 0x186   : > { %4498 = vmatprep.subr.bf16.mxu0 %v7581_v23  ;;  %4908 = vmatprep.subr.bf16.mxu1 %v7584_v24  ;;  %v7665_v23 = vld [vmem:[%s8246_s29 + $0xd44] ss:$16 sps:$4 sm:$0xff]   ;;  %v7668_v24 = vld [vmem:[%s8246_s29 + $0xd4c] ss:$16 sps:$4 sm:$0xff]  }
 0x189   : > { %4499 = vmatpush1.bf16.msra.mxu0 %v7579_v25  ;;  %4909 = vmatpush1.bf16.msra.mxu1 %v7582_v27  ;;  %v7663_v25 = vld [vmem:[%s8246_s29 + $0xd40] ss:$16 sps:$4 sm:$0xff]   ;;  %v7666_v27 = vld [vmem:[%s8246_s29 + $0xd48] ss:$16 sps:$4 sm:$0xff]  }
 0x18a   : > { %4500 = vmatprep.subr.bf16.mxu0 %v7587_v28  ;;  %4910 = vmatprep.subr.bf16.mxu1 %v7590_v29  ;;  %v7671_v28 = vld [vmem:[%s8246_s29 + $0xd64] ss:$16 sps:$4 sm:$0xff]   ;;  %v7674_v29 = vld [vmem:[%s8246_s29 + $0xd6c] ss:$16 sps:$4 sm:$0xff]  }
 0x18d   : > { %4501 = vmatpush1.bf16.msra.mxu0 %v7585_v30  ;;  %4911 = vmatpush1.bf16.msra.mxu1 %v7588_v31  ;;  %v7669_v30 = vld [vmem:[%s8246_s29 + $0xd60] ss:$16 sps:$4 sm:$0xff]   ;;  %v7672_v31 = vld [vmem:[%s8246_s29 + $0xd68] ss:$16 sps:$4 sm:$0xff]  }
 0x18e   : > { %4502 = vmatprep.subr.bf16.mxu0 %v7593_v16  ;;  %4912 = vmatprep.subr.bf16.mxu1 %v7596_v32  ;;  %v7677_v16 = vld [vmem:[%s8246_s29 + $0xd84] ss:$16 sps:$4 sm:$0xff]   ;;  %v7680_v32 = vld [vmem:[%s8246_s29 + $0xd8c] ss:$16 sps:$4 sm:$0xff]  }
 0x191   : > { %4503 = vmatpush1.bf16.msra.mxu0 %v7591_v26  ;;  %4913 = vmatpush1.bf16.msra.mxu1 %v7594_v35  ;;  %v7683_v26 = vld [vmem:[%s8246_s29 + $0xda4] ss:$16 sps:$4 sm:$0xff]   ;;  %v7686_v35 = vld [vmem:[%s8246_s29 + $0xdac] ss:$16 sps:$4 sm:$0xff]  }
 0x192   : > { %4504 = vmatprep.subr.bf16.mxu0 %v7599_v37  ;;  %4914 = vmatprep.subr.bf16.mxu1 %v7602_v38  ;;  %v7681_v37 = vld [vmem:[%s8246_s29 + $0xda0] ss:$16 sps:$4 sm:$0xff]   ;;  %v7684_v38 = vld [vmem:[%s8246_s29 + $0xda8] ss:$16 sps:$4 sm:$0xff]  }
 0x195   : > { %4505 = vmatpush1.bf16.msra.mxu0 %v7597_v40  ;;  %4915 = vmatpush1.bf16.msra.mxu1 %v7600_v41  ;;  %v7689_v40 = vld [vmem:[%s8246_s29 + $0xdc4] ss:$16 sps:$4 sm:$0xff]   ;;  %v7692_v41 = vld [vmem:[%s8246_s29 + $0xdcc] ss:$16 sps:$4 sm:$0xff]  }
 0x196   : > { %4515 = vmatprep.subr.bf16.mxu0 %v7605_v22  ;;  %4925 = vmatprep.subr.bf16.mxu1 %v7608_v42  ;;  %v7687_v22 = vld [vmem:[%s8246_s29 + $0xdc0] ss:$16 sps:$4 sm:$0xff]   ;;  %v7690_v42 = vld [vmem:[%s8246_s29 + $0xdc8] ss:$16 sps:$4 sm:$0xff]  }
 0x198   : > { %4507 = vmatmul.mubr.bf16.vlgmr.msra.gmra.mrb[0].mxu0 %v1021_v45  ;;  %4917 = vmatmul.mubr.bf16.vlgmr.msra.gmra.mrb[0].mxu1 %v1021_v45  ;;  %v7698_v45 = vld [vmem:[%s8246_s29 + $0xdec] ss:$16 sps:$4 sm:$0xff]  }
 0x199   : > { %4516 = vmatpush1.bf16.msra.mxu0 %v7603_v36  ;;  %4926 = vmatpush1.bf16.msra.mxu1 %v7606_v46  ;;  %v7693_v36 = vld [vmem:[%s8246_s29 + $0xde0] ss:$16 sps:$4 sm:$0xff]   ;;  %v7696_v46 = vld [vmem:[%s8246_s29 + $0xde8] ss:$16 sps:$4 sm:$0xff]  }
 0x19a   : > { %4517 = vmatprep.subr.bf16.mxu0 %v7611_v47  ;;  %4927 = vmatprep.subr.bf16.mxu1 %v7614_v48  ;;  %v7702_v47 = vld [vmem:[%s8246_s29 + $0xe04] ss:$16 sps:$4 sm:$0xff]   ;;  %v7705_v48 = vld [vmem:[%s8246_s29 + $0xe0c] ss:$16 sps:$4 sm:$0xff]  }
 0x19b   : > { %4547 = vmatprep.mubr.bf16.mxu0 %v8720_v49  ;;  %4957 = vmatprep.mubr.bf16.mxu1 %v8720_v49 }
 0x19d   : > { %4518 = vmatpush1.bf16.msra.mxu0 %v7609_v14  ;;  %4928 = vmatpush1.bf16.msra.mxu1 %v7612_v51  ;;  %v8786_v14 = vrot.slane %v8705_v39, %v8304_v50  ;;  %v7700_v51 = vld [vmem:[%s8246_s29 + $0xe00] ss:$16 sps:$4 sm:$0xff]  }
 0x19e   : > { %4519 = vmatprep.subr.bf16.mxu0 %v7617_v52  ;;  %4929 = vmatprep.subr.bf16.mxu1 %v7620_v54  ;;  %v7703_v52 = vld [vmem:[%s8246_s29 + $0xe08] ss:$16 sps:$4 sm:$0xff]   ;;  %v7708_v54 = vld [vmem:[%s8246_s29 + $0xe24] ss:$16 sps:$4 sm:$0xff]   ;;  %v7706_v39 = vld [vmem:[%s8246_s29 + $0xe20] ss:$16 sps:$4 sm:$0xff]  }
 0x1a1   : > { %4520 = vmatpush1.bf16.msra.mxu0 %v7615_v55  ;;  %4930 = vmatpush1.bf16.msra.mxu1 %v7618_v56  ;;  %v7711_v55 = vld [vmem:[%s8246_s29 + $0xe2c] ss:$16 sps:$4 sm:$0xff]   ;;  %v1024_v56 = vcombine.high %v8720_v49, %v8720_v49  ;;  %v7712_v49 = vld [vmem:[%s8246_s29 + $0xe40] ss:$16 sps:$4 sm:$0xff]  }
 0x1a2   : > { %4521 = vmatprep.subr.bf16.mxu0 %v7623_v57  ;;  %4931 = vmatprep.subr.bf16.mxu1 %v7626_v58  ;;  %v7709_v57 = vld [vmem:[%s8246_s29 + $0xe28] ss:$16 sps:$4 sm:$0xff]   ;;  %v7714_v58 = vld [vmem:[%s8246_s29 + $0xe44] ss:$16 sps:$4 sm:$0xff]  }
 0x1a5   : > { %4522 = vmatpush1.bf16.msra.mxu0 %v7621_v59  ;;  %4932 = vmatpush1.bf16.msra.mxu1 %v7624_v60  ;;  %v7717_v59 = vld [vmem:[%s8246_s29 + $0xe4c] ss:$16 sps:$4 sm:$0xff]   ;;  %v7715_v60 = vld [vmem:[%s8246_s29 + $0xe48] ss:$16 sps:$4 sm:$0xff]  }
 0x1a6   : > { %4523 = vmatprep.subr.bf16.mxu0 %v7629_v61  ;;  %4933 = vmatprep.subr.bf16.mxu1 %v7632_v62  ;;  %v7720_v61 = vld [vmem:[%s8246_s29 + $0xe64] ss:$16 sps:$4 sm:$0xff]   ;;  %v7723_v62 = vld [vmem:[%s8246_s29 + $0xe6c] ss:$16 sps:$4 sm:$0xff]  }
 0x1a9   : > { %4524 = vmatpush1.bf16.msra.mxu0 %v7627_v63  ;;  %4934 = vmatpush1.bf16.msra.mxu1 %v7630_v0  ;;  %v7718_v63 = vld [vmem:[%s8246_s29 + $0xe60] ss:$16 sps:$4 sm:$0xff]   ;;  %v7721_v0 = vld [vmem:[%s8246_s29 + $0xe68] ss:$16 sps:$4 sm:$0xff]  }
 0x1aa   : > { %4525 = vmatprep.subr.bf16.mxu0 %v7635_v1  ;;  %4935 = vmatprep.subr.bf16.mxu1 %v7638_v2  ;;  %v7726_v1 = vld [vmem:[%s8246_s29 + $0xe84] ss:$16 sps:$4 sm:$0xff]   ;;  %v7729_v2 = vld [vmem:[%s8246_s29 + $0xe8c] ss:$16 sps:$4 sm:$0xff]  }
 0x1ad   : > { %4526 = vmatpush1.bf16.msra.mxu0 %v7633_v3  ;;  %4936 = vmatpush1.bf16.msra.mxu1 %v7636_v4  ;;  %v7724_v3 = vld [vmem:[%s8246_s29 + $0xe80] ss:$16 sps:$4 sm:$0xff]   ;;  %v7727_v4 = vld [vmem:[%s8246_s29 + $0xe88] ss:$16 sps:$4 sm:$0xff]  }
 0x1ae   : > { %4527 = vmatprep.subr.bf16.mxu0 %v7641_v5  ;;  %4937 = vmatprep.subr.bf16.mxu1 %v7644_v6  ;;  %v7732_v5 = vld [vmem:[%s8246_s29 + $0xea4] ss:$16 sps:$4 sm:$0xff]   ;;  %v7735_v6 = vld [vmem:[%s8246_s29 + $0xeac] ss:$16 sps:$4 sm:$0xff]  }
 0x1b1   : > { %4528 = vmatpush1.bf16.msra.mxu0 %v7639_v7  ;;  %4938 = vmatpush1.bf16.msra.mxu1 %v7642_v8  ;;  %v7730_v7 = vld [vmem:[%s8246_s29 + $0xea0] ss:$16 sps:$4 sm:$0xff]   ;;  %v7733_v8 = vld [vmem:[%s8246_s29 + $0xea8] ss:$16 sps:$4 sm:$0xff]  }
 0x1b2   : > { %4529 = vmatprep.subr.bf16.mxu0 %v7647_v9  ;;  %4939 = vmatprep.subr.bf16.mxu1 %v7650_v10  ;;  %v7738_v9 = vld [vmem:[%s8246_s29 + $0xec4] ss:$16 sps:$4 sm:$0xff]   ;;  %v7741_v10 = vld [vmem:[%s8246_s29 + $0xecc] ss:$16 sps:$4 sm:$0xff]  }
 0x1b5   : > { %4530 = vmatpush1.bf16.msra.mxu0 %v7645_v11  ;;  %4940 = vmatpush1.bf16.msra.mxu1 %v7648_v12  ;;  %v7736_v11 = vld [vmem:[%s8246_s29 + $0xec0] ss:$16 sps:$4 sm:$0xff]   ;;  %v7739_v12 = vld [vmem:[%s8246_s29 + $0xec8] ss:$16 sps:$4 sm:$0xff]  }
 0x1b6   : > { %4531 = vmatprep.subr.bf16.mxu0 %v7653_v13  ;;  %4941 = vmatprep.subr.bf16.mxu1 %v7656_v15  ;;  %v7744_v13 = vld [vmem:[%s8246_s29 + $0xee4] ss:$16 sps:$4 sm:$0xff]   ;;  %v7747_v15 = vld [vmem:[%s8246_s29 + $0xeec] ss:$16 sps:$4 sm:$0xff]  }
 0x1b9   : > { %4532 = vmatpush1.bf16.msra.mxu0 %v7651_v17  ;;  %4942 = vmatpush1.bf16.msra.mxu1 %v7654_v53  ;;  %v7742_v17 = vld [vmem:[%s8246_s29 + $0xee0] ss:$16 sps:$4 sm:$0xff]   ;;  %v7745_v53 = vld [vmem:[%s8246_s29 + $0xee8] ss:$16 sps:$4 sm:$0xff]  }
 0x1ba   : > { %4533 = vmatprep.subr.bf16.mxu0 %v7659_v18  ;;  %4943 = vmatprep.subr.bf16.mxu1 %v7662_v19  ;;  %v7750_v18 = vld [vmem:[%s8246_s29 + $0xf04] ss:$16 sps:$4 sm:$0xff]   ;;  %v7753_v19 = vld [vmem:[%s8246_s29 + $0xf0c] ss:$16 sps:$4 sm:$0xff]  }
 0x1bd   : > { %4534 = vmatpush1.bf16.msra.mxu0 %v7657_v20  ;;  %4944 = vmatpush1.bf16.msra.mxu1 %v7660_v21  ;;  %v7748_v20 = vld [vmem:[%s8246_s29 + $0xf00] ss:$16 sps:$4 sm:$0xff]   ;;  %v7751_v21 = vld [vmem:[%s8246_s29 + $0xf08] ss:$16 sps:$4 sm:$0xff]  }
 0x1be   : > { %4535 = vmatprep.subr.bf16.mxu0 %v7665_v23  ;;  %4945 = vmatprep.subr.bf16.mxu1 %v7668_v24  ;;  %v7756_v23 = vld [vmem:[%s8246_s29 + $0xf24] ss:$16 sps:$4 sm:$0xff]   ;;  %v7759_v24 = vld [vmem:[%s8246_s29 + $0xf2c] ss:$16 sps:$4 sm:$0xff]  }
 0x1c1   : > { %4536 = vmatpush1.bf16.msra.mxu0 %v7663_v25  ;;  %4946 = vmatpush1.bf16.msra.mxu1 %v7666_v27  ;;  %v7754_v25 = vld [vmem:[%s8246_s29 + $0xf20] ss:$16 sps:$4 sm:$0xff]   ;;  %v7757_v27 = vld [vmem:[%s8246_s29 + $0xf28] ss:$16 sps:$4 sm:$0xff]  }
 0x1c2   : > { %4537 = vmatprep.subr.bf16.mxu0 %v7671_v28  ;;  %4947 = vmatprep.subr.bf16.mxu1 %v7674_v29  ;;  %v7762_v28 = vld [vmem:[%s8246_s29 + $0xf44] ss:$16 sps:$4 sm:$0xff]   ;;  %v7765_v29 = vld [vmem:[%s8246_s29 + $0xf4c] ss:$16 sps:$4 sm:$0xff]  }
 0x1c5   : > { %4538 = vmatpush1.bf16.msra.mxu0 %v7669_v30  ;;  %4948 = vmatpush1.bf16.msra.mxu1 %v7672_v31  ;;  %v7760_v30 = vld [vmem:[%s8246_s29 + $0xf40] ss:$16 sps:$4 sm:$0xff]   ;;  %v7763_v31 = vld [vmem:[%s8246_s29 + $0xf48] ss:$16 sps:$4 sm:$0xff]  }
 0x1c6   : > { %4539 = vmatprep.subr.bf16.mxu0 %v7677_v16  ;;  %4949 = vmatprep.subr.bf16.mxu1 %v7680_v32  ;;  %v7768_v16 = vld [vmem:[%s8246_s29 + $0xf64] ss:$16 sps:$4 sm:$0xff]   ;;  %v7771_v32 = vld [vmem:[%s8246_s29 + $0xf6c] ss:$16 sps:$4 sm:$0xff]  }
 0x1c9   : > { %4540 = vmatpush1.bf16.msra.mxu0 %v7675_v33  ;;  %4950 = vmatpush1.bf16.msra.mxu1 %v7678_v34  ;;  %v7766_v33 = vld [vmem:[%s8246_s29 + $0xf60] ss:$16 sps:$4 sm:$0xff]   ;;  %v7769_v34 = vld [vmem:[%s8246_s29 + $0xf68] ss:$16 sps:$4 sm:$0xff]  }
 0x1ca   : > { %4541 = vmatprep.subr.bf16.mxu0 %v7683_v26  ;;  %4951 = vmatprep.subr.bf16.mxu1 %v7686_v35  ;;  %v7774_v26 = vld [vmem:[%s8246_s29 + $0xf84] ss:$16 sps:$4 sm:$0xff]   ;;  %v7777_v35 = vld [vmem:[%s8246_s29 + $0xf8c] ss:$16 sps:$4 sm:$0xff]  }
 0x1cd   : > { %4542 = vmatpush1.bf16.msra.mxu0 %v7681_v37  ;;  %4952 = vmatpush1.bf16.msra.mxu1 %v7684_v38  ;;  %v7772_v37 = vld [vmem:[%s8246_s29 + $0xf80] ss:$16 sps:$4 sm:$0xff]   ;;  %v7775_v38 = vld [vmem:[%s8246_s29 + $0xf88] ss:$16 sps:$4 sm:$0xff]  }
 0x1ce   : > { %4543 = vmatprep.subr.bf16.mxu0 %v7689_v40  ;;  %4953 = vmatprep.subr.bf16.mxu1 %v7692_v41  ;;  %v7780_v40 = vld [vmem:[%s8246_s29 + $0xfa4] ss:$16 sps:$4 sm:$0xff]   ;;  %v7783_v41 = vld [vmem:[%s8246_s29 + $0xfac] ss:$16 sps:$4 sm:$0xff]  }
 0x1d1   : > { %4544 = vmatpush1.bf16.msra.mxu0 %v7687_v22  ;;  %4954 = vmatpush1.bf16.msra.mxu1 %v7690_v42  ;;  %v7778_v22 = vld [vmem:[%s8246_s29 + $0xfa0] ss:$16 sps:$4 sm:$0xff]   ;;  %v7781_v42 = vld [vmem:[%s8246_s29 + $0xfa8] ss:$16 sps:$4 sm:$0xff]  }
 0x1d2   : > { %4545 = vmatprep.subr.bf16.mxu0 %v7695_v44  ;;  %4955 = vmatprep.subr.bf16.mxu1 %v7698_v45  ;;  %v7786_v44 = vld [vmem:[%s8246_s29 + $0xfc4] ss:$16 sps:$4 sm:$0xff]   ;;  %v7789_v45 = vld [vmem:[%s8246_s29 + $0xfcc] ss:$16 sps:$4 sm:$0xff]  }
 0x1d5   : > { %4546 = vmatpush1.bf16.msra.mxu0 %v7693_v36  ;;  %4956 = vmatpush1.bf16.msra.mxu1 %v7696_v46  ;;  %v7784_v36 = vld [vmem:[%s8246_s29 + $0xfc0] ss:$16 sps:$4 sm:$0xff]   ;;  %v7787_v46 = vld [vmem:[%s8246_s29 + $0xfc8] ss:$16 sps:$4 sm:$0xff]  }
 0x1d6   : > { %4556 = vmatprep.subr.bf16.mxu0 %v7702_v47  ;;  %4966 = vmatprep.subr.bf16.mxu1 %v7705_v48  ;;  %v7792_v47 = vld [vmem:[%s8246_s29 + $0xfe4] ss:$16 sps:$4 sm:$0xff]   ;;  %v7795_v48 = vld [vmem:[%s8246_s29 + $0xfec] ss:$16 sps:$4 sm:$0xff]  }
 0x1d8   : > { %4548 = vmatmul.mubr.bf16.vlgmr.msra.gmra.mrb[0].mxu0 %v8786_v14  ;;  %4958 = vmatmul.mubr.bf16.vlgmr.msra.gmra.mrb[0].mxu1 %v8786_v14 }
 0x1d9   : > { %4557 = vmatpush1.bf16.msra.mxu0 %v7700_v51  ;;  %4967 = vmatpush1.bf16.msra.mxu1 %v7703_v52  ;;  %v8855_v51 = vld.sshfl [vmem:[%s9184_s0 + $0x10] sm:$0x33 pattern:$0x75316420] }
 0x1da   : > { %4558 = vmatprep.subr.bf16.mxu0 %v7708_v54  ;;  %4968 = vmatprep.subr.bf16.mxu1 %v7711_v55  ;;  %v7790_v52 = vld [vmem:[%s8246_s29 + $0xfe0] ss:$16 sps:$4 sm:$0xff]   ;;  %v7793_v54 = vld [vmem:[%s8246_s29 + $0xfe8] ss:$16 sps:$4 sm:$0xff]   ;;  %v7798_v55 = vld [vmem:[%s8246_s29 + $0x1004] ss:$16 sps:$4 sm:$0xff]  }
 0x1db   : > { %4588 = vmatprep.mubr.bf16.mxu0 %v1024_v56  ;;  %4998 = vmatprep.mubr.bf16.mxu1 %v1024_v56  ;;  %v7801_v56 = vld [vmem:[%s8246_s29 + $0x100c] ss:$16 sps:$4 sm:$0xff]  }
 0x1dd   : > { %4559 = vmatpush1.bf16.msra.mxu0 %v7706_v39  ;;  %4969 = vmatpush1.bf16.msra.mxu1 %v7709_v57  ;;  %v1032_v39 = vcombine.high %v8855_v51, %v8855_v51  ;;  %v1022_v57 = vcombine.high %v8786_v14, %v8786_v14  ;;  %v7802_v14 = vld [vmem:[%s8246_s29 + $0x1020] ss:$16 sps:$4 sm:$0xff]  }
 0x1de   : > { %4560 = vmatprep.subr.bf16.mxu0 %v7714_v58  ;;  %4970 = vmatprep.subr.bf16.mxu1 %v7717_v59  ;;  %v7796_v58 = vld [vmem:[%s8246_s29 + $0x1000] ss:$16 sps:$4 sm:$0xff]   ;;  %v7799_v59 = vld [vmem:[%s8246_s29 + $0x1008] ss:$16 sps:$4 sm:$0xff]  }
 0x1e1   : > { %4561 = vmatpush1.bf16.msra.mxu0 %v7712_v49  ;;  %4971 = vmatpush1.bf16.msra.mxu1 %v7715_v60  ;;  %v7804_v49 = vld [vmem:[%s8246_s29 + $0x1024] ss:$16 sps:$4 sm:$0xff]   ;;  %v7807_v60 = vld [vmem:[%s8246_s29 + $0x102c] ss:$16 sps:$4 sm:$0xff]  }
 0x1e2   : > { %4562 = vmatprep.subr.bf16.mxu0 %v7720_v61  ;;  %4972 = vmatprep.subr.bf16.mxu1 %v7723_v62  ;;  %v8870_v61 = vrot.slane %v1032_v39, %v8304_v50  ;;  %v7805_v62 = vld [vmem:[%s8246_s29 + $0x1028] ss:$16 sps:$4 sm:$0xff]   ;;  %v7888_v39 = vld [vmem:[%s8246_s29 + $0x11e4] ss:$16 sps:$4 sm:$0xff]  }
 0x1e5   : > { %4563 = vmatpush1.bf16.msra.mxu0 %v7718_v63  ;;  %4973 = vmatpush1.bf16.msra.mxu1 %v7721_v0  ;;  %v7810_v63 = vld [vmem:[%s8246_s29 + $0x1044] ss:$16 sps:$4 sm:$0xff]   ;;  %v7813_v0 = vld [vmem:[%s8246_s29 + $0x104c] ss:$16 sps:$4 sm:$0xff]  }
 0x1e6   : > { %4564 = vmatprep.subr.bf16.mxu0 %v7726_v1  ;;  %4974 = vmatprep.subr.bf16.mxu1 %v7729_v2  ;;  %v7808_v1 = vld [vmem:[%s8246_s29 + $0x1040] ss:$16 sps:$4 sm:$0xff]   ;;  %v7811_v2 = vld [vmem:[%s8246_s29 + $0x1048] ss:$16 sps:$4 sm:$0xff]  }
 0x1e9   : > { %4565 = vmatpush1.bf16.msra.mxu0 %v7724_v3  ;;  %4975 = vmatpush1.bf16.msra.mxu1 %v7727_v4  ;;  %v7816_v3 = vld [vmem:[%s8246_s29 + $0x1064] ss:$16 sps:$4 sm:$0xff]   ;;  %v7819_v4 = vld [vmem:[%s8246_s29 + $0x106c] ss:$16 sps:$4 sm:$0xff]  }
 0x1ea   : > { %4566 = vmatprep.subr.bf16.mxu0 %v7732_v5  ;;  %4976 = vmatprep.subr.bf16.mxu1 %v7735_v6  ;;  %v7814_v5 = vld [vmem:[%s8246_s29 + $0x1060] ss:$16 sps:$4 sm:$0xff]   ;;  %v7817_v6 = vld [vmem:[%s8246_s29 + $0x1068] ss:$16 sps:$4 sm:$0xff]  }
 0x1ed   : > { %4567 = vmatpush1.bf16.msra.mxu0 %v7730_v7  ;;  %4977 = vmatpush1.bf16.msra.mxu1 %v7733_v8  ;;  %v7822_v7 = vld [vmem:[%s8246_s29 + $0x1084] ss:$16 sps:$4 sm:$0xff]   ;;  %v7825_v8 = vld [vmem:[%s8246_s29 + $0x108c] ss:$16 sps:$4 sm:$0xff]  }
 0x1ee   : > { %4568 = vmatprep.subr.bf16.mxu0 %v7738_v9  ;;  %4978 = vmatprep.subr.bf16.mxu1 %v7741_v10  ;;  %v7820_v9 = vld [vmem:[%s8246_s29 + $0x1080] ss:$16 sps:$4 sm:$0xff]   ;;  %v7823_v10 = vld [vmem:[%s8246_s29 + $0x1088] ss:$16 sps:$4 sm:$0xff]  }
 0x1f1   : > { %4569 = vmatpush1.bf16.msra.mxu0 %v7736_v11  ;;  %4979 = vmatpush1.bf16.msra.mxu1 %v7739_v12  ;;  %v7828_v11 = vld [vmem:[%s8246_s29 + $0x10a4] ss:$16 sps:$4 sm:$0xff]   ;;  %v7831_v12 = vld [vmem:[%s8246_s29 + $0x10ac] ss:$16 sps:$4 sm:$0xff]  }
 0x1f2   : > { %4570 = vmatprep.subr.bf16.mxu0 %v7744_v13  ;;  %4980 = vmatprep.subr.bf16.mxu1 %v7747_v15  ;;  %v7826_v13 = vld [vmem:[%s8246_s29 + $0x10a0] ss:$16 sps:$4 sm:$0xff]   ;;  %v7829_v15 = vld [vmem:[%s8246_s29 + $0x10a8] ss:$16 sps:$4 sm:$0xff]  }
 0x1f5   : > { %4571 = vmatpush1.bf16.msra.mxu0 %v7742_v17  ;;  %4981 = vmatpush1.bf16.msra.mxu1 %v7745_v53  ;;  %v7834_v17 = vld [vmem:[%s8246_s29 + $0x10c4] ss:$16 sps:$4 sm:$0xff]   ;;  %v7837_v53 = vld [vmem:[%s8246_s29 + $0x10cc] ss:$16 sps:$4 sm:$0xff]  }
 0x1f6   : > { %4572 = vmatprep.subr.bf16.mxu0 %v7750_v18  ;;  %4982 = vmatprep.subr.bf16.mxu1 %v7753_v19  ;;  %v7832_v18 = vld [vmem:[%s8246_s29 + $0x10c0] ss:$16 sps:$4 sm:$0xff]   ;;  %v7835_v19 = vld [vmem:[%s8246_s29 + $0x10c8] ss:$16 sps:$4 sm:$0xff]  }
 0x1f9   : > { %4573 = vmatpush1.bf16.msra.mxu0 %v7748_v20  ;;  %4983 = vmatpush1.bf16.msra.mxu1 %v7751_v21  ;;  %v7840_v20 = vld [vmem:[%s8246_s29 + $0x10e4] ss:$16 sps:$4 sm:$0xff]   ;;  %v7843_v21 = vld [vmem:[%s8246_s29 + $0x10ec] ss:$16 sps:$4 sm:$0xff]  }
 0x1fa   : > { %4574 = vmatprep.subr.bf16.mxu0 %v7756_v23  ;;  %4984 = vmatprep.subr.bf16.mxu1 %v7759_v24  ;;  %v7838_v23 = vld [vmem:[%s8246_s29 + $0x10e0] ss:$16 sps:$4 sm:$0xff]   ;;  %v7841_v24 = vld [vmem:[%s8246_s29 + $0x10e8] ss:$16 sps:$4 sm:$0xff]  }
 0x1fd   : > { %4575 = vmatpush1.bf16.msra.mxu0 %v7754_v25  ;;  %4985 = vmatpush1.bf16.msra.mxu1 %v7757_v27  ;;  %v7846_v25 = vld [vmem:[%s8246_s29 + $0x1104] ss:$16 sps:$4 sm:$0xff]   ;;  %v7849_v27 = vld [vmem:[%s8246_s29 + $0x110c] ss:$16 sps:$4 sm:$0xff]  }
 0x1fe   : > { %4576 = vmatprep.subr.bf16.mxu0 %v7762_v28  ;;  %4986 = vmatprep.subr.bf16.mxu1 %v7765_v29  ;;  %v7844_v28 = vld [vmem:[%s8246_s29 + $0x1100] ss:$16 sps:$4 sm:$0xff]   ;;  %v7847_v29 = vld [vmem:[%s8246_s29 + $0x1108] ss:$16 sps:$4 sm:$0xff]  }
 0x201   : > { %4577 = vmatpush1.bf16.msra.mxu0 %v7760_v30  ;;  %4987 = vmatpush1.bf16.msra.mxu1 %v7763_v31  ;;  %v7852_v30 = vld [vmem:[%s8246_s29 + $0x1124] ss:$16 sps:$4 sm:$0xff]   ;;  %v7855_v31 = vld [vmem:[%s8246_s29 + $0x112c] ss:$16 sps:$4 sm:$0xff]  }
 0x202   : > { %4578 = vmatprep.subr.bf16.mxu0 %v7768_v16  ;;  %4988 = vmatprep.subr.bf16.mxu1 %v7771_v32  ;;  %v7850_v16 = vld [vmem:[%s8246_s29 + $0x1120] ss:$16 sps:$4 sm:$0xff]   ;;  %v7853_v32 = vld [vmem:[%s8246_s29 + $0x1128] ss:$16 sps:$4 sm:$0xff]  }
 0x205   : > { %4579 = vmatpush1.bf16.msra.mxu0 %v7766_v33  ;;  %4989 = vmatpush1.bf16.msra.mxu1 %v7769_v34  ;;  %v7858_v33 = vld [vmem:[%s8246_s29 + $0x1144] ss:$16 sps:$4 sm:$0xff]   ;;  %v7861_v34 = vld [vmem:[%s8246_s29 + $0x114c] ss:$16 sps:$4 sm:$0xff]  }
 0x206   : > { %4580 = vmatprep.subr.bf16.mxu0 %v7774_v26  ;;  %4990 = vmatprep.subr.bf16.mxu1 %v7777_v35  ;;  %v7856_v26 = vld [vmem:[%s8246_s29 + $0x1140] ss:$16 sps:$4 sm:$0xff]   ;;  %v7859_v35 = vld [vmem:[%s8246_s29 + $0x1148] ss:$16 sps:$4 sm:$0xff]  }
 0x209   : > { %4581 = vmatpush1.bf16.msra.mxu0 %v7772_v37  ;;  %4991 = vmatpush1.bf16.msra.mxu1 %v7775_v38  ;;  %v7864_v37 = vld [vmem:[%s8246_s29 + $0x1164] ss:$16 sps:$4 sm:$0xff]   ;;  %v7867_v38 = vld [vmem:[%s8246_s29 + $0x116c] ss:$16 sps:$4 sm:$0xff]  }
 0x20a   : > { %4582 = vmatprep.subr.bf16.mxu0 %v7780_v40  ;;  %4992 = vmatprep.subr.bf16.mxu1 %v7783_v41  ;;  %v7862_v40 = vld [vmem:[%s8246_s29 + $0x1160] ss:$16 sps:$4 sm:$0xff]   ;;  %v7865_v41 = vld [vmem:[%s8246_s29 + $0x1168] ss:$16 sps:$4 sm:$0xff]  }
 0x20d   : > { %4583 = vmatpush1.bf16.msra.mxu0 %v7778_v22  ;;  %4993 = vmatpush1.bf16.msra.mxu1 %v7781_v42  ;;  %v7870_v22 = vld [vmem:[%s8246_s29 + $0x1184] ss:$16 sps:$4 sm:$0xff]   ;;  %v7873_v42 = vld [vmem:[%s8246_s29 + $0x118c] ss:$16 sps:$4 sm:$0xff]  }
 0x20e   : > { %4584 = vmatprep.subr.bf16.mxu0 %v7786_v44  ;;  %4994 = vmatprep.subr.bf16.mxu1 %v7789_v45  ;;  %v7868_v44 = vld [vmem:[%s8246_s29 + $0x1180] ss:$16 sps:$4 sm:$0xff]   ;;  %v7871_v45 = vld [vmem:[%s8246_s29 + $0x1188] ss:$16 sps:$4 sm:$0xff]  }
 0x211   : > { %4585 = vmatpush1.bf16.msra.mxu0 %v7784_v36  ;;  %4995 = vmatpush1.bf16.msra.mxu1 %v7787_v46  ;;  %v7876_v36 = vld [vmem:[%s8246_s29 + $0x11a4] ss:$16 sps:$4 sm:$0xff]   ;;  %v7879_v46 = vld [vmem:[%s8246_s29 + $0x11ac] ss:$16 sps:$4 sm:$0xff]  }
 0x212   : > { %4586 = vmatprep.subr.bf16.mxu0 %v7792_v47  ;;  %4996 = vmatprep.subr.bf16.mxu1 %v7795_v48  ;;  %v7874_v47 = vld [vmem:[%s8246_s29 + $0x11a0] ss:$16 sps:$4 sm:$0xff]   ;;  %v7877_v48 = vld [vmem:[%s8246_s29 + $0x11a8] ss:$16 sps:$4 sm:$0xff]  }
 0x215   : > { %4587 = vmatpush1.bf16.msra.mxu0 %v7790_v52  ;;  %4997 = vmatpush1.bf16.msra.mxu1 %v7793_v54  ;;  %v7882_v52 = vld [vmem:[%s8246_s29 + $0x11c4] ss:$16 sps:$4 sm:$0xff]   ;;  %v7885_v54 = vld [vmem:[%s8246_s29 + $0x11cc] ss:$16 sps:$4 sm:$0xff]  }
 0x216   : > { %4597 = vmatprep.subr.bf16.mxu0 %v7798_v55  ;;  %5007 = vmatprep.subr.bf16.mxu1 %v7801_v56  ;;  %v7880_v55 = vld [vmem:[%s8246_s29 + $0x11c0] ss:$16 sps:$4 sm:$0xff]   ;;  %v7883_v56 = vld [vmem:[%s8246_s29 + $0x11c8] ss:$16 sps:$4 sm:$0xff]  }
 0x218   : > { %4589 = vmatmul.mubr.bf16.vlgmr.msra.gmra.mrb[0].mxu0 %v1022_v57  ;;  %4999 = vmatmul.mubr.bf16.vlgmr.msra.gmra.mrb[0].mxu1 %v1022_v57  ;;  %v7891_v57 = vld [vmem:[%s8246_s29 + $0x11ec] ss:$16 sps:$4 sm:$0xff]  }
 0x219   : > { %4598 = vmatpush1.bf16.msra.mxu0 %v7796_v58  ;;  %5008 = vmatpush1.bf16.msra.mxu1 %v7799_v59  ;;  %v7886_v58 = vld [vmem:[%s8246_s29 + $0x11e0] ss:$16 sps:$4 sm:$0xff]   ;;  %v7889_v59 = vld [vmem:[%s8246_s29 + $0x11e8] ss:$16 sps:$4 sm:$0xff]  }
 0x21a   : > { %4599 = vmatprep.subr.bf16.mxu0 %v7804_v49  ;;  %5009 = vmatprep.subr.bf16.mxu1 %v7807_v60  ;;  %v7894_v49 = vld [vmem:[%s8246_s29 + $0x1204] ss:$16 sps:$4 sm:$0xff]   ;;  %v7897_v60 = vld [vmem:[%s8246_s29 + $0x120c] ss:$16 sps:$4 sm:$0xff]  }
 0x21b   : > { %4629 = vmatprep.mubr.bf16.mxu0 %v8870_v61  ;;  %5039 = vmatprep.mubr.bf16.mxu1 %v8870_v61 }
 0x21d   : > { %4600 = vmatpush1.bf16.msra.mxu0 %v7802_v14  ;;  %5010 = vmatpush1.bf16.msra.mxu1 %v7805_v62  ;;  %v8936_v14 = vrot.slane %v8855_v51, %v8304_v50  ;;  %v7892_v62 = vld [vmem:[%s8246_s29 + $0x1200] ss:$16 sps:$4 sm:$0xff]   ;;  %v7901_v51 = vld [vmem:[%s8246_s29 + $0x1228] ss:$16 sps:$4 sm:$0xff]  }
 0x21e   : > { %4601 = vmatprep.subr.bf16.mxu0 %v7810_v63  ;;  %5011 = vmatprep.subr.bf16.mxu1 %v7813_v0  ;;  %v7895_v63 = vld [vmem:[%s8246_s29 + $0x1208] ss:$16 sps:$4 sm:$0xff]   ;;  %v7900_v0 = vld [vmem:[%s8246_s29 + $0x1224] ss:$16 sps:$4 sm:$0xff]   ;;  %v7898_v50 = vld [vmem:[%s8246_s29 + $0x1220] ss:$16 sps:$4 sm:$0xff]  }
 0x221   : > { %4602 = vmatpush1.bf16.msra.mxu0 %v7808_v1  ;;  %5012 = vmatpush1.bf16.msra.mxu1 %v7811_v2  ;;  %v7903_v1 = vld [vmem:[%s8246_s29 + $0x122c] ss:$16 sps:$4 sm:$0xff]   ;;  %v1048_v2 = vcombine.high %v8870_v61, %v8870_v61  ;;  %v7904_v61 = vld [vmem:[%s8246_s29 + $0x1240] ss:$16 sps:$4 sm:$0xff]  }
 0x222   : > { %4603 = vmatprep.subr.bf16.mxu0 %v7816_v3  ;;  %5013 = vmatprep.subr.bf16.mxu1 %v7819_v4  ;;  %v7906_v3 = vld [vmem:[%s8246_s29 + $0x1244] ss:$16 sps:$4 sm:$0xff]   ;;  %v7909_v4 = vld [vmem:[%s8246_s29 + $0x124c] ss:$16 sps:$4 sm:$0xff]  }
 0x225   : > { %4604 = vmatpush1.bf16.msra.mxu0 %v7814_v5  ;;  %5014 = vmatpush1.bf16.msra.mxu1 %v7817_v6  ;;  %v7907_v5 = vld [vmem:[%s8246_s29 + $0x1248] ss:$16 sps:$4 sm:$0xff]   ;;  %v7912_v6 = vld [vmem:[%s8246_s29 + $0x1264] ss:$16 sps:$4 sm:$0xff]  }
 0x226   : > { %4605 = vmatprep.subr.bf16.mxu0 %v7822_v7  ;;  %5015 = vmatprep.subr.bf16.mxu1 %v7825_v8  ;;  %v7915_v7 = vld [vmem:[%s8246_s29 + $0x126c] ss:$16 sps:$4 sm:$0xff]   ;;  %v7910_v8 = vld [vmem:[%s8246_s29 + $0x1260] ss:$16 sps:$4 sm:$0xff]  }
 0x229   : > { %4606 = vmatpush1.bf16.msra.mxu0 %v7820_v9  ;;  %5016 = vmatpush1.bf16.msra.mxu1 %v7823_v10  ;;  %v7913_v9 = vld [vmem:[%s8246_s29 + $0x1268] ss:$16 sps:$4 sm:$0xff]   ;;  %v7918_v10 = vld [vmem:[%s8246_s29 + $0x1284] ss:$16 sps:$4 sm:$0xff]  }
 0x22a   : > { %4607 = vmatprep.subr.bf16.mxu0 %v7828_v11  ;;  %5017 = vmatprep.subr.bf16.mxu1 %v7831_v12  ;;  %v7921_v11 = vld [vmem:[%s8246_s29 + $0x128c] ss:$16 sps:$4 sm:$0xff]   ;;  %v7916_v12 = vld [vmem:[%s8246_s29 + $0x1280] ss:$16 sps:$4 sm:$0xff]  }
 0x22d   : > { %4608 = vmatpush1.bf16.msra.mxu0 %v7826_v13  ;;  %5018 = vmatpush1.bf16.msra.mxu1 %v7829_v15  ;;  %v7919_v13 = vld [vmem:[%s8246_s29 + $0x1288] ss:$16 sps:$4 sm:$0xff]   ;;  %v7924_v15 = vld [vmem:[%s8246_s29 + $0x12a4] ss:$16 sps:$4 sm:$0xff]  }
 0x22e   : > { %4609 = vmatprep.subr.bf16.mxu0 %v7834_v17  ;;  %5019 = vmatprep.subr.bf16.mxu1 %v7837_v53  ;;  %v7927_v17 = vld [vmem:[%s8246_s29 + $0x12ac] ss:$16 sps:$4 sm:$0xff]   ;;  %v7922_v53 = vld [vmem:[%s8246_s29 + $0x12a0] ss:$16 sps:$4 sm:$0xff]  }
 0x231   : > { %4610 = vmatpush1.bf16.msra.mxu0 %v7832_v18  ;;  %5020 = vmatpush1.bf16.msra.mxu1 %v7835_v19  ;;  %v7925_v18 = vld [vmem:[%s8246_s29 + $0x12a8] ss:$16 sps:$4 sm:$0xff]   ;;  %v7930_v19 = vld [vmem:[%s8246_s29 + $0x12c4] ss:$16 sps:$4 sm:$0xff]  }
 0x232   : > { %4611 = vmatprep.subr.bf16.mxu0 %v7840_v20  ;;  %5021 = vmatprep.subr.bf16.mxu1 %v7843_v21  ;;  %v7933_v20 = vld [vmem:[%s8246_s29 + $0x12cc] ss:$16 sps:$4 sm:$0xff]   ;;  %v7928_v21 = vld [vmem:[%s8246_s29 + $0x12c0] ss:$16 sps:$4 sm:$0xff]  }
 0x235   : > { %4612 = vmatpush1.bf16.msra.mxu0 %v7838_v23  ;;  %5022 = vmatpush1.bf16.msra.mxu1 %v7841_v24  ;;  %v7931_v23 = vld [vmem:[%s8246_s29 + $0x12c8] ss:$16 sps:$4 sm:$0xff]   ;;  %v7936_v24 = vld [vmem:[%s8246_s29 + $0x12e4] ss:$16 sps:$4 sm:$0xff]  }
 0x236   : > { %4613 = vmatprep.subr.bf16.mxu0 %v7846_v25  ;;  %5023 = vmatprep.subr.bf16.mxu1 %v7849_v27  ;;  %v7939_v25 = vld [vmem:[%s8246_s29 + $0x12ec] ss:$16 sps:$4 sm:$0xff]   ;;  %v7934_v27 = vld [vmem:[%s8246_s29 + $0x12e0] ss:$16 sps:$4 sm:$0xff]  }
 0x239   : > { %4614 = vmatpush1.bf16.msra.mxu0 %v7844_v28  ;;  %5024 = vmatpush1.bf16.msra.mxu1 %v7847_v29  ;;  %v7937_v28 = vld [vmem:[%s8246_s29 + $0x12e8] ss:$16 sps:$4 sm:$0xff]   ;;  %v7942_v29 = vld [vmem:[%s8246_s29 + $0x1304] ss:$16 sps:$4 sm:$0xff]  }
 0x23a   : > { %4615 = vmatprep.subr.bf16.mxu0 %v7852_v30  ;;  %5025 = vmatprep.subr.bf16.mxu1 %v7855_v31  ;;  %v7945_v30 = vld [vmem:[%s8246_s29 + $0x130c] ss:$16 sps:$4 sm:$0xff]   ;;  %v7940_v31 = vld [vmem:[%s8246_s29 + $0x1300] ss:$16 sps:$4 sm:$0xff]  }
 0x23d   : > { %4616 = vmatpush1.bf16.msra.mxu0 %v7850_v16  ;;  %5026 = vmatpush1.bf16.msra.mxu1 %v7853_v32  ;;  %v7943_v16 = vld [vmem:[%s8246_s29 + $0x1308] ss:$16 sps:$4 sm:$0xff]   ;;  %v7948_v32 = vld [vmem:[%s8246_s29 + $0x1324] ss:$16 sps:$4 sm:$0xff]  }
 0x23e   : > { %4617 = vmatprep.subr.bf16.mxu0 %v7858_v33  ;;  %5027 = vmatprep.subr.bf16.mxu1 %v7861_v34  ;;  %v7951_v33 = vld [vmem:[%s8246_s29 + $0x132c] ss:$16 sps:$4 sm:$0xff]   ;;  %v7946_v34 = vld [vmem:[%s8246_s29 + $0x1320] ss:$16 sps:$4 sm:$0xff]  }
 0x241   : > { %4618 = vmatpush1.bf16.msra.mxu0 %v7856_v26  ;;  %5028 = vmatpush1.bf16.msra.mxu1 %v7859_v35  ;;  %v7949_v26 = vld [vmem:[%s8246_s29 + $0x1328] ss:$16 sps:$4 sm:$0xff]   ;;  %v7954_v35 = vld [vmem:[%s8246_s29 + $0x1344] ss:$16 sps:$4 sm:$0xff]  }
 0x242   : > { %4619 = vmatprep.subr.bf16.mxu0 %v7864_v37  ;;  %5029 = vmatprep.subr.bf16.mxu1 %v7867_v38  ;;  %v7957_v37 = vld [vmem:[%s8246_s29 + $0x134c] ss:$16 sps:$4 sm:$0xff]   ;;  %v7952_v38 = vld [vmem:[%s8246_s29 + $0x1340] ss:$16 sps:$4 sm:$0xff]  }
 0x245   : > { %4620 = vmatpush1.bf16.msra.mxu0 %v7862_v40  ;;  %5030 = vmatpush1.bf16.msra.mxu1 %v7865_v41  ;;  %v7955_v40 = vld [vmem:[%s8246_s29 + $0x1348] ss:$16 sps:$4 sm:$0xff]   ;;  %v7960_v41 = vld [vmem:[%s8246_s29 + $0x1364] ss:$16 sps:$4 sm:$0xff]  }
 0x246   : > { %4621 = vmatprep.subr.bf16.mxu0 %v7870_v22  ;;  %5031 = vmatprep.subr.bf16.mxu1 %v7873_v42  ;;  %v7963_v22 = vld [vmem:[%s8246_s29 + $0x136c] ss:$16 sps:$4 sm:$0xff]   ;;  %v7958_v42 = vld [vmem:[%s8246_s29 + $0x1360] ss:$16 sps:$4 sm:$0xff]  }
 0x249   : > { %4622 = vmatpush1.bf16.msra.mxu0 %v7868_v44  ;;  %5032 = vmatpush1.bf16.msra.mxu1 %v7871_v45  ;;  %v7961_v44 = vld [vmem:[%s8246_s29 + $0x1368] ss:$16 sps:$4 sm:$0xff]   ;;  %v7966_v45 = vld [vmem:[%s8246_s29 + $0x1384] ss:$16 sps:$4 sm:$0xff]  }
 0x24a   : > { %4623 = vmatprep.subr.bf16.mxu0 %v7876_v36  ;;  %5033 = vmatprep.subr.bf16.mxu1 %v7879_v46  ;;  %v7969_v36 = vld [vmem:[%s8246_s29 + $0x138c] ss:$16 sps:$4 sm:$0xff]   ;;  %v7964_v46 = vld [vmem:[%s8246_s29 + $0x1380] ss:$16 sps:$4 sm:$0xff]  }
 0x24d   : > { %4624 = vmatpush1.bf16.msra.mxu0 %v7874_v47  ;;  %5034 = vmatpush1.bf16.msra.mxu1 %v7877_v48  ;;  %v7967_v47 = vld [vmem:[%s8246_s29 + $0x1388] ss:$16 sps:$4 sm:$0xff]   ;;  %v7972_v48 = vld [vmem:[%s8246_s29 + $0x13a4] ss:$16 sps:$4 sm:$0xff]  }
 0x24e   : > { %4625 = vmatprep.subr.bf16.mxu0 %v7882_v52  ;;  %5035 = vmatprep.subr.bf16.mxu1 %v7885_v54  ;;  %v7975_v52 = vld [vmem:[%s8246_s29 + $0x13ac] ss:$16 sps:$4 sm:$0xff]   ;;  %v7970_v54 = vld [vmem:[%s8246_s29 + $0x13a0] ss:$16 sps:$4 sm:$0xff]  }
 0x251   : > { %4626 = vmatpush1.bf16.msra.mxu0 %v7880_v55  ;;  %5036 = vmatpush1.bf16.msra.mxu1 %v7883_v56  ;;  %v7973_v55 = vld [vmem:[%s8246_s29 + $0x13a8] ss:$16 sps:$4 sm:$0xff]   ;;  %v7978_v56 = vld [vmem:[%s8246_s29 + $0x13c4] ss:$16 sps:$4 sm:$0xff]  }
 0x252   : > { %4627 = vmatprep.subr.bf16.mxu0 %v7888_v39  ;;  %5037 = vmatprep.subr.bf16.mxu1 %v7891_v57  ;;  %v7981_v39 = vld [vmem:[%s8246_s29 + $0x13cc] ss:$16 sps:$4 sm:$0xff]   ;;  %v7976_v57 = vld [vmem:[%s8246_s29 + $0x13c0] ss:$16 sps:$4 sm:$0xff]  }
 0x255   : > { %4628 = vmatpush1.bf16.msra.mxu0 %v7886_v58  ;;  %5038 = vmatpush1.bf16.msra.mxu1 %v7889_v59  ;;  %v7979_v58 = vld [vmem:[%s8246_s29 + $0x13c8] ss:$16 sps:$4 sm:$0xff]   ;;  %v7984_v59 = vld [vmem:[%s8246_s29 + $0x13e4] ss:$16 sps:$4 sm:$0xff]  }
 0x256   : > { %4638 = vmatprep.subr.bf16.mxu0 %v7894_v49  ;;  %5048 = vmatprep.subr.bf16.mxu1 %v7897_v60  ;;  %v7987_v49 = vld [vmem:[%s8246_s29 + $0x13ec] ss:$16 sps:$4 sm:$0xff]   ;;  %v7982_v60 = vld [vmem:[%s8246_s29 + $0x13e0] ss:$16 sps:$4 sm:$0xff]  }
 0x258   : > { %4630 = vmatmul.mubr.bf16.vlgmr.msra.gmra.mrb[0].mxu0 %v8936_v14  ;;  %5040 = vmatmul.mubr.bf16.vlgmr.msra.gmra.mrb[0].mxu1 %v8936_v14 }
 0x259   : > { %4639 = vmatpush1.bf16.msra.mxu0 %v7892_v62  ;;  %5049 = vmatpush1.bf16.msra.mxu1 %v7895_v63  ;;  %v7985_v62 = vld [vmem:[%s8246_s29 + $0x13e8] ss:$16 sps:$4 sm:$0xff]   ;;  %v7990_v63 = vld [vmem:[%s8251_s8 + $0x4] ss:$16 sps:$4 sm:$0xff]  }
 0x25a   : > { %4640 = vmatprep.subr.bf16.mxu0 %v7900_v0  ;;  %5050 = vmatprep.subr.bf16.mxu1 %v7903_v1  ;;  %v7993_v0 = vld [vmem:[%s8251_s8 + $0xc] ss:$16 sps:$4 sm:$0xff]   ;;  %v1047_v1 = vcombine.high %v8936_v14, %v8936_v14  ;;  %v7997_v14 = vld [vmem:[%s8251_s8 + $0x28] ss:$16 sps:$4 sm:$0xff]  }
 0x25b   : > { %4670 = vmatprep.mubr.bf16.mxu0 %v1048_v2  ;;  %5080 = vmatprep.mubr.bf16.mxu1 %v1048_v2  ;;  %v7988_v2 = vld [vmem:[%s8251_s8] ss:$16 sps:$4 sm:$0xff]  }
 0x25d   : > { %4641 = vmatpush1.bf16.msra.mxu0 %v7898_v50  ;;  %5051 = vmatpush1.bf16.msra.mxu1 %v7901_v51  ;;  %v7991_v50 = vld [vmem:[%s8251_s8 + $0x8] ss:$16 sps:$4 sm:$0xff]   ;;  %v7996_v51 = vld [vmem:[%s8251_s8 + $0x24] ss:$16 sps:$4 sm:$0xff]  }
 0x25e   : > { %4642 = vmatprep.subr.bf16.mxu0 %v7906_v3  ;;  %5052 = vmatprep.subr.bf16.mxu1 %v7909_v4  ;;  %v7999_v3 = vld [vmem:[%s8251_s8 + $0x2c] ss:$16 sps:$4 sm:$0xff]   ;;  %v7994_v4 = vld [vmem:[%s8251_s8 + $0x20] ss:$16 sps:$4 sm:$0xff]  }
 0x261   : > { %4643 = vmatpush1.bf16.msra.mxu0 %v7904_v61  ;;  %5053 = vmatpush1.bf16.msra.mxu1 %v7907_v5  ;;  %v8002_v61 = vld [vmem:[%s8251_s8 + $0x44] ss:$16 sps:$4 sm:$0xff]   ;;  %v8005_v5 = vld [vmem:[%s8251_s8 + $0x4c] ss:$16 sps:$4 sm:$0xff]  }
 0x262   : > { %4644 = vmatprep.subr.bf16.mxu0 %v7912_v6  ;;  %5054 = vmatprep.subr.bf16.mxu1 %v7915_v7  ;;  %v8000_v6 = vld [vmem:[%s8251_s8 + $0x40] ss:$16 sps:$4 sm:$0xff]   ;;  %v8003_v7 = vld [vmem:[%s8251_s8 + $0x48] ss:$16 sps:$4 sm:$0xff]  }
 0x265   : > { %4645 = vmatpush1.bf16.msra.mxu0 %v7910_v8  ;;  %5055 = vmatpush1.bf16.msra.mxu1 %v7913_v9  ;;  %v8008_v8 = vld [vmem:[%s8251_s8 + $0x64] ss:$16 sps:$4 sm:$0xff]   ;;  %v8011_v9 = vld [vmem:[%s8251_s8 + $0x6c] ss:$16 sps:$4 sm:$0xff]  }
 0x266   : > { %4646 = vmatprep.subr.bf16.mxu0 %v7918_v10  ;;  %5056 = vmatprep.subr.bf16.mxu1 %v7921_v11  ;;  %v8006_v10 = vld [vmem:[%s8251_s8 + $0x60] ss:$16 sps:$4 sm:$0xff]   ;;  %v8009_v11 = vld [vmem:[%s8251_s8 + $0x68] ss:$16 sps:$4 sm:$0xff]  }
 0x269   : > { %4647 = vmatpush1.bf16.msra.mxu0 %v7916_v12  ;;  %5057 = vmatpush1.bf16.msra.mxu1 %v7919_v13  ;;  %v8014_v12 = vld [vmem:[%s8251_s8 + $0x84] ss:$16 sps:$4 sm:$0xff]   ;;  %v8017_v13 = vld [vmem:[%s8251_s8 + $0x8c] ss:$16 sps:$4 sm:$0xff]  }
 0x26a   : > { %4648 = vmatprep.subr.bf16.mxu0 %v7924_v15  ;;  %5058 = vmatprep.subr.bf16.mxu1 %v7927_v17  ;;  %v8012_v15 = vld [vmem:[%s8251_s8 + $0x80] ss:$16 sps:$4 sm:$0xff]   ;;  %v8015_v17 = vld [vmem:[%s8251_s8 + $0x88] ss:$16 sps:$4 sm:$0xff]  }
 0x26d   : > { %4649 = vmatpush1.bf16.msra.mxu0 %v7922_v53  ;;  %5059 = vmatpush1.bf16.msra.mxu1 %v7925_v18  ;;  %v8020_v53 = vld [vmem:[%s8251_s8 + $0xa4] ss:$16 sps:$4 sm:$0xff]   ;;  %v8023_v18 = vld [vmem:[%s8251_s8 + $0xac] ss:$16 sps:$4 sm:$0xff]  }
 0x26e   : > { %4650 = vmatprep.subr.bf16.mxu0 %v7930_v19  ;;  %5060 = vmatprep.subr.bf16.mxu1 %v7933_v20  ;;  %v8018_v19 = vld [vmem:[%s8251_s8 + $0xa0] ss:$16 sps:$4 sm:$0xff]   ;;  %v8021_v20 = vld [vmem:[%s8251_s8 + $0xa8] ss:$16 sps:$4 sm:$0xff]  }
 0x271   : > { %4651 = vmatpush1.bf16.msra.mxu0 %v7928_v21  ;;  %5061 = vmatpush1.bf16.msra.mxu1 %v7931_v23  ;;  %v8026_v21 = vld [vmem:[%s8251_s8 + $0xc4] ss:$16 sps:$4 sm:$0xff]   ;;  %v8029_v23 = vld [vmem:[%s8251_s8 + $0xcc] ss:$16 sps:$4 sm:$0xff]  }
 0x272   : > { %4652 = vmatprep.subr.bf16.mxu0 %v7936_v24  ;;  %5062 = vmatprep.subr.bf16.mxu1 %v7939_v25  ;;  %v8024_v24 = vld [vmem:[%s8251_s8 + $0xc0] ss:$16 sps:$4 sm:$0xff]   ;;  %v8027_v25 = vld [vmem:[%s8251_s8 + $0xc8] ss:$16 sps:$4 sm:$0xff]  }
 0x275   : > { %4653 = vmatpush1.bf16.msra.mxu0 %v7934_v27  ;;  %5063 = vmatpush1.bf16.msra.mxu1 %v7937_v28  ;;  %v8032_v27 = vld [vmem:[%s8251_s8 + $0xe4] ss:$16 sps:$4 sm:$0xff]   ;;  %v8035_v28 = vld [vmem:[%s8251_s8 + $0xec] ss:$16 sps:$4 sm:$0xff]  }
 0x276   : > { %4654 = vmatprep.subr.bf16.mxu0 %v7942_v29  ;;  %5064 = vmatprep.subr.bf16.mxu1 %v7945_v30  ;;  %v8030_v29 = vld [vmem:[%s8251_s8 + $0xe0] ss:$16 sps:$4 sm:$0xff]   ;;  %v8033_v30 = vld [vmem:[%s8251_s8 + $0xe8] ss:$16 sps:$4 sm:$0xff]  }
 0x279   : > { %4655 = vmatpush1.bf16.msra.mxu0 %v7940_v31  ;;  %5065 = vmatpush1.bf16.msra.mxu1 %v7943_v16  ;;  %v8038_v31 = vld [vmem:[%s8251_s8 + $0x104] ss:$16 sps:$4 sm:$0xff]   ;;  %v8041_v16 = vld [vmem:[%s8251_s8 + $0x10c] ss:$16 sps:$4 sm:$0xff]  }
 0x27a   : > { %4656 = vmatprep.subr.bf16.mxu0 %v7948_v32  ;;  %5066 = vmatprep.subr.bf16.mxu1 %v7951_v33  ;;  %v8036_v32 = vld [vmem:[%s8251_s8 + $0x100] ss:$16 sps:$4 sm:$0xff]   ;;  %v8039_v33 = vld [vmem:[%s8251_s8 + $0x108] ss:$16 sps:$4 sm:$0xff]  }
 0x27d   : > { %4657 = vmatpush1.bf16.msra.mxu0 %v7946_v34  ;;  %5067 = vmatpush1.bf16.msra.mxu1 %v7949_v26  ;;  %v8044_v34 = vld [vmem:[%s8251_s8 + $0x124] ss:$16 sps:$4 sm:$0xff]   ;;  %v8047_v26 = vld [vmem:[%s8251_s8 + $0x12c] ss:$16 sps:$4 sm:$0xff]  }
 0x27e   : > { %4658 = vmatprep.subr.bf16.mxu0 %v7954_v35  ;;  %5068 = vmatprep.subr.bf16.mxu1 %v7957_v37  ;;  %v8042_v35 = vld [vmem:[%s8251_s8 + $0x120] ss:$16 sps:$4 sm:$0xff]   ;;  %v8045_v37 = vld [vmem:[%s8251_s8 + $0x128] ss:$16 sps:$4 sm:$0xff]  }
 0x281   : > { %4659 = vmatpush1.bf16.msra.mxu0 %v7952_v38  ;;  %5069 = vmatpush1.bf16.msra.mxu1 %v7955_v40  ;;  %v8050_v38 = vld [vmem:[%s8251_s8 + $0x144] ss:$16 sps:$4 sm:$0xff]   ;;  %v8053_v40 = vld [vmem:[%s8251_s8 + $0x14c] ss:$16 sps:$4 sm:$0xff]  }
 0x282   : > { %4660 = vmatprep.subr.bf16.mxu0 %v7960_v41  ;;  %5070 = vmatprep.subr.bf16.mxu1 %v7963_v22  ;;  %v8048_v41 = vld [vmem:[%s8251_s8 + $0x140] ss:$16 sps:$4 sm:$0xff]   ;;  %v8051_v22 = vld [vmem:[%s8251_s8 + $0x148] ss:$16 sps:$4 sm:$0xff]  }
 0x285   : > { %4661 = vmatpush1.bf16.msra.mxu0 %v7958_v42  ;;  %5071 = vmatpush1.bf16.msra.mxu1 %v7961_v44  ;;  %v8056_v42 = vld [vmem:[%s8251_s8 + $0x164] ss:$16 sps:$4 sm:$0xff]   ;;  %v8059_v44 = vld [vmem:[%s8251_s8 + $0x16c] ss:$16 sps:$4 sm:$0xff]  }
 0x286   : > { %4662 = vmatprep.subr.bf16.mxu0 %v7966_v45  ;;  %5072 = vmatprep.subr.bf16.mxu1 %v7969_v36  ;;  %v8054_v45 = vld [vmem:[%s8251_s8 + $0x160] ss:$16 sps:$4 sm:$0xff]   ;;  %v8057_v36 = vld [vmem:[%s8251_s8 + $0x168] ss:$16 sps:$4 sm:$0xff]  }
 0x289   : > { %4663 = vmatpush1.bf16.msra.mxu0 %v7964_v46  ;;  %5073 = vmatpush1.bf16.msra.mxu1 %v7967_v47  ;;  %v8062_v46 = vld [vmem:[%s8251_s8 + $0x184] ss:$16 sps:$4 sm:$0xff]   ;;  %v8065_v47 = vld [vmem:[%s8251_s8 + $0x18c] ss:$16 sps:$4 sm:$0xff]  }
 0x28a   : > { %4664 = vmatprep.subr.bf16.mxu0 %v7972_v48  ;;  %5074 = vmatprep.subr.bf16.mxu1 %v7975_v52  ;;  %v8060_v48 = vld [vmem:[%s8251_s8 + $0x180] ss:$16 sps:$4 sm:$0xff]   ;;  %v8063_v52 = vld [vmem:[%s8251_s8 + $0x188] ss:$16 sps:$4 sm:$0xff]  }
 0x28d   : > { %4665 = vmatpush1.bf16.msra.mxu0 %v7970_v54  ;;  %5075 = vmatpush1.bf16.msra.mxu1 %v7973_v55  ;;  %v8068_v54 = vld [vmem:[%s8251_s8 + $0x1a4] ss:$16 sps:$4 sm:$0xff]   ;;  %v8071_v55 = vld [vmem:[%s8251_s8 + $0x1ac] ss:$16 sps:$4 sm:$0xff]  }
 0x28e   : > { %4666 = vmatprep.subr.bf16.mxu0 %v7978_v56  ;;  %5076 = vmatprep.subr.bf16.mxu1 %v7981_v39  ;;  %v8066_v56 = vld [vmem:[%s8251_s8 + $0x1a0] ss:$16 sps:$4 sm:$0xff]   ;;  %v8069_v39 = vld [vmem:[%s8251_s8 + $0x1a8] ss:$16 sps:$4 sm:$0xff]  }
 0x291   : > { %4667 = vmatpush1.bf16.msra.mxu0 %v7976_v57  ;;  %5077 = vmatpush1.bf16.msra.mxu1 %v7979_v58  ;;  %v8074_v57 = vld [vmem:[%s8251_s8 + $0x1c4] ss:$16 sps:$4 sm:$0xff]   ;;  %v8077_v58 = vld [vmem:[%s8251_s8 + $0x1cc] ss:$16 sps:$4 sm:$0xff]  }
 0x292   : > { %4668 = vmatprep.subr.bf16.mxu0 %v7984_v59  ;;  %5078 = vmatprep.subr.bf16.mxu1 %v7987_v49  ;;  %v8072_v59 = vld [vmem:[%s8251_s8 + $0x1c0] ss:$16 sps:$4 sm:$0xff]   ;;  %v8075_v49 = vld [vmem:[%s8251_s8 + $0x1c8] ss:$16 sps:$4 sm:$0xff]  }
 0x295   : > { %4669 = vmatpush1.bf16.msra.mxu0 %v7982_v60  ;;  %5079 = vmatpush1.bf16.msra.mxu1 %v7985_v62  ;;  %v8080_v60 = vld [vmem:[%s8251_s8 + $0x1e4] ss:$16 sps:$4 sm:$0xff]   ;;  %v8083_v62 = vld [vmem:[%s8251_s8 + $0x1ec] ss:$16 sps:$4 sm:$0xff]  }
 0x296   : > { %5866 = vmatprep.subr.bf16.mxu0 %v7990_v63  ;;  %5948 = vmatprep.subr.bf16.mxu1 %v7993_v0  ;;  %v8078_v63 = vld [vmem:[%s8251_s8 + $0x1e0] ss:$16 sps:$4 sm:$0xff]   ;;  %v8081_v0 = vld [vmem:[%s8251_s8 + $0x1e8] ss:$16 sps:$4 sm:$0xff]  }
 0x298   : > { %4671 = vmatmul.mubr.bf16.vlgmr.msra.gmra.mrb[0].mxu0 %v1047_v1  ;;  %5081 = vmatmul.mubr.bf16.vlgmr.msra.gmra.mrb[0].mxu1 %v1047_v1  ;;  %v8086_v1 = vld [vmem:[%s8251_s8 + $0x204] ss:$16 sps:$4 sm:$0xff]  }
 0x299   : > { %5867 = vmatpush1.bf16.msra.mxu0 %v7988_v2  ;;  %5949 = vmatpush1.bf16.msra.mxu1 %v7991_v50  ;;  %v8089_v2 = vld [vmem:[%s8251_s8 + $0x20c] ss:$16 sps:$4 sm:$0xff]   ;;  %v906_v50 = vsub.s32 0, %v8296_v43 }
 0x29a   : > { %5868 = vmatprep.subr.bf16.mxu0 %v7996_v51  ;;  %5950 = vmatprep.subr.bf16.mxu1 %v7999_v3  ;;  %v9078_v51 = vld [vmem:[%s245_s26] sm:$0xf]  ;;  %v910_v3 = vsub.s32 1, %v8296_v43 }
 0x29d   : > { %5869 = vmatpush1.bf16.msra.mxu0 %v7994_v4  ;;  %5951 = vmatpush1.bf16.msra.mxu1 %v7997_v14  ;;  %v918_v4 = vsub.s32 3, %v8296_v43  ;;  %v907_v14 = vrot.slane %v9078_v51, %v906_v50 }
 0x29e   : > { %5870 = vmatprep.subr.bf16.mxu0 %v8002_v61  ;;  %5952 = vmatprep.subr.bf16.mxu1 %v8005_v5  ;;  %v911_v61 = vrot.slane %v9078_v51, %v910_v3 }
 0x29f   : > { %v919_v5 = vrot.slane %v9078_v51, %v918_v4 }
 0x2a1   : > { %5871 = vmatpush1.bf16.msra.mxu0 %v8000_v6  ;;  %5953 = vmatpush1.bf16.msra.mxu1 %v8003_v7 }
 0x2a2   : > { %5872 = vmatprep.subr.bf16.mxu0 %v8008_v8  ;;  %5954 = vmatprep.subr.bf16.mxu1 %v8011_v9 }
 0x2a5   : > { %5873 = vmatpush1.bf16.msra.mxu0 %v8006_v10  ;;  %5955 = vmatpush1.bf16.msra.mxu1 %v8009_v11 }
 0x2a6   : > { %5874 = vmatprep.subr.bf16.mxu0 %v8014_v12  ;;  %5956 = vmatprep.subr.bf16.mxu1 %v8017_v13 }
 0x2a9   : > { %5875 = vmatpush1.bf16.msra.mxu0 %v8012_v15  ;;  %5957 = vmatpush1.bf16.msra.mxu1 %v8015_v17 }
 0x2aa   : > { %5876 = vmatprep.subr.bf16.mxu0 %v8020_v53  ;;  %5958 = vmatprep.subr.bf16.mxu1 %v8023_v18 }
 0x2ad   : > { %5877 = vmatpush1.bf16.msra.mxu0 %v8018_v19  ;;  %5959 = vmatpush1.bf16.msra.mxu1 %v8021_v20 }
 0x2ae   : > { %5878 = vmatprep.subr.bf16.mxu0 %v8026_v21  ;;  %5960 = vmatprep.subr.bf16.mxu1 %v8029_v23  ;;  %v8084_v23 = vld [vmem:[%s8251_s8 + $0x200] ss:$16 sps:$4 sm:$0xff]  }
 0x2b1   : > { %5879 = vmatpush1.bf16.msra.mxu0 %v8024_v24  ;;  %5961 = vmatpush1.bf16.msra.mxu1 %v8027_v25  ;;  %v8087_v24 = vld [vmem:[%s8251_s8 + $0x208] ss:$16 sps:$4 sm:$0xff]  }
 0x2b2   : > { %5880 = vmatprep.subr.bf16.mxu0 %v8032_v27  ;;  %5962 = vmatprep.subr.bf16.mxu1 %v8035_v28  ;;  %v8092_v27 = vld [vmem:[%s8251_s8 + $0x224] ss:$16 sps:$4 sm:$0xff]   ;;  %v8095_v28 = vld [vmem:[%s8251_s8 + $0x22c] ss:$16 sps:$4 sm:$0xff]  }
 0x2b5   : > { %5881 = vmatpush1.bf16.msra.mxu0 %v8030_v29  ;;  %5963 = vmatpush1.bf16.msra.mxu1 %v8033_v30  ;;  %v8090_v30 = vld [vmem:[%s8251_s8 + $0x220] ss:$16 sps:$4 sm:$0xff]  }
 0x2b6   : > { %5882 = vmatprep.subr.bf16.mxu0 %v8038_v31  ;;  %5964 = vmatprep.subr.bf16.mxu1 %v8041_v16  ;;  %v8093_v31 = vld [vmem:[%s8251_s8 + $0x228] ss:$16 sps:$4 sm:$0xff]   ;;  %v8098_v16 = vld [vmem:[%s8251_s8 + $0x244] ss:$16 sps:$4 sm:$0xff]  }
 0x2b9   : > { %5883 = vmatpush1.bf16.msra.mxu0 %v8036_v32  ;;  %5965 = vmatpush1.bf16.msra.mxu1 %v8039_v33  ;;  %v8101_v32 = vld [vmem:[%s8251_s8 + $0x24c] ss:$16 sps:$4 sm:$0xff]   ;;  %v8096_v33 = vld [vmem:[%s8251_s8 + $0x240] ss:$16 sps:$4 sm:$0xff]  }
 0x2ba   : > { %5884 = vmatprep.subr.bf16.mxu0 %v8044_v34  ;;  %5966 = vmatprep.subr.bf16.mxu1 %v8047_v26  ;;  %v8099_v34 = vld [vmem:[%s8251_s8 + $0x248] ss:$16 sps:$4 sm:$0xff]   ;;  %v8104_v26 = vld [vmem:[%s8251_s8 + $0x264] ss:$16 sps:$4 sm:$0xff]  }
 0x2bd   : > { %5885 = vmatpush1.bf16.msra.mxu0 %v8042_v35  ;;  %5967 = vmatpush1.bf16.msra.mxu1 %v8045_v37  ;;  %v8107_v35 = vld [vmem:[%s8251_s8 + $0x26c] ss:$16 sps:$4 sm:$0xff]   ;;  %v8102_v37 = vld [vmem:[%s8251_s8 + $0x260] ss:$16 sps:$4 sm:$0xff]  }
 0x2be   : > { %5886 = vmatprep.subr.bf16.mxu0 %v8050_v38  ;;  %5968 = vmatprep.subr.bf16.mxu1 %v8053_v40  ;;  %v8105_v38 = vld [vmem:[%s8251_s8 + $0x268] ss:$16 sps:$4 sm:$0xff]   ;;  %v8110_v40 = vld [vmem:[%s8251_s8 + $0x284] ss:$16 sps:$4 sm:$0xff]  }
 0x2c1   : > { %5887 = vmatpush1.bf16.msra.mxu0 %v8048_v41  ;;  %5969 = vmatpush1.bf16.msra.mxu1 %v8051_v22  ;;  %v8113_v41 = vld [vmem:[%s8251_s8 + $0x28c] ss:$16 sps:$4 sm:$0xff]   ;;  %v8108_v22 = vld [vmem:[%s8251_s8 + $0x280] ss:$16 sps:$4 sm:$0xff]  }
 0x2c2   : > { %5888 = vmatprep.subr.bf16.mxu0 %v8056_v42  ;;  %5970 = vmatprep.subr.bf16.mxu1 %v8059_v44  ;;  %v8111_v42 = vld [vmem:[%s8251_s8 + $0x288] ss:$16 sps:$4 sm:$0xff]   ;;  %v8116_v44 = vld [vmem:[%s8251_s8 + $0x2a4] ss:$16 sps:$4 sm:$0xff]  }
 0x2c5   : > { %5889 = vmatpush1.bf16.msra.mxu0 %v8054_v45  ;;  %5971 = vmatpush1.bf16.msra.mxu1 %v8057_v36  ;;  %v8119_v45 = vld [vmem:[%s8251_s8 + $0x2ac] ss:$16 sps:$4 sm:$0xff]   ;;  %v8114_v36 = vld [vmem:[%s8251_s8 + $0x2a0] ss:$16 sps:$4 sm:$0xff]  }
 0x2c6   : > { %5890 = vmatprep.subr.bf16.mxu0 %v8062_v46  ;;  %5972 = vmatprep.subr.bf16.mxu1 %v8065_v47  ;;  %v8117_v46 = vld [vmem:[%s8251_s8 + $0x2a8] ss:$16 sps:$4 sm:$0xff]   ;;  %v8122_v47 = vld [vmem:[%s8251_s8 + $0x2c4] ss:$16 sps:$4 sm:$0xff]  }
 0x2c9   : > { %5891 = vmatpush1.bf16.msra.mxu0 %v8060_v48  ;;  %5973 = vmatpush1.bf16.msra.mxu1 %v8063_v52  ;;  %v8125_v48 = vld [vmem:[%s8251_s8 + $0x2cc] ss:$16 sps:$4 sm:$0xff]   ;;  %v8120_v52 = vld [vmem:[%s8251_s8 + $0x2c0] ss:$16 sps:$4 sm:$0xff]  }
 0x2ca   : > { %5892 = vmatprep.subr.bf16.mxu0 %v8068_v54  ;;  %5974 = vmatprep.subr.bf16.mxu1 %v8071_v55  ;;  %v8123_v54 = vld [vmem:[%s8251_s8 + $0x2c8] ss:$16 sps:$4 sm:$0xff]   ;;  %v8128_v55 = vld [vmem:[%s8251_s8 + $0x2e4] ss:$16 sps:$4 sm:$0xff]  }
 0x2cd   : > { %5893 = vmatpush1.bf16.msra.mxu0 %v8066_v56  ;;  %5975 = vmatpush1.bf16.msra.mxu1 %v8069_v39  ;;  %v8131_v56 = vld [vmem:[%s8251_s8 + $0x2ec] ss:$16 sps:$4 sm:$0xff]   ;;  %v8126_v39 = vld [vmem:[%s8251_s8 + $0x2e0] ss:$16 sps:$4 sm:$0xff]  }
 0x2ce   : > { %5894 = vmatprep.subr.bf16.mxu0 %v8074_v57  ;;  %5976 = vmatprep.subr.bf16.mxu1 %v8077_v58  ;;  %v8129_v57 = vld [vmem:[%s8251_s8 + $0x2e8] ss:$16 sps:$4 sm:$0xff]   ;;  %v8134_v58 = vld [vmem:[%s8251_s8 + $0x304] ss:$16 sps:$4 sm:$0xff]  }
 0x2d1   : > { %5895 = vmatpush1.bf16.msra.mxu0 %v8072_v59  ;;  %5977 = vmatpush1.bf16.msra.mxu1 %v8075_v49  ;;  %v8137_v59 = vld [vmem:[%s8251_s8 + $0x30c] ss:$16 sps:$4 sm:$0xff]   ;;  %v8132_v49 = vld [vmem:[%s8251_s8 + $0x300] ss:$16 sps:$4 sm:$0xff]  }
 0x2d2   : > { %5896 = vmatprep.subr.bf16.mxu0 %v8080_v60  ;;  %5978 = vmatprep.subr.bf16.mxu1 %v8083_v62  ;;  %v8135_v60 = vld [vmem:[%s8251_s8 + $0x308] ss:$16 sps:$4 sm:$0xff]   ;;  %v8140_v62 = vld [vmem:[%s8251_s8 + $0x324] ss:$16 sps:$4 sm:$0xff]  }
 0x2d5   : > { %5897 = vmatpush1.bf16.msra.mxu0 %v8078_v63  ;;  %5979 = vmatpush1.bf16.msra.mxu1 %v8081_v0  ;;  %v8143_v63 = vld [vmem:[%s8251_s8 + $0x32c] ss:$16 sps:$4 sm:$0xff]   ;;  %v8138_v0 = vld [vmem:[%s8251_s8 + $0x320] ss:$16 sps:$4 sm:$0xff]  }
 0x2d6   : > { %5907 = vmatprep.subr.bf16.mxu0 %v8086_v1  ;;  %5989 = vmatprep.subr.bf16.mxu1 %v8089_v2  ;;  %v8141_v1 = vld [vmem:[%s8251_s8 + $0x328] ss:$16 sps:$4 sm:$0xff]   ;;  %v8146_v2 = vld [vmem:[%s8251_s8 + $0x344] ss:$16 sps:$4 sm:$0xff]  }
 0x36b   : > { %v4672_v6 = vpop.f32.mrb[0].mxu0  ;;  %v9091_v7 = vpop.f32.mrb[0].mxu1 }
 0x36c   : > { %v6930_v8 = vadd.f32 %v4672_v6, %v907_v14  ;;  %v4674_v9 = vpop.f32.mrb[1].mxu0  ;;  %v5084_v10 = vpop.f32.mrb[1].mxu1  ;;  %v8149_v14 = vld [vmem:[%s8251_s8 + $0x34c] ss:$16 sps:$4 sm:$0xff]   ;;  %v8152_v6 = vld [vmem:[%s8251_s8 + $0x364] ss:$16 sps:$4 sm:$0xff]  }
 0x36d   : > { %v6931_v11 = vadd.f32 %v4674_v9, %v911_v61  ;;  %v6933_v12 = vadd.f32 %v5084_v10, %v919_v5  ;;  %v4676_v13 = vpop.f32.mrb[2].mxu0  ;;  %v5086_v15 = vpop.f32.mrb[2].mxu1  ;;  %v8144_v61 = vld [vmem:[%s8251_s8 + $0x340] ss:$16 sps:$4 sm:$0xff]   ;;  %v8147_v5 = vld [vmem:[%s8251_s8 + $0x348] ss:$16 sps:$4 sm:$0xff]  }
 0x36e   : > { %v5089_v17 = vmax.f32 %v6930_v8, 0.0  ;;  %v4677_v53 = vpop.f32.mrb[3].mxu0  ;;  %v5087_v18 = vpop.f32.mrb[3].mxu1  ;;  %v8155_v8 = vld [vmem:[%s8251_s8 + $0x36c] ss:$16 sps:$4 sm:$0xff]  }
 0x36f   : > { %v5090_v19 = vmax.f32 %v6931_v11, 0.0  ;;  %v5092_v20 = vmax.f32 %v6933_v12, 0.0  ;;  %v8150_v9 = vld [vmem:[%s8251_s8 + $0x360] ss:$16 sps:$4 sm:$0xff]   ;;  %v8153_v10 = vld [vmem:[%s8251_s8 + $0x368] ss:$16 sps:$4 sm:$0xff]  }
 0x370   : > { %v5094_v25 = vpack.c.bf16 %v5089_v17, %v5089_v17  ;;  %v8158_v11 = vld [vmem:[%s8251_s8 + $0x384] ss:$16 sps:$4 sm:$0xff]   ;;  %v8161_v12 = vld [vmem:[%s8251_s8 + $0x38c] ss:$16 sps:$4 sm:$0xff]   ;;  %v8156_v13 = vld [vmem:[%s8251_s8 + $0x380] ss:$16 sps:$4 sm:$0xff]  }
 0x371   : > { %v5095_v21 = vpack.c.bf16 %v5090_v19, %v5090_v19  ;;  %v5097_v29 = vpack.c.bf16 %v5092_v20, %v5092_v20  ;;  %v8159_v15 = vld [vmem:[%s8251_s8 + $0x388] ss:$16 sps:$4 sm:$0xff]   ;;  %v914_v17 = vsub.s32 2, %v8296_v43  ;;  %v8164_v53 = vld [vmem:[%s8251_s8 + $0x3a4] ss:$16 sps:$4 sm:$0xff]  }
 0x372   : > { %v8167_v18 = vld [vmem:[%s8251_s8 + $0x3ac] ss:$16 sps:$4 sm:$0xff]   ;;  %v8162_v19 = vld [vmem:[%s8251_s8 + $0x3a0] ss:$16 sps:$4 sm:$0xff]   ;;  %v8165_v20 = vld [vmem:[%s8251_s8 + $0x3a8] ss:$16 sps:$4 sm:$0xff]  }
 0x373   : > { %5898 = vmatprep.mubr.bf16.mxu0 %v5095_v21  ;;  %5980 = vmatprep.mubr.bf16.mxu1 %v5095_v21  ;;  %v915_v21 = vrot.slane %v9078_v51, %v914_v17  ;;  %v8177_v51 = vld [vmem:[%s8251_s8 + $0x3e8] ss:$16 sps:$4 sm:$0xff]  }
 0x374   : > { %5899 = vmatmul.mubr.bf16.vlgmr.msra.gmra.mrb[4].mxu0 %v5094_v25  ;;  %5981 = vmatmul.mubr.bf16.vlgmr.msra.gmra.mrb[4].mxu1 %v5094_v25  ;;  %v8168_v25 = vld [vmem:[%s8251_s8 + $0x3c0] ss:$16 sps:$4 sm:$0xff]  }
 0x375   : > { %5908 = vmatpush1.bf16.msra.mxu0 %v8084_v23  ;;  %5990 = vmatpush1.bf16.msra.mxu1 %v8087_v24  ;;  %v8170_v23 = vld [vmem:[%s8251_s8 + $0x3c4] ss:$16 sps:$4 sm:$0xff]   ;;  %v8173_v24 = vld [vmem:[%s8251_s8 + $0x3cc] ss:$16 sps:$4 sm:$0xff]  }
 0x376   : > { %5939 = vmatprep.mubr.bf16.mxu0 %v5097_v29  ;;  %6021 = vmatprep.mubr.bf16.mxu1 %v5097_v29  ;;  %v8176_v29 = vld [vmem:[%s8251_s8 + $0x3e4] ss:$16 sps:$4 sm:$0xff]  }
 0x377   : > { %5909 = vmatprep.subr.bf16.mxu0 %v8092_v27  ;;  %5991 = vmatprep.subr.bf16.mxu1 %v8095_v28  ;;  %v8171_v27 = vld [vmem:[%s8251_s8 + $0x3c8] ss:$16 sps:$4 sm:$0xff]   ;;  %v6932_v28 = vadd.f32 %v9091_v7, %v915_v21 }
 0x379   : > { %5910 = vmatpush1.bf16.msra.mxu0 %v8090_v30  ;;  %5992 = vmatpush1.bf16.msra.mxu1 %v8093_v31  ;;  %v8179_v30 = vld [vmem:[%s8251_s8 + $0x3ec] ss:$16 sps:$4 sm:$0xff]   ;;  %v8174_v31 = vld [vmem:[%s8251_s8 + $0x3e0] ss:$16 sps:$4 sm:$0xff]  }
 0x37a   : > { %5911 = vmatprep.subr.bf16.mxu0 %v8098_v16  ;;  %5993 = vmatprep.subr.bf16.mxu1 %v8101_v32  ;;  %v5091_v16 = vmax.f32 %v6932_v28, 0.0 }
 0x37c   : > { %v5096_v32 = vpack.c.bf16 %v5091_v16, %v5091_v16 }
 0x37d   : > { %5912 = vmatpush1.bf16.msra.mxu0 %v8096_v33  ;;  %5994 = vmatpush1.bf16.msra.mxu1 %v8099_v34  ;;  %v8192_v33 = vmov 1983009808  }
 0x37e   : > { %5913 = vmatprep.subr.bf16.mxu0 %v8104_v26  ;;  %5995 = vmatprep.subr.bf16.mxu1 %v8107_v35  ;;  %v6037_v34 = vunpack.c.l.s4 %v8192_v33 }
 0x380   : > { %v6038_v26 = vunpack.c.0.s8 %v6037_v34 }
 0x381   : > { %5914 = vmatpush1.bf16.msra.mxu0 %v8102_v37  ;;  %5996 = vmatpush1.bf16.msra.mxu1 %v8105_v38 }
 0x382   : > { %5915 = vmatprep.subr.bf16.mxu0 %v8110_v40  ;;  %5997 = vmatprep.subr.bf16.mxu1 %v8113_v41  ;;  %v6041_v37 = vsub.s32 %v6038_v26, %v8296_v43 }
 0x385   : > { %5916 = vmatpush1.bf16.msra.mxu0 %v8108_v22  ;;  %5998 = vmatpush1.bf16.msra.mxu1 %v8111_v42 }
 0x386   : > { %5917 = vmatprep.subr.bf16.mxu0 %v8116_v44  ;;  %5999 = vmatprep.subr.bf16.mxu1 %v8119_v45 }
 0x389   : > { %5918 = vmatpush1.bf16.msra.mxu0 %v8114_v36  ;;  %6000 = vmatpush1.bf16.msra.mxu1 %v8117_v46 }
 0x38a   : > { %5919 = vmatprep.subr.bf16.mxu0 %v8122_v47  ;;  %6001 = vmatprep.subr.bf16.mxu1 %v8125_v48  ;;  %v5093_v48 = vld [vmem:[%s9189_s5] sm:$0xff] }
 0x38d   : > { %5920 = vmatpush1.bf16.msra.mxu0 %v8120_v52  ;;  %6002 = vmatpush1.bf16.msra.mxu1 %v8123_v54 }
 0x38e   : > { %5921 = vmatprep.subr.bf16.mxu0 %v8128_v55  ;;  %6003 = vmatprep.subr.bf16.mxu1 %v8131_v56  ;;  %v6059_v55 = vld [vmem:[%s9188_s4] sm:$0xf] (!%p6926_p7) }
 0x38f   : > { %v6064_v56 = vrot.slane (!%p6926_p7), %v6059_v55, %v906_v50 }
 0x391   : > { %5922 = vmatpush1.bf16.msra.mxu0 %v8126_v39  ;;  %6004 = vmatpush1.bf16.msra.mxu1 %v8129_v57  ;;  %v6068_v39 = vrot.slane (!%p6926_p7), %v6059_v55, %v910_v3  ;;  %v6072_v57 = vrot.slane (!%p6926_p7), %v6059_v55, %v914_v17 }
 0x392   : > { %5923 = vmatprep.subr.bf16.mxu0 %v8134_v58  ;;  %6005 = vmatprep.subr.bf16.mxu1 %v8137_v59  ;;  %v6076_v58 = vrot.slane (!%p6926_p7), %v6059_v55, %v918_v4 }
 0x393   : > { %v6077_v59 = vcombine.low (!%p6926_p7), %v6064_v56, %v6068_v39 }
 0x395   : > { %5924 = vmatpush1.bf16.msra.mxu0 %v8132_v49  ;;  %6006 = vmatpush1.bf16.msra.mxu1 %v8135_v60  ;;  %v6078_v49 = vcombine.low (!%p6926_p7), %v6072_v57, %v6076_v58  ;;  %v6085_v60 = vrot.slane (!%p6926_p7), %v6077_v59, %v6041_v37 }
 0x396   : > { %5925 = vmatprep.subr.bf16.mxu0 %v8140_v62  ;;  %6007 = vmatprep.subr.bf16.mxu1 %v8143_v63 }
 0x397   : > { %v6092_v62 = vrot.slane (!%p6926_p7), %v6078_v49, %v6041_v37 }
 0x399   : > { %5926 = vmatpush1.bf16.msra.mxu0 %v8138_v0  ;;  %6008 = vmatpush1.bf16.msra.mxu1 %v8141_v1  ;;  %v6093_v0 = vcombine.low (!%p6926_p7), %v6085_v60, %v6092_v62 }
 0x39a   : > { %5927 = vmatprep.subr.bf16.mxu0 %v8146_v2  ;;  %6009 = vmatprep.subr.bf16.mxu1 %v8149_v14 }
 0x39d   : > { %5928 = vmatpush1.bf16.msra.mxu0 %v8144_v61  ;;  %6010 = vmatpush1.bf16.msra.mxu1 %v8147_v5 }
 0x39e   : > { %5929 = vmatprep.subr.bf16.mxu0 %v8152_v6  ;;  %6011 = vmatprep.subr.bf16.mxu1 %v8155_v8 }
 0x3a1   : > { %5930 = vmatpush1.bf16.msra.mxu0 %v8150_v9  ;;  %6012 = vmatpush1.bf16.msra.mxu1 %v8153_v10 }
 0x3a2   : > { %5931 = vmatprep.subr.bf16.mxu0 %v8158_v11  ;;  %6013 = vmatprep.subr.bf16.mxu1 %v8161_v12 }
 0x3a5   : > { %5932 = vmatpush1.bf16.msra.mxu0 %v8156_v13  ;;  %6014 = vmatpush1.bf16.msra.mxu1 %v8159_v15 }
 0x3a6   : > { %5933 = vmatprep.subr.bf16.mxu0 %v8164_v53  ;;  %6015 = vmatprep.subr.bf16.mxu1 %v8167_v18 }
 0x3a9   : > { %5934 = vmatpush1.bf16.msra.mxu0 %v8162_v19  ;;  %6016 = vmatpush1.bf16.msra.mxu1 %v8165_v20 }
 0x3aa   : > { %5935 = vmatprep.subr.bf16.mxu0 %v8170_v23  ;;  %6017 = vmatprep.subr.bf16.mxu1 %v8173_v24 }
 0x3ad   : > { %5936 = vmatpush1.bf16.msra.mxu0 %v8168_v25  ;;  %6018 = vmatpush1.bf16.msra.mxu1 %v8171_v27 }
 0x3ae   : > { %5937 = vmatprep.subr.bf16.mxu0 %v8176_v29  ;;  %6019 = vmatprep.subr.bf16.mxu1 %v8179_v30 }
 0x3b1   : > { %5938 = vmatpush1.bf16.msra.mxu0 %v8174_v31  ;;  %6020 = vmatpush1.bf16.msra.mxu1 %v8177_v51 }
 0x3b4   : > { %5940 = vmatmul.mubr.bf16.vlgmr.msra.gmra.mrb[4].mxu0 %v5096_v32  ;;  %6022 = vmatmul.mubr.bf16.vlgmr.msra.gmra.mrb[4].mxu1 %v5096_v32 }
 0x487   : > { %v5941_v7 = vpop.f32.mrb[4].mxu0  ;;  %v6023_v35 = vpop.f32.mrb[4].mxu1 }
 0x488   : > { %v5943_v38 = vpop.f32.mrb[5].mxu0  ;;  %v6025_v40 = vpop.f32.mrb[5].mxu1 }
 0x489   : > { %v6034_v41 = vcombine.low %v5941_v7, %v5943_v38  ;;  %v6035_v22 = vcombine.low %v6023_v35, %v6025_v40  ;;  %v5945_v42 = vpop.f32.mrb[6].mxu0  ;;  %v6027_v44 = vpop.f32.mrb[6].mxu1 }
 0x48a   : > { %v5946_v45 = vpop.f32.mrb[7].mxu0  ;;  %v6028_v36 = vpop.f32.mrb[7].mxu1 }
 0x48b   : > { %v6042_v46 = vrot.slane %v6034_v41, %v6041_v37  ;;  %v6049_v47 = vrot.slane %v6035_v22, %v6041_v37  ;;  %6057 = sbr.rel (%p6926_p7) target bundleno = 1182 (0x49e), region = 48 }
 0x48d   : > { %v6050_v52 = vcombine.low %v6042_v46, %v6049_v47 }
 0x48f   : > { %v6052_v54 = vadd.f32 %v6050_v52, %v5093_v48 }
 0x491   : > { %6053 = vst [vmem:[%s9189_s5] sm:$0xff] %v6052_v54 }
 0x498   : > { %v6058_v63 = vld [vmem:[%s9189_s5] sm:$0xff] }
 0x499   : > { %v6095_v1 = vadd.f32 %v6093_v0, %v6058_v63 }
 0x49b   : > { %v6096_v2 = vmax.f32 %v6095_v1, 0.0 }
 0x49d   : > { %6097 = vst [vmem:[%s9189_s5] sm:$0xff] %v6096_v2 }
 0x49e PF: > { %s15_s18 = sadd.s32 1, %s8188_s18  }
 0x49f   : > { %p12_p8 = scmp.ge.s32.totalorder %s15_s18, 4  }
 0x4a1   :  { %14 = sbr.rel (!%p12_p8) target bundleno = 1 (0x1), region = 80 }

</bundles_post_ra>
